<compile_context>
chip_gen: v6e
topology: v6e:2x2x1
jax: 0.10.0
libtpu: 0.0.40
codegen_flags: <defaults>
</compile_context>

<pallas_src>
import functools

import jax
import jax.numpy as jnp
from jax.experimental import pallas as pl
from jax.experimental.pallas import tpu as pltpu

MATMUL_DTYPE = jnp.float32  # set to jnp.bfloat16 for ~2x MXU throughput


def _const_spec(shape):
    """Full-array block that is identical at every grid point."""
    nd = len(shape)
    return pl.BlockSpec(shape, lambda *_: (0,) * nd)


# ----------------------------------------------------------------------------
# Kernel 1: fused STN3d (6x Conv1d(k=3,pad=1)+ReLU, flatten, fc1..fc3 + iden)
# ----------------------------------------------------------------------------
def _stn_kernel(x_ref, *refs, n_conv):
    # refs = (w0,b0, ..., w5,b5, fc1w, fc1b, fc2w, fc2b, fc3w, fc3b, o_ref)
    #   conv weights pre-stacked (3*Cin, Cout); row = tap*Cin + cin,
    #   taps ordered (prev, center, next).
    #   fc1w is (d, N, 512): fc1w[c, p, :] == W_fc1[c*N + p, :]  (channel-major)
    #   fc3b already contains the [1,0,0,1] identity offset.
    o_ref = refs[-1]
    h = x_ref[0]                                      # (N, d): one point cloud
    npts, d = h.shape

    # Edge masks for the zero padding (hoisted; reused by every layer).
    row = jax.lax.broadcasted_iota(jnp.int32, (npts, 1), 0)
    m_prev = (row > 0).astype(jnp.float32)            # kills x[i-1] tap at i==0
    m_next = (row < npts - 1).astype(jnp.float32)     # kills x[i+1] tap at i==N-1

    def taps(a):
        prev = pltpu.roll(a, shift=1, axis=0) * m_prev
        nxt = pltpu.roll(a, shift=npts - 1, axis=0) * m_next   # shift >= 0
        return prev, nxt

    # --- conv1 (Cin = d = 2): K is tiny -> VPU broadcast-MACs, no MXU. ---
    w0 = refs[0][...]                                 # (3*d, 64)
    b0 = refs[1][...]                                 # (1, 64)
    h_prev, h_next = taps(h)
    y = b0
    for t, tap in enumerate((h_prev, h, h_next)):
        for c in range(d):
            r = t * d + c
            y = y + tap[:, c:c + 1] * w0[r:r + 1, :]
    h = jnp.maximum(y, 0.0)

    # --- conv2..conv6: ONE MXU dot per layer with K = 3*Cin. ---
    for layer in range(1, n_conv):
        w = refs[2 * layer][...]                      # (3*Cin, Cout)
        b = refs[2 * layer + 1][...]                  # (1, Cout)
        h_prev, h_next = taps(h)
        cat = jnp.concatenate((h_prev, h, h_next), axis=1)
        y = jnp.dot(cat.astype(MATMUL_DTYPE), w.astype(MATMUL_DTYPE),
                    preferred_element_type=jnp.float32) + b
        h = jnp.maximum(y, 0.0)                       # ReLU after every conv

    # --- torch view(B,-1) channel-major flatten fused into fc1:
    #     z1[j] = sum_{c,p} h[p,c] * fc1w[c,p,j]   (no transpose needed) ---
    fc1w_ref = refs[2 * n_conv]
    fc1b = refs[2 * n_conv + 1][...]
    acc = jnp.zeros((npts, fc1b.shape[-1]), jnp.float32)
    for c in range(d):
        acc = acc + h[:, c:c + 1] * fc1w_ref[c]
    z = jnp.sum(acc, axis=0, keepdims=True) + fc1b    # (1, 512)
    z = jnp.maximum(z, 0.0)

    fc2w = refs[2 * n_conv + 2][...]
    fc2b = refs[2 * n_conv + 3][...]
    z = jnp.dot(z.astype(MATMUL_DTYPE), fc2w.astype(MATMUL_DTYPE),
                preferred_element_type=jnp.float32) + fc2b
    z = jnp.maximum(z, 0.0)

    fc3w = refs[2 * n_conv + 4][...]
    fc3b = refs[2 * n_conv + 5][...]                  # identity already folded
    z = jnp.dot(z.astype(MATMUL_DTYPE), fc3w.astype(MATMUL_DTYPE),
                preferred_element_type=jnp.float32) + fc3b   # (1, 4)
    o_ref[...] = z.reshape(o_ref.shape).astype(o_ref.dtype)


def stn_forward(x, params):
    """x: (B, N, d) channels-last -> spatial transform (B, 2, 2)."""
    B, N, d = x.shape
    conv_ws = params["stn_conv_w"]
    conv_bs = params["stn_conv_b"]
    (fc1w, fc1b), (fc2w, fc2b), (fc3w, fc3b) = params["stn_fc"]
    # Fold the [1,0,0,1] identity offset into fc3's bias (no extra launch).
    fc3b = fc3b + jnp.array([[1.0, 0.0, 0.0, 1.0]], jnp.float32)

    args = [x]
    in_specs = [pl.BlockSpec((1, N, d), lambda b: (b, 0, 0))]
    for w, bb in zip(conv_ws, conv_bs):
        args += [w, bb]
        in_specs += [_const_spec(w.shape), _const_spec(bb.shape)]
    for w, bb in ((fc1w, fc1b), (fc2w, fc2b), (fc3w, fc3b)):
        args += [w, bb]
        in_specs += [_const_spec(w.shape), _const_spec(bb.shape)]

    out = pl.pallas_call(
        functools.partial(_stn_kernel, n_conv=len(conv_ws)),
        out_shape=jax.ShapeDtypeStruct((B, 1, 4), jnp.float32),
        grid=(B,),
        in_specs=in_specs,
        out_specs=pl.BlockSpec((1, 1, 4), lambda b: (b, 0, 0)),
        compiler_params=pltpu.CompilerParams(
            dimension_semantics=("parallel",),
            vmem_limit_bytes=48 * 1024 * 1024),
    )(*args)
    return out.reshape(B, 2, 2)


# ----------------------------------------------------------------------------
# Kernel 2: fused PointNetfeat (trans-fold + 1x1 convs + max) + classifier head
# ----------------------------------------------------------------------------
def _feat_head_kernel(x_ref, trans_ref, cw1_ref, cb1_ref, cw2_ref, cb2_ref,
                      cw3_ref, cb3_ref, hw1_ref, hb1_ref, hw2_ref, hb2_ref,
                      hw3_ref, hb3_ref, o_ref, gmax_ref):
    ns = pl.program_id(1)

    @pl.when(ns == 0)
    def _():
        gmax_ref[...] = jnp.full_like(gmax_ref, -jnp.inf)

    x = x_ref[0]                                      # (tile_n, d)
    trans = trans_ref[0]                              # (d, d)
    cw1 = cw1_ref[...]                                # (d, 64)
    d = x.shape[1]

    # Fold the spatial transform into conv1: (x @ trans) @ W1 == x @ (trans@W1).
    # Both contractions have K = d = 2 -> keep them off the MXU (VPU MACs).
    w1p = jnp.zeros_like(cw1)
    for k in range(d):
        w1p = w1p + trans[:, k:k + 1] * cw1[k:k + 1, :]
    h = cb1_ref[...]
    for k in range(d):
        h = h + x[:, k:k + 1] * w1p[k:k + 1, :]
    h = jnp.maximum(h, 0.0)                           # conv1 + ReLU

    h = jnp.dot(h.astype(MATMUL_DTYPE), cw2_ref[...].astype(MATMUL_DTYPE),
                preferred_element_type=jnp.float32) + cb2_ref[...]
    h = jnp.maximum(h, 0.0)                           # conv2 + ReLU
    h = jnp.dot(h.astype(MATMUL_DTYPE), cw3_ref[...].astype(MATMUL_DTYPE),
                preferred_element_type=jnp.float32) + cb3_ref[...]  # conv3

    # Running max over points (global-feature accumulator lives in VMEM).
    gmax_ref[...] = jnp.maximum(gmax_ref[...], jnp.max(h, axis=0, keepdims=True))

    # Epilogue on the last N chunk: classifier head, logits written directly.
    @pl.when(ns == pl.num_programs(1) - 1)
    def _():
        g = gmax_ref[...]                             # (1, 1024)
        z = jnp.dot(g.astype(MATMUL_DTYPE), hw1_ref[...].astype(MATMUL_DTYPE),
                    preferred_element_type=jnp.float32) + hb1_ref[...]
        z = jnp.maximum(z, 0.0)
        z = jnp.dot(z.astype(MATMUL_DTYPE), hw2_ref[...].astype(MATMUL_DTYPE),
                    preferred_element_type=jnp.float32) + hb2_ref[...]
        z = jnp.maximum(z, 0.0)
        z = jnp.dot(z.astype(MATMUL_DTYPE), hw3_ref[...].astype(MATMUL_DTYPE),
                    preferred_element_type=jnp.float32) + hb3_ref[...]
        o_ref[...] = z.reshape(o_ref.shape).astype(o_ref.dtype)


def _pick_n_tile(n, cap=512):
    """Largest point-chunk <= cap that divides N exactly (whole axis otherwise)."""
    if n <= cap:
        return n
    for t in range(cap, 7, -8):
        if n % t == 0:
            return t
    return n


def feat_head_forward(x, trans, params):
    """x: (B, N, d), trans: (B, d, d) -> logits (B, n_cls)."""
    B, N, d = x.shape
    (cw1, cb1), (cw2, cb2), (cw3, cb3) = params["feat_conv"]
    (hw1, hb1), (hw2, hb2), (hw3, hb3) = params["head_fc"]
    n_cls = hw3.shape[1]
    feat_dim = cw3.shape[1]

    tile_n = _pick_n_tile(N)
    n_steps = N // tile_n
    weights = [cw1, cb1, cw2, cb2, cw3, cb3, hw1, hb1, hw2, hb2, hw3, hb3]

    in_specs = [pl.BlockSpec((1, tile_n, d), lambda b, s: (b, s, 0)),
                pl.BlockSpec((1, d, d), lambda b, s: (b, 0, 0))]
    in_specs += [_const_spec(w.shape) for w in weights]

    out = pl.pallas_call(
        _feat_head_kernel,
        out_shape=jax.ShapeDtypeStruct((B, 1, n_cls), jnp.float32),
        grid=(B, n_steps),
        in_specs=in_specs,
        out_specs=pl.BlockSpec((1, 1, n_cls), lambda b, s: (b, 0, 0)),
        scratch_shapes=[pltpu.VMEM((1, feat_dim), jnp.float32)],
        compiler_params=pltpu.CompilerParams(
            dimension_semantics=("parallel", "arbitrary"),
            vmem_limit_bytes=48 * 1024 * 1024),
    )(x, trans, *weights)
    return out.reshape(B, n_cls)


# ----------------------------------------------------------------------------
# Parameters (deterministic synthetic init, torch-compatible layouts noted)
# ----------------------------------------------------------------------------
def init_params(key, d=2, N=64, n_cls=2):
    keys = iter(jax.random.split(key, 64))

    def w(shape, fan_in):
        return jax.random.normal(next(keys), shape, jnp.float32) / jnp.sqrt(
            jnp.float32(fan_in))

    def bias(cout):
        return jax.random.normal(next(keys), (1, cout), jnp.float32) * 0.01

    # STN3d convs: Conv1d(k=3,pad=1) d->64->128->256->128->64->d.
    # Stored pre-stacked (3*Cin, Cout); real torch weight (Cout, Cin, 3) maps
    # via transpose(2,1,0).reshape(3*Cin, Cout).
    stn_ch = [d, 64, 128, 256, 128, 64, d]
    stn_conv_w = [w((3 * stn_ch[i], stn_ch[i + 1]), 3 * stn_ch[i]) for i in range(6)]
    stn_conv_b = [bias(stn_ch[i + 1]) for i in range(6)]
    # STN FCs: d*N -> 512 -> 256 -> 4.  fc1 stored (d, N, 512) (channel-major
    # split of the (d*N, 512) matrix, i.e. torch fc1.weight.T reshaped).
    stn_fc = [
        (w((d, N, 512), d * N), bias(512)),
        (w((512, 256), 512), bias(256)),
        (w((256, 4), 256), bias(4)),
    ]
    # PointNetfeat 1x1 convs: d -> 64 -> 128 -> 1024 (stored (Cin, Cout)).
    feat_conv = [
        (w((d, 64), d), bias(64)),
        (w((64, 128), 64), bias(128)),
        (w((128, 1024), 128), bias(1024)),
    ]
    # Classifier head: 1024 -> 512 -> 256 -> n_cls.
    head_fc = [
        (w((1024, 512), 1024), bias(512)),
        (w((512, 256), 512), bias(256)),
        (w((256, n_cls), 256), bias(n_cls)),
    ]
    return dict(stn_conv_w=stn_conv_w, stn_conv_b=stn_conv_b, stn_fc=stn_fc,
                feat_conv=feat_conv, head_fc=head_fc)


# ----------------------------------------------------------------------------
# Forward pass: 1 transpose of the NCW input + 2 fused Pallas kernels
# ----------------------------------------------------------------------------
def pointnet_forward(x_ncw, params):
    """x_ncw: (B, d, N) PyTorch Conv1d (NCW) layout -> logits (B, n_cls)."""
    x = jnp.transpose(x_ncw, (0, 2, 1))               # (B, N, d) channels-last
    trans = stn_forward(x, params)                    # (B, 2, 2)
    return feat_head_forward(x, trans, params)        # (B, n_cls)


if __name__ == "__main__":
    B, d, N, n_cls = 2, 2, 64, 2
    key = jax.random.PRNGKey(0)
    pkey, xkey = jax.random.split(key)
    params = init_params(pkey, d=d, N=N, n_cls=n_cls)
    x = jax.random.normal(xkey, (B, d, N), jnp.float32)

    out = jax.jit(pointnet_forward)(x, params)
    jax.block_until_ready(out)

    assert out.shape == (B, n_cls) and out.dtype == jnp.float32
    assert bool(jnp.isfinite(out).all())
    print("KERNEL_OK")
</pallas_src>

<mosaic_0001>
module attributes {stable_mosaic.version = 11 : i64} {
  func.func @_feat_head_kernel(%arg0: i32, %arg1: i32, %arg2: memref<1x64x2xf32, #tpu.memory_space<vmem>>, %arg3: memref<1x2x2xf32, #tpu.memory_space<vmem>>, %arg4: memref<2x64xf32, #tpu.memory_space<vmem>>, %arg5: memref<1x64xf32, #tpu.memory_space<vmem>>, %arg6: memref<64x128xf32, #tpu.memory_space<vmem>>, %arg7: memref<1x128xf32, #tpu.memory_space<vmem>>, %arg8: memref<128x1024xf32, #tpu.memory_space<vmem>>, %arg9: memref<1x1024xf32, #tpu.memory_space<vmem>>, %arg10: memref<1024x512xf32, #tpu.memory_space<vmem>>, %arg11: memref<1x512xf32, #tpu.memory_space<vmem>>, %arg12: memref<512x256xf32, #tpu.memory_space<vmem>>, %arg13: memref<1x256xf32, #tpu.memory_space<vmem>>, %arg14: memref<256x2xf32, #tpu.memory_space<vmem>>, %arg15: memref<1x2xf32, #tpu.memory_space<vmem>>, %arg16: memref<1x1x2xf32, #tpu.memory_space<vmem>>, %arg17: memref<1x1024xf32, #tpu.memory_space<vmem>>) attributes {dimension_semantics = [#tpu.dimension_semantics<parallel>, #tpu.dimension_semantics<arbitrary>], iteration_bounds = array<i64: 2, 1>, scalar_prefetch = 0 : i64, scratch_operands = 1 : i64, tpu.core_type = #tpu.core_type<tc>, window_params = [{transform_indices = @transform_0, window_bounds = array<i64: 1, 64, 2>}, {transform_indices = @transform_1, window_bounds = array<i64: 1, 2, 2>}, {pipeline_mode = #tpu.pipeline_mode<synchronous>, transform_indices = @transform_2, window_bounds = array<i64: 2, 64>}, {pipeline_mode = #tpu.pipeline_mode<synchronous>, transform_indices = @transform_3, window_bounds = array<i64: 1, 64>}, {pipeline_mode = #tpu.pipeline_mode<synchronous>, transform_indices = @transform_4, window_bounds = array<i64: 64, 128>}, {pipeline_mode = #tpu.pipeline_mode<synchronous>, transform_indices = @transform_5, window_bounds = array<i64: 1, 128>}, {pipeline_mode = #tpu.pipeline_mode<synchronous>, transform_indices = @transform_6, window_bounds = array<i64: 128, 1024>}, {pipeline_mode = #tpu.pipeline_mode<synchronous>, transform_indices = @transform_7, window_bounds = array<i64: 1, 1024>}, {pipeline_mode = #tpu.pipeline_mode<synchronous>, transform_indices = @transform_8, window_bounds = array<i64: 1024, 512>}, {pipeline_mode = #tpu.pipeline_mode<synchronous>, transform_indices = @transform_9, window_bounds = array<i64: 1, 512>}, {pipeline_mode = #tpu.pipeline_mode<synchronous>, transform_indices = @transform_10, window_bounds = array<i64: 512, 256>}, {pipeline_mode = #tpu.pipeline_mode<synchronous>, transform_indices = @transform_11, window_bounds = array<i64: 1, 256>}, {pipeline_mode = #tpu.pipeline_mode<synchronous>, transform_indices = @transform_12, window_bounds = array<i64: 256, 2>}, {pipeline_mode = #tpu.pipeline_mode<synchronous>, transform_indices = @transform_13, window_bounds = array<i64: 1, 2>}, {transform_indices = @transform_14, window_bounds = array<i64: 1, 1, 2>}]} {
    %c0_i32 = arith.constant 0 : i32
    %0 = arith.cmpi eq, %arg1, %c0_i32 : i32
    %1 = arith.extui %0 : i1 to i32
    %c0_i32_0 = arith.constant 0 : i32
    %2 = arith.cmpi ne, %1, %c0_i32_0 : i32
    scf.if %2 {
      %cst_29 = arith.constant 0xFF800000 : f32
      %57 = vector.broadcast %cst_29 : f32 to vector<1x1024xf32>
      %c0_30 = arith.constant 0 : index
      %c0_31 = arith.constant 0 : index
      %58 = vector.load %arg17[%c0_30, %c0_31] : memref<1x1024xf32, #tpu.memory_space<vmem>>, vector<1x1024xf32>
      tpu.vector_store %arg17[%c0_30, %c0_31], %57 {strides = array<i32>} : memref<1x1024xf32, #tpu.memory_space<vmem>>, vector<1x1024xf32>,
    } else {
    }
    %c0 = arith.constant 0 : index
    %c0_1 = arith.constant 0 : index
    %c0_2 = arith.constant 0 : index
    %3 = vector.load %arg2[%c0, %c0_1, %c0_2] : memref<1x64x2xf32, #tpu.memory_space<vmem>>, vector<1x64x2xf32>
    %4 = vector.shape_cast %3 : vector<1x64x2xf32> to vector<64x2xf32>
    %c0_3 = arith.constant 0 : index
    %c0_4 = arith.constant 0 : index
    %c0_5 = arith.constant 0 : index
    %5 = vector.load %arg3[%c0_3, %c0_4, %c0_5] : memref<1x2x2xf32, #tpu.memory_space<vmem>>, vector<1x2x2xf32>
    %6 = vector.shape_cast %5 : vector<1x2x2xf32> to vector<2x2xf32>
    %c0_6 = arith.constant 0 : index
    %c0_7 = arith.constant 0 : index
    %7 = vector.load %arg4[%c0_6, %c0_7] : memref<2x64xf32, #tpu.memory_space<vmem>>, vector<2x64xf32>
    %cst = arith.constant 0.000000e+00 : f32
    %8 = vector.broadcast %cst : f32 to vector<2x64xf32>
    %9 = vector.extract_strided_slice %6 {offsets = [0, 0], sizes = [2, 1], strides = [1, 1]} : vector<2x2xf32> to vector<2x1xf32>
    %10 = vector.extract_strided_slice %7 {offsets = [0, 0], sizes = [1, 64], strides = [1, 1]} : vector<2x64xf32> to vector<1x64xf32>
    %11 = vector.broadcast %9 : vector<2x1xf32> to vector<2x64xf32>
    %12 = vector.broadcast %10 : vector<1x64xf32> to vector<2x64xf32>
    %13 = arith.mulf %11, %12 : vector<2x64xf32>
    %14 = arith.addf %8, %13 : vector<2x64xf32>
    %15 = vector.extract_strided_slice %6 {offsets = [0, 1], sizes = [2, 1], strides = [1, 1]} : vector<2x2xf32> to vector<2x1xf32>
    %16 = vector.extract_strided_slice %7 {offsets = [1, 0], sizes = [1, 64], strides = [1, 1]} : vector<2x64xf32> to vector<1x64xf32>
    %17 = vector.broadcast %15 : vector<2x1xf32> to vector<2x64xf32>
    %18 = vector.broadcast %16 : vector<1x64xf32> to vector<2x64xf32>
    %19 = arith.mulf %17, %18 : vector<2x64xf32>
    %20 = arith.addf %14, %19 : vector<2x64xf32>
    %c0_8 = arith.constant 0 : index
    %c0_9 = arith.constant 0 : index
    %21 = vector.load %arg5[%c0_8, %c0_9] : memref<1x64xf32, #tpu.memory_space<vmem>>, vector<1x64xf32>
    %22 = vector.extract_strided_slice %4 {offsets = [0, 0], sizes = [64, 1], strides = [1, 1]} : vector<64x2xf32> to vector<64x1xf32>
    %23 = vector.extract_strided_slice %20 {offsets = [0, 0], sizes = [1, 64], strides = [1, 1]} : vector<2x64xf32> to vector<1x64xf32>
    %24 = vector.broadcast %22 : vector<64x1xf32> to vector<64x64xf32>
    %25 = vector.broadcast %23 : vector<1x64xf32> to vector<64x64xf32>
    %26 = arith.mulf %24, %25 : vector<64x64xf32>
    %27 = vector.broadcast %21 : vector<1x64xf32> to vector<64x64xf32>
    %28 = arith.addf %27, %26 : vector<64x64xf32>
    %29 = vector.extract_strided_slice %4 {offsets = [0, 1], sizes = [64, 1], strides = [1, 1]} : vector<64x2xf32> to vector<64x1xf32>
    %30 = vector.extract_strided_slice %20 {offsets = [1, 0], sizes = [1, 64], strides = [1, 1]} : vector<2x64xf32> to vector<1x64xf32>
    %31 = vector.broadcast %29 : vector<64x1xf32> to vector<64x64xf32>
    %32 = vector.broadcast %30 : vector<1x64xf32> to vector<64x64xf32>
    %33 = arith.mulf %31, %32 : vector<64x64xf32>
    %34 = arith.addf %28, %33 : vector<64x64xf32>
    %cst_10 = arith.constant 0.000000e+00 : f32
    %35 = vector.broadcast %cst_10 : f32 to vector<64x64xf32>
    %36 = arith.maximumf %34, %35 : vector<64x64xf32>
    %c0_11 = arith.constant 0 : index
    %c0_12 = arith.constant 0 : index
    %37 = vector.load %arg6[%c0_11, %c0_12] : memref<64x128xf32, #tpu.memory_space<vmem>>, vector<64x128xf32>
    %cst_13 = arith.constant dense<0.000000e+00> : vector<64x128xf32>
    %38 = tpu.matmul %36, %37, %cst_13 {dimension_numbers = #tpu.dot_dimension_numbers<[1], [0], [0], [1], [0, 0, 1, 1], [], []>} : vector<64x64xf32>, vector<64x128xf32>, vector<64x128xf32> -> vector<64x128xf32>
    %c0_14 = arith.constant 0 : index
    %c0_15 = arith.constant 0 : index
    %39 = vector.load %arg7[%c0_14, %c0_15] : memref<1x128xf32, #tpu.memory_space<vmem>>, vector<1x128xf32>
    %40 = vector.broadcast %39 : vector<1x128xf32> to vector<64x128xf32>
    %41 = arith.addf %38, %40 : vector<64x128xf32>
    %cst_16 = arith.constant 0.000000e+00 : f32
    %42 = vector.broadcast %cst_16 : f32 to vector<64x128xf32>
    %43 = arith.maximumf %41, %42 : vector<64x128xf32>
    %c0_17 = arith.constant 0 : index
    %c0_18 = arith.constant 0 : index
    %44 = vector.load %arg8[%c0_17, %c0_18] : memref<128x1024xf32, #tpu.memory_space<vmem>>, vector<128x1024xf32>
    %cst_19 = arith.constant dense<0.000000e+00> : vector<64x1024xf32>
    %45 = tpu.matmul %43, %44, %cst_19 {dimension_numbers = #tpu.dot_dimension_numbers<[1], [0], [0], [1], [0, 0, 1, 1], [], []>} : vector<64x128xf32>, vector<128x1024xf32>, vector<64x1024xf32> -> vector<64x1024xf32>
    %c0_20 = arith.constant 0 : index
    %c0_21 = arith.constant 0 : index
    %46 = vector.load %arg9[%c0_20, %c0_21] : memref<1x1024xf32, #tpu.memory_space<vmem>>, vector<1x1024xf32>
    %47 = vector.broadcast %46 : vector<1x1024xf32> to vector<64x1024xf32>
    %48 = arith.addf %45, %47 : vector<64x1024xf32>
    %c0_22 = arith.constant 0 : index
    %c0_23 = arith.constant 0 : index
    %49 = vector.load %arg17[%c0_22, %c0_23] : memref<1x1024xf32, #tpu.memory_space<vmem>>, vector<1x1024xf32>
    %cst_24 = arith.constant dense<0xFF800000> : vector<1024xf32>
    %50 = vector.multi_reduction <maximumf>, %48, %cst_24 [0] : vector<64x1024xf32> to vector<1024xf32>
    %51 = vector.shape_cast %50 : vector<1024xf32> to vector<1x1024xf32>
    %52 = arith.maximumf %49, %51 : vector<1x1024xf32>
    %c0_25 = arith.constant 0 : index
    %c0_26 = arith.constant 0 : index
    %53 = vector.load %arg17[%c0_25, %c0_26] : memref<1x1024xf32, #tpu.memory_space<vmem>>, vector<1x1024xf32>
    tpu.vector_store %arg17[%c0_25, %c0_26], %52 {strides = array<i32>} : memref<1x1024xf32, #tpu.memory_space<vmem>>, vector<1x1024xf32>,
    %c0_i32_27 = arith.constant 0 : i32
    %54 = arith.cmpi eq, %arg1, %c0_i32_27 : i32
    %55 = arith.extui %54 : i1 to i32
    %c0_i32_28 = arith.constant 0 : i32
    %56 = arith.cmpi ne, %55, %c0_i32_28 : i32
    scf.if %56 {
      %c0_29 = arith.constant 0 : index
      %c0_30 = arith.constant 0 : index
      %57 = vector.load %arg17[%c0_29, %c0_30] : memref<1x1024xf32, #tpu.memory_space<vmem>>, vector<1x1024xf32>
      %c0_31 = arith.constant 0 : index
      %c0_32 = arith.constant 0 : index
      %58 = vector.load %arg10[%c0_31, %c0_32] : memref<1024x512xf32, #tpu.memory_space<vmem>>, vector<1024x512xf32>
      %cst_33 = arith.constant dense<0.000000e+00> : vector<1x512xf32>
      %59 = tpu.matmul %57, %58, %cst_33 {dimension_numbers = #tpu.dot_dimension_numbers<[1], [0], [0], [1], [0, 0, 1, 1], [], []>} : vector<1x1024xf32>, vector<1024x512xf32>, vector<1x512xf32> -> vector<1x512xf32>
      %c0_34 = arith.constant 0 : index
      %c0_35 = arith.constant 0 : index
      %60 = vector.load %arg11[%c0_34, %c0_35] : memref<1x512xf32, #tpu.memory_space<vmem>>, vector<1x512xf32>
      %61 = arith.addf %59, %60 : vector<1x512xf32>
      %cst_36 = arith.constant 0.000000e+00 : f32
      %62 = vector.broadcast %cst_36 : f32 to vector<1x512xf32>
      %63 = arith.maximumf %61, %62 : vector<1x512xf32>
      %c0_37 = arith.constant 0 : index
      %c0_38 = arith.constant 0 : index
      %64 = vector.load %arg12[%c0_37, %c0_38] : memref<512x256xf32, #tpu.memory_space<vmem>>, vector<512x256xf32>
      %cst_39 = arith.constant dense<0.000000e+00> : vector<1x256xf32>
      %65 = tpu.matmul %63, %64, %cst_39 {dimension_numbers = #tpu.dot_dimension_numbers<[1], [0], [0], [1], [0, 0, 1, 1], [], []>} : vector<1x512xf32>, vector<512x256xf32>, vector<1x256xf32> -> vector<1x256xf32>
      %c0_40 = arith.constant 0 : index
      %c0_41 = arith.constant 0 : index
      %66 = vector.load %arg13[%c0_40, %c0_41] : memref<1x256xf32, #tpu.memory_space<vmem>>, vector<1x256xf32>
      %67 = arith.addf %65, %66 : vector<1x256xf32>
      %cst_42 = arith.constant 0.000000e+00 : f32
      %68 = vector.broadcast %cst_42 : f32 to vector<1x256xf32>
      %69 = arith.maximumf %67, %68 : vector<1x256xf32>
      %c0_43 = arith.constant 0 : index
      %c0_44 = arith.constant 0 : index
      %70 = vector.load %arg14[%c0_43, %c0_44] : memref<256x2xf32, #tpu.memory_space<vmem>>, vector<256x2xf32>
      %cst_45 = arith.constant dense<0.000000e+00> : vector<1x2xf32>
      %71 = tpu.matmul %69, %70, %cst_45 {dimension_numbers = #tpu.dot_dimension_numbers<[1], [0], [0], [1], [0, 0, 1, 1], [], []>} : vector<1x256xf32>, vector<256x2xf32>, vector<1x2xf32> -> vector<1x2xf32>
      %c0_46 = arith.constant 0 : index
      %c0_47 = arith.constant 0 : index
      %72 = vector.load %arg15[%c0_46, %c0_47] : memref<1x2xf32, #tpu.memory_space<vmem>>, vector<1x2xf32>
      %73 = arith.addf %71, %72 : vector<1x2xf32>
      %74 = vector.shape_cast %73 : vector<1x2xf32> to vector<1x1x2xf32>
      %c0_48 = arith.constant 0 : index
      %c0_49 = arith.constant 0 : index
      %c0_50 = arith.constant 0 : index
      %75 = vector.load %arg16[%c0_48, %c0_49, %c0_50] : memref<1x1x2xf32, #tpu.memory_space<vmem>>, vector<1x1x2xf32>
      tpu.vector_store %arg16[%c0_48, %c0_49, %c0_50], %74 {strides = array<i32>} : memref<1x1x2xf32, #tpu.memory_space<vmem>>, vector<1x1x2xf32>,
    } else {
    }
    return
  }
  func.func @transform_0(%arg0: i32, %arg1: i32) -> (i32, i32, i32) {
    %c0_i32 = arith.constant 0 : i32
    %c0_i32_0 = arith.constant 0 : i32
    return %arg0, %arg1, %c0_i32 : i32, i32, i32
  }
  func.func @transform_1(%arg0: i32, %arg1: i32) -> (i32, i32, i32) {
    %c0_i32 = arith.constant 0 : i32
    %c0_i32_0 = arith.constant 0 : i32
    %c0_i32_1 = arith.constant 0 : i32
    return %arg0, %c0_i32, %c0_i32_0 : i32, i32, i32
  }
  func.func @transform_2(%arg0: i32, %arg1: i32) -> (i32, i32) {
    %c0_i32 = arith.constant 0 : i32
    %c0_i32_0 = arith.constant 0 : i32
    %c0_i32_1 = arith.constant 0 : i32
    return %c0_i32, %c0_i32_0 : i32, i32
  }
  func.func @transform_3(%arg0: i32, %arg1: i32) -> (i32, i32) {
    %c0_i32 = arith.constant 0 : i32
    %c0_i32_0 = arith.constant 0 : i32
    %c0_i32_1 = arith.constant 0 : i32
    return %c0_i32, %c0_i32_0 : i32, i32
  }
  func.func @transform_4(%arg0: i32, %arg1: i32) -> (i32, i32) {
    %c0_i32 = arith.constant 0 : i32
    %c0_i32_0 = arith.constant 0 : i32
    %c0_i32_1 = arith.constant 0 : i32
    return %c0_i32, %c0_i32_0 : i32, i32
  }
  func.func @transform_5(%arg0: i32, %arg1: i32) -> (i32, i32) {
    %c0_i32 = arith.constant 0 : i32
    %c0_i32_0 = arith.constant 0 : i32
    %c0_i32_1 = arith.constant 0 : i32
    return %c0_i32, %c0_i32_0 : i32, i32
  }
  func.func @transform_6(%arg0: i32, %arg1: i32) -> (i32, i32) {
    %c0_i32 = arith.constant 0 : i32
    %c0_i32_0 = arith.constant 0 : i32
    %c0_i32_1 = arith.constant 0 : i32
    return %c0_i32, %c0_i32_0 : i32, i32
  }
  func.func @transform_7(%arg0: i32, %arg1: i32) -> (i32, i32) {
    %c0_i32 = arith.constant 0 : i32
    %c0_i32_0 = arith.constant 0 : i32
    %c0_i32_1 = arith.constant 0 : i32
    return %c0_i32, %c0_i32_0 : i32, i32
  }
  func.func @transform_8(%arg0: i32, %arg1: i32) -> (i32, i32) {
    %c0_i32 = arith.constant 0 : i32
    %c0_i32_0 = arith.constant 0 : i32
    %c0_i32_1 = arith.constant 0 : i32
    return %c0_i32, %c0_i32_0 : i32, i32
  }
  func.func @transform_9(%arg0: i32, %arg1: i32) -> (i32, i32) {
    %c0_i32 = arith.constant 0 : i32
    %c0_i32_0 = arith.constant 0 : i32
    %c0_i32_1 = arith.constant 0 : i32
    return %c0_i32, %c0_i32_0 : i32, i32
  }
  func.func @transform_10(%arg0: i32, %arg1: i32) -> (i32, i32) {
    %c0_i32 = arith.constant 0 : i32
    %c0_i32_0 = arith.constant 0 : i32
    %c0_i32_1 = arith.constant 0 : i32
    return %c0_i32, %c0_i32_0 : i32, i32
  }
  func.func @transform_11(%arg0: i32, %arg1: i32) -> (i32, i32) {
    %c0_i32 = arith.constant 0 : i32
    %c0_i32_0 = arith.constant 0 : i32
    %c0_i32_1 = arith.constant 0 : i32
    return %c0_i32, %c0_i32_0 : i32, i32
  }
  func.func @transform_12(%arg0: i32, %arg1: i32) -> (i32, i32) {
    %c0_i32 = arith.constant 0 : i32
    %c0_i32_0 = arith.constant 0 : i32
    %c0_i32_1 = arith.constant 0 : i32
    return %c0_i32, %c0_i32_0 : i32, i32
  }
  func.func @transform_13(%arg0: i32, %arg1: i32) -> (i32, i32) {
    %c0_i32 = arith.constant 0 : i32
    %c0_i32_0 = arith.constant 0 : i32
    %c0_i32_1 = arith.constant 0 : i32
    return %c0_i32, %c0_i32_0 : i32, i32
  }
  func.func @transform_14(%arg0: i32, %arg1: i32) -> (i32, i32, i32) {
    %c0_i32 = arith.constant 0 : i32
    %c0_i32_0 = arith.constant 0 : i32
    %c0_i32_1 = arith.constant 0 : i32
    return %arg0, %c0_i32, %c0_i32_0 : i32, i32, i32
  }
}

module attributes {stable_mosaic.version = 11 : i64} {
  func.func @_stn_kernel(%arg0: i32, %arg1: memref<1x64x2xf32, #tpu.memory_space<vmem>>, %arg2: memref<6x64xf32, #tpu.memory_space<vmem>>, %arg3: memref<1x64xf32, #tpu.memory_space<vmem>>, %arg4: memref<192x128xf32, #tpu.memory_space<vmem>>, %arg5: memref<1x128xf32, #tpu.memory_space<vmem>>, %arg6: memref<384x256xf32, #tpu.memory_space<vmem>>, %arg7: memref<1x256xf32, #tpu.memory_space<vmem>>, %arg8: memref<768x128xf32, #tpu.memory_space<vmem>>, %arg9: memref<1x128xf32, #tpu.memory_space<vmem>>, %arg10: memref<384x64xf32, #tpu.memory_space<vmem>>, %arg11: memref<1x64xf32, #tpu.memory_space<vmem>>, %arg12: memref<192x2xf32, #tpu.memory_space<vmem>>, %arg13: memref<1x2xf32, #tpu.memory_space<vmem>>, %arg14: memref<2x64x512xf32, #tpu.memory_space<vmem>>, %arg15: memref<1x512xf32, #tpu.memory_space<vmem>>, %arg16: memref<512x256xf32, #tpu.memory_space<vmem>>, %arg17: memref<1x256xf32, #tpu.memory_space<vmem>>, %arg18: memref<256x4xf32, #tpu.memory_space<vmem>>, %arg19: memref<1x4xf32, #tpu.memory_space<vmem>>, %arg20: memref<1x1x4xf32, #tpu.memory_space<vmem>>) attributes {dimension_semantics = [#tpu.dimension_semantics<parallel>], iteration_bounds = array<i64: 2>, scalar_prefetch = 0 : i64, scratch_operands = 0 : i64, tpu.core_type = #tpu.core_type<tc>, window_params = [{transform_indices = @transform_0, window_bounds = array<i64: 1, 64, 2>}, {pipeline_mode = #tpu.pipeline_mode<synchronous>, transform_indices = @transform_1, window_bounds = array<i64: 6, 64>}, {pipeline_mode = #tpu.pipeline_mode<synchronous>, transform_indices = @transform_2, window_bounds = array<i64: 1, 64>}, {pipeline_mode = #tpu.pipeline_mode<synchronous>, transform_indices = @transform_3, window_bounds = array<i64: 192, 128>}, {pipeline_mode = #tpu.pipeline_mode<synchronous>, transform_indices = @transform_4, window_bounds = array<i64: 1, 128>}, {pipeline_mode = #tpu.pipeline_mode<synchronous>, transform_indices = @transform_5, window_bounds = array<i64: 384, 256>}, {pipeline_mode = #tpu.pipeline_mode<synchronous>, transform_indices = @transform_6, window_bounds = array<i64: 1, 256>}, {pipeline_mode = #tpu.pipeline_mode<synchronous>, transform_indices = @transform_7, window_bounds = array<i64: 768, 128>}, {pipeline_mode = #tpu.pipeline_mode<synchronous>, transform_indices = @transform_8, window_bounds = array<i64: 1, 128>}, {pipeline_mode = #tpu.pipeline_mode<synchronous>, transform_indices = @transform_9, window_bounds = array<i64: 384, 64>}, {pipeline_mode = #tpu.pipeline_mode<synchronous>, transform_indices = @transform_10, window_bounds = array<i64: 1, 64>}, {pipeline_mode = #tpu.pipeline_mode<synchronous>, transform_indices = @transform_11, window_bounds = array<i64: 192, 2>}, {pipeline_mode = #tpu.pipeline_mode<synchronous>, transform_indices = @transform_12, window_bounds = array<i64: 1, 2>}, {pipeline_mode = #tpu.pipeline_mode<synchronous>, transform_indices = @transform_13, window_bounds = array<i64: 2, 64, 512>}, {pipeline_mode = #tpu.pipeline_mode<synchronous>, transform_indices = @transform_14, window_bounds = array<i64: 1, 512>}, {pipeline_mode = #tpu.pipeline_mode<synchronous>, transform_indices = @transform_15, window_bounds = array<i64: 512, 256>}, {pipeline_mode = #tpu.pipeline_mode<synchronous>, transform_indices = @transform_16, window_bounds = array<i64: 1, 256>}, {pipeline_mode = #tpu.pipeline_mode<synchronous>, transform_indices = @transform_17, window_bounds = array<i64: 256, 4>}, {pipeline_mode = #tpu.pipeline_mode<synchronous>, transform_indices = @transform_18, window_bounds = array<i64: 1, 4>}, {transform_indices = @transform_19, window_bounds = array<i64: 1, 1, 4>}]} {
    %c0 = arith.constant 0 : index
    %c0_0 = arith.constant 0 : index
    %c0_1 = arith.constant 0 : index
    %0 = vector.load %arg1[%c0, %c0_0, %c0_1] : memref<1x64x2xf32, #tpu.memory_space<vmem>>, vector<1x64x2xf32>
    %1 = vector.shape_cast %0 : vector<1x64x2xf32> to vector<64x2xf32>
    %2 = tpu.iota {dimensions = array<i32: 0>} : vector<64x1xi32>
    %c0_i32 = arith.constant 0 : i32
    %3 = vector.broadcast %c0_i32 : i32 to vector<64x1xi32>
    %4 = arith.cmpi sgt, %2, %3 : vector<64x1xi32>
    %5 = arith.extui %4 : vector<64x1xi1> to vector<64x1xi32>
    %6 = arith.sitofp %5 : vector<64x1xi32> to vector<64x1xf32>
    %c63_i32 = arith.constant 63 : i32
    %7 = vector.broadcast %c63_i32 : i32 to vector<64x1xi32>
    %8 = arith.cmpi slt, %2, %7 : vector<64x1xi32>
    %9 = arith.extui %8 : vector<64x1xi1> to vector<64x1xi32>
    %10 = arith.sitofp %9 : vector<64x1xi32> to vector<64x1xf32>
    %c0_2 = arith.constant 0 : index
    %c0_3 = arith.constant 0 : index
    %11 = vector.load %arg2[%c0_2, %c0_3] : memref<6x64xf32, #tpu.memory_space<vmem>>, vector<6x64xf32>
    %c0_4 = arith.constant 0 : index
    %c0_5 = arith.constant 0 : index
    %12 = vector.load %arg3[%c0_4, %c0_5] : memref<1x64xf32, #tpu.memory_space<vmem>>, vector<1x64xf32>
    %c1_i32 = arith.constant 1 : i32
    %13 = tpu.dynamic_rotate %1 by %c1_i32 dim 0 : vector<64x2xf32>, i32 -> vector<64x2xf32>
    %14 = vector.broadcast %6 : vector<64x1xf32> to vector<64x2xf32>
    %15 = arith.mulf %13, %14 : vector<64x2xf32>
    %c63_i32_6 = arith.constant 63 : i32
    %16 = tpu.dynamic_rotate %1 by %c63_i32_6 dim 0 : vector<64x2xf32>, i32 -> vector<64x2xf32>
    %17 = vector.broadcast %10 : vector<64x1xf32> to vector<64x2xf32>
    %18 = arith.mulf %16, %17 : vector<64x2xf32>
    %19 = vector.extract_strided_slice %15 {offsets = [0, 0], sizes = [64, 1], strides = [1, 1]} : vector<64x2xf32> to vector<64x1xf32>
    %20 = vector.extract_strided_slice %11 {offsets = [0, 0], sizes = [1, 64], strides = [1, 1]} : vector<6x64xf32> to vector<1x64xf32>
    %21 = vector.broadcast %19 : vector<64x1xf32> to vector<64x64xf32>
    %22 = vector.broadcast %20 : vector<1x64xf32> to vector<64x64xf32>
    %23 = arith.mulf %21, %22 : vector<64x64xf32>
    %24 = vector.broadcast %12 : vector<1x64xf32> to vector<64x64xf32>
    %25 = arith.addf %24, %23 : vector<64x64xf32>
    %26 = vector.extract_strided_slice %15 {offsets = [0, 1], sizes = [64, 1], strides = [1, 1]} : vector<64x2xf32> to vector<64x1xf32>
    %27 = vector.extract_strided_slice %11 {offsets = [1, 0], sizes = [1, 64], strides = [1, 1]} : vector<6x64xf32> to vector<1x64xf32>
    %28 = vector.broadcast %26 : vector<64x1xf32> to vector<64x64xf32>
    %29 = vector.broadcast %27 : vector<1x64xf32> to vector<64x64xf32>
    %30 = arith.mulf %28, %29 : vector<64x64xf32>
    %31 = arith.addf %25, %30 : vector<64x64xf32>
    %32 = vector.extract_strided_slice %1 {offsets = [0, 0], sizes = [64, 1], strides = [1, 1]} : vector<64x2xf32> to vector<64x1xf32>
    %33 = vector.extract_strided_slice %11 {offsets = [2, 0], sizes = [1, 64], strides = [1, 1]} : vector<6x64xf32> to vector<1x64xf32>
    %34 = vector.broadcast %32 : vector<64x1xf32> to vector<64x64xf32>
    %35 = vector.broadcast %33 : vector<1x64xf32> to vector<64x64xf32>
    %36 = arith.mulf %34, %35 : vector<64x64xf32>
    %37 = arith.addf %31, %36 : vector<64x64xf32>
    %38 = vector.extract_strided_slice %1 {offsets = [0, 1], sizes = [64, 1], strides = [1, 1]} : vector<64x2xf32> to vector<64x1xf32>
    %39 = vector.extract_strided_slice %11 {offsets = [3, 0], sizes = [1, 64], strides = [1, 1]} : vector<6x64xf32> to vector<1x64xf32>
    %40 = vector.broadcast %38 : vector<64x1xf32> to vector<64x64xf32>
    %41 = vector.broadcast %39 : vector<1x64xf32> to vector<64x64xf32>
    %42 = arith.mulf %40, %41 : vector<64x64xf32>
    %43 = arith.addf %37, %42 : vector<64x64xf32>
    %44 = vector.extract_strided_slice %18 {offsets = [0, 0], sizes = [64, 1], strides = [1, 1]} : vector<64x2xf32> to vector<64x1xf32>
    %45 = vector.extract_strided_slice %11 {offsets = [4, 0], sizes = [1, 64], strides = [1, 1]} : vector<6x64xf32> to vector<1x64xf32>
    %46 = vector.broadcast %44 : vector<64x1xf32> to vector<64x64xf32>
    %47 = vector.broadcast %45 : vector<1x64xf32> to vector<64x64xf32>
    %48 = arith.mulf %46, %47 : vector<64x64xf32>
    %49 = arith.addf %43, %48 : vector<64x64xf32>
    %50 = vector.extract_strided_slice %18 {offsets = [0, 1], sizes = [64, 1], strides = [1, 1]} : vector<64x2xf32> to vector<64x1xf32>
    %51 = vector.extract_strided_slice %11 {offsets = [5, 0], sizes = [1, 64], strides = [1, 1]} : vector<6x64xf32> to vector<1x64xf32>
    %52 = vector.broadcast %50 : vector<64x1xf32> to vector<64x64xf32>
    %53 = vector.broadcast %51 : vector<1x64xf32> to vector<64x64xf32>
    %54 = arith.mulf %52, %53 : vector<64x64xf32>
    %55 = arith.addf %49, %54 : vector<64x64xf32>
    %cst = arith.constant 0.000000e+00 : f32
    %56 = vector.broadcast %cst : f32 to vector<64x64xf32>
    %57 = arith.maximumf %55, %56 : vector<64x64xf32>
    %c0_7 = arith.constant 0 : index
    %c0_8 = arith.constant 0 : index
    %58 = vector.load %arg4[%c0_7, %c0_8] : memref<192x128xf32, #tpu.memory_space<vmem>>, vector<192x128xf32>
    %c0_9 = arith.constant 0 : index
    %c0_10 = arith.constant 0 : index
    %59 = vector.load %arg5[%c0_9, %c0_10] : memref<1x128xf32, #tpu.memory_space<vmem>>, vector<1x128xf32>
    %c1_i32_11 = arith.constant 1 : i32
    %60 = tpu.dynamic_rotate %57 by %c1_i32_11 dim 0 : vector<64x64xf32>, i32 -> vector<64x64xf32>
    %61 = vector.broadcast %6 : vector<64x1xf32> to vector<64x64xf32>
    %62 = arith.mulf %60, %61 : vector<64x64xf32>
    %c63_i32_12 = arith.constant 63 : i32
    %63 = tpu.dynamic_rotate %57 by %c63_i32_12 dim 0 : vector<64x64xf32>, i32 -> vector<64x64xf32>
    %64 = vector.broadcast %10 : vector<64x1xf32> to vector<64x64xf32>
    %65 = arith.mulf %63, %64 : vector<64x64xf32>
    %66 = tpu.concatenate %62, %57, %65 in 1 : vector<64x64xf32>, vector<64x64xf32>, vector<64x64xf32> -> vector<64x192xf32>
    %cst_13 = arith.constant dense<0.000000e+00> : vector<64x128xf32>
    %67 = tpu.matmul %66, %58, %cst_13 {dimension_numbers = #tpu.dot_dimension_numbers<[1], [0], [0], [1], [0, 0, 1, 1], [], []>} : vector<64x192xf32>, vector<192x128xf32>, vector<64x128xf32> -> vector<64x128xf32>
    %68 = vector.broadcast %59 : vector<1x128xf32> to vector<64x128xf32>
    %69 = arith.addf %67, %68 : vector<64x128xf32>
    %cst_14 = arith.constant 0.000000e+00 : f32
    %70 = vector.broadcast %cst_14 : f32 to vector<64x128xf32>
    %71 = arith.maximumf %69, %70 : vector<64x128xf32>
    %c0_15 = arith.constant 0 : index
    %c0_16 = arith.constant 0 : index
    %72 = vector.load %arg6[%c0_15, %c0_16] : memref<384x256xf32, #tpu.memory_space<vmem>>, vector<384x256xf32>
    %c0_17 = arith.constant 0 : index
    %c0_18 = arith.constant 0 : index
    %73 = vector.load %arg7[%c0_17, %c0_18] : memref<1x256xf32, #tpu.memory_space<vmem>>, vector<1x256xf32>
    %c1_i32_19 = arith.constant 1 : i32
    %74 = tpu.dynamic_rotate %71 by %c1_i32_19 dim 0 : vector<64x128xf32>, i32 -> vector<64x128xf32>
    %75 = vector.broadcast %6 : vector<64x1xf32> to vector<64x128xf32>
    %76 = arith.mulf %74, %75 : vector<64x128xf32>
    %c63_i32_20 = arith.constant 63 : i32
    %77 = tpu.dynamic_rotate %71 by %c63_i32_20 dim 0 : vector<64x128xf32>, i32 -> vector<64x128xf32>
    %78 = vector.broadcast %10 : vector<64x1xf32> to vector<64x128xf32>
    %79 = arith.mulf %77, %78 : vector<64x128xf32>
    %80 = tpu.concatenate %76, %71, %79 in 1 : vector<64x128xf32>, vector<64x128xf32>, vector<64x128xf32> -> vector<64x384xf32>
    %cst_21 = arith.constant dense<0.000000e+00> : vector<64x256xf32>
    %81 = tpu.matmul %80, %72, %cst_21 {dimension_numbers = #tpu.dot_dimension_numbers<[1], [0], [0], [1], [0, 0, 1, 1], [], []>} : vector<64x384xf32>, vector<384x256xf32>, vector<64x256xf32> -> vector<64x256xf32>
    %82 = vector.broadcast %73 : vector<1x256xf32> to vector<64x256xf32>
    %83 = arith.addf %81, %82 : vector<64x256xf32>
    %cst_22 = arith.constant 0.000000e+00 : f32
    %84 = vector.broadcast %cst_22 : f32 to vector<64x256xf32>
    %85 = arith.maximumf %83, %84 : vector<64x256xf32>
    %c0_23 = arith.constant 0 : index
    %c0_24 = arith.constant 0 : index
    %86 = vector.load %arg8[%c0_23, %c0_24] : memref<768x128xf32, #tpu.memory_space<vmem>>, vector<768x128xf32>
    %c0_25 = arith.constant 0 : index
    %c0_26 = arith.constant 0 : index
    %87 = vector.load %arg9[%c0_25, %c0_26] : memref<1x128xf32, #tpu.memory_space<vmem>>, vector<1x128xf32>
    %c1_i32_27 = arith.constant 1 : i32
    %88 = tpu.dynamic_rotate %85 by %c1_i32_27 dim 0 : vector<64x256xf32>, i32 -> vector<64x256xf32>
    %89 = vector.broadcast %6 : vector<64x1xf32> to vector<64x256xf32>
    %90 = arith.mulf %88, %89 : vector<64x256xf32>
    %c63_i32_28 = arith.constant 63 : i32
    %91 = tpu.dynamic_rotate %85 by %c63_i32_28 dim 0 : vector<64x256xf32>, i32 -> vector<64x256xf32>
    %92 = vector.broadcast %10 : vector<64x1xf32> to vector<64x256xf32>
    %93 = arith.mulf %91, %92 : vector<64x256xf32>
    %94 = tpu.concatenate %90, %85, %93 in 1 : vector<64x256xf32>, vector<64x256xf32>, vector<64x256xf32> -> vector<64x768xf32>
    %cst_29 = arith.constant dense<0.000000e+00> : vector<64x128xf32>
    %95 = tpu.matmul %94, %86, %cst_29 {dimension_numbers = #tpu.dot_dimension_numbers<[1], [0], [0], [1], [0, 0, 1, 1], [], []>} : vector<64x768xf32>, vector<768x128xf32>, vector<64x128xf32> -> vector<64x128xf32>
    %96 = vector.broadcast %87 : vector<1x128xf32> to vector<64x128xf32>
    %97 = arith.addf %95, %96 : vector<64x128xf32>
    %cst_30 = arith.constant 0.000000e+00 : f32
    %98 = vector.broadcast %cst_30 : f32 to vector<64x128xf32>
    %99 = arith.maximumf %97, %98 : vector<64x128xf32>
    %c0_31 = arith.constant 0 : index
    %c0_32 = arith.constant 0 : index
    %100 = vector.load %arg10[%c0_31, %c0_32] : memref<384x64xf32, #tpu.memory_space<vmem>>, vector<384x64xf32>
    %c0_33 = arith.constant 0 : index
    %c0_34 = arith.constant 0 : index
    %101 = vector.load %arg11[%c0_33, %c0_34] : memref<1x64xf32, #tpu.memory_space<vmem>>, vector<1x64xf32>
    %c1_i32_35 = arith.constant 1 : i32
    %102 = tpu.dynamic_rotate %99 by %c1_i32_35 dim 0 : vector<64x128xf32>, i32 -> vector<64x128xf32>
    %103 = vector.broadcast %6 : vector<64x1xf32> to vector<64x128xf32>
    %104 = arith.mulf %102, %103 : vector<64x128xf32>
    %c63_i32_36 = arith.constant 63 : i32
    %105 = tpu.dynamic_rotate %99 by %c63_i32_36 dim 0 : vector<64x128xf32>, i32 -> vector<64x128xf32>
    %106 = vector.broadcast %10 : vector<64x1xf32> to vector<64x128xf32>
    %107 = arith.mulf %105, %106 : vector<64x128xf32>
    %108 = tpu.concatenate %104, %99, %107 in 1 : vector<64x128xf32>, vector<64x128xf32>, vector<64x128xf32> -> vector<64x384xf32>
    %cst_37 = arith.constant dense<0.000000e+00> : vector<64x64xf32>
    %109 = tpu.matmul %108, %100, %cst_37 {dimension_numbers = #tpu.dot_dimension_numbers<[1], [0], [0], [1], [0, 0, 1, 1], [], []>} : vector<64x384xf32>, vector<384x64xf32>, vector<64x64xf32> -> vector<64x64xf32>
    %110 = vector.broadcast %101 : vector<1x64xf32> to vector<64x64xf32>
    %111 = arith.addf %109, %110 : vector<64x64xf32>
    %cst_38 = arith.constant 0.000000e+00 : f32
    %112 = vector.broadcast %cst_38 : f32 to vector<64x64xf32>
    %113 = arith.maximumf %111, %112 : vector<64x64xf32>
    %c0_39 = arith.constant 0 : index
    %c0_40 = arith.constant 0 : index
    %114 = vector.load %arg12[%c0_39, %c0_40] : memref<192x2xf32, #tpu.memory_space<vmem>>, vector<192x2xf32>
    %c0_41 = arith.constant 0 : index
    %c0_42 = arith.constant 0 : index
    %115 = vector.load %arg13[%c0_41, %c0_42] : memref<1x2xf32, #tpu.memory_space<vmem>>, vector<1x2xf32>
    %c1_i32_43 = arith.constant 1 : i32
    %116 = tpu.dynamic_rotate %113 by %c1_i32_43 dim 0 : vector<64x64xf32>, i32 -> vector<64x64xf32>
    %117 = vector.broadcast %6 : vector<64x1xf32> to vector<64x64xf32>
    %118 = arith.mulf %116, %117 : vector<64x64xf32>
    %c63_i32_44 = arith.constant 63 : i32
    %119 = tpu.dynamic_rotate %113 by %c63_i32_44 dim 0 : vector<64x64xf32>, i32 -> vector<64x64xf32>
    %120 = vector.broadcast %10 : vector<64x1xf32> to vector<64x64xf32>
    %121 = arith.mulf %119, %120 : vector<64x64xf32>
    %122 = tpu.concatenate %118, %113, %121 in 1 : vector<64x64xf32>, vector<64x64xf32>, vector<64x64xf32> -> vector<64x192xf32>
    %cst_45 = arith.constant dense<0.000000e+00> : vector<64x2xf32>
    %123 = tpu.matmul %122, %114, %cst_45 {dimension_numbers = #tpu.dot_dimension_numbers<[1], [0], [0], [1], [0, 0, 1, 1], [], []>} : vector<64x192xf32>, vector<192x2xf32>, vector<64x2xf32> -> vector<64x2xf32>
    %124 = vector.broadcast %115 : vector<1x2xf32> to vector<64x2xf32>
    %125 = arith.addf %123, %124 : vector<64x2xf32>
    %cst_46 = arith.constant 0.000000e+00 : f32
    %126 = vector.broadcast %cst_46 : f32 to vector<64x2xf32>
    %127 = arith.maximumf %125, %126 : vector<64x2xf32>
    %c0_47 = arith.constant 0 : index
    %c0_48 = arith.constant 0 : index
    %128 = vector.load %arg15[%c0_47, %c0_48] : memref<1x512xf32, #tpu.memory_space<vmem>>, vector<1x512xf32>
    %cst_49 = arith.constant 0.000000e+00 : f32
    %129 = vector.broadcast %cst_49 : f32 to vector<64x512xf32>
    %130 = vector.extract_strided_slice %127 {offsets = [0, 0], sizes = [64, 1], strides = [1, 1]} : vector<64x2xf32> to vector<64x1xf32>
    %c0_50 = arith.constant 0 : index
    %c0_51 = arith.constant 0 : index
    %c0_52 = arith.constant 0 : index
    %131 = vector.load %arg14[%c0_50, %c0_51, %c0_52] : memref<2x64x512xf32, #tpu.memory_space<vmem>>, vector<1x64x512xf32>
    %132 = vector.shape_cast %131 : vector<1x64x512xf32> to vector<64x512xf32>
    %133 = vector.broadcast %130 : vector<64x1xf32> to vector<64x512xf32>
    %134 = arith.mulf %133, %132 : vector<64x512xf32>
    %135 = arith.addf %129, %134 : vector<64x512xf32>
    %136 = vector.extract_strided_slice %127 {offsets = [0, 1], sizes = [64, 1], strides = [1, 1]} : vector<64x2xf32> to vector<64x1xf32>
    %c1 = arith.constant 1 : index
    %c0_53 = arith.constant 0 : index
    %c0_54 = arith.constant 0 : index
    %137 = vector.load %arg14[%c1, %c0_53, %c0_54] : memref<2x64x512xf32, #tpu.memory_space<vmem>>, vector<1x64x512xf32>
    %138 = vector.shape_cast %137 : vector<1x64x512xf32> to vector<64x512xf32>
    %139 = vector.broadcast %136 : vector<64x1xf32> to vector<64x512xf32>
    %140 = arith.mulf %139, %138 : vector<64x512xf32>
    %141 = arith.addf %135, %140 : vector<64x512xf32>
    %cst_55 = arith.constant dense<0.000000e+00> : vector<512xf32>
    %142 = vector.multi_reduction <add>, %141, %cst_55 [0] : vector<64x512xf32> to vector<512xf32>
    %143 = vector.shape_cast %142 : vector<512xf32> to vector<1x512xf32>
    %144 = arith.addf %143, %128 : vector<1x512xf32>
    %cst_56 = arith.constant 0.000000e+00 : f32
    %145 = vector.broadcast %cst_56 : f32 to vector<1x512xf32>
    %146 = arith.maximumf %144, %145 : vector<1x512xf32>
    %c0_57 = arith.constant 0 : index
    %c0_58 = arith.constant 0 : index
    %147 = vector.load %arg16[%c0_57, %c0_58] : memref<512x256xf32, #tpu.memory_space<vmem>>, vector<512x256xf32>
    %c0_59 = arith.constant 0 : index
    %c0_60 = arith.constant 0 : index
    %148 = vector.load %arg17[%c0_59, %c0_60] : memref<1x256xf32, #tpu.memory_space<vmem>>, vector<1x256xf32>
    %cst_61 = arith.constant dense<0.000000e+00> : vector<1x256xf32>
    %149 = tpu.matmul %146, %147, %cst_61 {dimension_numbers = #tpu.dot_dimension_numbers<[1], [0], [0], [1], [0, 0, 1, 1], [], []>} : vector<1x512xf32>, vector<512x256xf32>, vector<1x256xf32> -> vector<1x256xf32>
    %150 = arith.addf %149, %148 : vector<1x256xf32>
    %cst_62 = arith.constant 0.000000e+00 : f32
    %151 = vector.broadcast %cst_62 : f32 to vector<1x256xf32>
    %152 = arith.maximumf %150, %151 : vector<1x256xf32>
    %c0_63 = arith.constant 0 : index
    %c0_64 = arith.constant 0 : index
    %153 = vector.load %arg18[%c0_63, %c0_64] : memref<256x4xf32, #tpu.memory_space<vmem>>, vector<256x4xf32>
    %c0_65 = arith.constant 0 : index
    %c0_66 = arith.constant 0 : index
    %154 = vector.load %arg19[%c0_65, %c0_66] : memref<1x4xf32, #tpu.memory_space<vmem>>, vector<1x4xf32>
    %cst_67 = arith.constant dense<0.000000e+00> : vector<1x4xf32>
    %155 = tpu.matmul %152, %153, %cst_67 {dimension_numbers = #tpu.dot_dimension_numbers<[1], [0], [0], [1], [0, 0, 1, 1], [], []>} : vector<1x256xf32>, vector<256x4xf32>, vector<1x4xf32> -> vector<1x4xf32>
    %156 = arith.addf %155, %154 : vector<1x4xf32>
    %157 = vector.shape_cast %156 : vector<1x4xf32> to vector<1x1x4xf32>
    %c0_68 = arith.constant 0 : index
    %c0_69 = arith.constant 0 : index
    %c0_70 = arith.constant 0 : index
    %158 = vector.load %arg20[%c0_68, %c0_69, %c0_70] : memref<1x1x4xf32, #tpu.memory_space<vmem>>, vector<1x1x4xf32>
    tpu.vector_store %arg20[%c0_68, %c0_69, %c0_70], %157 {strides = array<i32>} : memref<1x1x4xf32, #tpu.memory_space<vmem>>, vector<1x1x4xf32>,
    return
  }
  func.func @transform_0(%arg0: i32) -> (i32, i32, i32) {
    %c0_i32 = arith.constant 0 : i32
    %c0_i32_0 = arith.constant 0 : i32
    %c0_i32_1 = arith.constant 0 : i32
    return %arg0, %c0_i32, %c0_i32_0 : i32, i32, i32
  }
  func.func @transform_1(%arg0: i32) -> (i32, i32) {
    %c0_i32 = arith.constant 0 : i32
    %c0_i32_0 = arith.constant 0 : i32
    %c0_i32_1 = arith.constant 0 : i32
    return %c0_i32, %c0_i32_0 : i32, i32
  }
  func.func @transform_2(%arg0: i32) -> (i32, i32) {
    %c0_i32 = arith.constant 0 : i32
    %c0_i32_0 = arith.constant 0 : i32
    %c0_i32_1 = arith.constant 0 : i32
    return %c0_i32, %c0_i32_0 : i32, i32
  }
  func.func @transform_3(%arg0: i32) -> (i32, i32) {
    %c0_i32 = arith.constant 0 : i32
    %c0_i32_0 = arith.constant 0 : i32
    %c0_i32_1 = arith.constant 0 : i32
    return %c0_i32, %c0_i32_0 : i32, i32
  }
  func.func @transform_4(%arg0: i32) -> (i32, i32) {
    %c0_i32 = arith.constant 0 : i32
    %c0_i32_0 = arith.constant 0 : i32
    %c0_i32_1 = arith.constant 0 : i32
    return %c0_i32, %c0_i32_0 : i32, i32
  }
  func.func @transform_5(%arg0: i32) -> (i32, i32) {
    %c0_i32 = arith.constant 0 : i32
    %c0_i32_0 = arith.constant 0 : i32
    %c0_i32_1 = arith.constant 0 : i32
    return %c0_i32, %c0_i32_0 : i32, i32
  }
  func.func @transform_6(%arg0: i32) -> (i32, i32) {
    %c0_i32 = arith.constant 0 : i32
    %c0_i32_0 = arith.constant 0 : i32
    %c0_i32_1 = arith.constant 0 : i32
    return %c0_i32, %c0_i32_0 : i32, i32
  }
  func.func @transform_7(%arg0: i32) -> (i32, i32) {
    %c0_i32 = arith.constant 0 : i32
    %c0_i32_0 = arith.constant 0 : i32
    %c0_i32_1 = arith.constant 0 : i32
    return %c0_i32, %c0_i32_0 : i32, i32
  }
  func.func @transform_8(%arg0: i32) -> (i32, i32) {
    %c0_i32 = arith.constant 0 : i32
    %c0_i32_0 = arith.constant 0 : i32
    %c0_i32_1 = arith.constant 0 : i32
    return %c0_i32, %c0_i32_0 : i32, i32
  }
  func.func @transform_9(%arg0: i32) -> (i32, i32) {
    %c0_i32 = arith.constant 0 : i32
    %c0_i32_0 = arith.constant 0 : i32
    %c0_i32_1 = arith.constant 0 : i32
    return %c0_i32, %c0_i32_0 : i32, i32
  }
  func.func @transform_10(%arg0: i32) -> (i32, i32) {
    %c0_i32 = arith.constant 0 : i32
    %c0_i32_0 = arith.constant 0 : i32
    %c0_i32_1 = arith.constant 0 : i32
    return %c0_i32, %c0_i32_0 : i32, i32
  }
  func.func @transform_11(%arg0: i32) -> (i32, i32) {
    %c0_i32 = arith.constant 0 : i32
    %c0_i32_0 = arith.constant 0 : i32
    %c0_i32_1 = arith.constant 0 : i32
    return %c0_i32, %c0_i32_0 : i32, i32
  }
  func.func @transform_12(%arg0: i32) -> (i32, i32) {
    %c0_i32 = arith.constant 0 : i32
    %c0_i32_0 = arith.constant 0 : i32
    %c0_i32_1 = arith.constant 0 : i32
    return %c0_i32, %c0_i32_0 : i32, i32
  }
  func.func @transform_13(%arg0: i32) -> (i32, i32, i32) {
    %c0_i32 = arith.constant 0 : i32
    %c0_i32_0 = arith.constant 0 : i32
    %c0_i32_1 = arith.constant 0 : i32
    %c0_i32_2 = arith.constant 0 : i32
    return %c0_i32, %c0_i32_0, %c0_i32_1 : i32, i32, i32
  }
  func.func @transform_14(%arg0: i32) -> (i32, i32) {
    %c0_i32 = arith.constant 0 : i32
    %c0_i32_0 = arith.constant 0 : i32
    %c0_i32_1 = arith.constant 0 : i32
    return %c0_i32, %c0_i32_0 : i32, i32
  }
  func.func @transform_15(%arg0: i32) -> (i32, i32) {
    %c0_i32 = arith.constant 0 : i32
    %c0_i32_0 = arith.constant 0 : i32
    %c0_i32_1 = arith.constant 0 : i32
    return %c0_i32, %c0_i32_0 : i32, i32
  }
  func.func @transform_16(%arg0: i32) -> (i32, i32) {
    %c0_i32 = arith.constant 0 : i32
    %c0_i32_0 = arith.constant 0 : i32
    %c0_i32_1 = arith.constant 0 : i32
    return %c0_i32, %c0_i32_0 : i32, i32
  }
  func.func @transform_17(%arg0: i32) -> (i32, i32) {
    %c0_i32 = arith.constant 0 : i32
    %c0_i32_0 = arith.constant 0 : i32
    %c0_i32_1 = arith.constant 0 : i32
    return %c0_i32, %c0_i32_0 : i32, i32
  }
  func.func @transform_18(%arg0: i32) -> (i32, i32) {
    %c0_i32 = arith.constant 0 : i32
    %c0_i32_0 = arith.constant 0 : i32
    %c0_i32_1 = arith.constant 0 : i32
    return %c0_i32, %c0_i32_0 : i32, i32
  }
  func.func @transform_19(%arg0: i32) -> (i32, i32, i32) {
    %c0_i32 = arith.constant 0 : i32
    %c0_i32_0 = arith.constant 0 : i32
    %c0_i32_1 = arith.constant 0 : i32
    return %arg0, %c0_i32, %c0_i32_0 : i32, i32, i32
  }
}

</mosaic_0001>

<bundles_post_ra>
// kernel: pointnet_forward.2
= control target key start
LH: loop header
LB: loop body
LE: loop exit
PB: predicated region body
PF: predicated region fallthrough
CT: control target
= control target key end

     0   :  { %s6342_s0 = inlined_call_operand.vmem [shape: f32[2,64,2], index: 0, kind: input, shape index: {}]   ;;  %s6343_s1 = inlined_call_operand.hbm [shape: f32[6,64], index: 1, kind: input, shape index: {}]   ;;  %s6344_s2 = inlined_call_operand.hbm [shape: f32[1,64], index: 2, kind: input, shape index: {}]   ;;  %s6345_s3 = inlined_call_operand.hbm [shape: f32[192,128], index: 3, kind: input, shape index: {}]   ;;  %s6346_s4 = inlined_call_operand.hbm [shape: f32[1,128], index: 4, kind: input, shape index: {}]   ;;  %s6347_s5 = inlined_call_operand.hbm [shape: f32[384,256], index: 5, kind: input, shape index: {}]   ;;  %s6348_s6 = inlined_call_operand.hbm [shape: f32[1,256], index: 6, kind: input, shape index: {}]   ;;  %s6349_s7 = inlined_call_operand.hbm [shape: f32[768,128], index: 7, kind: input, shape index: {}]   ;;  %s6350_s8 = inlined_call_operand.hbm [shape: f32[1,128], index: 8, kind: input, shape index: {}]   ;;  %s6351_s9 = inlined_call_operand.vmem [shape: f32[384,64], index: 9, kind: input, shape index: {}]   ;;  %s6352_s10 = inlined_call_operand.hbm [shape: f32[1,64], index: 10, kind: input, shape index: {}]   ;;  %s6353_s11 = inlined_call_operand.vmem [shape: f32[192,2], index: 11, kind: input, shape index: {}]   ;;  %s6354_s12 = inlined_call_operand.hbm [shape: f32[1,2], index: 12, kind: input, shape index: {}]   ;;  %s6355_s13 = inlined_call_operand.hbm [shape: f32[2,64,512], index: 13, kind: input, shape index: {}]   ;;  %s6356_s14 = inlined_call_operand.hbm [shape: f32[1,512], index: 14, kind: input, shape index: {}]   ;;  %s6357_s15 = inlined_call_operand.hbm [shape: f32[512,256], index: 15, kind: input, shape index: {}]   ;;  %s6358_s16 = inlined_call_operand.hbm [shape: f32[1,256], index: 16, kind: input, shape index: {}]   ;;  %s6359_s17 = inlined_call_operand.vmem [shape: f32[256,4], index: 17, kind: input, shape index: {}]   ;;  %s6360_s18 = inlined_call_operand.vmem [shape: f32[1,4], index: 18, kind: input, shape index: {}]   ;;  %s6361_s19 = inlined_call_operand.vmem [shape: f32[2,1,4], index: 19, kind: output, shape index: {}]  }
   0x1   :  { %6367 = sst [smem:[#allocation32_spill]] %s6342_s0 }
   0x2   :  { %6368 = sst [smem:[#allocation33_spill]] %s6343_s1 }
   0x3   :  { %6369 = sst [smem:[#allocation34_spill]] %s6344_s2 }
   0x4   :  { %6370 = sst [smem:[#allocation35_spill]] %s6345_s3 }
   0x5   :  { %6371 = sst [smem:[#allocation36_spill]] %s6346_s4 }
   0x6   :  { %24 = vsyncpa [#allocation3], 0 }
   0x7   :  { %25 = vsyncpa [#allocation5], 0 }
   0x8   :  { %26 = vsyncpa [#allocation8], 0 }
   0x9   :  { %27 = vsyncpa [#allocation11], 0 }
   0xa   :  { %28 = vsyncpa [#allocation14], 0 }
   0xb   :  { %29 = vsyncpa [#allocation17], 0 }
   0xc   :  { %30 = vsyncpa [#allocation20], 0 }
   0xd   :  { %31 = vsyncpa [#allocation23], 0  ;;  %s5024_s0 = smov 0  }
   0xe LB: > { %s4900_s30 = smov [#allocation4]   ;;  %s5030_s21 = sadd.s32 4294967295, %s4898_s0   ;;  %s4898_s0 = sphi %s5024_s0, %s37_s0  }
   0xf   : > { %s496_s20 = sshll.u32 %s4900_s30, 4  ;;  %p3927_p0 = scmp.ge.s32.totalorder %s4898_s0, 1  ;;  %s497_s20 = int_to_ptr.vmem [resolvable:$true] %s496_s20 }
  0x10   : > { %p472_p1 = scmp.lt.s32.totalorder %s4898_s0, 3  ;;  %p6362_p2 = scmp.eq.s32.totalorder %s5030_s21, 0 }
  0x11   : > { %s4901_s22 = smov [#allocation7]   ;;  %s4902_s23 = smov [#allocation10]  }
  0x12   : > { %p5035_p3 = pnand %p3927_p0, %p472_p1  ;;  %s520_s2 = sshll.u32 %s4901_s22, 4  ;;  %s5041_s2 = int_to_ptr.vmem [resolvable:$true] %s520_s2 }
  0x13   : > { %s544_s24 = sshll.u32 %s4902_s23, 4  ;;  %s4903_s3 = smov [#allocation13]   ;;  %s5049_s24 = int_to_ptr.vmem [resolvable:$true] %s544_s24 }
  0x14   : > { %s6372_s1 = scalar_select %p5035_p3, 1, 0 }
  0x15   : > { %p4369_p4 = pneg %p5035_p3  ;;  %s568_s26 = sshll.u32 %s4903_s3, 4  ;;  %s5051_s26 = int_to_ptr.vmem [resolvable:$true] %s568_s26 }
  0x16   : > { %s4507_s28 = scalar_lea.vmem %s497_s20, 16  ;;  %s4514_s29 = scalar_lea.vmem %s497_s20, 32 }
  0x17   : > { %p5045_p5 = pnand %p6362_p2, %p4369_p4  ;;  %p4508_p7 = scmp.ne.s32.totalorder %s497_s20, %s4507_s28 }
  0x18   : > { %p4515_p10 = scmp.lt.s32.totalorder %s497_s20, %s497_s20  ;;  %p4516_p11 = scmp.lt.s32.totalorder %s4514_s29, %s4507_s28 }
  0x19   : > { %p5055_p6 = pneg %p5045_p5 }
  0x1a   : > { %p4517_p12 = por %p4516_p11, %p4515_p10 }
  0x1b   : > { %p4510_p8 = pnand %p4508_p7, %p5055_p6 }
  0x1d   : > { %p4511_p9 = pneg %p4510_p8 }
  0x1f   : > { %p4518_p13 = pnand %p4517_p12, %p4511_p9 }
  0x21   : > { %4521 = shalt.err (!%p4518_p13)
}
  0x22   : > { %s6375_s23 = sld [smem:[#allocation34_spill]]  ;;  %s4533_s3 = scalar_lea.vmem %s5041_s2, 16 }
  0x23   : > { %p4534_p0 = scmp.ne.s32.totalorder %s5041_s2, %s4533_s3  ;;  %s4540_s28 = scalar_lea.vmem %s5041_s2, 32 }
  0x24   : > { %p4541_p7 = scmp.lt.s32.totalorder %s5041_s2, %s5041_s2  ;;  %p4542_p8 = scmp.lt.s32.totalorder %s4540_s28, %s4533_s3 }
  0x25   : > { %p4536_p1 = pnand %p4534_p0, %p5055_p6 }
  0x26   : > { %p4543_p9 = por %p4542_p8, %p4541_p7 }
  0x27   : > { %p4537_p4 = pneg %p4536_p1 }
  0x28   : > { %4375 = dma.hbm_to_vmem [thread:$0]  (!%p5045_p5), %s6375_s23, 16, %s497_s20, [#allocation5]  }
  0x29   : > { %p4544_p10 = pnand %p4543_p9, %p4537_p4 }
  0x2b   : > { %4547 = shalt.err (!%p4544_p10)
}
  0x2c   : > { %s6376_s4 = sld [smem:[#allocation36_spill]]  ;;  %s4559_s20 = scalar_lea.vmem %s5049_s24, 32 }
  0x2d   : > { %p4560_p11 = scmp.ne.s32.totalorder %s5049_s24, %s4559_s20  ;;  %p4567_p0 = scmp.lt.s32.totalorder %s5049_s24, %s5049_s24 }
  0x2e   : > { %p4568_p1 = scmp.lt.s32.totalorder %s4559_s20, %s4559_s20 }
  0x2f   : > { %p4562_p12 = pnand %p4560_p11, %p5055_p6 }
  0x30   : > { %p4569_p4 = por %p4568_p1, %p4567_p0 }
  0x31   : > { %p4563_p13 = pneg %p4562_p12 }
  0x32   : > { %4381 = dma.hbm_to_vmem [thread:$0]  (!%p5045_p5), %s6376_s4, 16, %s5041_s2, [#allocation8]  }
  0x33   : > { %p4570_p7 = pnand %p4569_p4, %p4563_p13 }
  0x35   : > { %4573 = shalt.err (!%p4570_p7)
}
  0x36   : > { %4387 = dma.hbm_to_vmem [thread:$0]  (!%p5045_p5), %s6348_s6, 32, %s5049_s24, [#allocation11]  }
  0x37   : > { %s4585_s2 = scalar_lea.vmem %s5051_s26, 16  ;;  %s4592_s3 = scalar_lea.vmem %s5051_s26, 32 }
  0x38   : > { %p4586_p8 = scmp.ne.s32.totalorder %s5051_s26, %s4585_s2  ;;  %p4593_p11 = scmp.lt.s32.totalorder %s5051_s26, %s5051_s26 }
  0x39   : > { %p4594_p12 = scmp.lt.s32.totalorder %s4592_s3, %s4585_s2 }
  0x3a   : > { %p4588_p9 = pnand %p4586_p8, %p5055_p6 }
  0x3b   : > { %p4595_p13 = por %p4594_p12, %p4593_p11 }
  0x3c   : > { %p4589_p10 = pneg %p4588_p9 }
  0x3e   : > { %p4596_p0 = pnand %p4595_p13, %p4589_p10 }
  0x40   : > { %4599 = shalt.err (!%p4596_p0)
}
  0x41   : > { %4393 = dma.hbm_to_vmem [thread:$0]  (!%p5045_p5), %s6350_s8, 16, %s5051_s26, [#allocation14]  }
  0x42   : > { %s4904_s24 = smov [#allocation16]   ;;  %s4905_s20 = smov [#allocation19]  }
  0x43   : > { %s596_s30 = sshll.u32 %s4904_s24, 4  ;;  %s620_s22 = sshll.u32 %s4905_s20, 4  ;;  %s597_s30 = int_to_ptr.vmem [resolvable:$true] %s596_s30  ;;  %s621_s22 = int_to_ptr.vmem [resolvable:$true] %s620_s22 }
  0x44   : > { %s4611_s23 = scalar_lea.vmem %s597_s30, 16  ;;  %s4618_s2 = scalar_lea.vmem %s597_s30, 32 }
  0x45   : > { %p4612_p1 = scmp.ne.s32.totalorder %s597_s30, %s4611_s23  ;;  %p4619_p8 = scmp.lt.s32.totalorder %s597_s30, %s597_s30 }
  0x46   : > { %p4620_p9 = scmp.lt.s32.totalorder %s4618_s2, %s4611_s23 }
  0x47   : > { %p4614_p4 = pnand %p4612_p1, %p5055_p6 }
  0x48   : > { %p4621_p10 = por %p4620_p9, %p4619_p8 }
  0x49   : > { %p4615_p7 = pneg %p4614_p4 }
  0x4b   : > { %p4622_p11 = pnand %p4621_p10, %p4615_p7 }
  0x4d   : > { %4625 = shalt.err (!%p4622_p11)
}
  0x4e   : > { %4399 = dma.hbm_to_vmem [thread:$0]  (!%p5045_p5), %s6354_s12, 16, %s597_s30, [#allocation17]  }
  0x4f   : > { %s4637_s28 = scalar_lea.vmem %s621_s22, 64  ;;  %p4645_p1 = scmp.lt.s32.totalorder %s621_s22, %s621_s22 }
  0x50   : > { %p4638_p12 = scmp.ne.s32.totalorder %s621_s22, %s4637_s28  ;;  %p4646_p4 = scmp.lt.s32.totalorder %s4637_s28, %s4637_s28 }
  0x52   : > { %p4640_p13 = pnand %p4638_p12, %p5055_p6  ;;  %p4647_p2 = por %p4646_p4, %p4645_p1 }
  0x54   : > { %p4641_p0 = pneg %p4640_p13 }
  0x56   : > { %p4648_p3 = pnand %p4647_p2, %p4641_p0 }
  0x58   : > { %4651 = shalt.err (!%p4648_p3)
}
  0x59   : > { %4405 = dma.hbm_to_vmem [thread:$0]  (!%p5045_p5), %s6356_s14, 64, %s621_s22, [#allocation20]  }
  0x5a   : > { %s4906_s20 = smov [#allocation2]   ;;  %s4907_s23 = smov [#allocation6]  }
  0x5b   : > { %s485_s30 = sshll.u32 %s4906_s20, 4  ;;  %s506_s2 = sshll.u32 %s4907_s23, 4  ;;  %s486_s30 = int_to_ptr.vmem [resolvable:$true] %s485_s30  ;;  %s507_s2 = int_to_ptr.vmem [resolvable:$true] %s506_s2 }
  0x5c   : > { %s4663_s3 = scalar_lea.vmem %s486_s30, 128  ;;  %p4671_p10 = scmp.lt.s32.totalorder %s486_s30, %s486_s30 }
  0x5d   : > { %p4664_p7 = scmp.ne.s32.totalorder %s486_s30, %s4663_s3  ;;  %p4672_p2 = scmp.lt.s32.totalorder %s4663_s3, %s4663_s3 }
  0x5f   : > { %p4666_p8 = pnand %p4664_p7, %p5055_p6  ;;  %p4673_p3 = por %p4672_p2, %p4671_p10 }
  0x61   : > { %p4667_p9 = pneg %p4666_p8 }
  0x63   : > { %p4674_p11 = pnand %p4673_p3, %p4667_p9 }
  0x65   : > { %4677 = shalt.err (!%p4674_p11)
}
  0x66   : > { %s6377_s22 = sld [smem:[#allocation33_spill]]  ;;  %s4689_s29 = scalar_lea.vmem %s507_s2, 3072 }
  0x67   : > { %p4690_p12 = scmp.ne.s32.totalorder %s507_s2, %s4689_s29  ;;  %p4697_p1 = scmp.lt.s32.totalorder %s507_s2, %s507_s2 }
  0x68   : > { %p4698_p4 = scmp.lt.s32.totalorder %s4689_s29, %s4689_s29 }
  0x69   : > { %p4692_p13 = pnand %p4690_p12, %p5055_p6 }
  0x6a   : > { %p4699_p7 = por %p4698_p4, %p4697_p1 }
  0x6b   : > { %p4693_p0 = pneg %p4692_p13 }
  0x6c   : > { %4372 = dma.hbm_to_vmem [thread:$0]  (!%p5045_p5), %s6377_s22, 128, %s486_s30, [#allocation3]  }
  0x6d   : > { %p4700_p8 = pnand %p4699_p7, %p4693_p0 }
  0x6f   : > { %4703 = shalt.err (!%p4700_p8)
}
  0x70   : > { %s6364_s24 = smov 128   ;;  %s4909_s20 = smov 8  }
  0x71   : > { %s6378_s3 = sld [smem:[#allocation35_spill]]  ;;  %s4910_s26 = smov [#allocation9]  }
  0x72   : > { %s530_s28 = sshll.u32 %s4910_s26, 4  ;;  %s531_s28 = int_to_ptr.vmem [resolvable:$true] %s530_s28 }
  0x73   : > { %s4715_s22 = scalar_lea.vmem %s531_s28, 12288  ;;  %p4723_p3 = scmp.lt.s32.totalorder %s531_s28, %s531_s28 }
  0x74   : > { %p4716_p9 = scmp.ne.s32.totalorder %s531_s28, %s4715_s22  ;;  %p4724_p11 = scmp.lt.s32.totalorder %s4715_s22, %s4715_s22 }
  0x76   : > { %p4718_p10 = pnand %p4716_p9, %p5055_p6  ;;  %p4725_p12 = por %p4724_p11, %p4723_p3 }
  0x77   : > { %4378 = dma.hbm_to_vmem [thread:$0]  (!%p5045_p5), %s6378_s3, 3072, %s507_s2, [#allocation5], %s6364_s24, %s6364_s24, %s4909_s20  }
  0x78   : > { %p4719_p2 = pneg %p4718_p10 }
  0x7a   : > { %p4726_p13 = pnand %p4725_p12, %p4719_p2 }
  0x7c   : > { %4729 = shalt.err (!%p4726_p13)
}
  0x7d   : > { %s6365_s29 = smov 256   ;;  %s6366_s4 = smov 16  }
  0x7e   : > { %4384 = dma.hbm_to_vmem [thread:$0]  (!%p5045_p5), %s6347_s5, 12288, %s531_s28, [#allocation8], %s6365_s29, %s6365_s29, %s6366_s4  }
  0x7f   : > { %s4913_s23 = smov [#allocation12]   ;;  %s4914_s26 = smov [#allocation15]  }
  0x80   : > { %s554_s3 = sshll.u32 %s4913_s23, 4  ;;  %s582_s24 = sshll.u32 %s4914_s26, 4  ;;  %s555_s3 = int_to_ptr.vmem [resolvable:$true] %s554_s3  ;;  %s583_s24 = int_to_ptr.vmem [resolvable:$true] %s582_s24 }
  0x81   : > { %s4741_s22 = scalar_lea.vmem %s555_s3, 12288  ;;  %p4749_p7 = scmp.lt.s32.totalorder %s555_s3, %s555_s3 }
  0x82   : > { %p4742_p0 = scmp.ne.s32.totalorder %s555_s3, %s4741_s22  ;;  %p4750_p8 = scmp.lt.s32.totalorder %s4741_s22, %s4741_s22 }
  0x84   : > { %p4744_p1 = pnand %p4742_p0, %p5055_p6  ;;  %p4751_p9 = por %p4750_p8, %p4749_p7 }
  0x86   : > { %p4745_p4 = pneg %p4744_p1 }
  0x88   : > { %p4752_p10 = pnand %p4751_p9, %p4745_p4 }
  0x8a   : > { %4755 = shalt.err (!%p4752_p10)
}
  0x8b   : > { %s6379_s28 = smov 128   ;;  %s4767_s23 = scalar_lea.vmem %s583_s24, 16 }
  0x8c   : > { %4390 = dma.hbm_to_vmem [thread:$0]  (!%p5045_p5), %s6349_s7, 12288, %s555_s3, [#allocation11], %s6379_s28, %s6379_s28, %s4909_s20  }
  0x8d   : > { %p4768_p2 = scmp.ne.s32.totalorder %s583_s24, %s4767_s23  ;;  %s4774_s26 = scalar_lea.vmem %s583_s24, 32 }
  0x8e   : > { %p4775_p12 = scmp.lt.s32.totalorder %s583_s24, %s583_s24  ;;  %p4776_p13 = scmp.lt.s32.totalorder %s4774_s26, %s4767_s23 }
  0x8f   : > { %p4770_p3 = pnand %p4768_p2, %p5055_p6 }
  0x90   : > { %p4777_p0 = por %p4776_p13, %p4775_p12 }
  0x91   : > { %p4771_p11 = pneg %p4770_p3 }
  0x93   : > { %p4778_p1 = pnand %p4777_p0, %p4771_p11 }
  0x95   : > { %4781 = shalt.err (!%p4778_p1)
}
  0x96   : > { %4396 = dma.hbm_to_vmem [thread:$0]  (!%p5045_p5), %s6352_s10, 16, %s583_s24, [#allocation14]  }
  0x97   : > { %s4915_s2 = smov [#allocation18]  }
  0x98   : > { %s606_s20 = sshll.u32 %s4915_s2, 4  ;;  %s607_s20 = int_to_ptr.vmem [resolvable:$true] %s606_s20 }
  0x99   : > { %s4793_s3 = scalar_lea.vmem %s607_s20, 8192  ;;  %p4801_p9 = scmp.lt.s32.totalorder %s607_s20, %s607_s20 }
  0x9a   : > { %p4794_p4 = scmp.ne.s32.totalorder %s607_s20, %s4793_s3  ;;  %p4802_p10 = scmp.lt.s32.totalorder %s4793_s3, %s4793_s3 }
  0x9c   : > { %p4796_p7 = pnand %p4794_p4, %p5055_p6  ;;  %p4803_p2 = por %p4802_p10, %p4801_p9 }
  0x9e   : > { %p4797_p8 = pneg %p4796_p7 }
  0xa0   : > { %p4804_p3 = pnand %p4803_p2, %p4797_p8 }
  0xa2   : > { %4807 = shalt.err (!%p4804_p3)
}
  0xa3   : > { %s4916_s28 = smov 512   ;;  %s4917_s30 = smov 32  }
  0xa4   : > { %4402 = dma.hbm_to_vmem [thread:$0]  (!%p5045_p5), %s6355_s13, 8192, %s607_s20, [#allocation17], %s4916_s28, %s4916_s28, %s4917_s30  }
  0xa5   : > { %s4918_s23 = smov [#allocation21]   ;;  %s4919_s22 = smov [#allocation22]  }
  0xa6   : > { %s630_s26 = sshll.u32 %s4918_s23, 4  ;;  %s644_s2 = sshll.u32 %s4919_s22, 4  ;;  %s631_s26 = int_to_ptr.vmem [resolvable:$true] %s630_s26  ;;  %s645_s2 = int_to_ptr.vmem [resolvable:$true] %s644_s2 }
  0xa7   : > { %s4819_s4 = scalar_lea.vmem %s631_s26, 16384  ;;  %p4827_p0 = scmp.lt.s32.totalorder %s631_s26, %s631_s26 }
  0xa8   : > { %p4820_p11 = scmp.ne.s32.totalorder %s631_s26, %s4819_s4  ;;  %p4828_p1 = scmp.lt.s32.totalorder %s4819_s4, %s4819_s4 }
  0xaa   : > { %p4822_p12 = pnand %p4820_p11, %p5055_p6  ;;  %p4829_p4 = por %p4828_p1, %p4827_p0 }
  0xac   : > { %p4823_p13 = pneg %p4822_p12 }
  0xae   : > { %p4830_p7 = pnand %p4829_p4, %p4823_p13 }
  0xb0   : > { %4833 = shalt.err (!%p4830_p7)
}
  0xb1   : > { %s6380_s3 = smov 16   ;;  %s6381_s29 = smov 256  }
  0xb2   : > { %4408 = dma.hbm_to_vmem [thread:$0]  (!%p5045_p5), %s6357_s15, 16384, %s631_s26, [#allocation20], %s6381_s29, %s6381_s29, %s6380_s3  }
  0xb3   : > { %s4845_s30 = scalar_lea.vmem %s645_s2, 32  ;;  %p4853_p2 = scmp.lt.s32.totalorder %s645_s2, %s645_s2 }
  0xb4   : > { %p4846_p8 = scmp.ne.s32.totalorder %s645_s2, %s4845_s30  ;;  %p4854_p3 = scmp.lt.s32.totalorder %s4845_s30, %s4845_s30 }
  0xb6   : > { %p4848_p9 = pnand %p4846_p8, %p5055_p6  ;;  %p4855_p11 = por %p4854_p3, %p4853_p2 }
  0xb8   : > { %p4849_p10 = pneg %p4848_p9 }
  0xba   : > { %p4856_p12 = pnand %p4855_p11, %p4849_p10 }
  0xbc   : > { %4859 = shalt.err (!%p4856_p12)
}
  0xbd   : > { %4411 = dma.hbm_to_vmem [thread:$0]  (!%p5045_p5), %s6358_s16, 32, %s645_s2, [#allocation23]  }
  0xbe   : > { %p6382_p13 = scmp.ne.s32.totalorder %s6372_s1, 0 }
  0xbf   : > { %p6383_p0 = scmp.eq.s32.totalorder (!%p6382_p13), %s5030_s21, 0 }
  0xc0   : > { %671 = sbr.rel (%p6382_p13) target bundleno = 2410 (0x96a), region = 96 }
  0xc5   : > { %4865 = dma.done.wait (%p6383_p0), [#allocation3], 128   ;;  %p6384_p6 = pmov %p6383_p0 }
  0xc6   : > { %p6385_p1 = pmov %p6383_p0 }
  0xc7   : > { %4867 = vsyncadd (%p6384_p6), [#allocation3], 4294967168 }
  0xc8   : > { %4869 = dma.done.wait (%p6385_p1), [#allocation5], 3088   ;;  %p6386_p4 = pmov %p6383_p0 }
  0xc9   : > { %p6387_p7 = pmov %p6383_p0 }
  0xca   : > { %4871 = vsyncadd (%p6386_p4), [#allocation5], 4294964208 }
  0xcb   : > { %4873 = dma.done.wait (%p6387_p7), [#allocation8], 12304   ;;  %p6388_p5 = pmov %p6383_p0 }
  0xcc   : > { %p6389_p8 = pmov %p6383_p0 }
  0xcd   : > { %4875 = vsyncadd (%p6388_p5), [#allocation8], 4294954992 }
  0xce   : > { %4877 = dma.done.wait (%p6389_p8), [#allocation11], 12320   ;;  %p6390_p9 = pmov %p6383_p0 }
  0xcf   : > { %p6391_p10 = pmov %p6383_p0 }
  0xd0   : > { %4879 = vsyncadd (%p6390_p9), [#allocation11], 4294954976 }
  0xd1   : > { %4881 = dma.done.wait (%p6391_p10), [#allocation14], 32   ;;  %p6392_p2 = pmov %p6383_p0 }
  0xd2   : > { %p6393_p3 = pmov %p6383_p0 }
  0xd3   : > { %4883 = vsyncadd (%p6392_p2), [#allocation14], 4294967264 }
  0xd4   : > { %4885 = dma.done.wait (%p6393_p3), [#allocation17], 8208   ;;  %p6394_p11 = pmov %p6383_p0 }
  0xd5   : > { %p6395_p12 = pmov %p6383_p0 }
  0xd6   : > { %4887 = vsyncadd (%p6394_p11), [#allocation17], 4294959088 }
  0xd7   : > { %4889 = dma.done.wait (%p6395_p12), [#allocation20], 16448   ;;  %p6396_p13 = pmov %p6383_p0 }
  0xd9   : > { %4891 = vsyncadd (%p6396_p13), [#allocation20], 4294950848 }
  0xda   : > { %4893 = dma.done.wait (%p6383_p0), [#allocation23], 32   ;;  %p6397_p6 = pmov %p6383_p0 }
  0xdb   : > { %p777_p1 = scmp.lt.s32.totalorder %s5030_s21, 1  ;;  %v793_v0 = vlaneseq  ;;  %v4920_v1 = vmov 1   ;;  %v4921_v2 = vmov 0   ;;  %v4922_v4 = vmov 0.0   ;;  %s6398_s23 = sld [smem:[#allocation32_spill]]  ;;  %v1267_v48 = vld [vmem:[#allocation6 + $0x78] sm:$0xff] }
  0xdc   : > { %4895 = vsyncadd (%p6397_p6), [#allocation23], 4294967264  ;;  %4473 = vset.pattern.permute.xlu0 %v4920_v1  ;;  %4472 = vset.pattern.permute.xlu1 %v4921_v2  ;;  %v1266_v49 = vld [vmem:[#allocation6 + $0x70] sm:$0xff]  ;;  %v1265_v51 = vld [vmem:[#allocation6 + $0x68] sm:$0xff]  ;;  %s4923_s22 = smov 64   ;;  %vm1357_vm4 = vcmask 523264  }
  0xdd   : > { %s6400_s21 = smov (!%p777_p1, %s5030_s21), 1  ;;  %v5226_v3 = vshrl.u32 %v793_v0, 7  ;;  %1396 = vmatprep.subr.mxu0 %v4922_v4  ;;  %v1264_v52 = vld [vmem:[#allocation6 + $0x60] sm:$0xff]  ;;  %v1263_v54 = vld [vmem:[#allocation6 + $0x58] sm:$0xff]  ;;  %v1262_v55 = vld [vmem:[#allocation6 + $0x50] sm:$0xff]  ;;  %vm3740_vm5 = vcmask 24576  }
  0xde   : > { %s3985_s1 = sshll.u32 %s6400_s21, 6  ;;  %1397 = vmatpush1.msra.mxu0 %v1267_v48  ;;  %v1261_v56 = vld [vmem:[#allocation6 + $0x48] sm:$0xff]  ;;  %v1260_v57 = vld [vmem:[#allocation6 + $0x40] sm:$0xff]  ;;  %v1259_v58 = vld [vmem:[#allocation6 + $0x38] sm:$0xff] }
  0xdf   : > { %vm802_vm0 = vcmp.gt.s32.totalorder %v5226_v3, 0  ;;  %vm860_vm1 = vcmp.lt.s32.totalorder %v5226_v3, 1  ;;  %vm885_vm2 = vcmp.lt.s32.totalorder %v5226_v3, 7  ;;  %v801_v33 = vadd.s32 56, %v5226_v3  ;;  %1398 = vmatprep.subr.mxu0 %v4922_v4  ;;  %v1258_v59 = vld [vmem:[#allocation6 + $0x30] sm:$0xff]  ;;  %v1257_v60 = vld [vmem:[#allocation6 + $0x28] sm:$0xff] }
  0xe0   : > { %v5248_v10 = vsel %vm802_vm0, 1.0, %v4922_v4  ;;  %1399 = vmatpush1.msra.mxu0 %v1266_v49  ;;  %v1256_v61 = vld [vmem:[#allocation6 + $0x20] sm:$0xff]  ;;  %v1255_v62 = vld [vmem:[#allocation6 + $0x18] sm:$0xff] }
  0xe1   : > { %s5233_s26 = scalar_lea.vmem %s6398_s23, %s3985_s1  ;;  %vm833_vm3 = vcmp.lt.s32.totalorder %v801_v33, 63  ;;  %1400 = vmatprep.subr.mxu0 %v4922_v4  ;;  %v1174_v33 = vsub.s32 4, %v5226_v3 }
  0xe2   : > { %v5237_v5 = vld [vmem:[%s5233_s26] sm:$0xff]  ;;  %v786_v6 = vld [vmem:[%s5233_s26 + $0x8] sm:$0xff]  ;;  %v5242_v7 = vld [vmem:[%s5233_s26 + $0x38] sm:$0xff]  ;;  %v5303_v37 = vsel %vm833_vm3, 1.0, %v4922_v4  ;;  %1401 = vmatpush1.msra.mxu0 %v1265_v51 }
  0xe3   : > { %1081 = vperm.xlu0 %4473, %v5237_v5   ;;  %1022 = vperm.xlu1 %4472, %v5237_v5   ;;  %v852_v8 = vrot.slane %v5237_v5, 7  ;;  %v853_v9 = vrot.slane %v786_v6, 7  ;;  %v859_v11 = vrot.slane %v5242_v7, 7  ;;  %v787_v15 = vld [vmem:[%s5233_s26 + $0x10] sm:$0xff]  ;;  %v877_v18 = vrot.slane %v5237_v5, 1  ;;  %v788_v21 = vld [vmem:[%s5233_s26 + $0x18] sm:$0xff] }
  0xe4   : > { %v854_v16 = vrot.slane %v787_v15, 7  ;;  %v878_v19 = vrot.slane %v786_v6, 1  ;;  %v789_v22 = vld [vmem:[%s5233_s26 + $0x20] sm:$0xff]  ;;  %v855_v23 = vrot.slane %v788_v21, 7  ;;  %v5273_v24 = vld [vmem:[%s5233_s26 + $0x28] sm:$0xff]  ;;  %v879_v26 = vrot.slane %v787_v15, 1  ;;  %1402 = vmatprep.subr.mxu0 %v4922_v4 }
  0xe5   : > { %v867_v12 = vsel %vm860_vm1, %v852_v8, %v853_v9  ;;  %v868_v13 = vsel %vm860_vm1, %v859_v11, %v852_v8  ;;  %v5280_v27 = vld [vmem:[%s5233_s26 + $0x30] sm:$0xff]  ;;  %v856_v29 = vrot.slane %v789_v22, 7  ;;  %v880_v31 = vrot.slane %v788_v21, 1  ;;  %1403 = vmatpush1.msra.mxu0 %v1264_v52  ;;  %v1254_v5 = vld [vmem:[#allocation6 + $0x10] sm:$0xff]  ;;  %s784_s26 = scalar_lea.vmem %s6361_s19, %s6400_s21 }
  0xe6   : > { %v869_v14 = vmul.f32 %v5248_v10, %v868_v13  ;;  %v866_v17 = vsel %vm860_vm1, %v853_v9, %v854_v16  ;;  %v892_v20 = vsel %vm885_vm2, %v877_v18, %v878_v19  ;;  %v865_v25 = vsel %vm860_vm1, %v854_v16, %v855_v23  ;;  %1404 = vmatprep.subr.mxu0 %v4922_v4  ;;  %v1274_v16 = vld [vmem:[#allocation6 + $0xb0] sm:$0xff] }
  0xe7   : > { %4477 = vset.pattern.permute.xlu0 %v4921_v2  ;;  %909 = vperm.xlu1 %4472, %v867_v12   ;;  %v891_v28 = vsel %vm885_vm2, %v878_v19, %v879_v26  ;;  %v864_v30 = vsel %vm860_vm1, %v855_v23, %v856_v29  ;;  %v890_v32 = vsel %vm885_vm2, %v879_v26, %v880_v31  ;;  %v883_v34 = vrot.slane %v5280_v27, 1  ;;  %v1272_v23 = vld [vmem:[#allocation6 + $0xa0] sm:$0xff] }
  0xe8   : > { %904 = vperm.xlu0 %4477, %v869_v14   ;;  %v884_v35 = vrot.slane %v5242_v7, 1  ;;  %v857_v39 = vrot.slane %v5273_v24, 7  ;;  %v881_v42 = vrot.slane %v789_v22, 1  ;;  %v858_v44 = vrot.slane %v5280_v27, 7  ;;  %1405 = vmatpush1.msra.mxu0 %v1263_v54 }
  0xe9   : > { %v882_v46 = vrot.slane %v5273_v24, 1  ;;  %1406 = vmatprep.subr.mxu0 %v4922_v4  ;;  %v5356_v8 = vsub.s32 0, %v5226_v3  ;;  %v5362_v13 = vsub.s32 1, %v5226_v3 }
  0xea   : > { %v5300_v36 = vsel %vm885_vm2, %v883_v34, %v884_v35  ;;  %v893_v38 = vsel %vm885_vm2, %v884_v35, %v877_v18  ;;  %v863_v41 = vsel %vm860_vm1, %v856_v29, %v857_v39  ;;  %v889_v43 = vsel %vm885_vm2, %v880_v31, %v881_v42  ;;  %1407 = vmatpush1.msra.mxu0 %v1262_v55  ;;  %v1270_v31 = vld [vmem:[#allocation6 + $0x90] sm:$0xff] }
  0xeb   : > { %4474 = vset.pattern.permute.xlu1 %v4920_v1  ;;  %v5310_v40 = vmul.f32 %v5303_v37, %v893_v38  ;;  %v862_v45 = vsel %vm860_vm1, %v857_v39, %v858_v44  ;;  %v888_v47 = vsel %vm885_vm2, %v881_v42, %v882_v46  ;;  %v861_v50 = vsel %vm860_vm1, %v858_v44, %v859_v11  ;;  %v1252_v11 = vld [vmem:[#allocation6] sm:$0xff] }
  0xec   : > { %4478 = vset.pattern.permute.xlu0 %v4920_v1  ;;  %973 = vperm.xlu1 %4474, %v867_v12   ;;  %v887_v53 = vsel %vm885_vm2, %v882_v46, %v883_v34  ;;  %v1269_v34 = vld [vmem:[#allocation6 + $0x88] sm:$0xff]  ;;  %v1226_v42 = vsub.s32 5, %v5226_v3 }
  0xed   : > { %969 = vperm.xlu0 %4478, %v869_v14   ;;  %1408 = vmatprep.subr.mxu0 %v4922_v4  ;;  %v1275_v14 = vld [vmem:[#allocation6 + $0xb8] sm:$0xff] }
  0xee   : > { %1409 = vmatpush1.msra.mxu0 %v1261_v56 }
  0xef   : > { %1410 = vmatprep.subr.mxu0 %v4922_v4 }
  0xf0   : > { %4475 = vset.pattern.permute.xlu1 %v4921_v2  ;;  %1411 = vmatpush1.msra.mxu0 %v1260_v57 }
  0xf1   : > { %1085 = vperm.xlu0 %4478, %v786_v6   ;;  %914 = vperm.xlu1 %4475, %v866_v17  }
  0xf2   : > { %1412 = vmatprep.subr.mxu0 %v4922_v4 }
  0xf3   : > { %1413 = vmatpush1.msra.mxu0 %v1259_v58 }
  0xf4   : > { %1414 = vmatprep.subr.mxu0 %v4922_v4 }
  0xf5   : > { %1089 = vperm.xlu0 %4478, %v787_v15   ;;  %1134 = vperm.xlu1 %4475, %v892_v20  }
  0xf6   : > { %1415 = vmatpush1.msra.mxu0 %v1258_v59 }
  0xf7   : > { %1416 = vmatprep.subr.mxu0 %v4922_v4 }
  0xf8   : > { %1417 = vmatpush1.msra.mxu0 %v1257_v60 }
  0xf9   : > { %1093 = vperm.xlu0 %4478, %v788_v21   ;;  %4476 = vset.pattern.permute.xlu1 %v4920_v1 }
  0xfa   : > { %977 = vperm.xlu1 %4476, %v866_v17   ;;  %1418 = vmatprep.subr.mxu0 %v4922_v4 }
  0xfb   : > { %1419 = vmatpush1.msra.mxu0 %v1256_v61 }
  0xfc   : > { %1420 = vmatprep.subr.mxu0 %v4922_v4 }
  0xfd   : > { %1097 = vperm.xlu0 %4478, %v789_v22   ;;  %1421 = vmatpush1.msra.mxu0 %v1255_v62 }
  0xfe   : > { %1193 = vperm.xlu1 %4476, %v892_v20   ;;  %1422 = vmatprep.subr.mxu0 %v4922_v4 }
  0xff   : > { %1423 = vmatpush1.msra.mxu0 %v1254_v5 }
 0x100   : > { %1424 = vmatprep.subr.mxu0 %v4922_v4 }
 0x101   : > { %1101 = vperm.xlu0 %4478, %v5273_v24  }
 0x102   : > { %4479 = vset.pattern.permute.xlu1 %v4921_v2 }
 0x103   : > { %919 = vperm.xlu1 %4479, %v865_v25  }
 0x105   : > { %1105 = vperm.xlu0 %4478, %v5280_v27  }
 0x107   : > { %1139 = vperm.xlu1 %4479, %v891_v28  }
 0x109   : > { %4489 = vset.pattern.permute.xlu0 %v4921_v2 }
 0x10a   : > { %1027 = vperm.xlu0 %4489, %v786_v6   ;;  %v1253_v6 = vld [vmem:[#allocation6 + $0x8] sm:$0xff] }
 0x10b   : > { %4480 = vset.pattern.permute.xlu1 %v4920_v1  ;;  %1425 = vmatpush1.msra.mxu0 %v1253_v6 }
 0x10c   : > { %981 = vperm.xlu1 %4480, %v865_v25   ;;  %1426 = vmatprep.subr.mxu0 %v4922_v4  ;;  %v1114_v25 = vsub.s32 3, %v5226_v3 }
 0x10d   : > { %1427 = vmatpush1.msra.mxu0 %v1252_v11 }
 0x10e   : > { %1032 = vperm.xlu0 %4489, %v787_v15   ;;  %1444 = vmatprep.subr.mxu0 %v4922_v4  ;;  %v850_v15 = vld [vmem:[#allocation2] sm:$0x3f] }
 0x10f   : > { %1445 = vmatpush2.msra.mxu0 %v1275_v14  ;;  %v5372_v19 = vrot.slane %v850_v15, %v5362_v13  ;;  %v5393_v35 = vrot.slane %v850_v15, %v1114_v25  ;;  %v5406_v49 = vrot.slane %v850_v15, %v1226_v42 }
 0x110   : > { %1197 = vperm.xlu1 %4480, %v891_v28   ;;  %1446 = vmatprep.subr.mxu0 %v4922_v4 }
 0x111   : > { %1447 = vmatpush2.msra.mxu0 %v1274_v16 }
 0x112   : > { %1037 = vperm.xlu0 %4489, %v788_v21   ;;  %1448 = vmatprep.subr.mxu0 %v4922_v4  ;;  %v1273_v21 = vld [vmem:[#allocation6 + $0xa8] sm:$0xff] }
 0x113   : > { %1449 = vmatpush2.msra.mxu0 %v1273_v21 }
 0x114   : > { %4481 = vset.pattern.permute.xlu1 %v4921_v2  ;;  %1450 = vmatprep.subr.mxu0 %v4922_v4 }
 0x115   : > { %924 = vperm.xlu1 %4481, %v864_v30   ;;  %1451 = vmatpush2.msra.mxu0 %v1272_v23 }
 0x116   : > { %1042 = vperm.xlu0 %4489, %v789_v22   ;;  %v1062_v22 = vsub.s32 2, %v5226_v3  ;;  %1452 = vmatprep.subr.mxu0 %v4922_v4  ;;  %v3652_v3 = vld [vmem:[%s6359_s17 + $0x78] sm:$0xff] }
 0x119   : > { %1144 = vperm.xlu1 %4481, %v890_v32  }
 0x11a   : > { %1047 = vperm.xlu0 %4489, %v5273_v24   ;;  %v5378_v24 = vld [vmem:[#allocation4] ss:$0 sm:$0xff] }
 0x11d   : > { %4482 = vset.pattern.permute.xlu1 %v4920_v1 }
 0x11e   : > { %985 = vperm.xlu1 %4482, %v864_v30   ;;  %1052 = vperm.xlu0 %4489, %v5280_v27   ;;  %v1271_v30 = vld [vmem:[#allocation6 + $0x98] sm:$0xff] }
 0x11f   : > { %1453 = vmatpush2.msra.mxu0 %v1271_v30 }
 0x120   : > { %1454 = vmatprep.subr.mxu0 %v4922_v4 }
 0x121   : > { %1455 = vmatpush2.msra.mxu0 %v1270_v31 }
 0x122   : > { %1201 = vperm.xlu1 %4482, %v890_v32   ;;  %1164 = vperm.xlu0 %4489, %v5300_v36   ;;  %v5386_v32 = vrot.slane %v850_v15, %v1062_v22 }
 0x123   : > { %1456 = vmatprep.subr.mxu0 %v4922_v4 }
 0x124   : > { %1457 = vmatpush2.msra.mxu0 %v1269_v34 }
 0x125   : > { %1458 = vmatprep.subr.mxu0 %v4922_v4 }
 0x126   : > { %4483 = vset.pattern.permute.xlu1 %v4921_v2  ;;  %1169 = vperm.xlu0 %4489, %v5310_v40  }
 0x127   : > { %929 = vperm.xlu1 %4483, %v863_v41  }
 0x12b   : > { %1149 = vperm.xlu1 %4483, %v889_v43  }
 0x12f   : > { %4484 = vset.pattern.permute.xlu1 %v4920_v1 }
 0x130   : > { %989 = vperm.xlu1 %4484, %v863_v41   ;;  %v5397_v41 = vrot.slane %v850_v15, %v1174_v33 }
 0x134   : > { %1205 = vperm.xlu1 %4484, %v889_v43   ;;  %v1268_v43 = vld [vmem:[#allocation6 + $0x80] sm:$0xff] }
 0x135   : > { %1459 = vmatpush2.msra.mxu0 %v1268_v43 }
 0x138   : > { %4485 = vset.pattern.permute.xlu1 %v4921_v2 }
 0x139   : > { %934 = vperm.xlu1 %4485, %v862_v45  }
 0x13d   : > { %1154 = vperm.xlu1 %4485, %v888_v47  }
 0x141   : > { %4486 = vset.pattern.permute.xlu1 %v4920_v1 }
 0x142   : > { %993 = vperm.xlu1 %4486, %v862_v45  }
 0x146   : > { %1209 = vperm.xlu1 %4486, %v888_v47  }
 0x14a   : > { %4487 = vset.pattern.permute.xlu1 %v4921_v2 }
 0x14b   : > { %939 = vperm.xlu1 %4487, %v861_v50  }
 0x14f   : > { %1159 = vperm.xlu1 %4487, %v887_v53  }
 0x153   : > { %4488 = vset.pattern.permute.xlu1 %v4920_v1 }
 0x154   : > { %997 = vperm.xlu1 %4488, %v861_v50  }
 0x158   : > { %1213 = vperm.xlu1 %4488, %v887_v53  }
 0x15c   : > { %4490 = vset.pattern.permute.xlu1 %v4921_v2 }
 0x15d   : > { %1057 = vperm.xlu1 %4490, %v5242_v7  }
 0x15e   : > { %v1023_v63 = vpop.permute.xlu1 %1022  ;;  %v5349_v0 = vpop.permute.xlu0 %1081 }
 0x15f   : > { %v1116_v44 = vmul.f32 %v5393_v35, %v5349_v0 }
 0x161   : > { %4491 = vset.pattern.permute.xlu1 %v4920_v1 }
 0x162   : > { %1109 = vperm.xlu1 %4491, %v5242_v7   ;;  %v5358_v9 = vpop.permute.xlu1 %909  ;;  %v5366_v7 = vrot.slane %v850_v15, %v5356_v8 }
 0x163   : > { %v905_v12 = vpop.permute.xlu0 %904 }
 0x164   : > { %v946_v18 = vmul.f32 %v5366_v7, %v905_v12  ;;  %v947_v59 = vmul.f32 %v5366_v7, %v5358_v9 }
 0x166   : > { %1217 = vperm.xlu1 %4491, %v5300_v36   ;;  %v960_v26 = vadd.f32 %v5378_v24, %v946_v18 }
 0x167   : > { %v974_v17 = vpop.permute.xlu1 %973 }
 0x168   : > { %v970_v20 = vpop.permute.xlu0 %969  ;;  %v1005_v61 = vmul.f32 %v5372_v19, %v974_v17 }
 0x169   : > { %v1004_v27 = vmul.f32 %v5372_v19, %v970_v20 }
 0x16a   : > { %1221 = vperm.xlu1 %4491, %v5310_v40   ;;  %v1064_v40 = vmul.f32 %v5386_v32, %v1023_v63  ;;  %v961_v63 = vadd.f32 %v5378_v24, %v947_v59 }
 0x16b   : > { %v1012_v36 = vadd.f32 %v1004_v27, %v960_v26 }
 0x16c   : > { %v915_v28 = vpop.permute.xlu1 %914  ;;  %v1086_v29 = vpop.permute.xlu0 %1085  ;;  %v1013_v5 = vadd.f32 %v1005_v61, %v961_v63 }
 0x16d   : > { %v1072_v45 = vadd.f32 %v1064_v40, %v1012_v36  ;;  %v1117_v6 = vmul.f32 %v5393_v35, %v1086_v29  ;;  %v948_v17 = vmul.f32 %v5366_v7, %v915_v28 }
 0x16e   : > { %4493 = vset.pattern.permute.xlu1 %v4921_v2 }
 0x16f   : > { %v1124_v50 = vadd.f32 %v1116_v44, %v1072_v45  ;;  %v962_v36 = vadd.f32 %v5378_v24, %v948_v17 }
 0x170   : > { %v1135_v38 = vpop.permute.xlu1 %1134  ;;  %v1090_v39 = vpop.permute.xlu0 %1089 }
 0x171   : > { %v1176_v48 = vmul.f32 %v5397_v41, %v1135_v38  ;;  %v1118_v44 = vmul.f32 %v5393_v35, %v1090_v39 }
 0x173   : > { %v1184_v53 = vadd.f32 %v1176_v48, %v1124_v50 }
 0x174   : > { %v5403_v46 = vpop.permute.xlu0 %1093 }
 0x175   : > { %v978_v47 = vpop.permute.xlu1 %977 }
 0x176   : > { %v1006_v27 = vmul.f32 %v5372_v19, %v978_v47 }
 0x178   : > { %v5408_v51 = vpop.permute.xlu0 %1097  ;;  %v1014_v43 = vadd.f32 %v1006_v27, %v962_v36 }
 0x179   : > { %v1194_v52 = vpop.permute.xlu1 %1193 }
 0x17a   : > { %v1228_v54 = vmul.f32 %v5406_v49, %v1194_v52 }
 0x17c   : > { %v1236_v55 = vadd.f32 %v1228_v54, %v1184_v53  ;;  %v5411_v56 = vpop.permute.xlu0 %1101 }
 0x17e   : > { %v5413_v57 = vmax.f32 %v1236_v55, 0.0  ;;  %v920_v58 = vpop.permute.xlu1 %919 }
 0x17f   : > { %v949_v59 = vmul.f32 %v5366_v7, %v920_v58 }
 0x180   : > { %1333 = vrot.lane.b32.xlu0 %v5413_v57, %s4923_s22  ;;  %v5419_v60 = vpop.permute.xlu0 %1105  ;;  %v1277_v29 = vrot.slane %v5413_v57, 7  ;;  %v1301_v33 = vrot.slane %v5413_v57, 1  ;;  %v1540_v57 = vld [vmem:[#allocation9 + $0xf8] sm:$0xff] }
 0x181   : > { %v963_v39 = vadd.f32 %v5378_v24, %v949_v59  ;;  %1665 = vmatprep.subr.mxu1 %v1540_v57  ;;  %v1550_v57 = vld [vmem:[#allocation9 + $0x148] sm:$0xff] }
 0x182   : > { %v1140_v62 = vpop.permute.xlu1 %1139 }
 0x183   : > { %v1177_v9 = vmul.f32 %v5397_v41, %v1140_v62 }
 0x185   : > { %v1028_v0 = vpop.permute.xlu0 %1027 }
 0x186   : > { %v1065_v11 = vmul.f32 %v5386_v32, %v1028_v0 }
 0x187   : > { %v982_v12 = vpop.permute.xlu1 %981 }
 0x188   : > { %v1073_v14 = vadd.f32 %v1065_v11, %v1013_v5  ;;  %v1007_v0 = vmul.f32 %v5372_v19, %v982_v12  ;;  %v1119_v12 = vmul.f32 %v5393_v35, %v5403_v46 }
 0x189   : > { %v1033_v30 = vpop.permute.xlu0 %1032 }
 0x18a   : > { %v1125_v15 = vadd.f32 %v1117_v6, %v1073_v14  ;;  %v1066_v38 = vmul.f32 %v5386_v32, %v1033_v30 }
 0x18b   : > { %v1198_v16 = vpop.permute.xlu1 %1197 }
 0x18c   : > { %v1185_v18 = vadd.f32 %v1177_v9, %v1125_v15  ;;  %v1229_v20 = vmul.f32 %v5406_v49, %v1198_v16  ;;  %v1074_v45 = vadd.f32 %v1066_v38, %v1014_v43  ;;  %v1015_v15 = vadd.f32 %v1007_v0, %v963_v39 }
 0x18d   : > { %v1038_v63 = vpop.permute.xlu0 %1037 }
 0x18e   : > { %v1237_v21 = vadd.f32 %v1229_v20, %v1185_v18  ;;  %v1126_v50 = vadd.f32 %v1118_v44, %v1074_v45  ;;  %v1067_v11 = vmul.f32 %v5386_v32, %v1038_v63 }
 0x190   : > { %v1245_v23 = vmax.f32 %v1237_v21, 0.0  ;;  %v925_v26 = vpop.permute.xlu1 %924  ;;  %v1075_v16 = vadd.f32 %v1067_v11, %v1015_v15 }
 0x191   : > { %v950_v30 = vmul.f32 %v5366_v7, %v925_v26 }
 0x192   : > { %v1278_v31 = vrot.slane %v1245_v23, 7  ;;  %1335 = vrot.lane.b32.xlu1 %v1245_v23, %s4923_s22  ;;  %v1302_v34 = vrot.slane %v1245_v23, 1  ;;  %v1127_v21 = vadd.f32 %v1119_v12, %v1075_v16 }
 0x194   : > { %v1145_v40 = vpop.permute.xlu1 %1144  ;;  %v1315_v28 = vsel %vm885_vm2, %v1301_v33, %v1302_v34  ;;  %v5442_v42 = vsel %vm860_vm1, %v1277_v29, %v1278_v31 }
 0x195   : > { %3964 = vmatprep.mubr.msk.f32.mxu0 %vm1357_vm4, %v1315_v28  ;;  %v1178_v48 = vmul.f32 %v5397_v41, %v1145_v40  ;;  %v1043_v40 = vpop.permute.xlu0 %1042  ;;  %v964_v28 = vadd.f32 %v5378_v24, %v950_v30 }
 0x196   : > { %v1068_v45 = vmul.f32 %v5386_v32, %v1043_v40 }
 0x197   : > { %v1186_v53 = vadd.f32 %v1178_v48, %v1126_v50 }
 0x199   : > { %v986_v47 = vpop.permute.xlu1 %985 }
 0x19a   : > { %v1008_v36 = vmul.f32 %v5372_v19, %v986_v47  ;;  %v1120_v47 = vmul.f32 %v5393_v35, %v5408_v51 }
 0x19c   : > { %v1016_v44 = vadd.f32 %v1008_v36, %v964_v28 }
 0x19d   : > { %v1202_v52 = vpop.permute.xlu1 %1201 }
 0x19e   : > { %v1230_v54 = vmul.f32 %v5406_v49, %v1202_v52  ;;  %v1076_v52 = vadd.f32 %v1068_v45, %v1016_v44 }
 0x1a0   : > { %v1238_v55 = vadd.f32 %v1230_v54, %v1186_v53 }
 0x1a2   : > { %v1246_v61 = vmax.f32 %v1238_v55, 0.0  ;;  %v930_v62 = vpop.permute.xlu1 %929  ;;  %v1128_v55 = vadd.f32 %v1120_v47, %v1076_v52 }
 0x1a3   : > { %v951_v0 = vmul.f32 %v5366_v7, %v930_v62 }
 0x1a4   : > { %v1279_v5 = vrot.slane %v1246_v61, 7  ;;  %v1303_v6 = vrot.slane %v1246_v61, 1  ;;  %1337 = vrot.lane.b32.xlu0 %v1246_v61, %s4923_s22 }
 0x1a5   : > { %v965_v15 = vadd.f32 %v5378_v24, %v951_v0 }
 0x1a6   : > { %v1150_v14 = vpop.permute.xlu1 %1149  ;;  %v5455_v9 = vsel %vm885_vm2, %v1302_v34, %v1303_v6  ;;  %v5459_v58 = vsel %vm860_vm1, %v1278_v31, %v1279_v5 }
 0x1a7   : > { %v1179_v20 = vmul.f32 %v5397_v41, %v1150_v14  ;;  %v1048_v14 = vpop.permute.xlu0 %1047 }
 0x1a9   : > { %v1187_v23 = vadd.f32 %v1179_v20, %v1127_v21  ;;  %v1069_v20 = vmul.f32 %v5386_v32, %v1048_v14 }
 0x1ab   : > { %v990_v18 = vpop.permute.xlu1 %989  ;;  %v1053_v40 = vpop.permute.xlu0 %1052 }
 0x1ac   : > { %v1009_v39 = vmul.f32 %v5372_v19, %v990_v18 }
 0x1ae   : > { %v1017_v16 = vadd.f32 %v1009_v39, %v965_v15 }
 0x1af   : > { %v1206_v17 = vpop.permute.xlu1 %1205 }
 0x1b0   : > { %v1231_v27 = vmul.f32 %v5406_v49, %v1206_v17  ;;  %v1077_v18 = vadd.f32 %v1069_v20, %v1017_v16  ;;  %v1604_v16 = vld [vmem:[#allocation9 + $0x2f8] sm:$0xff] }
 0x1b1   : > { %1778 = vmatprep.subr.mxu0 %v1604_v16  ;;  %v1587_v16 = vld [vmem:[#allocation9 + $0x270] sm:$0xff] }
 0x1b2   : > { %v1239_v34 = vadd.f32 %v1231_v27, %v1187_v23  ;;  %v1121_v27 = vmul.f32 %v5393_v35, %v5411_v56 }
 0x1b4   : > { %v1247_v31 = vmax.f32 %v1239_v34, 0.0  ;;  %v935_v38 = vpop.permute.xlu1 %934 }
 0x1b5   : > { %v952_v30 = vmul.f32 %v5366_v7, %v935_v38 }
 0x1b6   : > { %v1280_v46 = vrot.slane %v1247_v31, 7  ;;  %v1304_v43 = vrot.slane %v1247_v31, 1  ;;  %1339 = vrot.lane.b32.xlu1 %v1247_v31, %s4923_s22  ;;  %v1129_v31 = vadd.f32 %v1121_v27, %v1077_v18 }
 0x1b8   : > { %v1155_v48 = vpop.permute.xlu1 %1154  ;;  %v5472_v50 = vsel %vm885_vm2, %v1303_v6, %v1304_v43  ;;  %v5476_v26 = vsel %vm860_vm1, %v1279_v5, %v1280_v46 }
 0x1b9   : > { %v1180_v54 = vmul.f32 %v5397_v41, %v1155_v48  ;;  %v1070_v48 = vmul.f32 %v5386_v32, %v1053_v40 }
 0x1bb   : > { %v1188_v61 = vadd.f32 %v1180_v54, %v1128_v55 }
 0x1bd   : > { %v994_v53 = vpop.permute.xlu1 %993 }
 0x1be   : > { %v1010_v36 = vmul.f32 %v5372_v19, %v994_v53 }
 0x1c1   : > { %v1210_v59 = vpop.permute.xlu1 %1209 }
 0x1c2   : > { %v1232_v63 = vmul.f32 %v5406_v49, %v1210_v59 }
 0x1c4   : > { %v1240_v6 = vadd.f32 %v1232_v63, %v1188_v61  ;;  %v1122_v61 = vmul.f32 %v5393_v35, %v5419_v60  ;;  %v1165_v63 = vpop.permute.xlu0 %1164 }
 0x1c6   : > { %v1248_v11 = vmax.f32 %v1240_v6, 0.0  ;;  %v940_v5 = vpop.permute.xlu1 %939 }
 0x1c7   : > { %v953_v56 = vmul.f32 %v5366_v7, %v940_v5  ;;  %v1182_v5 = vmul.f32 %v5397_v41, %v1165_v63 }
 0x1c8   : > { %v1281_v51 = vrot.slane %v1248_v11, 7  ;;  %v1305_v12 = vrot.slane %v1248_v11, 1  ;;  %1341 = vrot.lane.b32.xlu0 %v1248_v11, %s4923_s22  ;;  %v1170_v20 = vpop.permute.xlu0 %1169 }
 0x1c9   : > { %v967_v0 = vadd.f32 %v5378_v24, %v953_v56  ;;  %v1183_v18 = vmul.f32 %v5397_v41, %v1170_v20  ;;  %v1603_v56 = vld [vmem:[#allocation9 + $0x2f0] sm:$0xff]  ;;  %v1586_v20 = vld [vmem:[#allocation9 + $0x268] sm:$0xff] }
 0x1ca   : > { %v1160_v21 = vpop.permute.xlu1 %1159  ;;  %v5489_v17 = vsel %vm885_vm2, %v1304_v43, %v1305_v12  ;;  %v5493_v62 = vsel %vm860_vm1, %v1280_v46, %v1281_v51  ;;  %v966_v43 = vadd.f32 %v5378_v24, %v952_v30 }
 0x1cb   : > { %v1181_v34 = vmul.f32 %v5397_v41, %v1160_v21 }
 0x1cc   : > { %v1018_v45 = vadd.f32 %v1010_v36, %v966_v43 }
 0x1cd   : > { %v1189_v44 = vadd.f32 %v1181_v34, %v1129_v31 }
 0x1ce   : > { %v1078_v54 = vadd.f32 %v1070_v48, %v1018_v45 }
 0x1cf   : > { %v998_v23 = vpop.permute.xlu1 %997 }
 0x1d0   : > { %v1011_v55 = vmul.f32 %v5372_v19, %v998_v23  ;;  %v1130_v11 = vadd.f32 %v1122_v61, %v1078_v54  ;;  %v1601_v54 = vld [vmem:[#allocation9 + $0x2e0] sm:$0xff] }
 0x1d2   : > { %v1019_v14 = vadd.f32 %v1011_v55, %v967_v0  ;;  %v1599_v55 = vld [vmem:[#allocation9 + $0x2d0] sm:$0xff] }
 0x1d3   : > { %v1214_v28 = vpop.permute.xlu1 %1213 }
 0x1d4   : > { %v1233_v46 = vmul.f32 %v5406_v49, %v1214_v28 }
 0x1d6   : > { %v1241_v47 = vadd.f32 %v1233_v46, %v1189_v44 }
 0x1d8   : > { %v1249_v52 = vmax.f32 %v1241_v47, 0.0  ;;  %v1058_v38 = vpop.permute.xlu1 %1057 }
 0x1d9   : > { %v1071_v6 = vmul.f32 %v5386_v32, %v1058_v38  ;;  %v1190_v32 = vadd.f32 %v1182_v5, %v1130_v11  ;;  %v1602_v38 = vld [vmem:[#allocation9 + $0x2e8] sm:$0xff]  ;;  %v1593_v11 = vld [vmem:[#allocation9 + $0x2a0] sm:$0xff]  ;;  %v1591_v5 = vld [vmem:[#allocation9 + $0x290] sm:$0xff] }
 0x1da   : > { %v1282_v53 = vrot.slane %v1249_v52, 7  ;;  %v1306_v59 = vrot.slane %v1249_v52, 1  ;;  %1343 = vrot.lane.b32.xlu1 %v1249_v52, %s4923_s22 }
 0x1db   : > { %v1079_v60 = vadd.f32 %v1071_v6, %v1019_v14  ;;  %v1597_v6 = vld [vmem:[#allocation9 + $0x2c0] sm:$0xff]  ;;  %v1590_v14 = vld [vmem:[#allocation9 + $0x288] sm:$0xff] }
 0x1dc   : > { %v1311_v7 = vsel %vm885_vm2, %v1305_v12, %v1306_v59  ;;  %v5514_v39 = vsel %vm860_vm1, %v1281_v51, %v1282_v53 }
 0x1dd   : > { %v1110_v19 = vpop.permute.xlu1 %1109 }
 0x1de   : > { %v1123_v15 = vmul.f32 %v5393_v35, %v1110_v19  ;;  %v1595_v19 = vld [vmem:[#allocation9 + $0x2b0] sm:$0xff] }
 0x1e0   : > { %v1131_v21 = vadd.f32 %v1123_v15, %v1079_v60  ;;  %v1588_v60 = vld [vmem:[#allocation9 + $0x278] sm:$0xff] }
 0x1e1   : > { %v1218_v24 = vpop.permute.xlu1 %1217 }
 0x1e2   : > { %v1234_v12 = vmul.f32 %v5406_v49, %v1218_v24  ;;  %v1191_v30 = vadd.f32 %v1183_v18, %v1131_v21  ;;  %v1585_v24 = vld [vmem:[#allocation9 + $0x260] sm:$0xff]  ;;  %v1583_v21 = vld [vmem:[#allocation9 + $0x250] sm:$0xff] }
 0x1e3   : > { %v1581_v18 = vld [vmem:[#allocation9 + $0x240] sm:$0xff] }
 0x1e4   : > { %v1242_v51 = vadd.f32 %v1234_v12, %v1190_v32  ;;  %v1584_v32 = vld [vmem:[#allocation9 + $0x258] sm:$0xff]  ;;  %v1582_v12 = vld [vmem:[#allocation9 + $0x248] sm:$0xff] }
 0x1e5   : > { %v1222_v23 = vpop.permute.xlu1 %1221 }
 0x1e6   : > { %v1250_v27 = vmax.f32 %v1242_v51, 0.0  ;;  %v1235_v34 = vmul.f32 %v5406_v49, %v1222_v23  ;;  %v1579_v51 = vld [vmem:[#allocation9 + $0x230] sm:$0xff]  ;;  %v1578_v23 = vld [vmem:[#allocation9 + $0x228] sm:$0xff] }
 0x1e8   : > { %v1283_v36 = vrot.slane %v1250_v27, 7  ;;  %v1307_v31 = vrot.slane %v1250_v27, 1  ;;  %v1243_v35 = vadd.f32 %v1235_v34, %v1191_v30  ;;  %1345 = vrot.lane.b32.xlu0 %v1250_v27, %s4923_s22  ;;  %v1577_v27 = vld [vmem:[#allocation9 + $0x220] sm:$0xff]  ;;  %v1576_v30 = vld [vmem:[#allocation9 + $0x218] sm:$0xff]  ;;  %v1575_v34 = vld [vmem:[#allocation9 + $0x210] sm:$0xff] }
 0x1ea   : > { %v5522_v40 = vmax.f32 %v1243_v35, 0.0  ;;  %v1310_v28 = vsel %vm885_vm2, %v1306_v59, %v1307_v31  ;;  %v5528_v43 = vsel %vm860_vm1, %v1282_v53, %v1283_v36 }
 0x1ec   : > { %v1284_v41 = vrot.slane %v5522_v40, 7  ;;  %v1308_v44 = vrot.slane %v5522_v40, 1  ;;  %1347 = vrot.lane.b32.xlu1 %v5522_v40, %s4923_s22  ;;  %v1539_v40 = vld [vmem:[#allocation9 + $0xf0] sm:$0xff] }
 0x1ed   : > { %1666 = vmatpush1.msra.mxu1 %v1539_v40  ;;  %v1549_v40 = vld [vmem:[#allocation9 + $0x140] sm:$0xff] }
 0x1ee   : > { %v1292_v49 = vsel %vm860_vm1, %v1284_v41, %v1277_v29  ;;  %v5542_v46 = vsel %vm885_vm2, %v1307_v31, %v1308_v44  ;;  %v5546_v45 = vsel %vm860_vm1, %v1283_v36, %v1284_v41  ;;  %v1600_v29 = vld [vmem:[#allocation9 + $0x2d8] sm:$0xff]  ;;  %v1574_v36 = vld [vmem:[#allocation9 + $0x208] sm:$0xff]  ;;  %v1573_v31 = vld [vmem:[#allocation9 + $0x200] sm:$0xff]  ;;  %v1316_v41 = vsel %vm885_vm2, %v1308_v44, %v1301_v33 }
 0x1ef   : > { %v1293_v48 = vmul.f32 %v5248_v10, %v1292_v49  ;;  %v1538_v33 = vld [vmem:[#allocation9 + $0xe8] sm:$0xff]  ;;  %v1537_v44 = vld [vmem:[#allocation9 + $0xe0] sm:$0xff] }
 0x1f0   : > { %1667 = vmatprep.subr.mxu1 %v1538_v33  ;;  %v1548_v33 = vld [vmem:[#allocation9 + $0x138] sm:$0xff] }
 0x1f1   : > { %1668 = vmatpush1.msra.mxu1 %v1537_v44  ;;  %v1547_v44 = vld [vmem:[#allocation9 + $0x130] sm:$0xff] }
 0x1f2   : > { %v1334_v47 = vpop.permute.xlu0 %1333 }
 0x1f3   : > { %v1358_v52 = vsel %vm1357_vm4, %v1293_v48, %v1334_v47  ;;  %v1324_v47 = vmul.f32 %v5303_v37, %v1316_v41  ;;  %v1556_v41 = vld [vmem:[#allocation9 + $0x178] sm:$0xff] }
 0x1f4   : > { %1461 = vmatmul.mubr.f32.vlgmr.msra.gmra.mxu0 %v1358_v52  ;;  %v1534_v52 = vld [vmem:[#allocation9 + $0xc8] sm:$0xff] }
 0x1f5   : > { %3965 = vmatprep.mubr.msk.f32.mxu0 %vm1357_vm4, %v5455_v9  ;;  %1779 = vmatpush1.msra.mxu0 %v1603_v56  ;;  %v1535_v56 = vld [vmem:[#allocation9 + $0xd0] sm:$0xff] }
 0x1f6   : > { %1780 = vmatprep.subr.mxu0 %v1602_v38  ;;  %v1533_v38 = vld [vmem:[#allocation9 + $0xc0] sm:$0xff] }
 0x1f7   : > { %1781 = vmatpush1.msra.mxu0 %v1601_v54  ;;  %v1532_v54 = vld [vmem:[#allocation9 + $0xb8] sm:$0xff] }
 0x1f8   : > { %1782 = vmatprep.subr.mxu0 %v1600_v29  ;;  %v1530_v29 = vld [vmem:[#allocation9 + $0xa8] sm:$0xff] }
 0x1f9   : > { %1783 = vmatpush1.msra.mxu0 %v1599_v55  ;;  %v1529_v55 = vld [vmem:[#allocation9 + $0xa0] sm:$0xff] }
 0x204   : > { %v1336_v53 = vpop.permute.xlu1 %1335 }
 0x205   : > { %v1359_v59 = vsel %vm1357_vm4, %v5442_v42, %v1336_v53  ;;  %v1598_v42 = vld [vmem:[#allocation9 + $0x2c8] sm:$0xff]  ;;  %v1528_v53 = vld [vmem:[#allocation9 + $0x98] sm:$0xff] }
 0x206   : > { %1466 = vmatmul.mubr.f32.gmra.mxu0 %v1359_v59  ;;  %1784 = vmatprep.subr.mxu0 %v1598_v42  ;;  %v1527_v59 = vld [vmem:[#allocation9 + $0x90] sm:$0xff]  ;;  %v1522_v42 = vld [vmem:[#allocation9 + $0x68] sm:$0xff] }
 0x207   : > { %3966 = vmatprep.mubr.msk.f32.mxu0 %vm1357_vm4, %v5472_v50  ;;  %1785 = vmatpush1.msra.mxu0 %v1597_v6  ;;  %v1596_v50 = vld [vmem:[#allocation9 + $0x2b8] sm:$0xff]  ;;  %v1521_v6 = vld [vmem:[#allocation9 + $0x60] sm:$0xff] }
 0x208   : > { %1786 = vmatprep.subr.mxu0 %v1596_v50  ;;  %v1520_v50 = vld [vmem:[#allocation9 + $0x58] sm:$0xff] }
 0x209   : > { %1787 = vmatpush1.msra.mxu0 %v1595_v19  ;;  %v1519_v19 = vld [vmem:[#allocation9 + $0x50] sm:$0xff] }
 0x216   : > { %v1338_v61 = vpop.permute.xlu0 %1337 }
 0x217   : > { %v1360_v63 = vsel %vm1357_vm4, %v5459_v58, %v1338_v61  ;;  %v1594_v58 = vld [vmem:[#allocation9 + $0x2a8] sm:$0xff] }
 0x218   : > { %1471 = vmatmul.mubr.f32.gmra.mxu0 %v1360_v63  ;;  %1788 = vmatprep.subr.mxu0 %v1594_v58  ;;  %v1526_v61 = vld [vmem:[#allocation9 + $0x88] sm:$0xff]  ;;  %v1525_v63 = vld [vmem:[#allocation9 + $0x80] sm:$0xff] }
 0x219   : > { %3967 = vmatprep.mubr.msk.f32.mxu0 %vm1357_vm4, %v5489_v17  ;;  %1789 = vmatpush1.msra.mxu0 %v1593_v11  ;;  %v1592_v17 = vld [vmem:[#allocation9 + $0x298] sm:$0xff]  ;;  %v1518_v58 = vld [vmem:[#allocation9 + $0x48] sm:$0xff]  ;;  %v1517_v11 = vld [vmem:[#allocation9 + $0x40] sm:$0xff] }
 0x21a   : > { %1790 = vmatprep.subr.mxu0 %v1592_v17  ;;  %v1516_v17 = vld [vmem:[#allocation9 + $0x38] sm:$0xff] }
 0x21b   : > { %1791 = vmatpush1.msra.mxu0 %v1591_v5  ;;  %v1515_v5 = vld [vmem:[#allocation9 + $0x30] sm:$0xff] }
 0x21c   : > { %1792 = vmatprep.subr.mxu0 %v1590_v14  ;;  %v1514_v14 = vld [vmem:[#allocation9 + $0x28] sm:$0xff] }
 0x228   : > { %v1340_v9 = vpop.permute.xlu1 %1339 }
 0x229   : > { %v1361_v0 = vsel %vm1357_vm4, %v5476_v26, %v1340_v9  ;;  %v1589_v26 = vld [vmem:[#allocation9 + $0x280] sm:$0xff]  ;;  %v1524_v9 = vld [vmem:[#allocation9 + $0x78] sm:$0xff] }
 0x22a   : > { %1476 = vmatmul.mubr.f32.gmra.mxu0 %v1361_v0  ;;  %v1523_v0 = vld [vmem:[#allocation9 + $0x70] sm:$0xff] }
 0x22b   : > { %3968 = vmatprep.mubr.msk.f32.mxu0 %vm1357_vm4, %v1311_v7  ;;  %1793 = vmatpush1.msra.mxu0 %v1589_v26  ;;  %v1512_v26 = vld [vmem:[#allocation9 + $0x18] sm:$0xff] }
 0x22c   : > { %1794 = vmatprep.subr.mxu0 %v1588_v60  ;;  %v1510_v60 = vld [vmem:[#allocation9 + $0x8] sm:$0xff] }
 0x22d   : > { %1795 = vmatpush1.msra.mxu0 %v1587_v16  ;;  %v1509_v16 = vld [vmem:[#allocation9] sm:$0xff] }
 0x22e   : > { %1796 = vmatprep.subr.mxu0 %v1586_v20  ;;  %v1572_v20 = vld [vmem:[#allocation9 + $0x1f8] sm:$0xff] }
 0x22f   : > { %1797 = vmatpush1.msra.mxu0 %v1585_v24  ;;  %v1571_v24 = vld [vmem:[#allocation9 + $0x1f0] sm:$0xff] }
 0x230   : > { %1798 = vmatprep.subr.mxu0 %v1584_v32  ;;  %v1570_v32 = vld [vmem:[#allocation9 + $0x1e8] sm:$0xff] }
 0x231   : > { %1799 = vmatpush1.msra.mxu0 %v1583_v21  ;;  %v1569_v21 = vld [vmem:[#allocation9 + $0x1e0] sm:$0xff] }
 0x232   : > { %1800 = vmatprep.subr.mxu0 %v1582_v12  ;;  %v1568_v12 = vld [vmem:[#allocation9 + $0x1d8] sm:$0xff] }
 0x233   : > { %1801 = vmatpush1.msra.mxu0 %v1581_v18  ;;  %v1567_v18 = vld [vmem:[#allocation9 + $0x1d0] sm:$0xff] }
 0x23a   : > { %v1342_v15 = vpop.permute.xlu0 %1341 }
 0x23b   : > { %v1362_v7 = vsel %vm1357_vm4, %v5493_v62, %v1342_v15  ;;  %v1580_v62 = vld [vmem:[#allocation9 + $0x238] sm:$0xff]  ;;  %v1513_v15 = vld [vmem:[#allocation9 + $0x20] sm:$0xff] }
 0x23c   : > { %1481 = vmatmul.mubr.f32.gmra.mxu0 %v1362_v7  ;;  %1802 = vmatprep.subr.mxu0 %v1580_v62  ;;  %v1511_v7 = vld [vmem:[#allocation9 + $0x10] sm:$0xff]  ;;  %v1566_v62 = vld [vmem:[#allocation9 + $0x1c8] sm:$0xff] }
 0x23d   : > { %3969 = vmatprep.mubr.msk.f32.mxu0 %vm1357_vm4, %v1310_v28  ;;  %1803 = vmatpush1.msra.mxu0 %v1579_v51  ;;  %v1565_v51 = vld [vmem:[#allocation9 + $0x1c0] sm:$0xff] }
 0x23e   : > { %1804 = vmatprep.subr.mxu0 %v1578_v23  ;;  %v1564_v23 = vld [vmem:[#allocation9 + $0x1b8] sm:$0xff] }
 0x23f   : > { %1805 = vmatpush1.msra.mxu0 %v1577_v27  ;;  %v1563_v27 = vld [vmem:[#allocation9 + $0x1b0] sm:$0xff] }
 0x240   : > { %1806 = vmatprep.subr.mxu0 %v1576_v30  ;;  %v1562_v30 = vld [vmem:[#allocation9 + $0x1a8] sm:$0xff] }
 0x241   : > { %1807 = vmatpush1.msra.mxu0 %v1575_v34  ;;  %v1561_v34 = vld [vmem:[#allocation9 + $0x1a0] sm:$0xff] }
 0x242   : > { %1808 = vmatprep.subr.mxu0 %v1574_v36  ;;  %v1560_v36 = vld [vmem:[#allocation9 + $0x198] sm:$0xff] }
 0x243   : > { %1809 = vmatpush1.msra.mxu0 %v1573_v31  ;;  %v1559_v31 = vld [vmem:[#allocation9 + $0x190] sm:$0xff] }
 0x24c   : > { %v1344_v35 = vpop.permute.xlu1 %1343 }
 0x24d   : > { %v1363_v28 = vsel %vm1357_vm4, %v5514_v39, %v1344_v35  ;;  %v1558_v35 = vld [vmem:[#allocation9 + $0x188] sm:$0xff] }
 0x24e   : > { %1486 = vmatmul.mubr.f32.gmra.mxu0 %v1363_v28  ;;  %v1557_v28 = vld [vmem:[#allocation9 + $0x180] sm:$0xff] }
 0x24f   : > { %3970 = vmatprep.mubr.msk.f32.mxu0 %vm1357_vm4, %v5542_v46 }
 0x25a   : > { %v1346_v49 = vpop.permute.xlu0 %1345 }
 0x25b   : > { %v1364_v48 = vsel %vm1357_vm4, %v5528_v43, %v1346_v49  ;;  %v1536_v43 = vld [vmem:[#allocation9 + $0xd8] sm:$0xff]  ;;  %v1555_v49 = vld [vmem:[#allocation9 + $0x170] sm:$0xff] }
 0x25c   : > { %1491 = vmatmul.mubr.f32.gmra.mxu0 %v1364_v48  ;;  %1669 = vmatprep.subr.mxu1 %v1536_v43  ;;  %v1554_v48 = vld [vmem:[#allocation9 + $0x168] sm:$0xff] }
 0x25d   : > { %3971 = vmatprep.mubr.msk.f32.mxu0 %vm1357_vm4, %v1324_v47  ;;  %1670 = vmatpush1.msra.mxu1 %v1535_v56  ;;  %v1553_v47 = vld [vmem:[#allocation9 + $0x160] sm:$0xff]  ;;  %v1546_v43 = vld [vmem:[#allocation9 + $0x128] sm:$0xff] }
 0x25e   : > { %v1348_v39 = vpop.permute.xlu1 %1347  ;;  %1671 = vmatprep.subr.mxu1 %v1534_v52  ;;  %v1545_v56 = vld [vmem:[#allocation9 + $0x120] sm:$0xff]  ;;  %v1544_v52 = vld [vmem:[#allocation9 + $0x118] sm:$0xff] }
 0x25f   : > { %v1365_v46 = vsel %vm1357_vm4, %v5546_v45, %v1348_v39  ;;  %1672 = vmatpush1.msra.mxu1 %v1533_v38  ;;  %v1531_v45 = vld [vmem:[#allocation9 + $0xb0] sm:$0xff]  ;;  %v1552_v39 = vld [vmem:[#allocation9 + $0x158] sm:$0xff] }
 0x260   : > { %1496 = vmatmul.mubr.f32.gmra.mxu0 %v1365_v46  ;;  %1673 = vmatprep.subr.mxu1 %v1532_v54  ;;  %v1551_v46 = vld [vmem:[#allocation9 + $0x150] sm:$0xff]  ;;  %v1542_v54 = vld [vmem:[#allocation9 + $0x108] sm:$0xff] }
 0x261   : > { %1842 = vmatprep.mubr.f32.mxu0 %v4922_v4  ;;  %1674 = vmatpush1.msra.mxu1 %v1531_v45  ;;  %v1543_v38 = vld [vmem:[#allocation9 + $0x110] sm:$0xff]  ;;  %v1541_v45 = vld [vmem:[#allocation9 + $0x100] sm:$0xff] }
 0x262   : > { %1675 = vmatprep.subr.mxu1 %v1530_v29  ;;  %v3963_v29 = vld [vmem:[#allocation7] ss:$0 sm:$0xff] }
 0x263   : > { %1676 = vmatpush1.msra.mxu1 %v1529_v55 }
 0x264   : > { %1677 = vmatprep.subr.mxu1 %v1528_v53 }
 0x265   : > { %1678 = vmatpush1.msra.mxu1 %v1527_v59 }
 0x266   : > { %1679 = vmatprep.subr.mxu1 %v1526_v61 }
 0x267   : > { %1680 = vmatpush1.msra.mxu1 %v1525_v63 }
 0x268   : > { %1681 = vmatprep.subr.mxu1 %v1524_v9 }
 0x269   : > { %1682 = vmatpush1.msra.mxu1 %v1523_v0 }
 0x26a   : > { %1683 = vmatprep.subr.mxu1 %v1522_v42 }
 0x26b   : > { %1684 = vmatpush1.msra.mxu1 %v1521_v6 }
 0x26c   : > { %1685 = vmatprep.subr.mxu1 %v1520_v50 }
 0x26d   : > { %1686 = vmatpush1.msra.mxu1 %v1519_v19 }
 0x26e   : > { %1687 = vmatprep.subr.mxu1 %v1518_v58 }
 0x26f   : > { %1688 = vmatpush1.msra.mxu1 %v1517_v11 }
 0x270   : > { %1689 = vmatprep.subr.mxu1 %v1516_v17 }
 0x271   : > { %1690 = vmatpush1.msra.mxu1 %v1515_v5 }
 0x272   : > { %1691 = vmatprep.subr.mxu1 %v1514_v14 }
 0x273   : > { %1692 = vmatpush1.msra.mxu1 %v1513_v15 }
 0x274   : > { %1693 = vmatprep.subr.mxu1 %v1512_v26 }
 0x275   : > { %1694 = vmatpush1.msra.mxu1 %v1511_v7 }
 0x276   : > { %1695 = vmatprep.subr.mxu1 %v1510_v60 }
 0x277   : > { %1696 = vmatpush1.msra.mxu1 %v1509_v16 }
 0x278   : > { %1697 = vmatprep.subr.mxu1 %v1572_v20 }
 0x279   : > { %1698 = vmatpush2.msra.mxu1 %v1571_v24 }
 0x27a   : > { %1699 = vmatprep.subr.mxu1 %v1570_v32 }
 0x27b   : > { %1700 = vmatpush2.msra.mxu1 %v1569_v21 }
 0x27c   : > { %1701 = vmatprep.subr.mxu1 %v1568_v12 }
 0x27d   : > { %1702 = vmatpush2.msra.mxu1 %v1567_v18 }
 0x27e   : > { %1703 = vmatprep.subr.mxu1 %v1566_v62 }
 0x27f   : > { %1704 = vmatpush2.msra.mxu1 %v1565_v51 }
 0x280   : > { %1705 = vmatprep.subr.mxu1 %v1564_v23 }
 0x281   : > { %1706 = vmatpush2.msra.mxu1 %v1563_v27 }
 0x282   : > { %1707 = vmatprep.subr.mxu1 %v1562_v30 }
 0x283   : > { %1708 = vmatpush2.msra.mxu1 %v1561_v34 }
 0x284   : > { %1709 = vmatprep.subr.mxu1 %v1560_v36 }
 0x285   : > { %1710 = vmatpush2.msra.mxu1 %v1559_v31 }
 0x286   : > { %1711 = vmatprep.subr.mxu1 %v1558_v35 }
 0x287   : > { %1712 = vmatpush2.msra.mxu1 %v1557_v28 }
 0x288   : > { %1713 = vmatprep.subr.mxu1 %v1556_v41 }
 0x289   : > { %1714 = vmatpush2.msra.mxu1 %v1555_v49 }
 0x28a   : > { %1715 = vmatprep.subr.mxu1 %v1554_v48 }
 0x28b   : > { %1716 = vmatpush2.msra.mxu1 %v1553_v47 }
 0x28c   : > { %1717 = vmatprep.subr.mxu1 %v1552_v39 }
 0x28d   : > { %1718 = vmatpush2.msra.mxu1 %v1551_v46 }
 0x28e   : > { %1719 = vmatprep.subr.mxu1 %v1550_v57 }
 0x28f   : > { %1720 = vmatpush2.msra.mxu1 %v1549_v40 }
 0x290   : > { %1721 = vmatprep.subr.mxu1 %v1548_v33 }
 0x291   : > { %1722 = vmatpush2.msra.mxu1 %v1547_v44 }
 0x292   : > { %1723 = vmatprep.subr.mxu1 %v1546_v43 }
 0x293   : > { %1724 = vmatpush2.msra.mxu1 %v1545_v56 }
 0x294   : > { %1725 = vmatprep.subr.mxu1 %v1544_v52 }
 0x295   : > { %1726 = vmatpush2.msra.mxu1 %v1543_v38 }
 0x296   : > { %1727 = vmatprep.subr.mxu1 %v1542_v54 }
 0x297   : > { %1728 = vmatpush2.msra.mxu1 %v1541_v45 }
 0x2b4   : > { %v1462_v55 = vpop.f32.mrf.mxu0 }
 0x2b5   : > { %v1463_v53 = vadd.f32 %v3963_v29, %v1462_v55 }
 0x2b6   : > { %v1464_v59 = vpop.f32.mrf.mxu0 }
 0x2b7   : > { %v5583_v61 = vmax.f32 %v1463_v53, 0.0 }
 0x2b9   : > { %1729 = vmatprep.mubr.f32.mxu1 %v5583_v61  ;;  %v1630_v6 = vrot.slane %v5583_v61, 1  ;;  %v1606_v33 = vrot.slane %v5583_v61, 7 }
 0x2c6   : > { %v1467_v63 = vpop.f32.mrf.mxu0 }
 0x2c7   : > { %v1468_v9 = vadd.f32 %v3963_v29, %v1467_v63 }
 0x2c8   : > { %v1469_v0 = vpop.f32.mrf.mxu0 }
 0x2c9   : > { %v5586_v42 = vmax.f32 %v1468_v9, 0.0 }
 0x2cb   : > { %v1631_v50 = vrot.slane %v5586_v42, 1  ;;  %v1607_v45 = vrot.slane %v5586_v42, 7 }
 0x2cd   : > { %v1644_v19 = vsel %vm885_vm2, %v1630_v6, %v1631_v50  ;;  %v1620_v53 = vsel %vm860_vm1, %v1606_v33, %v1607_v45 }
 0x2ce   : > { %1843 = vmatmul.mubr.f32.vlgmr.msra.gmra.mxu0 %v1644_v19 }
 0x2cf   : > { %1848 = vmatprep.mubr.f32.mxu0 %v4922_v4 }
 0x2d8   : > { %v1472_v58 = vpop.f32.mrf.mxu0 }
 0x2d9   : > { %v1473_v11 = vadd.f32 %v3963_v29, %v1472_v58 }
 0x2da   : > { %v1474_v17 = vpop.f32.mrf.mxu0 }
 0x2db   : > { %v5593_v5 = vmax.f32 %v1473_v11, 0.0  ;;  %v1970_v11 = vld [vmem:[#allocation12 + $0x1f8] sm:$0xff] }
 0x2dc   : > { %v1954_v17 = vld [vmem:[#allocation12 + $0x178] sm:$0xff]  ;;  %4042 = vmatprep.subr.mxu0 %v1970_v11  ;;  %v1927_v11 = vld [vmem:[#allocation12 + $0xa0] sm:$0xff] }
 0x2dd   : > { %v1632_v14 = vrot.slane %v5593_v5, 1  ;;  %v1608_v55 = vrot.slane %v5593_v5, 7  ;;  %4043 = vmatpush3.msra.mxu0 %v1954_v17  ;;  %v1911_v17 = vld [vmem:[#allocation12 + $0x20] sm:$0xff] }
 0x2df   : > { %v1643_v15 = vsel %vm885_vm2, %v1631_v50, %v1632_v14  ;;  %v1619_v61 = vsel %vm860_vm1, %v1607_v45, %v1608_v55  ;;  %v1934_v45 = vld [vmem:[#allocation12 + $0xd8] sm:$0xff] }
 0x2e0   : > { %1849 = vmatmul.mubr.f32.gmra.mxu0 %v1643_v15  ;;  %v1968_v15 = vld [vmem:[#allocation12 + $0x1e8] sm:$0xff] }
 0x2e1   : > { %1854 = vmatprep.mubr.f32.mxu0 %v4922_v4 }
 0x2ea   : > { %v1477_v26 = vpop.f32.mrf.mxu0 }
 0x2eb   : > { %v1478_v7 = vadd.f32 %v3963_v29, %v1477_v26  ;;  %v1952_v26 = vld [vmem:[#allocation12 + $0x168] sm:$0xff] }
 0x2ec   : > { %v1479_v60 = vpop.f32.mrf.mxu0 }
 0x2ed   : > { %v1504_v16 = vmax.f32 %v1478_v7, 0.0  ;;  %v1967_v7 = vld [vmem:[#allocation12 + $0x1e0] sm:$0xff] }
 0x2ee   : > { %v1951_v60 = vld [vmem:[#allocation12 + $0x160] sm:$0xff] }
 0x2ef   : > { %v1633_v20 = vrot.slane %v1504_v16, 1  ;;  %v1609_v59 = vrot.slane %v1504_v16, 7 }
 0x2f1   : > { %v1642_v24 = vsel %vm885_vm2, %v1632_v14, %v1633_v20  ;;  %v1618_v9 = vsel %vm860_vm1, %v1608_v55, %v1609_v59  ;;  %v1953_v14 = vld [vmem:[#allocation12 + $0x170] sm:$0xff] }
 0x2f2   : > { %1855 = vmatmul.mubr.f32.gmra.mxu0 %v1642_v24  ;;  %v1965_v24 = vld [vmem:[#allocation12 + $0x1d0] sm:$0xff] }
 0x2f3   : > { %1860 = vmatprep.mubr.f32.mxu0 %v4922_v4  ;;  %v1933_v55 = vld [vmem:[#allocation12 + $0xd0] sm:$0xff] }
 0x2fc   : > { %v1482_v32 = vpop.f32.mrf.mxu0 }
 0x2fd   : > { %v1483_v21 = vadd.f32 %v3963_v29, %v1482_v32  ;;  %v1949_v32 = vld [vmem:[#allocation12 + $0x150] sm:$0xff] }
 0x2fe   : > { %v1484_v12 = vpop.f32.mrf.mxu0 }
 0x2ff   : > { %v1505_v18 = vmax.f32 %v1483_v21, 0.0  ;;  %v1964_v21 = vld [vmem:[#allocation12 + $0x1c8] sm:$0xff] }
 0x300   : > { %v1948_v12 = vld [vmem:[#allocation12 + $0x148] sm:$0xff] }
 0x301   : > { %v1634_v62 = vrot.slane %v1505_v18, 1  ;;  %v1610_v63 = vrot.slane %v1505_v18, 7 }
 0x303   : > { %v1641_v51 = vsel %vm885_vm2, %v1633_v20, %v1634_v62  ;;  %v1950_v20 = vld [vmem:[#allocation12 + $0x158] sm:$0xff] }
 0x304   : > { %1861 = vmatmul.mubr.f32.gmra.mxu0 %v1641_v51  ;;  %v1962_v51 = vld [vmem:[#allocation12 + $0x1b8] sm:$0xff] }
 0x305   : > { %1866 = vmatprep.mubr.f32.mxu0 %v4922_v4 }
 0x30e   : > { %v1487_v23 = vpop.f32.mrf.mxu0 }
 0x30f   : > { %v1488_v27 = vadd.f32 %v3963_v29, %v1487_v23  ;;  %v1946_v23 = vld [vmem:[#allocation12 + $0x138] sm:$0xff] }
 0x310   : > { %v1489_v30 = vpop.f32.mrf.mxu0 }
 0x311   : > { %v1506_v34 = vmax.f32 %v1488_v27, 0.0  ;;  %v1961_v27 = vld [vmem:[#allocation12 + $0x1b0] sm:$0xff] }
 0x312   : > { %v1945_v30 = vld [vmem:[#allocation12 + $0x130] sm:$0xff] }
 0x313   : > { %v1635_v36 = vrot.slane %v1506_v34, 1  ;;  %v1611_v0 = vrot.slane %v1506_v34, 7 }
 0x315   : > { %v1640_v31 = vsel %vm885_vm2, %v1634_v62, %v1635_v36  ;;  %v1616_v50 = vsel %vm860_vm1, %v1610_v63, %v1611_v0  ;;  %v1947_v62 = vld [vmem:[#allocation12 + $0x140] sm:$0xff] }
 0x316   : > { %1867 = vmatmul.mubr.f32.gmra.mxu0 %v1640_v31  ;;  %v1959_v31 = vld [vmem:[#allocation12 + $0x1a0] sm:$0xff] }
 0x317   : > { %1872 = vmatprep.mubr.f32.mxu0 %v4922_v4 }
 0x31c   : > { %v1492_v35 = vpop.f32.mrf.mxu0 }
 0x31d   : > { %v1493_v28 = vadd.f32 %v3963_v29, %v1492_v35  ;;  %v1943_v35 = vld [vmem:[#allocation12 + $0x120] sm:$0xff] }
 0x31e   : > { %v1494_v41 = vpop.f32.mrf.mxu0 }
 0x31f   : > { %v1507_v49 = vmax.f32 %v1493_v28, 0.0  ;;  %v1958_v28 = vld [vmem:[#allocation12 + $0x198] sm:$0xff] }
 0x320   : > { %v1497_v48 = vpop.f32.mrf.mxu0  ;;  %v1942_v41 = vld [vmem:[#allocation12 + $0x118] sm:$0xff] }
 0x321   : > { %v1636_v47 = vrot.slane %v1507_v49, 1  ;;  %v1498_v39 = vadd.f32 %v3963_v29, %v1497_v48  ;;  %v1941_v48 = vld [vmem:[#allocation12 + $0x110] sm:$0xff] }
 0x322   : > { %v1499_v46 = vpop.f32.mrf.mxu0 }
 0x323   : > { %v1508_v57 = vmax.f32 %v1498_v39, 0.0  ;;  %v1639_v40 = vsel %vm885_vm2, %v1635_v36, %v1636_v47  ;;  %v1944_v36 = vld [vmem:[#allocation12 + $0x128] sm:$0xff]  ;;  %v1955_v46 = vld [vmem:[#allocation12 + $0x180] sm:$0xff] }
 0x324   : > { %1873 = vmatmul.mubr.f32.gmra.mxu0 %v1639_v40  ;;  %v1940_v39 = vld [vmem:[#allocation12 + $0x108] sm:$0xff]  ;;  %v1938_v40 = vld [vmem:[#allocation12 + $0xf8] sm:$0xff] }
 0x325   : > { %v1613_v44 = vrot.slane %v1508_v57, 7  ;;  %v1637_v43 = vrot.slane %v1508_v57, 1  ;;  %1878 = vmatprep.mubr.f32.mxu0 %v4922_v4  ;;  %3986 = vmatprep.subr.mxu1 %v1938_v40 }
 0x327   : > { %v1638_v56 = vsel %vm885_vm2, %v1636_v47, %v1637_v43  ;;  %v1621_v52 = vsel %vm860_vm1, %v1613_v44, %v1606_v33  ;;  %v1645_v38 = vsel %vm885_vm2, %v1637_v43, %v1630_v6  ;;  %v1612_v6 = vrot.slane %v1507_v49, 7  ;;  %v1956_v47 = vld [vmem:[#allocation12 + $0x188] sm:$0xff]  ;;  %v1922_v33 = vld [vmem:[#allocation12 + $0x78] sm:$0xff]  ;;  %v1921_v43 = vld [vmem:[#allocation12 + $0x70] sm:$0xff] }
 0x328   : > { %1879 = vmatmul.mubr.f32.gmra.mxu0 %v1638_v56  ;;  %v1622_v54 = vmul.f32 %v5248_v10, %v1621_v52  ;;  %v1653_v29 = vmul.f32 %v5303_v37, %v1645_v38  ;;  %v1936_v56 = vld [vmem:[#allocation12 + $0xe8] sm:$0xff]  ;;  %v1935_v38 = vld [vmem:[#allocation12 + $0xe0] sm:$0xff] }
 0x329   : > { %1884 = vmatprep.mubr.f32.mxu0 %v4922_v4  ;;  %v1615_v19 = vsel %vm860_vm1, %v1611_v0, %v1612_v6  ;;  %v1614_v58 = vsel %vm860_vm1, %v1612_v6, %v1613_v44  ;;  %v1937_v44 = vld [vmem:[#allocation12 + $0xf0] sm:$0xff]  ;;  %v1920_v52 = vld [vmem:[#allocation12 + $0x68] sm:$0xff]  ;;  %v1930_v0 = vld [vmem:[#allocation12 + $0xb8] sm:$0xff] }
 0x32a   : > { %1730 = vmatmul.mubr.f32.vlgmr.msra.gmra.mxu1 %v1622_v54  ;;  %v1919_v54 = vld [vmem:[#allocation12 + $0x60] sm:$0xff]  ;;  %v1929_v6 = vld [vmem:[#allocation12 + $0xb0] sm:$0xff] }
 0x32b   : > { %1735 = vmatprep.mubr.f32.mxu1 %v5586_v42  ;;  %v1617_v42 = vsel %vm860_vm1, %v1609_v59, %v1610_v63  ;;  %3987 = vmatpush3.msra.mxu1 %v1922_v33  ;;  %v1932_v59 = vld [vmem:[#allocation12 + $0xc8] sm:$0xff]  ;;  %v1931_v63 = vld [vmem:[#allocation12 + $0xc0] sm:$0xff] }
 0x32c   : > { %1885 = vmatmul.mubr.f32.gmra.mxu0 %v1653_v29  ;;  %3988 = vmatprep.subr.mxu1 %v1937_v44  ;;  %v1918_v29 = vld [vmem:[#allocation12 + $0x58] sm:$0xff] }
 0x32d   : > { %3989 = vmatpush3.msra.mxu1 %v1921_v43 }
 0x32e   : > { %1736 = vmatmul.mubr.f32.gmra.mxu1 %v1620_v53  ;;  %3990 = vmatprep.subr.mxu1 %v1936_v56  ;;  %v1917_v53 = vld [vmem:[#allocation12 + $0x50] sm:$0xff] }
 0x32f   : > { %1741 = vmatprep.mubr.f32.mxu1 %v5593_v5  ;;  %v1969_v5 = vld [vmem:[#allocation12 + $0x1f0] sm:$0xff]  ;;  %3991 = vmatpush3.msra.mxu1 %v1920_v52 }
 0x330   : > { %4044 = vmatprep.subr.mxu0 %v1969_v5  ;;  %3992 = vmatprep.subr.mxu1 %v1935_v38  ;;  %v1926_v5 = vld [vmem:[#allocation12 + $0x98] sm:$0xff] }
 0x331   : > { %4045 = vmatpush3.msra.mxu0 %v1953_v14  ;;  %3993 = vmatpush3.msra.mxu1 %v1919_v54  ;;  %v1910_v14 = vld [vmem:[#allocation12 + $0x18] sm:$0xff] }
 0x332   : > { %1742 = vmatmul.mubr.f32.gmra.mxu1 %v1619_v61  ;;  %4046 = vmatprep.subr.mxu0 %v1968_v15  ;;  %v1916_v61 = vld [vmem:[#allocation12 + $0x48] sm:$0xff]  ;;  %v1925_v15 = vld [vmem:[#allocation12 + $0x90] sm:$0xff] }
 0x333   : > { %1747 = vmatprep.mubr.f32.mxu1 %v1504_v16  ;;  %4047 = vmatpush3.msra.mxu0 %v1952_v26  ;;  %v1966_v16 = vld [vmem:[#allocation12 + $0x1d8] sm:$0xff]  ;;  %v1909_v26 = vld [vmem:[#allocation12 + $0x10] sm:$0xff] }
 0x334   : > { %4048 = vmatprep.subr.mxu0 %v1967_v7  ;;  %3994 = vmatprep.subr.mxu1 %v1934_v45  ;;  %v1924_v7 = vld [vmem:[#allocation12 + $0x88] sm:$0xff] }
 0x335   : > { %4049 = vmatpush3.msra.mxu0 %v1951_v60  ;;  %3995 = vmatpush3.msra.mxu1 %v1918_v29  ;;  %v1908_v60 = vld [vmem:[#allocation12 + $0x8] sm:$0xff] }
 0x336   : > { %1748 = vmatmul.mubr.f32.gmra.mxu1 %v1618_v9  ;;  %4050 = vmatprep.subr.mxu0 %v1966_v16  ;;  %v1915_v9 = vld [vmem:[#allocation12 + $0x40] sm:$0xff] }
 0x337   : > { %1753 = vmatprep.mubr.f32.mxu1 %v1505_v18  ;;  %4051 = vmatpush3.msra.mxu0 %v1950_v20  ;;  %v1963_v18 = vld [vmem:[#allocation12 + $0x1c0] sm:$0xff] }
 0x338   : > { %4052 = vmatprep.subr.mxu0 %v1965_v24  ;;  %3996 = vmatprep.subr.mxu1 %v1933_v55  ;;  %v1923_v16 = vld [vmem:[#allocation12 + $0x80] sm:$0xff]  ;;  %v2002_v24 = vld [vmem:[#allocation12 + $0x2f8] sm:$0xff] }
 0x339   : > { %4053 = vmatpush3.msra.mxu0 %v1949_v32  ;;  %3997 = vmatpush3.msra.mxu1 %v1917_v53  ;;  %v1907_v20 = vld [vmem:[#allocation12] sm:$0xff] }
 0x33a   : > { %1754 = vmatmul.mubr.f32.gmra.mxu1 %v1617_v42  ;;  %4054 = vmatprep.subr.mxu0 %v1964_v21  ;;  %v1914_v42 = vld [vmem:[#allocation12 + $0x38] sm:$0xff] }
 0x33b   : > { %1759 = vmatprep.mubr.f32.mxu1 %v1506_v34  ;;  %4055 = vmatpush3.msra.mxu0 %v1948_v12  ;;  %v1960_v34 = vld [vmem:[#allocation12 + $0x1a8] sm:$0xff] }
 0x33c   : > { %4056 = vmatprep.subr.mxu0 %v1963_v18  ;;  %3998 = vmatprep.subr.mxu1 %v1932_v59 }
 0x33d   : > { %4057 = vmatpush3.msra.mxu0 %v1947_v62  ;;  %3999 = vmatpush3.msra.mxu1 %v1916_v61 }
 0x33e   : > { %1760 = vmatmul.mubr.f32.gmra.mxu1 %v1616_v50  ;;  %4058 = vmatprep.subr.mxu0 %v1962_v51  ;;  %v1913_v50 = vld [vmem:[#allocation12 + $0x30] sm:$0xff]  ;;  %v1605_v51 = vld [vmem:[#allocation10] sm:$0x3] }
 0x33f   : > { %1765 = vmatprep.mubr.f32.mxu1 %v1507_v49  ;;  %4059 = vmatpush3.msra.mxu0 %v1946_v23  ;;  %v1957_v49 = vld [vmem:[#allocation12 + $0x190] sm:$0xff]  ;;  %v5640_v23 = vrot.slane %v1605_v51, %v5356_v8 }
 0x340   : > { %4060 = vmatprep.subr.mxu0 %v1961_v27  ;;  %4000 = vmatprep.subr.mxu1 %v1931_v63 }
 0x341   : > { %4061 = vmatpush3.msra.mxu0 %v1945_v30  ;;  %4001 = vmatpush3.msra.mxu1 %v1915_v9  ;;  %v5643_v30 = vrot.slane %v1605_v51, %v5362_v13 }
 0x342   : > { %1766 = vmatmul.mubr.f32.gmra.mxu1 %v1615_v19  ;;  %4062 = vmatprep.subr.mxu0 %v1960_v34  ;;  %v1928_v19 = vld [vmem:[#allocation12 + $0xa8] sm:$0xff] }
 0x343   : > { %1771 = vmatprep.mubr.f32.mxu1 %v1508_v57  ;;  %4063 = vmatpush3.msra.mxu0 %v1944_v36  ;;  %v1939_v57 = vld [vmem:[#allocation12 + $0x100] sm:$0xff] }
 0x344   : > { %4064 = vmatprep.subr.mxu0 %v1959_v31  ;;  %4002 = vmatprep.subr.mxu1 %v1930_v0 }
 0x345   : > { %4065 = vmatpush3.msra.mxu0 %v1943_v35  ;;  %4003 = vmatpush3.msra.mxu1 %v1914_v42 }
 0x346   : > { %1772 = vmatmul.mubr.f32.gmra.mxu1 %v1614_v58  ;;  %4066 = vmatprep.subr.mxu0 %v1958_v28  ;;  %v1912_v58 = vld [vmem:[#allocation12 + $0x28] sm:$0xff] }
 0x347   : > { %4067 = vmatpush3.msra.mxu0 %v1942_v41  ;;  %4004 = vmatprep.subr.mxu1 %v1929_v6 }
 0x348   : > { %4068 = vmatprep.subr.mxu0 %v1957_v49  ;;  %4005 = vmatpush3.msra.mxu1 %v1913_v50 }
 0x349   : > { %4069 = vmatpush3.msra.mxu0 %v1941_v48  ;;  %4006 = vmatprep.subr.mxu1 %v1928_v19 }
 0x34a   : > { %4070 = vmatprep.subr.mxu0 %v1956_v47  ;;  %4007 = vmatpush3.msra.mxu1 %v1912_v58 }
 0x34b   : > { %4071 = vmatpush3.msra.mxu0 %v1940_v39  ;;  %4008 = vmatprep.subr.mxu1 %v1927_v11 }
 0x34c   : > { %4072 = vmatprep.subr.mxu0 %v1955_v46  ;;  %4009 = vmatpush3.msra.mxu1 %v1911_v17 }
 0x34d   : > { %4073 = vmatpush3.msra.mxu0 %v1939_v57  ;;  %4010 = vmatprep.subr.mxu1 %v1926_v5 }
 0x34e   : > { %4011 = vmatpush3.msra.mxu1 %v1910_v14 }
 0x34f   : > { %4012 = vmatprep.subr.mxu1 %v1925_v15 }
 0x350   : > { %4013 = vmatpush3.msra.mxu1 %v1909_v26 }
 0x351   : > { %4014 = vmatprep.subr.mxu1 %v1924_v7 }
 0x352   : > { %4015 = vmatpush3.msra.mxu1 %v1908_v60 }
 0x353   : > { %4016 = vmatprep.subr.mxu1 %v1923_v16 }
 0x354   : > { %4017 = vmatpush3.msra.mxu1 %v1907_v20 }
 0x355   : > { %4098 = vmatprep.subr.mxu1 %v2002_v24 }
 0x38e   : > { %v1844_v32 = vpop.f32.mrf.mxu0 }
 0x390   : > { %v1846_v21 = vpop.f32.mrf.mxu0 }
 0x3a0   : > { %v1850_v12 = vpop.f32.mrf.mxu0 }
 0x3a2   : > { %v1852_v18 = vpop.f32.mrf.mxu0 }
 0x3b2   : > { %v1856_v62 = vpop.f32.mrf.mxu0 }
 0x3b4   : > { %v1858_v27 = vpop.f32.mrf.mxu0 }
 0x3c4   : > { %v1862_v34 = vpop.f32.mrf.mxu0 }
 0x3c6   : > { %v1864_v41 = vpop.f32.mrf.mxu0 }
 0x3d6   : > { %v1868_v46 = vpop.f32.mrf.mxu0 }
 0x3d8   : > { %v1870_v38 = vpop.f32.mrf.mxu0 }
 0x3e4   : > { %v1874_v55 = vpop.f32.mrf.mxu0 }
 0x3e6   : > { %v1876_v19 = vpop.f32.mrf.mxu0 }
 0x3e8   : > { %v1880_v60 = vpop.f32.mrf.mxu0 }
 0x3ea   : > { %v1731_v36 = vpop.f32.mrf.mxu1  ;;  %v1882_v51 = vpop.f32.mrf.mxu0 }
 0x3eb   : > { %v1732_v31 = vadd.f32 %v1731_v36, %v5640_v23 }
 0x3ec   : > { %v1733_v35 = vpop.f32.mrf.mxu1 }
 0x3ed   : > { %v1734_v28 = vadd.f32 %v1733_v35, %v5643_v30  ;;  %v1845_v49 = vadd.f32 %v1844_v32, %v1732_v31 }
 0x3ee   : > { %v1737_v48 = vpop.f32.mrf.mxu1 }
 0x3ef   : > { %v1847_v47 = vadd.f32 %v1846_v21, %v1734_v28  ;;  %v1738_v39 = vadd.f32 %v1737_v48, %v5640_v23  ;;  %v5650_v33 = vmax.f32 %v1845_v49, 0.0  ;;  %v1886_v48 = vpop.f32.mrf.mxu0 }
 0x3f0   : > { %v1739_v57 = vpop.f32.mrf.mxu1 }
 0x3f1   : > { %v5648_v40 = vmax.f32 %v1847_v47, 0.0  ;;  %v1740_v44 = vadd.f32 %v1739_v57, %v5643_v30  ;;  %v1851_v56 = vadd.f32 %v1850_v12, %v1738_v39 }
 0x3f2   : > { %v1743_v43 = vpop.f32.mrf.mxu1 }
 0x3f3   : > { %v1744_v52 = vadd.f32 %v1743_v43, %v5640_v23  ;;  %2275 = vmatprep.mubr.f32.mxu0 %v5648_v40  ;;  %v1853_v54 = vadd.f32 %v1852_v18, %v1740_v44  ;;  %v5659_v61 = vmax.f32 %v1851_v56, 0.0 }
 0x3f4   : > { %v1745_v45 = vpop.f32.mrf.mxu1  ;;  %2276 = vmatmul.mubr.f32.vlgmr.msra.gmra.mxu0 %v5650_v33 }
 0x3f5   : > { %v1746_v29 = vadd.f32 %v1745_v45, %v5643_v30  ;;  %v5657_v53 = vmax.f32 %v1853_v54, 0.0  ;;  %v1857_v63 = vadd.f32 %v1856_v62, %v1744_v52  ;;  %v1888_v54 = vpop.f32.mrf.mxu0 }
 0x3f6   : > { %v1749_v59 = vpop.f32.mrf.mxu1 }
 0x3f7   : > { %v1859_v9 = vadd.f32 %v1858_v27, %v1746_v29  ;;  %v1750_v0 = vadd.f32 %v1749_v59, %v5640_v23  ;;  %2280 = vmatprep.mubr.f32.mxu0 %v5657_v53  ;;  %v5667_v11 = vmax.f32 %v1857_v63, 0.0  ;;  %v2004_v63 = vrot.slane %v5650_v33, 7 }
 0x3f8   : > { %v1751_v42 = vpop.f32.mrf.mxu1  ;;  %2281 = vmatmul.mubr.f32.gmra.mxu0 %v5659_v61 }
 0x3f9   : > { %v5663_v6 = vmax.f32 %v1859_v9, 0.0  ;;  %v1752_v50 = vadd.f32 %v1751_v42, %v5643_v30  ;;  %v1863_v17 = vadd.f32 %v1862_v34, %v1750_v0 }
 0x3fa   : > { %v1755_v58 = vpop.f32.mrf.mxu1 }
 0x3fb   : > { %v1865_v5 = vadd.f32 %v1864_v41, %v1752_v50  ;;  %v1756_v14 = vadd.f32 %v1755_v58, %v5640_v23  ;;  %2285 = vmatprep.mubr.f32.mxu0 %v5663_v6  ;;  %v5675_v20 = vmax.f32 %v1863_v17, 0.0  ;;  %v2007_v50 = vrot.slane %v5657_v53, 7  ;;  %v1986_v17 = vld [vmem:[#allocation12 + $0x278] sm:$0xff] }
 0x3fc   : > { %v1757_v15 = vpop.f32.mrf.mxu1  ;;  %2286 = vmatmul.mubr.f32.gmra.mxu0 %v5667_v11 }
 0x3fd   : > { %v5671_v26 = vmax.f32 %v1865_v5, 0.0  ;;  %v1758_v7 = vadd.f32 %v1757_v15, %v5643_v30  ;;  %v1869_v24 = vadd.f32 %v1868_v46, %v1756_v14  ;;  %v2001_v5 = vld [vmem:[#allocation12 + $0x2f0] sm:$0xff]  ;;  %v2006_v14 = vrot.slane %v5659_v61, 7 }
 0x3fe   : > { %v1761_v16 = vpop.f32.mrf.mxu1 }
 0x3ff   : > { %v1871_v32 = vadd.f32 %v1870_v38, %v1758_v7  ;;  %v1762_v21 = vadd.f32 %v1761_v16, %v5640_v23  ;;  %2290 = vmatprep.mubr.f32.mxu0 %v5671_v26  ;;  %v5683_v34 = vmax.f32 %v1869_v24, 0.0  ;;  %v1985_v7 = vld [vmem:[#allocation12 + $0x270] sm:$0xff]  ;;  %v2000_v16 = vld [vmem:[#allocation12 + $0x2e8] sm:$0xff] }
 0x400   : > { %v1763_v12 = vpop.f32.mrf.mxu1  ;;  %2291 = vmatmul.mubr.f32.gmra.mxu0 %v5675_v20  ;;  %v1984_v24 = vld [vmem:[#allocation12 + $0x268] sm:$0xff] }
 0x401   : > { %v5679_v18 = vmax.f32 %v1871_v32, 0.0  ;;  %v1764_v62 = vadd.f32 %v1763_v12, %v5643_v30  ;;  %v1875_v36 = vadd.f32 %v1874_v55, %v1762_v21  ;;  %v2032_v32 = vsel %vm860_vm1, %v2004_v63, %v2006_v14  ;;  %v1999_v21 = vld [vmem:[#allocation12 + $0x2e0] sm:$0xff] }
 0x402   : > { %v1767_v27 = vpop.f32.mrf.mxu1  ;;  %v2008_v12 = vrot.slane %v5667_v11, 7 }
 0x403   : > { %v1877_v31 = vadd.f32 %v1876_v19, %v1764_v62  ;;  %v1768_v35 = vadd.f32 %v1767_v27, %v5640_v23  ;;  %2295 = vmatprep.mubr.f32.mxu0 %v5679_v18  ;;  %v5691_v39 = vmax.f32 %v1875_v36, 0.0  ;;  %v2011_v27 = vrot.slane %v5671_v26, 7  ;;  %v1998_v36 = vld [vmem:[#allocation12 + $0x2d8] sm:$0xff] }
 0x404   : > { %v1769_v28 = vpop.f32.mrf.mxu1  ;;  %2296 = vmatmul.mubr.f32.gmra.mxu0 %v5683_v34 }
 0x405   : > { %v5687_v41 = vmax.f32 %v1877_v31, 0.0  ;;  %v1770_v49 = vadd.f32 %v1769_v28, %v5643_v30  ;;  %v1881_v46 = vadd.f32 %v1880_v60, %v1768_v35  ;;  %v2009_v60 = vrot.slane %v5663_v6, 7  ;;  %v1982_v31 = vld [vmem:[#allocation12 + $0x258] sm:$0xff]  ;;  %v1997_v28 = vld [vmem:[#allocation12 + $0x2d0] sm:$0xff] }
 0x406   : > { %v1773_v47 = vpop.f32.mrf.mxu1  ;;  %v2030_v35 = vsel %vm860_vm1, %v2006_v14, %v2008_v12  ;;  %v1992_v14 = vld [vmem:[#allocation12 + $0x2a8] sm:$0xff] }
 0x407   : > { %v1883_v57 = vadd.f32 %v1882_v51, %v1770_v49  ;;  %v1774_v44 = vadd.f32 %v1773_v47, %v5640_v23  ;;  %2300 = vmatprep.mubr.f32.mxu0 %v5687_v41  ;;  %v5699_v45 = vmax.f32 %v1881_v46, 0.0  ;;  %v2031_v62 = vsel %vm860_vm1, %v2007_v50, %v2009_v60  ;;  %v1983_v51 = vld [vmem:[#allocation12 + $0x260] sm:$0xff]  ;;  %v1981_v47 = vld [vmem:[#allocation12 + $0x250] sm:$0xff] }
 0x408   : > { %v1775_v43 = vpop.f32.mrf.mxu1  ;;  %2301 = vmatmul.mubr.f32.gmra.mxu0 %v5691_v39  ;;  %v2010_v49 = vrot.slane %v5675_v20, 7  ;;  %v2013_v46 = vrot.slane %v5679_v18, 7 }
 0x409   : > { %v5695_v56 = vmax.f32 %v1883_v57, 0.0  ;;  %v1887_v52 = vadd.f32 %v1886_v48, %v1774_v44  ;;  %v1776_v38 = vadd.f32 %v1775_v43, %v5643_v30  ;;  %v2005_v30 = vrot.slane %v5648_v40, 7  ;;  %v1996_v57 = vld [vmem:[#allocation12 + $0x2c8] sm:$0xff] }
 0x40a   : > { %v2029_v48 = vsel %vm860_vm1, %v2009_v60, %v2011_v27  ;;  %v1980_v44 = vld [vmem:[#allocation12 + $0x248] sm:$0xff]  ;;  %v2028_v43 = vsel %vm860_vm1, %v2008_v12, %v2010_v49  ;;  %v1991_v60 = vld [vmem:[#allocation12 + $0x2a0] sm:$0xff]  ;;  %v1974_v12 = vld [vmem:[#allocation12 + $0x218] sm:$0xff] }
 0x40b   : > { %v5701_v29 = vmax.f32 %v1887_v52, 0.0  ;;  %v1889_v55 = vadd.f32 %v1888_v54, %v1776_v38  ;;  %2305 = vmatprep.mubr.f32.mxu0 %v5695_v56  ;;  %v2033_v15 = vsel %vm860_vm1, %v2005_v30, %v2007_v50  ;;  %v1995_v52 = vld [vmem:[#allocation12 + $0x2c0] sm:$0xff]  ;;  %v2012_v38 = vrot.slane %v5683_v34, 7  ;;  %v1993_v50 = vld [vmem:[#allocation12 + $0x2b0] sm:$0xff] }
 0x40c   : > { %2306 = vmatmul.mubr.f32.gmra.mxu0 %v5699_v45  ;;  %v2027_v54 = vsel %vm860_vm1, %v2011_v27, %v2013_v46 }
 0x40d   : > { %v2018_v23 = vrot.slane %v5701_v29, 7  ;;  %v5705_v59 = vmax.f32 %v1889_v55, 0.0  ;;  %v1979_v55 = vld [vmem:[#allocation12 + $0x240] sm:$0xff] }
 0x40f   : > { %v2019_v9 = vrot.slane %v5705_v59, 7  ;;  %2310 = vmatprep.mubr.f32.mxu0 %v5705_v59  ;;  %v2034_v0 = vsel %vm860_vm1, %v2018_v23, %v2004_v63  ;;  %v2015_v63 = vrot.slane %v5687_v41, 7 }
 0x410   : > { %2311 = vmatmul.mubr.f32.gmra.mxu0 %v5701_v29  ;;  %v2036_v58 = vmul.f32 %v5248_v10, %v2034_v0  ;;  %v1978_v0 = vld [vmem:[#allocation12 + $0x238] sm:$0xff] }
 0x411   : > { %v2035_v42 = vsel %vm860_vm1, %v2019_v9, %v2005_v30  ;;  %v1994_v30 = vld [vmem:[#allocation12 + $0x2b8] sm:$0xff] }
 0x412   : > { %v2037_v19 = vmul.f32 %v5248_v10, %v2035_v42  ;;  %v2026_v42 = vsel %vm860_vm1, %v2010_v49, %v2012_v38  ;;  %v2053_v49 = vrot.slane %v5648_v40, 1 }
 0x414   : > { %2170 = vmatprep.mubr.f32.mxu1 %v2037_v19  ;;  %v2014_v19 = vrot.slane %v5691_v39, 7 }
 0x415   : > { %2171 = vmatmul.mubr.f32.vlgmr.msra.gmra.mxu1 %v2036_v58  ;;  %v2025_v58 = vsel %vm860_vm1, %v2013_v46, %v2015_v63  ;;  %v1987_v46 = vld [vmem:[#allocation12 + $0x280] sm:$0xff] }
 0x416   : > { %4099 = vmatpush3.msra.mxu1 %v1986_v17  ;;  %2175 = vmatprep.mubr.f32.mxu1 %v2033_v15  ;;  %v1977_v17 = vld [vmem:[#allocation12 + $0x230] sm:$0xff]  ;;  %v1976_v15 = vld [vmem:[#allocation12 + $0x228] sm:$0xff] }
 0x417   : > { %4100 = vmatprep.subr.mxu1 %v2001_v5  ;;  %v2017_v5 = vrot.slane %v5695_v56, 7 }
 0x418   : > { %4101 = vmatpush3.msra.mxu1 %v1985_v7  ;;  %v2024_v7 = vsel %vm860_vm1, %v2012_v38, %v2014_v19  ;;  %v2061_v38 = vrot.slane %v5679_v18, 1 }
 0x419   : > { %4102 = vmatprep.subr.mxu1 %v2000_v16  ;;  %2176 = vmatmul.mubr.f32.gmra.mxu1 %v2032_v32  ;;  %v2016_v16 = vrot.slane %v5699_v45, 7  ;;  %v1975_v32 = vld [vmem:[#allocation12 + $0x220] sm:$0xff]  ;;  %v2021_v27 = vsel %vm860_vm1, %v2017_v5, %v2019_v9 }
 0x41a   : > { %4103 = vmatpush3.msra.mxu1 %v1984_v24  ;;  %2180 = vmatprep.mubr.f32.mxu1 %v2031_v62  ;;  %v2023_v24 = vsel %vm860_vm1, %v2015_v63, %v2017_v5  ;;  %v1971_v9 = vld [vmem:[#allocation12 + $0x200] sm:$0xff]  ;;  %v2062_v63 = vrot.slane %v5691_v39, 1 }
 0x41b   : > { %4104 = vmatprep.subr.mxu1 %v1999_v21  ;;  %v1990_v21 = vld [vmem:[#allocation12 + $0x298] sm:$0xff]  ;;  %v2022_v62 = vsel %vm860_vm1, %v2014_v19, %v2016_v16  ;;  %v2475_v5 = vld [vmem:[%s6351_s9 + $0x170] sm:$0xff] }
 0x41c   : > { %4105 = vmatpush3.msra.mxu1 %v1983_v51  ;;  %v1989_v51 = vld [vmem:[#allocation12 + $0x290] sm:$0xff] }
 0x41d   : > { %4106 = vmatprep.subr.mxu1 %v1998_v36  ;;  %2181 = vmatmul.mubr.f32.gmra.mxu1 %v2030_v35  ;;  %v1973_v36 = vld [vmem:[#allocation12 + $0x210] sm:$0xff]  ;;  %v1988_v35 = vld [vmem:[#allocation12 + $0x288] sm:$0xff] }
 0x41e   : > { %4107 = vmatpush3.msra.mxu1 %v1982_v31  ;;  %2185 = vmatprep.mubr.f32.mxu1 %v2029_v48  ;;  %v2055_v31 = vrot.slane %v5657_v53, 1  ;;  %v2054_v48 = vrot.slane %v5659_v61, 1  ;;  %v2056_v61 = vrot.slane %v5667_v11, 1 }
 0x41f   : > { %4108 = vmatprep.subr.mxu1 %v1997_v28  ;;  %v1972_v28 = vld [vmem:[#allocation12 + $0x208] sm:$0xff] }
 0x420   : > { %4109 = vmatpush3.msra.mxu1 %v1981_v47  ;;  %v2020_v47 = vsel %vm860_vm1, %v2016_v16, %v2018_v23  ;;  %v2081_v53 = vsel %vm885_vm2, %v2053_v49, %v2055_v31  ;;  %v2470_v16 = vld [vmem:[%s6351_s9 + $0x148] sm:$0xff] }
 0x421   : > { %4110 = vmatprep.subr.mxu1 %v1996_v57  ;;  %2186 = vmatmul.mubr.f32.gmra.mxu1 %v2028_v43  ;;  %v2057_v57 = vrot.slane %v5663_v6, 1  ;;  %v2059_v43 = vrot.slane %v5671_v26, 1  ;;  %v2078_v6 = vsel %vm885_vm2, %v2054_v48, %v2056_v61 }
 0x422   : > { %4111 = vmatpush3.msra.mxu1 %v1980_v44  ;;  %2190 = vmatprep.mubr.f32.mxu1 %v2027_v54  ;;  %v2052_v44 = vrot.slane %v5650_v33, 1  ;;  %v2058_v33 = vrot.slane %v5675_v20, 1  ;;  %v2060_v54 = vrot.slane %v5683_v34, 1 }
 0x423   : > { %4112 = vmatprep.subr.mxu1 %v1995_v52  ;;  %v2079_v23 = vsel %vm885_vm2, %v2055_v31, %v2057_v57  ;;  %v2077_v52 = vsel %vm885_vm2, %v2057_v57, %v2059_v43  ;;  %v2075_v26 = vsel %vm885_vm2, %v2059_v43, %v2061_v38  ;;  %v2464_v31 = vld [vmem:[%s6351_s9 + $0x118] sm:$0xff]  ;;  %v2461_v57 = vld [vmem:[%s6351_s9 + $0x100] sm:$0xff]  ;;  %v2438_v43 = vld [vmem:[%s6351_s9 + $0x48] sm:$0xff] }
 0x424   : > { %4113 = vmatpush3.msra.mxu1 %v1979_v55  ;;  %v2080_v40 = vsel %vm885_vm2, %v2052_v44, %v2054_v48  ;;  %v2076_v11 = vsel %vm885_vm2, %v2056_v61, %v2058_v33  ;;  %v2063_v55 = vrot.slane %v5687_v41, 1  ;;  %v2074_v20 = vsel %vm885_vm2, %v2058_v33, %v2060_v54  ;;  %v2442_v48 = vld [vmem:[%s6351_s9 + $0x68] sm:$0xff]  ;;  %v2439_v61 = vld [vmem:[%s6351_s9 + $0x50] sm:$0xff]  ;;  %v2437_v33 = vld [vmem:[%s6351_s9 + $0x40] sm:$0xff] }
 0x425   : > { %4114 = vmatprep.subr.mxu1 %v1994_v30  ;;  %2191 = vmatmul.mubr.f32.gmra.mxu1 %v2026_v42  ;;  %v2065_v30 = vrot.slane %v5695_v56, 1  ;;  %v2072_v34 = vsel %vm885_vm2, %v2060_v54, %v2062_v63  ;;  %v2067_v42 = vrot.slane %v5705_v59, 1  ;;  %v2435_v54 = vld [vmem:[%s6351_s9 + $0x30] sm:$0xff] }
 0x426   : > { %4115 = vmatpush3.msra.mxu1 %v1978_v0  ;;  %2195 = vmatprep.mubr.f32.mxu1 %v2025_v58  ;;  %v2073_v18 = vsel %vm885_vm2, %v2061_v38, %v2063_v55  ;;  %v2064_v0 = vrot.slane %v5699_v45, 1  ;;  %v2436_v38 = vld [vmem:[%s6351_s9 + $0x38] sm:$0xff] }
 0x427   : > { %4116 = vmatprep.subr.mxu1 %v1993_v50  ;;  %v2071_v41 = vsel %vm885_vm2, %v2063_v55, %v2065_v30  ;;  %v2066_v50 = vrot.slane %v5701_v29, 1  ;;  %v2069_v56 = vsel %vm885_vm2, %v2065_v30, %v2067_v42  ;;  %v2083_v19 = vsel %vm885_vm2, %v2067_v42, %v2053_v49  ;;  %v2463_v49 = vld [vmem:[%s6351_s9 + $0x110] sm:$0xff]  ;;  %v2434_v55 = vld [vmem:[%s6351_s9 + $0x28] sm:$0xff]  ;;  %v2432_v30 = vld [vmem:[%s6351_s9 + $0x18] sm:$0xff] }
 0x428   : > { %4117 = vmatpush3.msra.mxu1 %v1977_v17  ;;  %v2070_v39 = vsel %vm885_vm2, %v2062_v63, %v2064_v0  ;;  %v2099_v58 = vmul.f32 %v5303_v37, %v2083_v19  ;;  %v2476_v17 = vld [vmem:[%s6351_s9 + $0x178] sm:$0xff]  ;;  %v2433_v63 = vld [vmem:[%s6351_s9 + $0x20] sm:$0xff]  ;;  %v2430_v42 = vld [vmem:[%s6351_s9 + $0x8] sm:$0xff] }
 0x429   : > { %4118 = vmatprep.subr.mxu1 %v1992_v14  ;;  %2196 = vmatmul.mubr.f32.gmra.mxu1 %v2024_v7  ;;  %v2068_v45 = vsel %vm885_vm2, %v2064_v0, %v2066_v50  ;;  %v2082_v59 = vsel %vm885_vm2, %v2066_v50, %v2052_v44  ;;  %v2474_v14 = vld [vmem:[%s6351_s9 + $0x168] sm:$0xff]  ;;  %v2472_v7 = vld [vmem:[%s6351_s9 + $0x158] sm:$0xff]  ;;  %v2431_v0 = vld [vmem:[%s6351_s9 + $0x10] sm:$0xff] }
 0x42a   : > { %4119 = vmatpush3.msra.mxu1 %v1976_v15  ;;  %2200 = vmatprep.mubr.f32.mxu1 %v2023_v24  ;;  %v2098_v29 = vmul.f32 %v5303_v37, %v2082_v59  ;;  %v2473_v15 = vld [vmem:[%s6351_s9 + $0x160] sm:$0xff]  ;;  %v2440_v44 = vld [vmem:[%s6351_s9 + $0x58] sm:$0xff] }
 0x42b   : > { %4120 = vmatprep.subr.mxu1 %v1991_v60  ;;  %v2471_v60 = vld [vmem:[%s6351_s9 + $0x150] sm:$0xff]  ;;  %v2469_v24 = vld [vmem:[%s6351_s9 + $0x140] sm:$0xff] }
 0x42c   : > { %4121 = vmatpush3.msra.mxu1 %v1975_v32  ;;  %v2468_v32 = vld [vmem:[%s6351_s9 + $0x138] sm:$0xff]  ;;  %v2429_v50 = vld [vmem:[%s6351_s9] sm:$0xff] }
 0x42d   : > { %4122 = vmatprep.subr.mxu1 %v1990_v21  ;;  %2201 = vmatmul.mubr.f32.gmra.mxu1 %v2022_v62  ;;  %v2467_v21 = vld [vmem:[%s6351_s9 + $0x130] sm:$0xff]  ;;  %v2460_v62 = vld [vmem:[%s6351_s9 + $0xf8] sm:$0xff] }
 0x42e   : > { %4123 = vmatpush3.msra.mxu1 %v1974_v12  ;;  %2205 = vmatprep.mubr.f32.mxu1 %v2021_v27  ;;  %v2466_v12 = vld [vmem:[%s6351_s9 + $0x128] sm:$0xff]  ;;  %v2444_v27 = vld [vmem:[%s6351_s9 + $0x78] sm:$0xff] }
 0x42f   : > { %4124 = vmatprep.subr.mxu1 %v1989_v51  ;;  %v2465_v51 = vld [vmem:[%s6351_s9 + $0x120] sm:$0xff]  ;;  %4154 = vmatprep.subr.mxu0 %v2460_v62 }
 0x430   : > { %4125 = vmatpush3.msra.mxu1 %v1973_v36  ;;  %4155 = vmatpush3.msra.mxu0 %v2444_v27  ;;  %v2459_v36 = vld [vmem:[%s6351_s9 + $0xf0] sm:$0xff] }
 0x431   : > { %4126 = vmatprep.subr.mxu1 %v1988_v35  ;;  %2206 = vmatmul.mubr.f32.gmra.mxu1 %v2020_v47  ;;  %v2443_v35 = vld [vmem:[%s6351_s9 + $0x70] sm:$0xff]  ;;  %v2457_v47 = vld [vmem:[%s6351_s9 + $0xe0] sm:$0xff] }
 0x432   : > { %4127 = vmatpush3.msra.mxu1 %v1972_v28  ;;  %2380 = vmatprep.mubr.f32.mxu1 %v2081_v53  ;;  %v2458_v28 = vld [vmem:[%s6351_s9 + $0xe8] sm:$0xff]  ;;  %v2441_v53 = vld [vmem:[%s6351_s9 + $0x60] sm:$0xff] }
 0x433   : > { %4128 = vmatprep.subr.mxu1 %v1987_v46  ;;  %4156 = vmatprep.subr.mxu0 %v2459_v36  ;;  %v2462_v46 = vld [vmem:[%s6351_s9 + $0x108] sm:$0xff] }
 0x434   : > { %4129 = vmatpush3.msra.mxu1 %v1971_v9  ;;  %4157 = vmatpush3.msra.mxu0 %v2443_v35  ;;  %v2456_v9 = vld [vmem:[%s6351_s9 + $0xd8] sm:$0xff] }
 0x435   : > { %2381 = vmatmul.mubr.f32.vlgmr.msra.gmra.mxu1 %v2080_v40  ;;  %4269 = vmatprep.subr.mxu1 %v2476_v17  ;;  %v2455_v40 = vld [vmem:[%s6351_s9 + $0xd0] sm:$0xff] }
 0x436   : > { %2385 = vmatprep.mubr.f32.mxu1 %v2079_v23  ;;  %4270 = vmatpush3.msra.mxu1 %v2476_v17  ;;  %v2454_v23 = vld [vmem:[%s6351_s9 + $0xc8] sm:$0xff] }
 0x437   : > { %4271 = vmatprep.subr.mxu1 %v2475_v5  ;;  %4158 = vmatprep.subr.mxu0 %v2458_v28  ;;  %v5962_v28 = vld [vmem:[#allocation13] ss:$0 sm:$0xff] }
 0x438   : > { %4272 = vmatpush3.msra.mxu1 %v2475_v5  ;;  %4159 = vmatpush3.msra.mxu0 %v2442_v48 }
 0x439   : > { %2386 = vmatmul.mubr.f32.gmra.mxu1 %v2078_v6  ;;  %4273 = vmatprep.subr.mxu1 %v2474_v14  ;;  %v2453_v6 = vld [vmem:[%s6351_s9 + $0xc0] sm:$0xff] }
 0x43a   : > { %2390 = vmatprep.mubr.f32.mxu1 %v2077_v52  ;;  %4274 = vmatpush3.msra.mxu1 %v2474_v14  ;;  %v2452_v52 = vld [vmem:[%s6351_s9 + $0xb8] sm:$0xff] }
 0x43b   : > { %4275 = vmatprep.subr.mxu1 %v2473_v15  ;;  %4160 = vmatprep.subr.mxu0 %v2457_v47 }
 0x43c   : > { %4276 = vmatpush3.msra.mxu1 %v2473_v15  ;;  %4161 = vmatpush3.msra.mxu0 %v2441_v53 }
 0x43d   : > { %2391 = vmatmul.mubr.f32.gmra.mxu1 %v2076_v11  ;;  %4277 = vmatprep.subr.mxu1 %v2472_v7  ;;  %v2451_v11 = vld [vmem:[%s6351_s9 + $0xb0] sm:$0xff] }
 0x43e   : > { %2395 = vmatprep.mubr.f32.mxu1 %v2075_v26  ;;  %4278 = vmatpush3.msra.mxu1 %v2472_v7  ;;  %v2450_v26 = vld [vmem:[%s6351_s9 + $0xa8] sm:$0xff] }
 0x43f   : > { %4279 = vmatprep.subr.mxu1 %v2471_v60  ;;  %4162 = vmatprep.subr.mxu0 %v2456_v9 }
 0x440   : > { %4280 = vmatpush3.msra.mxu1 %v2471_v60  ;;  %4163 = vmatpush3.msra.mxu0 %v2440_v44 }
 0x441   : > { %2396 = vmatmul.mubr.f32.gmra.mxu1 %v2074_v20  ;;  %4281 = vmatprep.subr.mxu1 %v2470_v16  ;;  %v2449_v20 = vld [vmem:[%s6351_s9 + $0xa0] sm:$0xff] }
 0x442   : > { %2400 = vmatprep.mubr.f32.mxu1 %v2073_v18  ;;  %4282 = vmatpush3.msra.mxu1 %v2470_v16  ;;  %v2448_v18 = vld [vmem:[%s6351_s9 + $0x98] sm:$0xff] }
 0x443   : > { %4283 = vmatprep.subr.mxu1 %v2469_v24  ;;  %4164 = vmatprep.subr.mxu0 %v2455_v40 }
 0x444   : > { %4284 = vmatpush3.msra.mxu1 %v2469_v24  ;;  %4165 = vmatpush3.msra.mxu0 %v2439_v61 }
 0x445   : > { %2401 = vmatmul.mubr.f32.gmra.mxu1 %v2072_v34  ;;  %4285 = vmatprep.subr.mxu1 %v2468_v32  ;;  %v2447_v34 = vld [vmem:[%s6351_s9 + $0x90] sm:$0xff] }
 0x446   : > { %2405 = vmatprep.mubr.f32.mxu1 %v2071_v41  ;;  %4286 = vmatpush3.msra.mxu1 %v2468_v32  ;;  %v2446_v41 = vld [vmem:[%s6351_s9 + $0x88] sm:$0xff] }
 0x447   : > { %4287 = vmatprep.subr.mxu1 %v2467_v21  ;;  %4166 = vmatprep.subr.mxu0 %v2454_v23 }
 0x448   : > { %4288 = vmatpush3.msra.mxu1 %v2467_v21  ;;  %4167 = vmatpush3.msra.mxu0 %v2438_v43 }
 0x449   : > { %2406 = vmatmul.mubr.f32.gmra.mxu1 %v2070_v39  ;;  %4289 = vmatprep.subr.mxu1 %v2466_v12  ;;  %v2445_v39 = vld [vmem:[%s6351_s9 + $0x80] sm:$0xff] }
 0x44a   : > { %2410 = vmatprep.mubr.f32.mxu1 %v2069_v56  ;;  %4290 = vmatpush3.msra.mxu1 %v2466_v12 }
 0x44b   : > { %4291 = vmatprep.subr.mxu1 %v2465_v51  ;;  %4168 = vmatprep.subr.mxu0 %v2453_v6 }
 0x44c   : > { %4292 = vmatpush3.msra.mxu1 %v2465_v51  ;;  %4169 = vmatpush3.msra.mxu0 %v2437_v33 }
 0x44d   : > { %2411 = vmatmul.mubr.f32.gmra.mxu1 %v2068_v45  ;;  %4293 = vmatprep.subr.mxu1 %v2464_v31 }
 0x44e   : > { %2415 = vmatprep.mubr.f32.mxu1 %v2099_v58  ;;  %4294 = vmatpush3.msra.mxu1 %v2464_v31 }
 0x44f   : > { %4295 = vmatprep.subr.mxu1 %v2463_v49  ;;  %4170 = vmatprep.subr.mxu0 %v2452_v52 }
 0x450   : > { %4296 = vmatpush3.msra.mxu1 %v2463_v49  ;;  %4171 = vmatpush3.msra.mxu0 %v2436_v38 }
 0x451   : > { %2416 = vmatmul.mubr.f32.gmra.mxu1 %v2098_v29  ;;  %4297 = vmatprep.subr.mxu1 %v2462_v46 }
 0x452   : > { %4298 = vmatpush3.msra.mxu1 %v2462_v46  ;;  %4172 = vmatprep.subr.mxu0 %v2451_v11 }
 0x453   : > { %4299 = vmatprep.subr.mxu1 %v2461_v57  ;;  %4173 = vmatpush3.msra.mxu0 %v2435_v54 }
 0x454   : > { %4300 = vmatpush3.msra.mxu1 %v2461_v57  ;;  %4174 = vmatprep.subr.mxu0 %v2450_v26 }
 0x455   : > { %4175 = vmatpush3.msra.mxu0 %v2434_v55 }
 0x456   : > { %4176 = vmatprep.subr.mxu0 %v2449_v20 }
 0x457   : > { %4177 = vmatpush3.msra.mxu0 %v2433_v63 }
 0x458   : > { %4178 = vmatprep.subr.mxu0 %v2448_v18 }
 0x459   : > { %4179 = vmatpush3.msra.mxu0 %v2432_v30 }
 0x45a   : > { %4180 = vmatprep.subr.mxu0 %v2447_v34 }
 0x45b   : > { %4181 = vmatpush3.msra.mxu0 %v2431_v0 }
 0x45c   : > { %4182 = vmatprep.subr.mxu0 %v2446_v41 }
 0x45d   : > { %4183 = vmatpush3.msra.mxu0 %v2430_v42 }
 0x45e   : > { %4184 = vmatprep.subr.mxu0 %v2445_v39 }
 0x45f   : > { %4185 = vmatpush3.msra.mxu0 %v2429_v50 }
 0x460   : > { %2893 = vmatprep.subr.mxu0 %v4922_v4 }
 0x4b4   : > { %v4074_v56 = vpop.f32.mrf.mxu0 }
 0x4b6   : > { %v4075_v45 = vpop.f32.mrf.mxu0 }
 0x4b7   : > { %v4076_v57 = vadd.f32 %v4075_v45, %v4074_v56 }
 0x4b8   : > { %v4077_v29 = vpop.f32.mrf.mxu0 }
 0x4ba   : > { %v4078_v14 = vpop.f32.mrf.mxu0 }
 0x4bb   : > { %v4079_v52 = vadd.f32 %v4078_v14, %v4077_v29 }
 0x4bc   : > { %v4080_v60 = vpop.f32.mrf.mxu0 }
 0x4be   : > { %v4081_v32 = vpop.f32.mrf.mxu0 }
 0x4bf   : > { %v4082_v34 = vadd.f32 %v4081_v32, %v4080_v60 }
 0x4c0   : > { %v4083_v62 = vpop.f32.mrf.mxu0 }
 0x4c2   : > { %v4084_v36 = vpop.f32.mrf.mxu0 }
 0x4c4   : > { %v4086_v48 = vpop.f32.mrf.mxu0 }
 0x4c6   : > { %v4087_v44 = vpop.f32.mrf.mxu0 }
 0x4c8   : > { %v4089_v11 = vpop.f32.mrf.mxu0 }
 0x4ca   : > { %v4090_v41 = vpop.f32.mrf.mxu0 }
 0x4cc   : > { %v4092_v14 = vpop.f32.mrf.mxu0 }
 0x4d5   : > { %v4018_v19 = vpop.f32.mrf.mxu1 }
 0x4d7   : > { %v4019_v58 = vpop.f32.mrf.mxu1 }
 0x4d8   : > { %v4020_v35 = vadd.f32 %v4019_v58, %v4018_v19  ;;  %v4085_v58 = vadd.f32 %v4084_v36, %v4083_v62  ;;  %v4088_v36 = vadd.f32 %v4087_v44, %v4086_v48 }
 0x4d9   : > { %v4021_v59 = vpop.f32.mrf.mxu1 }
 0x4da   : > { %v2173_v46 = vadd.f32 %v4020_v35, %v5962_v28 }
 0x4db   : > { %v4022_v17 = vpop.f32.mrf.mxu1 }
 0x4dc   : > { %v4023_v53 = vadd.f32 %v4022_v17, %v4021_v59  ;;  %v2278_v43 = vadd.f32 %v4076_v57, %v2173_v46 }
 0x4dd   : > { %v4024_v5 = vpop.f32.mrf.mxu1 }
 0x4de   : > { %v2178_v61 = vadd.f32 %v4023_v53, %v5962_v28  ;;  %v4093_v53 = vpop.f32.mrf.mxu0 }
 0x4df   : > { %v4025_v15 = vpop.f32.mrf.mxu1 }
 0x4e0   : > { %v4026_v23 = vadd.f32 %v4025_v15, %v4024_v5  ;;  %v2283_v63 = vadd.f32 %v4079_v52, %v2178_v61  ;;  %v4095_v44 = vpop.f32.mrf.mxu0 }
 0x4e1   : > { %v4027_v7 = vpop.f32.mrf.mxu1 }
 0x4e2   : > { %v2183_v55 = vadd.f32 %v4026_v23, %v5962_v28 }
 0x4e3   : > { %v4028_v16 = vpop.f32.mrf.mxu1 }
 0x4e4   : > { %v4029_v54 = vadd.f32 %v4028_v16, %v4027_v7  ;;  %v2288_v19 = vadd.f32 %v4082_v34, %v2183_v55  ;;  %v4096_v34 = vpop.f32.mrf.mxu0 }
 0x4e5   : > { %v4030_v24 = vpop.f32.mrf.mxu1 }
 0x4e6   : > { %v2188_v42 = vadd.f32 %v4029_v54, %v5962_v28 }
 0x4e7   : > { %v4031_v21 = vpop.f32.mrf.mxu1 }
 0x4e8   : > { %v4032_v50 = vadd.f32 %v4031_v21, %v4030_v24  ;;  %v2293_v7 = vadd.f32 %v4085_v58, %v2188_v42 }
 0x4e9   : > { %v4033_v12 = vpop.f32.mrf.mxu1 }
 0x4ea   : > { %v2193_v16 = vadd.f32 %v4032_v50, %v5962_v28 }
 0x4eb   : > { %v4034_v51 = vpop.f32.mrf.mxu1 }
 0x4ec   : > { %v4035_v15 = vadd.f32 %v4034_v51, %v4033_v12 }
 0x4ed   : > { %v4036_v27 = vpop.f32.mrf.mxu1 }
 0x4ee   : > { %v2198_v12 = vadd.f32 %v4035_v15, %v5962_v28 }
 0x4ef   : > { %v4037_v31 = vpop.f32.mrf.mxu1 }
 0x4f0   : > { %v4038_v51 = vadd.f32 %v4037_v31, %v4036_v27 }
 0x4f1   : > { %v5964_v49 = vpop.f32.mrf.mxu1 }
 0x4f2   : > { %v2203_v52 = vadd.f32 %v4038_v51, %v5962_v28 }
 0x4f3   : > { %v5966_v47 = vpop.f32.mrf.mxu1 }
 0x4f4   : > { %v4041_v27 = vadd.f32 %v5966_v47, %v5964_v49 }
 0x4f5   : > { %v4130_v9 = vpop.f32.mrf.mxu1 }
 0x4f6   : > { %v2208_v42 = vadd.f32 %v4041_v27, %v5962_v28  ;;  %v2760_v27 = vld [vmem:[%s6353_s11 + $0x50] sm:$0xff] }
 0x4f7   : > { %v4131_v40 = vpop.f32.mrf.mxu1 }
 0x4f8   : > { %v4132_v6 = vadd.f32 %v4131_v40, %v4130_v9  ;;  %v2298_v40 = vadd.f32 %v4088_v36, %v2193_v16 }
 0x4f9   : > { %v4133_v33 = vpop.f32.mrf.mxu1 }
 0x4fa   : > { %v2383_v38 = vadd.f32 %v4132_v6, %v2278_v43  ;;  %v4091_v43 = vadd.f32 %v4090_v41, %v4089_v11 }
 0x4fb   : > { %v4134_v26 = vpop.f32.mrf.mxu1 }
 0x4fc   : > { %v5971_v20 = vmax.f32 %v2383_v38, 0.0  ;;  %v4135_v18 = vadd.f32 %v4134_v26, %v4133_v33  ;;  %v2303_v38 = vadd.f32 %v4091_v43, %v2198_v12 }
 0x4fd   : > { %v4136_v30 = vpop.f32.mrf.mxu1 }
 0x4fe   : > { %v2388_v0 = vadd.f32 %v4135_v18, %v2283_v63  ;;  %2596 = vmatprep.mubr.f32.mxu0 %v5971_v20  ;;  %v2502_v17 = vrot.slane %v5971_v20, 1  ;;  %v4094_v63 = vadd.f32 %v4093_v53, %v4092_v14 }
 0x4ff   : > { %v4137_v39 = vpop.f32.mrf.mxu1 }
 0x500   : > { %v5975_v56 = vmax.f32 %v2388_v0, 0.0  ;;  %v4138_v45 = vadd.f32 %v4137_v39, %v4136_v30  ;;  %v2308_v0 = vadd.f32 %v4094_v63, %v2203_v52  ;;  %v2763_v52 = vld [vmem:[%s6353_s11 + $0x68] sm:$0xff]  ;;  %v2756_v63 = vld [vmem:[%s6353_s11 + $0x30] sm:$0xff] }
 0x501   : > { %v4139_v59 = vpop.f32.mrf.mxu1 }
 0x502   : > { %v2393_v29 = vadd.f32 %v4138_v45, %v2288_v19  ;;  %v2503_v5 = vrot.slane %v5975_v56, 1  ;;  %v4097_v19 = vadd.f32 %v4096_v34, %v4095_v44  ;;  %v2479_v51 = vrot.slane %v5975_v56, 7  ;;  %v2764_v44 = vld [vmem:[%s6353_s11 + $0x70] sm:$0xff] }
 0x503   : > { %v4140_v60 = vpop.f32.mrf.mxu1  ;;  %v2752_v34 = vld [vmem:[%s6353_s11 + $0x10] sm:$0xff] }
 0x504   : > { %v5980_v32 = vmax.f32 %v2393_v29, 0.0  ;;  %v4141_v24 = vadd.f32 %v4140_v60, %v4139_v59  ;;  %v2516_v21 = vsel %vm885_vm2, %v2502_v17, %v2503_v5 }
 0x505   : > { %v4142_v62 = vpop.f32.mrf.mxu1  ;;  %4301 = vmatprep.mubr.f32.mxu1 %v2516_v21 }
 0x506   : > { %v2504_v35 = vrot.slane %v5980_v32, 1  ;;  %v2398_v46 = vadd.f32 %v4141_v24, %v2293_v7  ;;  %v2478_v24 = vrot.slane %v5971_v20, 7 }
 0x507   : > { %v4143_v9 = vpop.f32.mrf.mxu1 }
 0x508   : > { %v5988_v57 = vmax.f32 %v2398_v46, 0.0  ;;  %v4144_v61 = vadd.f32 %v4143_v9, %v4142_v62  ;;  %v2515_v23 = vsel %vm885_vm2, %v2503_v5, %v2504_v35  ;;  %v2313_v5 = vadd.f32 %v4097_v19, %v2208_v42  ;;  %v2773_v42 = vld [vmem:[%s6353_s11 + $0xb8] sm:$0xff]  ;;  %v2768_v19 = vld [vmem:[%s6353_s11 + $0x90] sm:$0xff] }
 0x509   : > { %v4145_v6 = vpop.f32.mrf.mxu1  ;;  %4302 = vmatmul.mubr.f32.vlgmr.msra.gmra.mxu1 %v2515_v23  ;;  %v2492_v9 = vsel %vm860_vm1, %v2478_v24, %v2479_v51 }
 0x50a   : > { %v2403_v33 = vadd.f32 %v4144_v61, %v2298_v40  ;;  %v2505_v48 = vrot.slane %v5988_v57, 1  ;;  %v2480_v40 = vrot.slane %v5980_v32, 7 }
 0x50b   : > { %v4146_v54 = vpop.f32.mrf.mxu1 }
 0x50c   : > { %v2425_v31 = vmax.f32 %v2403_v33, 0.0  ;;  %v4147_v26 = vadd.f32 %v4146_v54, %v4145_v6  ;;  %v2514_v55 = vsel %vm885_vm2, %v2504_v35, %v2505_v48  ;;  %v2491_v20 = vsel %vm860_vm1, %v2479_v51, %v2480_v40  ;;  %v2761_v54 = vld [vmem:[%s6353_s11 + $0x58] sm:$0xff] }
 0x50d   : > { %v4148_v11 = vpop.f32.mrf.mxu1  ;;  %4304 = vmatprep.mubr.f32.mxu1 %v2514_v55  ;;  %v2757_v55 = vld [vmem:[%s6353_s11 + $0x38] sm:$0xff] }
 0x50e   : > { %v2408_v18 = vadd.f32 %v4147_v26, %v2303_v38  ;;  %v2506_v30 = vrot.slane %v2425_v31, 1  ;;  %v2762_v38 = vld [vmem:[%s6353_s11 + $0x60] sm:$0xff] }
 0x50f   : > { %v4149_v41 = vpop.f32.mrf.mxu1  ;;  %v2758_v26 = vld [vmem:[%s6353_s11 + $0x40] sm:$0xff] }
 0x510   : > { %v2426_v39 = vmax.f32 %v2408_v18, 0.0  ;;  %v4150_v50 = vadd.f32 %v4149_v41, %v4148_v11  ;;  %v2513_v49 = vsel %vm885_vm2, %v2505_v48, %v2506_v30  ;;  %v2765_v48 = vld [vmem:[%s6353_s11 + $0x78] sm:$0xff]  ;;  %v2755_v11 = vld [vmem:[%s6353_s11 + $0x28] sm:$0xff]  ;;  %v2754_v18 = vld [vmem:[%s6353_s11 + $0x20] sm:$0xff] }
 0x511   : > { %v4151_v47 = vpop.f32.mrf.mxu1  ;;  %4305 = vmatmul.mubr.f32.gmra.mxu1 %v2513_v49  ;;  %v2750_v41 = vld [vmem:[%s6353_s11] sm:$0xff] }
 0x512   : > { %v2413_v45 = vadd.f32 %v4150_v50, %v2308_v0  ;;  %v2507_v58 = vrot.slane %v2426_v39, 1  ;;  %v2483_v43 = vrot.slane %v2426_v39, 7  ;;  %v2751_v0 = vld [vmem:[%s6353_s11 + $0x8] sm:$0xff]  ;;  %v2770_v49 = vld [vmem:[%s6353_s11 + $0xa0] sm:$0xff] }
 0x513   : > { %v4152_v59 = vpop.f32.mrf.mxu1  ;;  %v2771_v50 = vld [vmem:[%s6353_s11 + $0xa8] sm:$0xff] }
 0x514   : > { %v2427_v29 = vmax.f32 %v2413_v45, 0.0  ;;  %v4153_v14 = vadd.f32 %v4152_v59, %v4151_v47  ;;  %v2512_v15 = vsel %vm885_vm2, %v2506_v30, %v2507_v58  ;;  %v2753_v30 = vld [vmem:[%s6353_s11 + $0x18] sm:$0xff]  ;;  %v2767_v45 = vld [vmem:[%s6353_s11 + $0x88] sm:$0xff] }
 0x515   : > { %4307 = vmatprep.mubr.f32.mxu1 %v2512_v15  ;;  %v2769_v47 = vld [vmem:[%s6353_s11 + $0x98] sm:$0xff] }
 0x516   : > { %v2418_v7 = vadd.f32 %v4153_v14, %v2313_v5  ;;  %v2508_v28 = vrot.slane %v2427_v29, 1  ;;  %v2484_v6 = vrot.slane %v2427_v29, 7  ;;  %v6131_v5 = vld [vmem:[#allocation15] ss:$0 sm:$0xff] }
 0x518   : > { %v2428_v60 = vmax.f32 %v2418_v7, 0.0  ;;  %v2511_v16 = vsel %vm885_vm2, %v2507_v58, %v2508_v28  ;;  %v2766_v58 = vld [vmem:[%s6353_s11 + $0x80] sm:$0xff] }
 0x519   : > { %4308 = vmatmul.mubr.f32.gmra.mxu1 %v2511_v16 }
 0x51a   : > { %v2485_v21 = vrot.slane %v2428_v60, 7  ;;  %v2509_v62 = vrot.slane %v2428_v60, 1 }
 0x51c   : > { %v2493_v36 = vsel %vm860_vm1, %v2485_v21, %v2478_v24  ;;  %v2510_v35 = vsel %vm885_vm2, %v2508_v28, %v2509_v62  ;;  %v2517_v46 = vsel %vm885_vm2, %v2509_v62, %v2502_v17  ;;  %v2481_v17 = vrot.slane %v5988_v57, 7 }
 0x51d   : > { %4310 = vmatprep.mubr.f32.mxu1 %v2510_v35  ;;  %v2494_v53 = vmul.f32 %v5248_v10, %v2493_v36  ;;  %v2525_v12 = vmul.f32 %v5303_v37, %v2517_v46  ;;  %v2486_v33 = vsel %vm860_vm1, %v2484_v6, %v2485_v21 }
 0x51e   : > { %v2490_v61 = vsel %vm860_vm1, %v2480_v40, %v2481_v17 }
 0x51f   : > { %2597 = vmatmul.mubr.f32.vlgmr.msra.gmra.mxu0 %v2494_v53  ;;  %4311 = vmatmul.mubr.f32.gmra.mxu1 %v2525_v12 }
 0x520   : > { %2601 = vmatprep.mubr.f32.mxu0 %v5975_v56  ;;  %v2482_v56 = vrot.slane %v2425_v31, 7  ;;  %2894 = vmatpush1.msra.mxu0 %v2765_v48 }
 0x521   : > { %2895 = vmatprep.subr.mxu0 %v4922_v4 }
 0x522   : > { %v2489_v23 = vsel %vm860_vm1, %v2481_v17, %v2482_v56  ;;  %2896 = vmatpush1.msra.mxu0 %v2764_v44 }
 0x523   : > { %2602 = vmatmul.mubr.f32.gmra.mxu0 %v2492_v9  ;;  %2897 = vmatprep.subr.mxu0 %v4922_v4 }
 0x524   : > { %2606 = vmatprep.mubr.f32.mxu0 %v5980_v32  ;;  %v2488_v32 = vsel %vm860_vm1, %v2482_v56, %v2483_v43  ;;  %2898 = vmatpush1.msra.mxu0 %v2763_v52 }
 0x525   : > { %2899 = vmatprep.subr.mxu0 %v4922_v4 }
 0x526   : > { %2900 = vmatpush1.msra.mxu0 %v2762_v38 }
 0x527   : > { %2607 = vmatmul.mubr.f32.gmra.mxu0 %v2491_v20  ;;  %2901 = vmatprep.subr.mxu0 %v4922_v4 }
 0x528   : > { %2611 = vmatprep.mubr.f32.mxu0 %v5988_v57  ;;  %v2487_v57 = vsel %vm860_vm1, %v2483_v43, %v2484_v6  ;;  %2902 = vmatpush1.msra.mxu0 %v2761_v54 }
 0x529   : > { %2903 = vmatprep.subr.mxu0 %v4922_v4 }
 0x52a   : > { %2904 = vmatpush1.msra.mxu0 %v2760_v27 }
 0x52b   : > { %2612 = vmatmul.mubr.f32.gmra.mxu0 %v2490_v61  ;;  %2905 = vmatprep.subr.mxu0 %v4922_v4 }
 0x52c   : > { %2616 = vmatprep.mubr.f32.mxu0 %v2425_v31  ;;  %v2759_v31 = vld [vmem:[%s6353_s11 + $0x48] sm:$0xff] }
 0x52d   : > { %2906 = vmatpush1.msra.mxu0 %v2759_v31 }
 0x52e   : > { %2907 = vmatprep.subr.mxu0 %v4922_v4 }
 0x52f   : > { %2617 = vmatmul.mubr.f32.gmra.mxu0 %v2489_v23 }
 0x530   : > { %2621 = vmatprep.mubr.f32.mxu0 %v2426_v39  ;;  %2908 = vmatpush1.msra.mxu0 %v2758_v26  ;;  %v2772_v39 = vld [vmem:[%s6353_s11 + $0xb0] sm:$0xff] }
 0x531   : > { %2909 = vmatprep.subr.mxu0 %v4922_v4 }
 0x532   : > { %2910 = vmatpush1.msra.mxu0 %v2757_v55 }
 0x533   : > { %2622 = vmatmul.mubr.f32.gmra.mxu0 %v2488_v32  ;;  %2911 = vmatprep.subr.mxu0 %v4922_v4 }
 0x534   : > { %2626 = vmatprep.mubr.f32.mxu0 %v2427_v29  ;;  %2912 = vmatpush1.msra.mxu0 %v2756_v63 }
 0x535   : > { %2913 = vmatprep.subr.mxu0 %v4922_v4 }
 0x536   : > { %2914 = vmatpush1.msra.mxu0 %v2755_v11 }
 0x537   : > { %2627 = vmatmul.mubr.f32.gmra.mxu0 %v2487_v57  ;;  %2915 = vmatprep.subr.mxu0 %v4922_v4 }
 0x538   : > { %2631 = vmatprep.mubr.f32.mxu0 %v2428_v60  ;;  %2916 = vmatpush1.msra.mxu0 %v2754_v18 }
 0x539   : > { %2917 = vmatprep.subr.mxu0 %v4922_v4 }
 0x53a   : > { %2918 = vmatpush1.msra.mxu0 %v2753_v30 }
 0x53b   : > { %2632 = vmatmul.mubr.f32.gmra.mxu0 %v2486_v33  ;;  %2919 = vmatprep.subr.mxu0 %v4922_v4 }
 0x53c   : > { %2920 = vmatpush1.msra.mxu0 %v2752_v34 }
 0x53d   : > { %2921 = vmatprep.subr.mxu0 %v4922_v4 }
 0x53e   : > { %2922 = vmatpush1.msra.mxu0 %v2751_v0 }
 0x53f   : > { %2923 = vmatprep.subr.mxu0 %v4922_v4 }
 0x540   : > { %2924 = vmatpush1.msra.mxu0 %v2750_v41 }
 0x541   : > { %2941 = vmatprep.subr.mxu0 %v4922_v4 }
 0x542   : > { %2942 = vmatpush2.msra.mxu0 %v2773_v42 }
 0x543   : > { %2943 = vmatprep.subr.mxu0 %v4922_v4 }
 0x544   : > { %2944 = vmatpush2.msra.mxu0 %v2772_v39 }
 0x545   : > { %2945 = vmatprep.subr.mxu0 %v4922_v4 }
 0x546   : > { %2946 = vmatpush2.msra.mxu0 %v2771_v50 }
 0x547   : > { %2947 = vmatprep.subr.mxu0 %v4922_v4 }
 0x548   : > { %2948 = vmatpush2.msra.mxu0 %v2770_v49 }
 0x549   : > { %2949 = vmatprep.subr.mxu0 %v4922_v4 }
 0x54a   : > { %2950 = vmatpush2.msra.mxu0 %v2769_v47 }
 0x54b   : > { %2951 = vmatprep.subr.mxu0 %v4922_v4 }
 0x54c   : > { %2952 = vmatpush2.msra.mxu0 %v2768_v19 }
 0x54d   : > { %2953 = vmatprep.subr.mxu0 %v4922_v4 }
 0x54e   : > { %2954 = vmatpush2.msra.mxu0 %v2767_v45 }
 0x54f   : > { %2955 = vmatprep.subr.mxu0 %v4922_v4 }
 0x550   : > { %2956 = vmatpush2.msra.mxu0 %v2766_v58 }
 0x5c9   : > { %v4303_v29 = vpop.f32.mrf.mxu1 }
 0x5cb   : > { %v2703_v60 = vpop.f32.mrf.mxu1 }
 0x5d1   : > { %v4306_v35 = vpop.f32.mrf.mxu1 }
 0x5d3   : > { %v2713_v20 = vpop.f32.mrf.mxu1 }
 0x5d9   : > { %v4309_v38 = vpop.f32.mrf.mxu1 }
 0x5db   : > { %v2723_v0 = vpop.f32.mrf.mxu1 }
 0x5df   : > { %v4186_v59 = vpop.f32.mrf.mxu0 }
 0x5e1   : > { %v4187_v14 = vpop.f32.mrf.mxu0 }
 0x5e2   : > { %v4188_v15 = vadd.f32 %v4187_v14, %v4186_v59 }
 0x5e3   : > { %v4189_v7 = vpop.f32.mrf.mxu0 }
 0x5e4   : > { %v2599_v28 = vadd.f32 %v4188_v15, %v6131_v5 }
 0x5e5   : > { %v4190_v16 = vpop.f32.mrf.mxu0 }
 0x5e6   : > { %v4191_v24 = vadd.f32 %v4190_v16, %v4189_v7  ;;  %v2704_v21 = vadd.f32 %v2703_v60, %v2599_v28 }
 0x5e7   : > { %v4192_v62 = vpop.f32.mrf.mxu0 }
 0x5e8   : > { %v2604_v4 = vadd.f32 %v4191_v24, %v6131_v5  ;;  %v6135_v36 = vmax.f32 %v2704_v21, 0.0 }
 0x5e9   : > { %v4193_v46 = vpop.f32.mrf.mxu0 }
 0x5ea   : > { %v4194_v53 = vadd.f32 %v4193_v46, %v4192_v62  ;;  %2831 = vrot.lane.b32.xlu0 %v6135_v36, %s4923_s22  ;;  %v2709_v12 = vadd.f32 %v4303_v29, %v2604_v4  ;;  %v2775_v17 = vrot.slane %v6135_v36, 7  ;;  %v2799_v56 = vrot.slane %v6135_v36, 1  ;;  %v4312_v29 = vpop.f32.mrf.mxu1 }
 0x5eb   : > { %v4195_v51 = vpop.f32.mrf.mxu0 }
 0x5ec   : > { %v2609_v9 = vadd.f32 %v4194_v53, %v6131_v5  ;;  %v2743_v40 = vmax.f32 %v2709_v12, 0.0 }
 0x5ed   : > { %v4196_v61 = vpop.f32.mrf.mxu0 }
 0x5ee   : > { %v4197_v23 = vadd.f32 %v4196_v61, %v4195_v51  ;;  %2833 = vrot.lane.b32.xlu1 %v2743_v40, %s4923_s22  ;;  %v2800_v43 = vrot.slane %v2743_v40, 1  ;;  %v2714_v32 = vadd.f32 %v2713_v20, %v2609_v9  ;;  %v2776_v6 = vrot.slane %v2743_v40, 7 }
 0x5ef   : > { %v4198_v57 = vpop.f32.mrf.mxu0 }
 0x5f0   : > { %v2614_v33 = vadd.f32 %v4197_v23, %v6131_v5  ;;  %v2813_v48 = vsel %vm885_vm2, %v2799_v56, %v2800_v43  ;;  %v2744_v44 = vmax.f32 %v2714_v32, 0.0  ;;  %v6152_v52 = vsel %vm860_vm1, %v2775_v17, %v2776_v6 }
 0x5f1   : > { %v4199_v54 = vpop.f32.mrf.mxu0  ;;  %3975 = vmatprep.mubr.msk.f32.mxu0 %vm1357_vm4, %v2813_v48 }
 0x5f2   : > { %v4200_v27 = vadd.f32 %v4199_v54, %v4198_v57  ;;  %2835 = vrot.lane.b32.xlu0 %v2744_v44, %s4923_s22  ;;  %v2719_v31 = vadd.f32 %v4306_v35, %v2614_v33  ;;  %v2801_v26 = vrot.slane %v2744_v44, 1  ;;  %v2777_v55 = vrot.slane %v2744_v44, 7  ;;  %v2733_v35 = vpop.f32.mrf.mxu1 }
 0x5f3   : > { %v4201_v63 = vpop.f32.mrf.mxu0 }
 0x5f4   : > { %v2619_v11 = vadd.f32 %v4200_v27, %v6131_v5  ;;  %v2745_v18 = vmax.f32 %v2719_v31, 0.0  ;;  %v2812_v30 = vsel %vm885_vm2, %v2800_v43, %v2801_v26  ;;  %v2788_v34 = vsel %vm860_vm1, %v2776_v6, %v2777_v55 }
 0x5f5   : > { %v4202_v41 = vpop.f32.mrf.mxu0 }
 0x5f6   : > { %v4203_v42 = vadd.f32 %v4202_v41, %v4201_v63  ;;  %2837 = vrot.lane.b32.xlu1 %v2745_v18, %s4923_s22  ;;  %v2724_v39 = vadd.f32 %v2723_v0, %v2619_v11  ;;  %v2802_v50 = vrot.slane %v2745_v18, 1  ;;  %v2778_v49 = vrot.slane %v2745_v18, 7 }
 0x5f7   : > { %v4204_v47 = vpop.f32.mrf.mxu0 }
 0x5f8   : > { %v2624_v19 = vadd.f32 %v4203_v42, %v6131_v5  ;;  %v2746_v45 = vmax.f32 %v2724_v39, 0.0  ;;  %v2811_v58 = vsel %vm885_vm2, %v2801_v26, %v2802_v50  ;;  %v2787_v59 = vsel %vm860_vm1, %v2777_v55, %v2778_v49 }
 0x5f9   : > { %v4205_v14 = vpop.f32.mrf.mxu0 }
 0x5fa   : > { %v4206_v15 = vadd.f32 %v4205_v14, %v4204_v47  ;;  %2839 = vrot.lane.b32.xlu0 %v2746_v45, %s4923_s22  ;;  %v2729_v7 = vadd.f32 %v4309_v38, %v2624_v19  ;;  %v2803_v28 = vrot.slane %v2746_v45, 1  ;;  %v2779_v60 = vrot.slane %v2746_v45, 7  ;;  %v3384_v47 = vld [vmem:[#allocation21 + $0xf8] sm:$0xff]  ;;  %v3383_v45 = vld [vmem:[#allocation21 + $0xf0] sm:$0xff]  ;;  %v3381_v14 = vld [vmem:[#allocation21 + $0xe0] sm:$0xff] }
 0x5fb   : > { %v4207_v16 = vpop.f32.mrf.mxu0  ;;  %v3448_v19 = vld [vmem:[#allocation21 + $0x2f8] sm:$0xff]  ;;  %3493 = vmatprep.subr.mxu1 %v3384_v47 }
 0x5fc   : > { %v2629_v24 = vadd.f32 %v4206_v15, %v6131_v5  ;;  %v2747_v21 = vmax.f32 %v2729_v7, 0.0  ;;  %v2810_v62 = vsel %vm885_vm2, %v2802_v50, %v2803_v28  ;;  %v2786_v4 = vsel %vm860_vm1, %v2778_v49, %v2779_v60  ;;  %3564 = vmatprep.subr.mxu0 %v3448_v19  ;;  %3494 = vmatpush1.msra.mxu1 %v3383_v45  ;;  %v3445_v15 = vld [vmem:[#allocation21 + $0x2e0] sm:$0xff]  ;;  %v3444_v7 = vld [vmem:[#allocation21 + $0x2d8] sm:$0xff] }
 0x5fd   : > { %v4208_v46 = vpop.f32.mrf.mxu0  ;;  %v3364_v19 = vld [vmem:[#allocation21 + $0x58] sm:$0xff] }
 0x5fe   : > { %v4209_v53 = vadd.f32 %v4208_v46, %v4207_v16  ;;  %2841 = vrot.lane.b32.xlu1 %v2747_v21, %s4923_s22  ;;  %v2734_v12 = vadd.f32 %v2733_v35, %v2629_v24  ;;  %v2804_v51 = vrot.slane %v2747_v21, 1  ;;  %v2780_v9 = vrot.slane %v2747_v21, 7  ;;  %v3378_v16 = vld [vmem:[#allocation21 + $0xc8] sm:$0xff]  ;;  %v6215_v21 = vld [vmem:[#allocation16] ss:$0 sm:$0xff]  ;;  %v3377_v35 = vld [vmem:[#allocation21 + $0xc0] sm:$0xff] }
 0x5ff   : > { %v3442_v24 = vld [vmem:[#allocation21 + $0x2c8] sm:$0xff]  ;;  %v3441_v46 = vld [vmem:[#allocation21 + $0x2c0] sm:$0xff] }
 0x600   : > { %v2634_v40 = vadd.f32 %v4209_v53, %v6131_v5  ;;  %v2748_v20 = vmax.f32 %v2734_v12, 0.0  ;;  %v2809_v61 = vsel %vm885_vm2, %v2803_v28, %v2804_v51  ;;  %v2785_v23 = vsel %vm860_vm1, %v2779_v60, %v2780_v9  ;;  %v3379_v28 = vld [vmem:[#allocation21 + $0xd0] sm:$0xff]  ;;  %v3376_v53 = vld [vmem:[#allocation21 + $0xb8] sm:$0xff] }
 0x601   : > { %v3443_v60 = vld [vmem:[#allocation21 + $0x2d0] sm:$0xff] }
 0x602   : > { %2843 = vrot.lane.b32.xlu0 %v2748_v20, %s4923_s22  ;;  %v2739_v43 = vadd.f32 %v4312_v29, %v2634_v40  ;;  %v2805_v32 = vrot.slane %v2748_v20, 1  ;;  %v2781_v6 = vrot.slane %v2748_v20, 7  ;;  %v3446_v29 = vld [vmem:[#allocation21 + $0x2e8] sm:$0xff]  ;;  %v3439_v40 = vld [vmem:[#allocation21 + $0x2b0] sm:$0xff] }
 0x604   : > { %v2749_v57 = vmax.f32 %v2739_v43, 0.0  ;;  %v2808_v33 = vsel %vm885_vm2, %v2804_v51, %v2805_v32  ;;  %v2784_v48 = vsel %vm860_vm1, %v2780_v9, %v2781_v6  ;;  %v3440_v51 = vld [vmem:[#allocation21 + $0x2b8] sm:$0xff]  ;;  %v3375_v9 = vld [vmem:[#allocation21 + $0xb0] sm:$0xff] }
 0x606   : > { %2845 = vrot.lane.b32.xlu1 %v2749_v57, %s4923_s22  ;;  %v2782_v5 = vrot.slane %v2749_v57, 7  ;;  %v2806_v44 = vrot.slane %v2749_v57, 1  ;;  %v3437_v57 = vld [vmem:[#allocation21 + $0x2a0] sm:$0xff] }
 0x608   : > { %v2790_v38 = vsel %vm860_vm1, %v2782_v5, %v2775_v17  ;;  %v2807_v54 = vsel %vm885_vm2, %v2805_v32, %v2806_v44  ;;  %v2814_v27 = vsel %vm885_vm2, %v2806_v44, %v2799_v56  ;;  %v2783_v31 = vsel %vm860_vm1, %v2781_v6, %v2782_v5  ;;  %v3373_v6 = vld [vmem:[#allocation21 + $0xa0] sm:$0xff]  ;;  %v3372_v5 = vld [vmem:[#allocation21 + $0x98] sm:$0xff] }
 0x609   : > { %v2791_v26 = vmul.f32 %v5248_v10, %v2790_v38  ;;  %v2822_v39 = vmul.f32 %v5303_v37, %v2814_v27  ;;  %v3380_v37 = vld [vmem:[#allocation21 + $0xd8] sm:$0xff]  ;;  %v3435_v27 = vld [vmem:[#allocation21 + $0x290] sm:$0xff] }
 0x60a   : > { %v3436_v44 = vld [vmem:[#allocation21 + $0x298] sm:$0xff] }
 0x65c   : > { %v2832_v55 = vpop.permute.xlu0 %2831 }
 0x65d   : > { %v2855_v63 = vsel %vm1357_vm4, %v2791_v26, %v2832_v55  ;;  %v3434_v55 = vld [vmem:[#allocation21 + $0x288] sm:$0xff] }
 0x65e   : > { %2958 = vmatmul.mubr.f32.vlgmr.msra.gmra.mxu0 %v2855_v63  ;;  %v3369_v63 = vld [vmem:[#allocation21 + $0x80] sm:$0xff] }
 0x65f   : > { %3976 = vmatprep.mubr.msk.f32.mxu0 %vm1357_vm4, %v2812_v30 }
 0x660   : > { %v2834_v17 = vpop.permute.xlu1 %2833 }
 0x661   : > { %v2856_v11 = vsel %vm1357_vm4, %v6152_v52, %v2834_v17 }
 0x662   : > { %2963 = vmatmul.mubr.f32.gmra.mxu0 %v2856_v11  ;;  %v3433_v11 = vld [vmem:[#allocation21 + $0x280] sm:$0xff] }
 0x663   : > { %3977 = vmatprep.mubr.msk.f32.mxu0 %vm1357_vm4, %v2811_v58  ;;  %v3447_v58 = vld [vmem:[#allocation21 + $0x2f0] sm:$0xff] }
 0x664   : > { %v2836_v36 = vpop.permute.xlu0 %2835  ;;  %3565 = vmatpush1.msra.mxu0 %v3447_v58  ;;  %v3428_v58 = vld [vmem:[#allocation21 + $0x258] sm:$0xff] }
 0x665   : > { %v2857_v56 = vsel %vm1357_vm4, %v2788_v34, %v2836_v36  ;;  %3566 = vmatprep.subr.mxu0 %v3446_v29 }
 0x666   : > { %2968 = vmatmul.mubr.f32.gmra.mxu0 %v2857_v56 }
 0x667   : > { %3978 = vmatprep.mubr.msk.f32.mxu0 %vm1357_vm4, %v2810_v62  ;;  %3567 = vmatpush1.msra.mxu0 %v3445_v15 }
 0x668   : > { %v2838_v10 = vpop.permute.xlu1 %2837  ;;  %3568 = vmatprep.subr.mxu0 %v3444_v7 }
 0x669   : > { %v2858_v18 = vsel %vm1357_vm4, %v2787_v59, %v2838_v10  ;;  %v3382_v59 = vld [vmem:[#allocation21 + $0xe8] sm:$0xff]  ;;  %3569 = vmatpush1.msra.mxu0 %v3443_v60  ;;  %v3368_v10 = vld [vmem:[#allocation21 + $0x78] sm:$0xff]  ;;  %v3361_v60 = vld [vmem:[#allocation21 + $0x40] sm:$0xff] }
 0x66a   : > { %2973 = vmatmul.mubr.f32.gmra.mxu0 %v2858_v18  ;;  %3495 = vmatprep.subr.mxu1 %v3382_v59  ;;  %v3363_v59 = vld [vmem:[#allocation21 + $0x50] sm:$0xff] }
 0x66b   : > { %3979 = vmatprep.mubr.msk.f32.mxu0 %vm1357_vm4, %v2809_v61  ;;  %3496 = vmatpush1.msra.mxu1 %v3381_v14  ;;  %v3374_v61 = vld [vmem:[#allocation21 + $0xa8] sm:$0xff]  ;;  %v3427_v14 = vld [vmem:[#allocation21 + $0x250] sm:$0xff] }
 0x66c   : > { %v2840_v30 = vpop.permute.xlu0 %2839  ;;  %3497 = vmatprep.subr.mxu1 %v3380_v37  ;;  %3570 = vmatprep.subr.mxu0 %v3442_v24  ;;  %v3362_v37 = vld [vmem:[#allocation21 + $0x48] sm:$0xff]  ;;  %v3360_v24 = vld [vmem:[#allocation21 + $0x38] sm:$0xff] }
 0x66d   : > { %v2859_v0 = vsel %vm1357_vm4, %v2786_v4, %v2840_v30  ;;  %3498 = vmatpush1.msra.mxu1 %v3379_v28  ;;  %3571 = vmatpush1.msra.mxu0 %v3441_v46  ;;  %v3432_v30 = vld [vmem:[#allocation21 + $0x278] sm:$0xff]  ;;  %v3426_v28 = vld [vmem:[#allocation21 + $0x248] sm:$0xff]  ;;  %v3359_v46 = vld [vmem:[#allocation21 + $0x30] sm:$0xff] }
 0x66e   : > { %2978 = vmatmul.mubr.f32.gmra.mxu0 %v2859_v0  ;;  %3499 = vmatprep.subr.mxu1 %v3378_v16  ;;  %v3367_v0 = vld [vmem:[#allocation21 + $0x70] sm:$0xff] }
 0x66f   : > { %3980 = vmatprep.mubr.msk.f32.mxu0 %vm1357_vm4, %v2808_v33  ;;  %3500 = vmatpush1.msra.mxu1 %v3377_v35 }
 0x670   : > { %v2842_v52 = vpop.permute.xlu1 %2841  ;;  %3501 = vmatprep.subr.mxu1 %v3376_v53  ;;  %3572 = vmatprep.subr.mxu0 %v3440_v51  ;;  %v3358_v51 = vld [vmem:[#allocation21 + $0x28] sm:$0xff] }
 0x671   : > { %v2860_v41 = vsel %vm1357_vm4, %v2785_v23, %v2842_v52  ;;  %v3438_v23 = vld [vmem:[#allocation21 + $0x2a8] sm:$0xff]  ;;  %3502 = vmatpush1.msra.mxu1 %v3375_v9  ;;  %3573 = vmatpush1.msra.mxu0 %v3439_v40  ;;  %v3431_v52 = vld [vmem:[#allocation21 + $0x270] sm:$0xff] }
 0x672   : > { %2983 = vmatmul.mubr.f32.gmra.mxu0 %v2860_v41  ;;  %3503 = vmatprep.subr.mxu1 %v3374_v61  ;;  %v3422_v40 = vld [vmem:[#allocation21 + $0x228] sm:$0xff] }
 0x673   : > { %3981 = vmatprep.mubr.msk.f32.mxu0 %vm1357_vm4, %v2807_v54  ;;  %3574 = vmatprep.subr.mxu0 %v3438_v23  ;;  %v3371_v54 = vld [vmem:[#allocation21 + $0x90] sm:$0xff]  ;;  %v3421_v23 = vld [vmem:[#allocation21 + $0x220] sm:$0xff] }
 0x674   : > { %v2844_v34 = vpop.permute.xlu0 %2843  ;;  %3504 = vmatpush1.msra.mxu1 %v3373_v6  ;;  %3575 = vmatpush1.msra.mxu0 %v3437_v57  ;;  %v3420_v57 = vld [vmem:[#allocation21 + $0x218] sm:$0xff] }
 0x675   : > { %v2861_v42 = vsel %vm1357_vm4, %v2784_v48, %v2844_v34  ;;  %3505 = vmatprep.subr.mxu1 %v3372_v5  ;;  %3576 = vmatprep.subr.mxu0 %v3436_v44  ;;  %v3366_v34 = vld [vmem:[#allocation21 + $0x68] sm:$0xff]  ;;  %v3419_v5 = vld [vmem:[#allocation21 + $0x210] sm:$0xff] }
 0x676   : > { %2988 = vmatmul.mubr.f32.gmra.mxu0 %v2861_v42  ;;  %3506 = vmatpush1.msra.mxu1 %v3371_v54  ;;  %v3430_v42 = vld [vmem:[#allocation21 + $0x268] sm:$0xff] }
 0x677   : > { %3982 = vmatprep.mubr.msk.f32.mxu0 %vm1357_vm4, %v2822_v39  ;;  %3577 = vmatpush1.msra.mxu0 %v3435_v27  ;;  %v3354_v44 = vld [vmem:[#allocation21 + $0x8] sm:$0xff]  ;;  %v3353_v27 = vld [vmem:[#allocation21] sm:$0xff] }
 0x678   : > { %v2846_v50 = vpop.permute.xlu1 %2845  ;;  %3578 = vmatprep.subr.mxu0 %v3434_v55  ;;  %v3418_v54 = vld [vmem:[#allocation21 + $0x208] sm:$0xff]  ;;  %v3415_v55 = vld [vmem:[#allocation21 + $0x1f0] sm:$0xff] }
 0x679   : > { %v2862_v49 = vsel %vm1357_vm4, %v2783_v31, %v2846_v50  ;;  %v3370_v31 = vld [vmem:[#allocation21 + $0x88] sm:$0xff]  ;;  %3579 = vmatpush1.msra.mxu0 %v3433_v11 }
 0x67a   : > { %2993 = vmatmul.mubr.f32.gmra.mxu0 %v2862_v49  ;;  %3507 = vmatprep.subr.mxu1 %v3370_v31  ;;  %v3365_v49 = vld [vmem:[#allocation21 + $0x60] sm:$0xff]  ;;  %v3478_v11 = vld [vmem:[#allocation21 + $0x3e8] sm:$0xff] }
 0x67b   : > { %3508 = vmatpush1.msra.mxu1 %v3369_v63  ;;  %3580 = vmatprep.subr.mxu0 %v3432_v30  ;;  %v3417_v31 = vld [vmem:[#allocation21 + $0x200] sm:$0xff]  ;;  %v3479_v63 = vld [vmem:[#allocation21 + $0x3f0] sm:$0xff] }
 0x67c   : > { %3509 = vmatprep.subr.mxu1 %v3368_v10  ;;  %3581 = vmatpush1.msra.mxu0 %v3431_v52  ;;  %v3412_v10 = vld [vmem:[#allocation21 + $0x1d8] sm:$0xff]  ;;  %v3411_v30 = vld [vmem:[#allocation21 + $0x1d0] sm:$0xff]  ;;  %v3410_v52 = vld [vmem:[#allocation21 + $0x1c8] sm:$0xff] }
 0x67d   : > { %3510 = vmatpush1.msra.mxu1 %v3367_v0  ;;  %3582 = vmatprep.subr.mxu0 %v3430_v42  ;;  %v3475_v0 = vld [vmem:[#allocation21 + $0x3d0] sm:$0xff]  ;;  %v3473_v42 = vld [vmem:[#allocation21 + $0x3c0] sm:$0xff] }
 0x67e   : > { %3511 = vmatprep.subr.mxu1 %v3366_v34  ;;  %v3409_v34 = vld [vmem:[#allocation21 + $0x1c0] sm:$0xff] }
 0x67f   : > { %3512 = vmatpush1.msra.mxu1 %v3365_v49  ;;  %v3407_v49 = vld [vmem:[#allocation21 + $0x1b0] sm:$0xff] }
 0x680   : > { %3513 = vmatprep.subr.mxu1 %v3364_v19  ;;  %v3470_v19 = vld [vmem:[#allocation21 + $0x3a8] sm:$0xff] }
 0x681   : > { %3514 = vmatpush1.msra.mxu1 %v3363_v59  ;;  %v3404_v59 = vld [vmem:[#allocation21 + $0x198] sm:$0xff] }
 0x682   : > { %3515 = vmatprep.subr.mxu1 %v3362_v37  ;;  %v3402_v37 = vld [vmem:[#allocation21 + $0x188] sm:$0xff] }
 0x683   : > { %3516 = vmatpush1.msra.mxu1 %v3361_v60  ;;  %v3465_v60 = vld [vmem:[#allocation21 + $0x380] sm:$0xff] }
 0x684   : > { %3517 = vmatprep.subr.mxu1 %v3360_v24  ;;  %v3399_v24 = vld [vmem:[#allocation21 + $0x170] sm:$0xff] }
 0x685   : > { %3518 = vmatpush1.msra.mxu1 %v3359_v46  ;;  %v3397_v46 = vld [vmem:[#allocation21 + $0x160] sm:$0xff] }
 0x686   : > { %3519 = vmatprep.subr.mxu1 %v3358_v51  ;;  %v3460_v51 = vld [vmem:[#allocation21 + $0x358] sm:$0xff] }
 0x71e   : > { %v2959_v62 = vpop.f32.mrf.mxu0 }
 0x71f   : > { %v2960_v4 = vadd.f32 %v6215_v21, %v2959_v62 }
 0x720   : > { %v2961_v12 = vpop.f32.mrf.mxu0 }
 0x721   : > { %v2998_v20 = vmax.f32 %v2960_v4, 0.0  ;;  %v3424_v4 = vld [vmem:[#allocation21 + $0x238] sm:$0xff]  ;;  %v3423_v12 = vld [vmem:[#allocation21 + $0x230] sm:$0xff] }
 0x722   : > { %v2964_v43 = vpop.f32.mrf.mxu0 }
 0x723   : > { %v2965_v32 = vadd.f32 %v6215_v21, %v2964_v43  ;;  %3041 = vperm.xlu0 %4489, %v2998_v20  }
 0x724   : > { %v2966_v33 = vpop.f32.mrf.mxu0 }
 0x725   : > { %v2999_v48 = vmax.f32 %v2965_v32, 0.0  ;;  %v3356_v32 = vld [vmem:[#allocation21 + $0x18] sm:$0xff]  ;;  %v3355_v33 = vld [vmem:[#allocation21 + $0x10] sm:$0xff] }
 0x726   : > { %v2969_v38 = vpop.f32.mrf.mxu0 }
 0x727   : > { %v2970_v26 = vadd.f32 %v6215_v21, %v2969_v38  ;;  %3046 = vperm.xlu1 %4493, %v2999_v48   ;;  %4492 = vset.pattern.permute.xlu0 %v4920_v1 }
 0x728   : > { %v2971_v17 = vpop.f32.mrf.mxu0  ;;  %3177 = vperm.xlu0 %4492, %v2998_v20   ;;  %v3357_v20 = vld [vmem:[#allocation21 + $0x20] sm:$0xff] }
 0x729   : > { %v3000_v36 = vmax.f32 %v2970_v26, 0.0  ;;  %3520 = vmatpush1.msra.mxu1 %v3357_v20  ;;  %v3480_v26 = vld [vmem:[#allocation21 + $0x3f8] sm:$0xff]  ;;  %v3414_v17 = vld [vmem:[#allocation21 + $0x1e8] sm:$0xff] }
 0x72a   : > { %v2974_v56 = vpop.f32.mrf.mxu0  ;;  %3521 = vmatprep.subr.mxu1 %v3356_v32  ;;  %v3394_v20 = vld [vmem:[#allocation21 + $0x148] sm:$0xff]  ;;  %v3392_v32 = vld [vmem:[#allocation21 + $0x138] sm:$0xff] }
 0x72b   : > { %v2975_v18 = vadd.f32 %v6215_v21, %v2974_v56  ;;  %4494 = vset.pattern.permute.xlu1 %v4920_v1  ;;  %v3429_v1 = vld [vmem:[#allocation21 + $0x260] sm:$0xff]  ;;  %3522 = vmatpush1.msra.mxu1 %v3355_v33  ;;  %v3455_v33 = vld [vmem:[#allocation21 + $0x330] sm:$0xff] }
 0x72c   : > { %v2976_v41 = vpop.f32.mrf.mxu0  ;;  %3181 = vperm.xlu1 %4494, %v2999_v48   ;;  %3185 = vperm.xlu0 %4492, %v3000_v36   ;;  %v3477_v56 = vld [vmem:[#allocation21 + $0x3e0] sm:$0xff] }
 0x72d   : > { %v3001_v39 = vmax.f32 %v2975_v18, 0.0  ;;  %3583 = vmatpush1.msra.mxu0 %v3429_v1  ;;  %3523 = vmatprep.subr.mxu1 %v3354_v44  ;;  %v3476_v18 = vld [vmem:[#allocation21 + $0x3d8] sm:$0xff]  ;;  %v3474_v41 = vld [vmem:[#allocation21 + $0x3c8] sm:$0xff]  ;;  %v3389_v44 = vld [vmem:[#allocation21 + $0x120] sm:$0xff] }
 0x72e   : > { %v2979_v50 = vpop.f32.mrf.mxu0  ;;  %3584 = vmatprep.subr.mxu0 %v3428_v58  ;;  %3524 = vmatpush1.msra.mxu1 %v3353_v27  ;;  %v3406_v1 = vld [vmem:[#allocation21 + $0x1a8] sm:$0xff]  ;;  %v3469_v58 = vld [vmem:[#allocation21 + $0x3a0] sm:$0xff]  ;;  %v3452_v27 = vld [vmem:[#allocation21 + $0x318] sm:$0xff] }
 0x72f   : > { %v2980_v47 = vadd.f32 %v6215_v21, %v2979_v50  ;;  %3585 = vmatpush1.msra.mxu0 %v3427_v14  ;;  %v3472_v50 = vld [vmem:[#allocation21 + $0x3b8] sm:$0xff]  ;;  %v3403_v14 = vld [vmem:[#allocation21 + $0x190] sm:$0xff] }
 0x730   : > { %v2981_v45 = vpop.f32.mrf.mxu0  ;;  %4495 = vset.pattern.permute.xlu1 %v4921_v2  ;;  %3189 = vperm.xlu0 %4492, %v3001_v39   ;;  %v3425_v2 = vld [vmem:[#allocation21 + $0x240] sm:$0xff] }
 0x731   : > { %v3002_v29 = vmax.f32 %v2980_v47, 0.0  ;;  %3051 = vperm.xlu1 %4495, %v3000_v36   ;;  %3586 = vmatprep.subr.mxu0 %v3426_v28  ;;  %v3413_v36 = vld [vmem:[#allocation21 + $0x1e0] sm:$0xff]  ;;  %v3471_v47 = vld [vmem:[#allocation21 + $0x3b0] sm:$0xff] }
 0x732   : > { %v2984_v15 = vpop.f32.mrf.mxu0  ;;  %3587 = vmatpush1.msra.mxu0 %v3425_v2  ;;  %v3405_v45 = vld [vmem:[#allocation21 + $0x1a0] sm:$0xff]  ;;  %v3464_v2 = vld [vmem:[#allocation21 + $0x378] sm:$0xff] }
 0x733   : > { %v2985_v7 = vadd.f32 %v6215_v21, %v2984_v15  ;;  %3588 = vmatprep.subr.mxu0 %v3424_v4  ;;  %v3467_v15 = vld [vmem:[#allocation21 + $0x390] sm:$0xff]  ;;  %v3401_v28 = vld [vmem:[#allocation21 + $0x180] sm:$0xff]  ;;  %v3398_v4 = vld [vmem:[#allocation21 + $0x168] sm:$0xff] }
 0x734   : > { %v2986_v16 = vpop.f32.mrf.mxu0  ;;  %3193 = vperm.xlu0 %4492, %v3002_v29   ;;  %3589 = vmatpush1.msra.mxu0 %v3423_v12  ;;  %v3396_v12 = vld [vmem:[#allocation21 + $0x158] sm:$0xff] }
 0x735   : > { %v3003_v62 = vmax.f32 %v2985_v7, 0.0  ;;  %3056 = vperm.xlu1 %4495, %v3001_v39   ;;  %3590 = vmatprep.subr.mxu0 %v3422_v40  ;;  %v3408_v39 = vld [vmem:[#allocation21 + $0x1b8] sm:$0xff]  ;;  %v3466_v7 = vld [vmem:[#allocation21 + $0x388] sm:$0xff]  ;;  %v3459_v40 = vld [vmem:[#allocation21 + $0x350] sm:$0xff] }
 0x736   : > { %v2989_v35 = vpop.f32.mrf.mxu0  ;;  %3591 = vmatpush1.msra.mxu0 %v3421_v23  ;;  %v3400_v16 = vld [vmem:[#allocation21 + $0x178] sm:$0xff]  ;;  %v3393_v23 = vld [vmem:[#allocation21 + $0x140] sm:$0xff] }
 0x737   : > { %v2990_v53 = vadd.f32 %v6215_v21, %v2989_v35  ;;  %3592 = vmatprep.subr.mxu0 %v3420_v57  ;;  %v3462_v35 = vld [vmem:[#allocation21 + $0x368] sm:$0xff]  ;;  %v3391_v57 = vld [vmem:[#allocation21 + $0x130] sm:$0xff] }
 0x738   : > { %v2991_v9 = vpop.f32.mrf.mxu0  ;;  %3197 = vperm.xlu0 %4492, %v3003_v62   ;;  %3593 = vmatpush1.msra.mxu0 %v3419_v5  ;;  %v3454_v5 = vld [vmem:[#allocation21 + $0x328] sm:$0xff] }
 0x739   : > { %v3004_v61 = vmax.f32 %v2990_v53, 0.0  ;;  %3061 = vperm.xlu1 %4495, %v3002_v29   ;;  %3594 = vmatprep.subr.mxu0 %v3418_v54  ;;  %v3468_v29 = vld [vmem:[#allocation21 + $0x398] sm:$0xff]  ;;  %v3461_v53 = vld [vmem:[#allocation21 + $0x360] sm:$0xff]  ;;  %v3395_v9 = vld [vmem:[#allocation21 + $0x150] sm:$0xff] }
 0x73a   : > { %v2994_v43 = vpop.f32.mrf.mxu0  ;;  %3595 = vmatpush1.msra.mxu0 %v3417_v31  ;;  %v3388_v54 = vld [vmem:[#allocation21 + $0x118] sm:$0xff]  ;;  %v3387_v31 = vld [vmem:[#allocation21 + $0x110] sm:$0xff] }
 0x73b   : > { %v2995_v6 = vadd.f32 %v6215_v21, %v2994_v43  ;;  %v3416_v21 = vld [vmem:[#allocation21 + $0x1f8] sm:$0xff]  ;;  %3596 = vmatprep.subr.mxu0 %v3480_v26  ;;  %v3457_v43 = vld [vmem:[#allocation21 + $0x340] sm:$0xff]  ;;  %v3386_v26 = vld [vmem:[#allocation21 + $0x108] sm:$0xff] }
 0x73c   : > { %3201 = vperm.xlu0 %4492, %v3004_v61   ;;  %v2996_v48 = vpop.f32.mrf.mxu0  ;;  %3525 = vmatprep.subr.mxu1 %v3416_v21  ;;  %v3451_v21 = vld [vmem:[#allocation21 + $0x310] sm:$0xff] }
 0x73d   : > { %v3005_v38 = vmax.f32 %v2995_v6, 0.0  ;;  %3066 = vperm.xlu1 %4495, %v3003_v62   ;;  %3526 = vmatpush2.msra.mxu1 %v3415_v55  ;;  %v3463_v62 = vld [vmem:[#allocation21 + $0x370] sm:$0xff]  ;;  %v3456_v6 = vld [vmem:[#allocation21 + $0x338] sm:$0xff]  ;;  %v3390_v48 = vld [vmem:[#allocation21 + $0x128] sm:$0xff] }
 0x73e   : > { %3597 = vmatpush2.msra.mxu0 %v3479_v63  ;;  %3527 = vmatprep.subr.mxu1 %v3414_v17  ;;  %v3450_v55 = vld [vmem:[#allocation21 + $0x308] sm:$0xff]  ;;  %v3385_v63 = vld [vmem:[#allocation21 + $0x100] sm:$0xff] }
 0x73f   : > { %3598 = vmatprep.subr.mxu0 %v3478_v11  ;;  %3528 = vmatpush2.msra.mxu1 %v3413_v36  ;;  %v3449_v17 = vld [vmem:[#allocation21 + $0x300] sm:$0xff] }
 0x740   : > { %3205 = vperm.xlu0 %4492, %v3005_v38   ;;  %3599 = vmatpush2.msra.mxu0 %v3477_v56  ;;  %v3668_v11 = vld [vmem:[%s6359_s17 + $0xf8] sm:$0xff] }
 0x741   : > { %3071 = vperm.xlu1 %4495, %v3004_v61   ;;  %3529 = vmatprep.subr.mxu1 %v3412_v10  ;;  %v3458_v61 = vld [vmem:[#allocation21 + $0x348] sm:$0xff]  ;;  %v3011_v56 = vld [vmem:[#allocation18 + $0x20] sm:$0xff] }
 0x742   : > { %3600 = vmatprep.subr.mxu0 %v3476_v18  ;;  %3530 = vmatpush2.msra.mxu1 %v3411_v30  ;;  %v3012_v10 = vld [vmem:[#allocation18 + $0x28] sm:$0xff]  ;;  %v3013_v18 = vld [vmem:[#allocation18 + $0x30] sm:$0xff] }
 0x743   : > { %3601 = vmatpush2.msra.mxu0 %v3475_v0  ;;  %3531 = vmatprep.subr.mxu1 %v3410_v52  ;;  %v3014_v0 = vld [vmem:[#allocation18 + $0x38] sm:$0xff]  ;;  %v3144_v52 = vld [vmem:[#allocation18 + $0x100] sm:$0xff] }
 0x744   : > { %3602 = vmatprep.subr.mxu0 %v3474_v41  ;;  %3532 = vmatpush2.msra.mxu1 %v3409_v34  ;;  %v3145_v41 = vld [vmem:[#allocation18 + $0x108] sm:$0xff] }
 0x745   : > { %3076 = vperm.xlu1 %4495, %v3005_v38   ;;  %3603 = vmatpush2.msra.mxu0 %v3473_v42  ;;  %v3453_v38 = vld [vmem:[#allocation21 + $0x320] sm:$0xff] }
 0x746   : > { %3533 = vmatprep.subr.mxu1 %v3408_v39  ;;  %3604 = vmatprep.subr.mxu0 %v3472_v50  ;;  %v3007_v42 = vld [vmem:[#allocation18] sm:$0xff]  ;;  %v3146_v39 = vld [vmem:[#allocation18 + $0x110] sm:$0xff]  ;;  %v3147_v50 = vld [vmem:[#allocation18 + $0x118] sm:$0xff] }
 0x747   : > { %3534 = vmatpush2.msra.mxu1 %v3407_v49  ;;  %3605 = vmatpush2.msra.mxu0 %v3471_v47  ;;  %v3148_v49 = vld [vmem:[#allocation18 + $0x120] sm:$0xff]  ;;  %v3149_v47 = vld [vmem:[#allocation18 + $0x128] sm:$0xff] }
 0x748   : > { %3535 = vmatprep.subr.mxu1 %v3406_v1  ;;  %3606 = vmatprep.subr.mxu0 %v3470_v19  ;;  %v3150_v1 = vld [vmem:[#allocation18 + $0x130] sm:$0xff]  ;;  %v3151_v19 = vld [vmem:[#allocation18 + $0x138] sm:$0xff] }
 0x749   : > { %3536 = vmatpush2.msra.mxu1 %v3405_v45  ;;  %3607 = vmatpush2.msra.mxu0 %v3469_v58  ;;  %v3008_v45 = vld [vmem:[#allocation18 + $0x8] sm:$0xff]  ;;  %v3009_v58 = vld [vmem:[#allocation18 + $0x10] sm:$0xff] }
 0x74a   : > { %3537 = vmatprep.subr.mxu1 %v3404_v59  ;;  %3608 = vmatprep.subr.mxu0 %v3468_v29  ;;  %v3010_v59 = vld [vmem:[#allocation18 + $0x18] sm:$0xff] }
 0x74b   : > { %3538 = vmatpush2.msra.mxu1 %v3403_v14  ;;  %3609 = vmatpush2.msra.mxu0 %v3467_v15 }
 0x74c   : > { %3539 = vmatprep.subr.mxu1 %v3402_v37  ;;  %3610 = vmatprep.subr.mxu0 %v3466_v7 }
 0x74d   : > { %3540 = vmatpush2.msra.mxu1 %v3401_v28  ;;  %3611 = vmatpush2.msra.mxu0 %v3465_v60 }
 0x74e   : > { %3541 = vmatprep.subr.mxu1 %v3400_v16  ;;  %3612 = vmatprep.subr.mxu0 %v3464_v2 }
 0x74f   : > { %3542 = vmatpush2.msra.mxu1 %v3399_v24  ;;  %3613 = vmatpush2.msra.mxu0 %v3463_v62 }
 0x750   : > { %3543 = vmatprep.subr.mxu1 %v3398_v4  ;;  %3614 = vmatprep.subr.mxu0 %v3462_v35 }
 0x751   : > { %3544 = vmatpush2.msra.mxu1 %v3397_v46  ;;  %3615 = vmatpush2.msra.mxu0 %v3461_v53  ;;  %v3152_v53 = vld [vmem:[#allocation18 + $0x140] sm:$0xff] }
 0x752   : > { %3545 = vmatprep.subr.mxu1 %v3396_v12  ;;  %3616 = vmatprep.subr.mxu0 %v3460_v51 }
 0x753   : > { %3546 = vmatpush2.msra.mxu1 %v3395_v9  ;;  %3617 = vmatpush2.msra.mxu0 %v3459_v40 }
 0x754   : > { %3547 = vmatprep.subr.mxu1 %v3394_v20  ;;  %3618 = vmatprep.subr.mxu0 %v3458_v61  ;;  %v3153_v20 = vld [vmem:[#allocation18 + $0x148] sm:$0xff]  ;;  %v3154_v61 = vld [vmem:[#allocation18 + $0x150] sm:$0xff] }
 0x755   : > { %3548 = vmatpush2.msra.mxu1 %v3393_v23  ;;  %3619 = vmatpush2.msra.mxu0 %v3457_v43  ;;  %v3155_v23 = vld [vmem:[#allocation18 + $0x158] sm:$0xff] }
 0x756   : > { %3549 = vmatprep.subr.mxu1 %v3392_v32  ;;  %3620 = vmatprep.subr.mxu0 %v3456_v6 }
 0x757   : > { %3550 = vmatpush2.msra.mxu1 %v3391_v57  ;;  %3621 = vmatpush2.msra.mxu0 %v3455_v33  ;;  %v3156_v33 = vld [vmem:[#allocation18 + $0x160] sm:$0xff] }
 0x758   : > { %3551 = vmatprep.subr.mxu1 %v3390_v48  ;;  %3622 = vmatprep.subr.mxu0 %v3454_v5  ;;  %v3015_v48 = vld [vmem:[#allocation18 + $0x40] sm:$0xff] }
 0x759   : > { %3552 = vmatpush2.msra.mxu1 %v3389_v44  ;;  %3623 = vmatpush2.msra.mxu0 %v3453_v38 }
 0x75a   : > { %3553 = vmatprep.subr.mxu1 %v3388_v54  ;;  %3624 = vmatprep.subr.mxu0 %v3452_v27 }
 0x75b   : > { %3554 = vmatpush2.msra.mxu1 %v3387_v31  ;;  %3625 = vmatpush2.msra.mxu0 %v3451_v21  ;;  %v3016_v31 = vld [vmem:[#allocation18 + $0x48] sm:$0xff]  ;;  %v3017_v21 = vld [vmem:[#allocation18 + $0x50] sm:$0xff] }
 0x75c   : > { %3555 = vmatprep.subr.mxu1 %v3386_v26  ;;  %3626 = vmatprep.subr.mxu0 %v3450_v55  ;;  %v3018_v26 = vld [vmem:[#allocation18 + $0x58] sm:$0xff] }
 0x75d   : > { %3556 = vmatpush2.msra.mxu1 %v3385_v63  ;;  %3627 = vmatpush2.msra.mxu0 %v3449_v17 }
 0x75e   : > { %4234 = vmatprep.subr.mxu1 %v3668_v11 }
 0x79e   : > { %v3042_v36 = vpop.permute.xlu0 %3041 }
 0x79f   : > { %v3079_v12 = vmul.f32 %v3042_v36, %v3007_v42  ;;  %v3080_v51 = vmul.f32 %v3042_v36, %v3008_v45  ;;  %v3081_v9 = vmul.f32 %v3042_v36, %v3009_v58  ;;  %v3082_v40 = vmul.f32 %v3042_v36, %v3010_v59  ;;  %v3157_v36 = vld [vmem:[#allocation18 + $0x168] sm:$0xff] }
 0x7a2   : > { %v3047_v30 = vpop.permute.xlu1 %3046 }
 0x7a3   : > { %v3178_v34 = vpop.permute.xlu0 %3177  ;;  %v3083_v29 = vmul.f32 %v3047_v30, %v3011_v56  ;;  %v3084_v14 = vmul.f32 %v3047_v30, %v3012_v10  ;;  %v3085_v15 = vmul.f32 %v3047_v30, %v3013_v18  ;;  %v3086_v37 = vmul.f32 %v3047_v30, %v3014_v0  ;;  %v3158_v56 = vld [vmem:[#allocation18 + $0x170] sm:$0xff]  ;;  %v3159_v10 = vld [vmem:[#allocation18 + $0x178] sm:$0xff] }
 0x7a4   : > { %v3208_v7 = vmul.f32 %v3178_v34, %v3144_v52  ;;  %v3209_v28 = vmul.f32 %v3178_v34, %v3145_v41  ;;  %v3210_v60 = vmul.f32 %v3178_v34, %v3146_v39  ;;  %v3211_v16 = vmul.f32 %v3178_v34, %v3147_v50  ;;  %v3160_v34 = vld [vmem:[#allocation18 + $0x180] sm:$0xff] }
 0x7a6   : > { %v3240_v5 = vadd.f32 %v3208_v7, %v3079_v12  ;;  %v3241_v44 = vadd.f32 %v3209_v28, %v3080_v51  ;;  %v3242_v38 = vadd.f32 %v3210_v60, %v3081_v9  ;;  %v3243_v54 = vadd.f32 %v3211_v16, %v3082_v40  ;;  %v3165_v51 = vld [vmem:[#allocation18 + $0x1a8] sm:$0xff]  ;;  %v3166_v9 = vld [vmem:[#allocation18 + $0x1b0] sm:$0xff]  ;;  %v3167_v40 = vld [vmem:[#allocation18 + $0x1b8] sm:$0xff] }
 0x7a7   : > { %v3182_v2 = vpop.permute.xlu1 %3181  ;;  %v3186_v24 = vpop.permute.xlu0 %3185 }
 0x7a8   : > { %v3212_v62 = vmul.f32 %v3182_v2, %v3148_v49  ;;  %v3213_v4 = vmul.f32 %v3182_v2, %v3149_v47  ;;  %v3214_v35 = vmul.f32 %v3182_v2, %v3150_v1  ;;  %v3215_v46 = vmul.f32 %v3182_v2, %v3151_v19  ;;  %v3161_v47 = vld [vmem:[#allocation18 + $0x188] sm:$0xff]  ;;  %v3162_v1 = vld [vmem:[#allocation18 + $0x190] sm:$0xff]  ;;  %v3163_v19 = vld [vmem:[#allocation18 + $0x198] sm:$0xff] }
 0x7a9   : > { %v3216_v55 = vmul.f32 %v3186_v24, %v3152_v53  ;;  %v3217_v63 = vmul.f32 %v3186_v24, %v3153_v20  ;;  %v3218_v17 = vmul.f32 %v3186_v24, %v3154_v61  ;;  %v3219_v11 = vmul.f32 %v3186_v24, %v3155_v23  ;;  %v3021_v2 = vld [vmem:[#allocation18 + $0x70] sm:$0xff]  ;;  %v3022_v24 = vld [vmem:[#allocation18 + $0x78] sm:$0xff] }
 0x7aa   : > { %v3244_v43 = vadd.f32 %v3212_v62, %v3083_v29  ;;  %v3245_v32 = vadd.f32 %v3213_v4, %v3084_v14  ;;  %v3246_v6 = vadd.f32 %v3214_v35, %v3085_v15  ;;  %v3247_v57 = vadd.f32 %v3215_v46, %v3086_v37  ;;  %v3019_v15 = vld [vmem:[#allocation18 + $0x60] sm:$0xff]  ;;  %v3020_v37 = vld [vmem:[#allocation18 + $0x68] sm:$0xff] }
 0x7ab   : > { %v3190_v27 = vpop.permute.xlu0 %3189  ;;  %v3164_v4 = vld [vmem:[#allocation18 + $0x1a0] sm:$0xff] }
 0x7ac   : > { %v3052_v18 = vpop.permute.xlu1 %3051  ;;  %v3272_v30 = vadd.f32 %v3244_v43, %v3240_v5  ;;  %v3285_v0 = vadd.f32 %v3245_v32, %v3241_v44  ;;  %v3298_v52 = vadd.f32 %v3246_v6, %v3242_v38  ;;  %v3311_v41 = vadd.f32 %v3247_v57, %v3243_v54  ;;  %v3023_v32 = vld [vmem:[#allocation18 + $0x80] sm:$0xff]  ;;  %v3024_v44 = vld [vmem:[#allocation18 + $0x88] sm:$0xff]  ;;  %v3025_v38 = vld [vmem:[#allocation18 + $0x90] sm:$0xff] }
 0x7ad   : > { %v3087_v42 = vmul.f32 %v3052_v18, %v3015_v48  ;;  %v3088_v39 = vmul.f32 %v3052_v18, %v3016_v31  ;;  %v3089_v50 = vmul.f32 %v3052_v18, %v3017_v21  ;;  %v3090_v49 = vmul.f32 %v3052_v18, %v3018_v26  ;;  %v3026_v54 = vld [vmem:[#allocation18 + $0x98] sm:$0xff] }
 0x7ae   : > { %v3220_v45 = vmul.f32 %v3190_v27, %v3156_v33  ;;  %v3221_v58 = vmul.f32 %v3190_v27, %v3157_v36  ;;  %v3222_v59 = vmul.f32 %v3190_v27, %v3158_v56  ;;  %v3223_v29 = vmul.f32 %v3190_v27, %v3159_v10  ;;  %v3168_v56 = vld [vmem:[#allocation18 + $0x1c0] sm:$0xff] }
 0x7af   : > { %v3194_v14 = vpop.permute.xlu0 %3193  ;;  %v3248_v7 = vadd.f32 %v3216_v55, %v3087_v42  ;;  %v3249_v28 = vadd.f32 %v3217_v63, %v3088_v39  ;;  %v3250_v60 = vadd.f32 %v3218_v17, %v3089_v50  ;;  %v3251_v16 = vadd.f32 %v3219_v11, %v3090_v49 }
 0x7b0   : > { %v3057_v62 = vpop.permute.xlu1 %3056  ;;  %v3224_v35 = vmul.f32 %v3194_v14, %v3160_v34  ;;  %v3225_v46 = vmul.f32 %v3194_v14, %v3161_v47  ;;  %v3226_v53 = vmul.f32 %v3194_v14, %v3162_v1  ;;  %v3227_v12 = vmul.f32 %v3194_v14, %v3163_v19  ;;  %v3171_v34 = vld [vmem:[#allocation18 + $0x1d8] sm:$0xff]  ;;  %v3027_v1 = vld [vmem:[#allocation18 + $0xa0] sm:$0xff]  ;;  %v3028_v19 = vld [vmem:[#allocation18 + $0xa8] sm:$0xff] }
 0x7b1   : > { %v3273_v20 = vadd.f32 %v3272_v30, %v3248_v7  ;;  %v3286_v61 = vadd.f32 %v3285_v0, %v3249_v28  ;;  %v3299_v23 = vadd.f32 %v3298_v52, %v3250_v60  ;;  %v3312_v43 = vadd.f32 %v3311_v41, %v3251_v16  ;;  %v3169_v52 = vld [vmem:[#allocation18 + $0x1c8] sm:$0xff]  ;;  %v3170_v41 = vld [vmem:[#allocation18 + $0x1d0] sm:$0xff]  ;;  %v3172_v7 = vld [vmem:[#allocation18 + $0x1e0] sm:$0xff] }
 0x7b2   : > { %v3091_v6 = vmul.f32 %v3057_v62, %v3019_v15  ;;  %v3092_v57 = vmul.f32 %v3057_v62, %v3020_v37  ;;  %v3093_v33 = vmul.f32 %v3057_v62, %v3021_v2  ;;  %v3094_v48 = vmul.f32 %v3057_v62, %v3022_v24  ;;  %v3030_v15 = vld [vmem:[#allocation18 + $0xb8] sm:$0xff]  ;;  %v3173_v24 = vld [vmem:[#allocation18 + $0x1e8] sm:$0xff]  ;;  %v3174_v62 = vld [vmem:[#allocation18 + $0x1f0] sm:$0xff] }
 0x7b3   : > { %v3198_v5 = vpop.permute.xlu0 %3197 }
 0x7b4   : > { %v3228_v27 = vmul.f32 %v3198_v5, %v3164_v4  ;;  %v3229_v31 = vmul.f32 %v3198_v5, %v3165_v51  ;;  %v3230_v21 = vmul.f32 %v3198_v5, %v3166_v9  ;;  %v3231_v26 = vmul.f32 %v3198_v5, %v3167_v40  ;;  %v3062_v55 = vpop.permute.xlu1 %3061  ;;  %v3175_v4 = vld [vmem:[#allocation18 + $0x1f8] sm:$0xff] }
 0x7b5   : > { %v3252_v63 = vadd.f32 %v3220_v45, %v3091_v6  ;;  %v3253_v17 = vadd.f32 %v3221_v58, %v3092_v57  ;;  %v3254_v11 = vadd.f32 %v3222_v59, %v3093_v33  ;;  %v3255_v36 = vadd.f32 %v3223_v29, %v3094_v48  ;;  %v3029_v29 = vld [vmem:[#allocation18 + $0xb0] sm:$0xff]  ;;  %v3034_v6 = vld [vmem:[#allocation18 + $0xd8] sm:$0xff] }
 0x7b6   : > { %v3095_v10 = vmul.f32 %v3062_v55, %v3023_v32  ;;  %v3096_v18 = vmul.f32 %v3062_v55, %v3024_v44  ;;  %v3097_v30 = vmul.f32 %v3062_v55, %v3025_v38  ;;  %v3098_v0 = vmul.f32 %v3062_v55, %v3026_v54  ;;  %v3033_v32 = vld [vmem:[#allocation18 + $0xd0] sm:$0xff] }
 0x7b7   : > { %v3274_v42 = vadd.f32 %v3273_v20, %v3252_v63  ;;  %v3287_v39 = vadd.f32 %v3286_v61, %v3253_v17  ;;  %v3300_v50 = vadd.f32 %v3299_v23, %v3254_v11  ;;  %v3313_v49 = vadd.f32 %v3312_v43, %v3255_v36  ;;  %v3202_v47 = vpop.permute.xlu0 %3201  ;;  %v3031_v61 = vld [vmem:[#allocation18 + $0xc0] sm:$0xff]  ;;  %v3032_v43 = vld [vmem:[#allocation18 + $0xc8] sm:$0xff] }
 0x7b8   : > { %v3256_v14 = vadd.f32 %v3224_v35, %v3095_v10  ;;  %v3257_v45 = vadd.f32 %v3225_v46, %v3096_v18  ;;  %v3258_v58 = vadd.f32 %v3226_v53, %v3097_v30  ;;  %v3259_v59 = vadd.f32 %v3227_v12, %v3098_v0  ;;  %v3067_v37 = vpop.permute.xlu1 %3066  ;;  %v3035_v17 = vld [vmem:[#allocation18 + $0xe0] sm:$0xff]  ;;  %v3036_v18 = vld [vmem:[#allocation18 + $0xe8] sm:$0xff]  ;;  %v3037_v30 = vld [vmem:[#allocation18 + $0xf0] sm:$0xff] }
 0x7b9   : > { %v3232_v28 = vmul.f32 %v3202_v47, %v3168_v56  ;;  %v3233_v60 = vmul.f32 %v3202_v47, %v3169_v52  ;;  %v3234_v16 = vmul.f32 %v3202_v47, %v3170_v41  ;;  %v3235_v2 = vmul.f32 %v3202_v47, %v3171_v34  ;;  %v3038_v0 = vld [vmem:[#allocation18 + $0xf8] sm:$0xff] }
 0x7ba   : > { %v3275_v51 = vadd.f32 %v3274_v42, %v3256_v14  ;;  %v3288_v9 = vadd.f32 %v3287_v39, %v3257_v45  ;;  %v3301_v40 = vadd.f32 %v3300_v50, %v3258_v58  ;;  %v3314_v20 = vadd.f32 %v3313_v49, %v3259_v59 }
 0x7bb   : > { %v3099_v35 = vmul.f32 %v3067_v37, %v3027_v1  ;;  %v3100_v46 = vmul.f32 %v3067_v37, %v3028_v19  ;;  %v3101_v53 = vmul.f32 %v3067_v37, %v3029_v29  ;;  %v3102_v12 = vmul.f32 %v3067_v37, %v3030_v15  ;;  %v3206_v23 = vpop.permute.xlu0 %3205 }
 0x7bc   : > { %v3236_v57 = vmul.f32 %v3206_v23, %v3172_v7  ;;  %v3237_v33 = vmul.f32 %v3206_v23, %v3173_v24  ;;  %v3238_v48 = vmul.f32 %v3206_v23, %v3174_v62  ;;  %v3239_v5 = vmul.f32 %v3206_v23, %v3175_v4  ;;  %v3072_v44 = vpop.permute.xlu1 %3071 }
 0x7bd   : > { %v3260_v38 = vadd.f32 %v3228_v27, %v3099_v35  ;;  %v3261_v54 = vadd.f32 %v3229_v31, %v3100_v46  ;;  %v3262_v55 = vadd.f32 %v3230_v21, %v3101_v53  ;;  %v3263_v63 = vadd.f32 %v3231_v26, %v3102_v12  ;;  %v3006_v46 = vld [vmem:[#allocation19] sm:$0xf] }
 0x7be   : > { %v3103_v11 = vmul.f32 %v3072_v44, %v3031_v61  ;;  %v3104_v36 = vmul.f32 %v3072_v44, %v3032_v43  ;;  %v3105_v56 = vmul.f32 %v3072_v44, %v3033_v32  ;;  %v3106_v10 = vmul.f32 %v3072_v44, %v3034_v6 }
 0x7bf   : > { %v3276_v52 = vadd.f32 %v3275_v51, %v3260_v38  ;;  %v3289_v41 = vadd.f32 %v3288_v9, %v3261_v54  ;;  %v3302_v34 = vadd.f32 %v3301_v40, %v3262_v55  ;;  %v3315_v42 = vadd.f32 %v3314_v20, %v3263_v63 }
 0x7c0   : > { %v3264_v39 = vadd.f32 %v3232_v28, %v3103_v11  ;;  %v3265_v50 = vadd.f32 %v3233_v60, %v3104_v36  ;;  %v3266_v49 = vadd.f32 %v3234_v16, %v3105_v56  ;;  %v3267_v47 = vadd.f32 %v3235_v2, %v3106_v10  ;;  %v3077_v27 = vpop.permute.xlu1 %3076 }
 0x7c1   : > { %v3107_v31 = vmul.f32 %v3077_v27, %v3035_v17  ;;  %v3108_v21 = vmul.f32 %v3077_v27, %v3036_v18  ;;  %v3109_v26 = vmul.f32 %v3077_v27, %v3037_v30  ;;  %v3110_v1 = vmul.f32 %v3077_v27, %v3038_v0  ;;  %v3648_v27 = vld [vmem:[%s6359_s17 + $0x58] sm:$0xff] }
 0x7c2   : > { %v3277_v19 = vadd.f32 %v3276_v52, %v3264_v39  ;;  %v3290_v14 = vadd.f32 %v3289_v41, %v3265_v50  ;;  %v3303_v45 = vadd.f32 %v3302_v34, %v3266_v49  ;;  %v3316_v58 = vadd.f32 %v3315_v42, %v3267_v47  ;;  %v3651_v34 = vld [vmem:[%s6359_s17 + $0x70] sm:$0xff]  ;;  %v3666_v42 = vld [vmem:[%s6359_s17 + $0xe8] sm:$0xff]  ;;  %v3665_v50 = vld [vmem:[%s6359_s17 + $0xe0] sm:$0xff] }
 0x7c3   : > { %v3268_v59 = vadd.f32 %v3236_v57, %v3107_v31  ;;  %v3269_v29 = vadd.f32 %v3237_v33, %v3108_v21  ;;  %v3270_v15 = vadd.f32 %v3238_v48, %v3109_v26  ;;  %v3271_v37 = vadd.f32 %v3239_v5, %v3110_v1  ;;  %v3650_v39 = vld [vmem:[%s6359_s17 + $0x68] sm:$0xff]  ;;  %v3649_v49 = vld [vmem:[%s6359_s17 + $0x60] sm:$0xff]  ;;  %v3664_v47 = vld [vmem:[%s6359_s17 + $0xd8] sm:$0xff] }
 0x7c4   : > { %v3332_v57 = vrot.slane %v3006_v46, %v5362_v13  ;;  %v3340_v33 = vrot.slane %v3006_v46, %v1114_v25  ;;  %v3328_v48 = vrot.slane %v3006_v46, %v5356_v8  ;;  %v3336_v5 = vrot.slane %v3006_v46, %v1062_v22  ;;  %v3667_v22 = vld [vmem:[%s6359_s17 + $0xf0] sm:$0xff]  ;;  %v3662_v26 = vld [vmem:[%s6359_s17 + $0xc8] sm:$0xff] }
 0x7c5   : > { %v3278_v7 = vadd.f32 %v3277_v19, %v3268_v59  ;;  %v3291_v24 = vadd.f32 %v3290_v14, %v3269_v29  ;;  %v3304_v62 = vadd.f32 %v3303_v45, %v3270_v15  ;;  %v3317_v28 = vadd.f32 %v3316_v58, %v3271_v37  ;;  %v3663_v31 = vld [vmem:[%s6359_s17 + $0xd0] sm:$0xff]  ;;  %v3646_v1 = vld [vmem:[%s6359_s17 + $0x48] sm:$0xff]  ;;  %v3661_v19 = vld [vmem:[%s6359_s17 + $0xc0] sm:$0xff] }
 0x7c6   : > { %v3647_v21 = vld [vmem:[%s6359_s17 + $0x50] sm:$0xff]  ;;  %v3645_v14 = vld [vmem:[%s6359_s17 + $0x40] sm:$0xff]  ;;  %v3660_v45 = vld [vmem:[%s6359_s17 + $0xb8] sm:$0xff] }
 0x7c7   : > { %v3279_v60 = vrot.slane %v3278_v7, 4  ;;  %v3292_v16 = vrot.slane %v3291_v24, 4  ;;  %v3305_v2 = vrot.slane %v3304_v62, 4  ;;  %v3318_v4 = vrot.slane %v3317_v28, 4  ;;  %v3644_v58 = vld [vmem:[%s6359_s17 + $0x38] sm:$0xff]  ;;  %v3659_v59 = vld [vmem:[%s6359_s17 + $0xb0] sm:$0xff] }
 0x7c8   : > { %v3643_v29 = vld [vmem:[%s6359_s17 + $0x30] sm:$0xff]  ;;  %v3658_v15 = vld [vmem:[%s6359_s17 + $0xa8] sm:$0xff] }
 0x7c9   : > { %v3280_v51 = vadd.f32 %v3279_v60, %v3278_v7  ;;  %v3293_v9 = vadd.f32 %v3292_v16, %v3291_v24  ;;  %v3306_v40 = vadd.f32 %v3305_v2, %v3304_v62  ;;  %v3319_v20 = vadd.f32 %v3318_v4, %v3317_v28  ;;  %v3642_v37 = vld [vmem:[%s6359_s17 + $0x28] sm:$0xff]  ;;  %v3657_v7 = vld [vmem:[%s6359_s17 + $0xa0] sm:$0xff]  ;;  %v3656_v62 = vld [vmem:[%s6359_s17 + $0x98] sm:$0xff] }
 0x7ca   : > { %v3641_v24 = vld [vmem:[%s6359_s17 + $0x20] sm:$0xff]  ;;  %v3640_v28 = vld [vmem:[%s6359_s17 + $0x18] sm:$0xff]  ;;  %v3655_v60 = vld [vmem:[%s6359_s17 + $0x90] sm:$0xff] }
 0x7cb   : > { %v3281_v61 = vrot.slane %v3280_v51, 2  ;;  %v3307_v35 = vrot.slane %v3306_v40, 2  ;;  %v3294_v53 = vrot.slane %v3293_v9, 2  ;;  %v3320_v12 = vrot.slane %v3319_v20, 2  ;;  %v3639_v16 = vld [vmem:[%s6359_s17 + $0x10] sm:$0xff]  ;;  %v3654_v2 = vld [vmem:[%s6359_s17 + $0x88] sm:$0xff] }
 0x7cc   : > { %v3638_v4 = vld [vmem:[%s6359_s17 + $0x8] sm:$0xff] }
 0x7cd   : > { %v3282_v23 = vadd.f32 %v3281_v61, %v3280_v51  ;;  %v3308_v43 = vadd.f32 %v3307_v35, %v3306_v40  ;;  %v3295_v32 = vadd.f32 %v3294_v53, %v3293_v9  ;;  %v3321_v6 = vadd.f32 %v3320_v12, %v3319_v20  ;;  %v3653_v51 = vld [vmem:[%s6359_s17 + $0x80] sm:$0xff]  ;;  %v3481_v40 = vld [vmem:[#allocation22] sm:$0x3] }
 0x7ce   : > { %v3637_v9 = vld [vmem:[%s6359_s17] sm:$0xff]  ;;  %v3486_v20 = vrot.slane %v3481_v40, %v5356_v8  ;;  %v3490_v61 = vrot.slane %v3481_v40, %v5362_v13 }
 0x7cf   : > { %v3283_v44 = vrot.slane %v3282_v23, 1  ;;  %v3309_v38 = vrot.slane %v3308_v43, 1  ;;  %v3296_v54 = vrot.slane %v3295_v32, 1  ;;  %v3322_v55 = vrot.slane %v3321_v6, 1  ;;  %v3669_v8 = vld [vmem:[%s6360_s18] sm:$0x1] }
 0x7d1   : > { %v3284_v63 = vadd.f32 %v3283_v44, %v3282_v23  ;;  %v3310_v17 = vadd.f32 %v3309_v38, %v3308_v43  ;;  %v3297_v11 = vadd.f32 %v3296_v54, %v3295_v32  ;;  %v3323_v36 = vadd.f32 %v3322_v55, %v3321_v6 }
 0x7d3   : > { %v3346_v56 = vadd.f32 %v3332_v57, %v3297_v11  ;;  %v3348_v10 = vadd.f32 %v3340_v33, %v3323_v36  ;;  %v3345_v18 = vadd.f32 %v3328_v48, %v3284_v63  ;;  %v3347_v30 = vadd.f32 %v3336_v5, %v3310_v17 }
 0x7d5   : > { %v3350_v0 = vmax.f32 %v3346_v56, 0.0  ;;  %v3352_v52 = vmax.f32 %v3348_v10, 0.0  ;;  %v3349_v25 = vmax.f32 %v3345_v18, 0.0  ;;  %v3351_v41 = vmax.f32 %v3347_v30, 0.0 }
 0x7d7   : > { %3557 = vmatprep.mubr.f32.mxu1 %v3350_v0  ;;  %3628 = vmatprep.mubr.f32.mxu0 %v3352_v52 }
 0x7d8   : > { %3558 = vmatmul.mubr.f32.vlgmr.msra.gmra.mxu1 %v3349_v25  ;;  %3629 = vmatmul.mubr.f32.vlgmr.msra.gmra.mxu0 %v3351_v41 }
 0x7d9   : > { %4235 = vmatpush3.msra.mxu1 %v3652_v3 }
 0x7da   : > { %4236 = vmatprep.subr.mxu1 %v3667_v22 }
 0x7db   : > { %4237 = vmatpush3.msra.mxu1 %v3651_v34 }
 0x7dc   : > { %4238 = vmatprep.subr.mxu1 %v3666_v42 }
 0x7dd   : > { %4239 = vmatpush3.msra.mxu1 %v3650_v39 }
 0x7de   : > { %4240 = vmatprep.subr.mxu1 %v3665_v50 }
 0x7df   : > { %4241 = vmatpush3.msra.mxu1 %v3649_v49 }
 0x7e0   : > { %4242 = vmatprep.subr.mxu1 %v3664_v47 }
 0x7e1   : > { %4243 = vmatpush3.msra.mxu1 %v3648_v27 }
 0x7e2   : > { %4244 = vmatprep.subr.mxu1 %v3663_v31 }
 0x7e3   : > { %4245 = vmatpush3.msra.mxu1 %v3647_v21 }
 0x7e4   : > { %4246 = vmatprep.subr.mxu1 %v3662_v26 }
 0x7e5   : > { %4247 = vmatpush3.msra.mxu1 %v3646_v1 }
 0x7e6   : > { %4248 = vmatprep.subr.mxu1 %v3661_v19 }
 0x7e7   : > { %4249 = vmatpush3.msra.mxu1 %v3645_v14 }
 0x7e8   : > { %4250 = vmatprep.subr.mxu1 %v3660_v45 }
 0x7e9   : > { %4251 = vmatpush3.msra.mxu1 %v3644_v58 }
 0x7ea   : > { %4252 = vmatprep.subr.mxu1 %v3659_v59 }
 0x7eb   : > { %4253 = vmatpush3.msra.mxu1 %v3643_v29 }
 0x7ec   : > { %4254 = vmatprep.subr.mxu1 %v3658_v15 }
 0x7ed   : > { %4255 = vmatpush3.msra.mxu1 %v3642_v37 }
 0x7ee   : > { %4256 = vmatprep.subr.mxu1 %v3657_v7 }
 0x7ef   : > { %4257 = vmatpush3.msra.mxu1 %v3641_v24 }
 0x7f0   : > { %4258 = vmatprep.subr.mxu1 %v3656_v62 }
 0x7f1   : > { %4259 = vmatpush3.msra.mxu1 %v3640_v28 }
 0x7f2   : > { %4260 = vmatprep.subr.mxu1 %v3655_v60 }
 0x7f3   : > { %4261 = vmatpush3.msra.mxu1 %v3639_v16 }
 0x7f4   : > { %4262 = vmatprep.subr.mxu1 %v3654_v2 }
 0x7f5   : > { %4263 = vmatpush3.msra.mxu1 %v3638_v4 }
 0x7f6   : > { %4264 = vmatprep.subr.mxu1 %v3653_v51 }
 0x7f7   : > { %4265 = vmatpush3.msra.mxu1 %v3637_v9 }
 0x898   : > { %v3559_v35 = vpop.f32.mrf.mxu1  ;;  %v3630_v46 = vpop.f32.mrf.mxu0 }
 0x899   : > { %v3560_v53 = vadd.f32 %v3559_v35, %v3486_v20 }
 0x89a   : > { %v3561_v12 = vpop.f32.mrf.mxu1  ;;  %v3632_v32 = vpop.f32.mrf.mxu0 }
 0x89b   : > { %v3562_v23 = vadd.f32 %v3561_v12, %v3490_v61  ;;  %v3631_v43 = vadd.f32 %v3630_v46, %v3560_v53 }
 0x89d   : > { %v3633_v6 = vadd.f32 %v3632_v32, %v3562_v23  ;;  %v3635_v33 = vmax.f32 %v3631_v43, 0.0 }
 0x89f   : > { %v3636_v57 = vmax.f32 %v3633_v6, 0.0 }
 0x8a1   : > { %3734 = vmatprep.mubr.f32.mxu1 %v3636_v57 }
 0x8a2   : > { %3735 = vmatmul.mubr.f32.vlgmr.msra.gmra.mxu1 %v3635_v33 }
 0x962   : > { %v4266_v48 = vpop.f32.mrf.mxu1 }
 0x964   : > { %v4267_v5 = vpop.f32.mrf.mxu1 }
 0x965   : > { %v4268_v13 = vadd.f32 %v4267_v5, %v4266_v48 }
 0x967   : > { %v3737_v44 = vadd.f32 %v4268_v13, %v3669_v8 }
 0x969   : > { %3741 = vst.msk [vmem:[%s784_s26] sm:$0x1] %vm3740_vm5, %v3737_v44 }
 0x96a PF: > { %s37_s0 = sadd.s32 1, %s4898_s0  }
 0x96b   : > { %p34_p4 = scmp.ge.s32.totalorder %s37_s0, 4  }
 0x96d   :  { %36 = sbr.rel (!%p34_p4) target bundleno = 14 (0xe), region = 184 }
 0x972   :  { %3759 = vsyncpa [#allocation3], 1 }
 0x973   :  { %3761 = vsyncpa [#allocation3 + $0x1], 1 }
 0x974   :  { %3762 = vsyncpa [#allocation5], 1 }
 0x975   :  { %3763 = vsyncpa [#allocation8], 1 }
 0x976   :  { %3764 = vsyncpa [#allocation11], 1 }
 0x977   :  { %3765 = vsyncpa [#allocation14], 1 }
 0x978   :  { %3766 = vsyncpa [#allocation17], 1 }
 0x979   :  { %3767 = vsyncpa [#allocation20], 1 }
 0x97a   :  { %3768 = vsyncpa [#allocation23], 1 }

// kernel: pointnet_forward.3
= control target key start
LH: loop header
LB: loop body
LE: loop exit
PB: predicated region body
PF: predicated region fallthrough
CT: control target
= control target key end

     0   :  { %s6164_s0 = inlined_call_operand.vmem [shape: f32[2,64,2], index: 0, kind: input, shape index: {}]   ;;  %s6165_s1 = inlined_call_operand.vmem [shape: f32[2,2,2], index: 1, kind: input, shape index: {}]   ;;  %s6166_s2 = inlined_call_operand.vmem [shape: f32[2,64], index: 2, kind: input, shape index: {}]   ;;  %s6167_s3 = inlined_call_operand.vmem [shape: f32[1,64], index: 3, kind: input, shape index: {}]   ;;  %s6168_s4 = inlined_call_operand.vmem [shape: f32[64,128], index: 4, kind: input, shape index: {}]   ;;  %s6169_s5 = inlined_call_operand.vmem [shape: f32[1,128], index: 5, kind: input, shape index: {}]   ;;  %s6170_s6 = inlined_call_operand.vmem [shape: f32[128,1024], index: 6, kind: input, shape index: {}]   ;;  %s6171_s7 = inlined_call_operand.vmem [shape: f32[1,1024], index: 7, kind: input, shape index: {}]   ;;  %s6172_s8 = inlined_call_operand.vmem [shape: f32[1024,512], index: 8, kind: input, shape index: {}]   ;;  %s6173_s9 = inlined_call_operand.vmem [shape: f32[1,512], index: 9, kind: input, shape index: {}]   ;;  %s6174_s10 = inlined_call_operand.hbm [shape: f32[512,256], index: 10, kind: input, shape index: {}]   ;;  %s6175_s11 = inlined_call_operand.vmem [shape: f32[1,256], index: 11, kind: input, shape index: {}]   ;;  %s6176_s12 = inlined_call_operand.vmem [shape: f32[256,2], index: 12, kind: input, shape index: {}]   ;;  %s6177_s13 = inlined_call_operand.vmem [shape: f32[1,2], index: 13, kind: input, shape index: {}]   ;;  %s6178_s14 = inlined_call_operand.hbm [shape: f32[2,1,2], index: 14, kind: output, shape index: {}]  }
   0x1   :  { %6182 = sst [smem:[#allocation13_spill]] %s6164_s0 }
   0x2   :  { %6183 = sst [smem:[#allocation14_spill]] %s6174_s10 }
   0x3   :  { %19 = vsyncpa [#allocation4], 0 }
   0x4   :  { %20 = vsyncpa [#allocation5], 0 }
   0x5   :  { %22 = vsyncpa [#allocation5 + $0x1], 0  ;;  %s3654_s29 = smov 0   ;;  %s3656_s30 = smov 0  }
   0x6   :  { %s3658_s15 = smov 0   ;;  %s3660_s16 = smov 0  }
   0x7   :  { %s3662_s17 = smov 0   ;;  %s3664_s18 = smov 0  }
   0x8 LB: > { %6184 = sst [smem:[#allocation9_spill]] %s3557_s15  ;;  %s3274_s19 = sadd.s32 4294967295, %s3569_s18   ;;  %s3569_s18 = sphi %s3664_s18, %s28_s18   ;;  %s3565_s17 = sphi %s3662_s17, %s6197_s17   ;;  %s3561_s16 = sphi %s3660_s16, %s6196_s16   ;;  %s3557_s15 = sphi %s3658_s15, %s6195_s15   ;;  %s3553_s30 = sphi %s3656_s30, %s6199_s30   ;;  %s3549_s29 = sphi %s3654_s29, %s6198_s29  }
   0x9   : > { %6185 = sst [smem:[#allocation10_spill]] %s3565_s17  ;;  %s3275_s20 = sadd.s32 4294967294, %s3569_s18  }
   0xa   : > { %s40_s21 = sadd.s32 1, %s3565_s17  ;;  %s353_s22 = sadd.s32 1, %s3557_s15 }
   0xb   : > { %p42_p0 = scmp.ge.s32.totalorder %s40_s21, 2  ;;  %p363_p1 = scmp.ne.s32.totalorder %s3557_s15, %s3553_s30 }
   0xc   : > { %p364_p2 = scmp.eq.s32.totalorder %s3274_s19, 1  ;;  %p369_p3 = scmp.ne.s32.totalorder %s3553_s30, %s3549_s29 }
   0xd   : > { %s6201_s21 = smov (%p42_p0, %s40_s21), 0  ;;  %p370_p5 = scmp.eq.s32.totalorder %s3275_s20, 1 }
   0xe   : > { %6186 = sst [smem:[#allocation11_spill]] %s6201_s21  ;;  %p3694_p4 = por %p364_p2, %p363_p1 }
   0xf   : > { %s350_s24 = ssub.s32 %s3565_s17, %s6201_s21  ;;  %p3276_p6 = scmp.ge.s32.totalorder %s3569_s18, 1 }
  0x10   : > { %p351_p7 = scmp.eq.s32.totalorder %s350_s24, 0  ;;  %p3701_p8 = por %p370_p5, %p369_p3 }
  0x11   : > { %p377_p9 = scmp.lt.s32.totalorder %s3569_s18, 3  ;;  %p3713_p11 = scmp.eq.s32.totalorder %s3274_s19, 0 }
  0x12   : > { %s3707_s26 = scalar_select %p351_p7, %s3557_s15, %s353_s22  }
  0x13   : > { %p3709_p10 = pnand %p3276_p6, %p377_p9  ;;  %s3571_s20 = smov [#allocation3]  }
  0x14   : > { %6189 = sst [smem:[#allocation12_spill]] %s3707_s26  ;;  %s413_s24 = sshll.u32 %s3571_s20, 4  ;;  %s414_s24 = int_to_ptr.vmem [resolvable:$true] %s413_s24 }
  0x15   : > { %p3383_p12 = pneg %p3709_p10  ;;  %s3474_s22 = scalar_lea.vmem %s414_s24, 16384 }
  0x16   : > { %p3475_p1 = scmp.ne.s32.totalorder %s414_s24, %s3474_s22  ;;  %p3482_p5 = scmp.lt.s32.totalorder %s414_s24, %s414_s24 }
  0x17   : > { %p3384_p13 = pnand %p3713_p11, %p3383_p12  ;;  %p3483_p6 = scmp.lt.s32.totalorder %s3474_s22, %s3474_s22 }
  0x19   : > { %p3465_p0 = pneg %p3384_p13  ;;  %p3484_p7 = por %p3483_p6, %p3482_p5 }
  0x1b   : > { %p3477_p2 = pnand %p3475_p1, %p3465_p0 }
  0x1d   : > { %p3478_p3 = pneg %p3477_p2 }
  0x1f   : > { %p3485_p9 = pnand %p3484_p7, %p3478_p3 }
  0x21   : > { %3488 = shalt.err (!%p3485_p9)
}
  0x22   : > { %s3572_s19 = smov 256   ;;  %s3573_s21 = smov 16  }
  0x23   : > { %s6192_s10 = sld [smem:[#allocation14_spill]] }
  0x25   : > { %458 = sbr.rel (%p3709_p10) target bundleno = 1503 (0x5df), region = 76 }
  0x29   : > { %3386 = dma.hbm_to_vmem [thread:$0]  (!%p3384_p13), %s6192_s10, 16384, %s414_s24, [#allocation4], %s3572_s19, %s3572_s19, %s3573_s21  }
  0x2a   : > { %3540 = dma.done.wait (%p3713_p11), [#allocation4], 16384  }
  0x2b   : > { %3542 = vsyncadd (%p3713_p11), [#allocation4], 4294950912  ;;  %p512_p12 = scmp.lt.s32.totalorder %s3561_s16, 1  ;;  %v3574_v0 = vmov 0   ;;  %s6193_s0 = sld [smem:[#allocation13_spill]]  ;;  %v695_v4 = vld [vmem:[%s6168_s4 + $0x38] sm:$0xff]  ;;  %v545_v45 = vlaneseq }
  0x2c   : > { %3451 = vset.pattern.permute.xlu1 %v3574_v0  ;;  %3449 = vset.pattern.permute.xlu0 %v3574_v0  ;;  %v694_v5 = vld [vmem:[%s6168_s4 + $0x30] sm:$0xff]  ;;  %v3575_v6 = vmov 1   ;;  %v693_v7 = vld [vmem:[%s6168_s4 + $0x28] sm:$0xff]  ;;  %v692_v8 = vld [vmem:[%s6168_s4 + $0x20] sm:$0xff]  ;;  %vm703_vm0 = vcmask 523264   ;;  %s509_s22 = sand.u32 1, %s3553_s30  }
  0x2d   : > { %s513_s20 = scalar_select %p512_p12, %s3561_s16, 1  ;;  %3349 = vmatprep.subr.mxu0 %v695_v4  ;;  %v691_v11 = vld [vmem:[%s6168_s4 + $0x18] sm:$0xff]  ;;  %v690_v12 = vld [vmem:[%s6168_s4 + $0x10] sm:$0xff]  ;;  %v689_v14 = vld [vmem:[%s6168_s4 + $0x8] sm:$0xff]  ;;  %v3857_v46 = vshrl.u32 %v545_v45, 7  ;;  %vm3166_vm1 = vcmask 8192  }
  0x2e   : > { %3350 = vmatpush3.msra.mxu0 %v695_v4  ;;  %v688_v15 = vld [vmem:[%s6168_s4] sm:$0xff]  ;;  %v962_v19 = vld [vmem:[%s6170_s6 + $0x3c8] sm:$0xff]  ;;  %v964_v20 = vld [vmem:[%s6170_s6 + $0x3d8] sm:$0xff]  ;;  %s3169_s15 = scalar_lea.sflag [#allocation5], %s509_s22  ;;  %s3578_s19 = smov [#allocation6]  }
  0x2f   : > { %s3297_s17 = sshll.u32 %s513_s20, 6  ;;  %s3283_s21 = sshll.u32 %s513_s20, 1  ;;  %3351 = vmatprep.subr.mxu0 %v694_v5  ;;  %v961_v21 = vld [vmem:[%s6170_s6 + $0x3c0] sm:$0xff]  ;;  %1011 = vmatprep.subr.mxu1 %v962_v19  ;;  %v954_v22 = vld [vmem:[%s6170_s6 + $0x388] sm:$0xff]  ;;  %v3860_v47 = vsub.s32 0, %v3857_v46  ;;  %v3866_v49 = vsub.s32 1, %v3857_v46 }
  0x30   : > { %s524_s28 = scalar_lea.vmem %s6165_s1, %s3283_s21  ;;  %3352 = vmatpush3.msra.mxu0 %v694_v5  ;;  %1012 = vmatpush1.msra.mxu1 %v961_v21  ;;  %v953_v23 = vld [vmem:[%s6170_s6 + $0x380] sm:$0xff]  ;;  %v946_v24 = vld [vmem:[%s6170_s6 + $0x348] sm:$0xff]  ;;  %v955_v21 = vld [vmem:[%s6170_s6 + $0x390] sm:$0xff]  ;;  %s510_s20 = scalar_lea.vmem [#allocation6], %s509_s22 }
  0x31   : > { %s3737_s24 = scalar_lea.vmem %s6193_s0, %s3297_s17  ;;  %v538_v1 = vld [vmem:[%s524_s28] sm:$0x3]  ;;  %3353 = vmatprep.subr.mxu0 %v693_v7  ;;  %1013 = vmatprep.subr.mxu1 %v954_v22  ;;  %v938_v26 = vld [vmem:[%s6170_s6 + $0x308] sm:$0xff]  ;;  %v915_v45 = vld [vmem:[%s6170_s6 + $0x250] sm:$0xff]  ;;  %s3181_s26 = sshll.u32 %s510_s20, 4  ;;  %s3182_s26 = int_to_ptr.vmem [resolvable:$true] %s3181_s26 }
  0x32   : > { %v530_v2 = vld [vmem:[%s3737_s24] sm:$0xff]  ;;  %542 = vperm.xlu0 %3449, %v538_v1   ;;  %v531_v3 = vld [vmem:[%s3737_s24 + $0x8] sm:$0xff]  ;;  %3354 = vmatpush3.msra.mxu0 %v693_v7  ;;  %v533_v9 = vld [vmem:[%s3737_s24 + $0x18] sm:$0xff]  ;;  %s3489_s27 = scalar_lea.vmem %s3182_s26, 16  ;;  %s3493_s28 = sshll.u32 %s3578_s19, 4  ;;  %s3494_s28 = int_to_ptr.vmem [resolvable:$false] %s3493_s28 }
  0x33   : > { %564 = vperm.xlu1 %3451, %v530_v2   ;;  %v532_v10 = vld [vmem:[%s3737_s24 + $0x10] sm:$0xff]  ;;  %3355 = vmatprep.subr.mxu0 %v692_v8  ;;  %v534_v13 = vld [vmem:[%s3737_s24 + $0x20] sm:$0xff]  ;;  %v537_v16 = vld [vmem:[%s3737_s24 + $0x38] sm:$0xff]  ;;  %p3490_p10 = scmp.ne.s32.totalorder %s3182_s26, %s3489_s27  ;;  %p3496_p0 = scmp.lt.s32.totalorder %s3182_s26, %s3494_s28 }
  0x34   : > { %3356 = vmatpush3.msra.mxu0 %v692_v8  ;;  %v535_v17 = vld [vmem:[%s3737_s24 + $0x28] sm:$0xff]  ;;  %v536_v18 = vld [vmem:[%s3737_s24 + $0x30] sm:$0xff]  ;;  %v945_v25 = vld [vmem:[%s6170_s6 + $0x340] sm:$0xff]  ;;  %1014 = vmatpush1.msra.mxu1 %v953_v23  ;;  %s3294_s24 = sshll.u32 %s3561_s16, 4  ;;  %s3495_s16 = scalar_lea.vmem %s3494_s28, 32 }
  0x35   : > { %3357 = vmatprep.subr.mxu0 %v691_v11  ;;  %1015 = vmatprep.subr.mxu1 %v946_v24  ;;  %v937_v27 = vld [vmem:[%s6170_s6 + $0x300] sm:$0xff]  ;;  %v930_v28 = vld [vmem:[%s6170_s6 + $0x2c8] sm:$0xff]  ;;  %v948_v23 = vld [vmem:[%s6170_s6 + $0x358] sm:$0xff]  ;;  %s3179_s10 = scalar_lea.hbm %s6178_s14, %s3294_s24  ;;  %p3491_p11 = pnand %p3490_p10, %p3694_p4 }
  0x36   : > { %3450 = vset.pattern.permute.xlu0 %v3575_v6  ;;  %3358 = vmatpush3.msra.mxu0 %v691_v11  ;;  %v929_v29 = vld [vmem:[%s6170_s6 + $0x2c0] sm:$0xff]  ;;  %v922_v30 = vld [vmem:[%s6170_s6 + $0x288] sm:$0xff]  ;;  %p3497_p1 = scmp.lt.s32.totalorder %s3495_s16, %s3489_s27 }
  0x37   : > { %569 = vperm.xlu1 %3451, %v531_v3   ;;  %552 = vperm.xlu0 %3450, %v538_v1   ;;  %v921_v31 = vld [vmem:[%s6170_s6 + $0x280] sm:$0xff]  ;;  %v914_v32 = vld [vmem:[%s6170_s6 + $0x248] sm:$0xff]  ;;  %p3492_p13 = pneg %p3491_p11 }
  0x38   : > { %3359 = vmatprep.subr.mxu0 %v690_v12  ;;  %1016 = vmatpush1.msra.mxu1 %v945_v25  ;;  %v913_v33 = vld [vmem:[%s6170_s6 + $0x240] sm:$0xff]  ;;  %v906_v34 = vld [vmem:[%s6170_s6 + $0x208] sm:$0xff]  ;;  %p3498_p2 = por %p3497_p1, %p3496_p0 }
  0x39   : > { %3360 = vmatpush3.msra.mxu0 %v690_v12  ;;  %1017 = vmatprep.subr.mxu1 %v938_v26  ;;  %v905_v35 = vld [vmem:[%s6170_s6 + $0x200] sm:$0xff]  ;;  %v898_v36 = vld [vmem:[%s6170_s6 + $0x1c8] sm:$0xff] }
  0x3a   : > { %3361 = vmatprep.subr.mxu0 %v689_v14  ;;  %1018 = vmatpush1.msra.mxu1 %v937_v27  ;;  %v897_v37 = vld [vmem:[%s6170_s6 + $0x1c0] sm:$0xff]  ;;  %v890_v38 = vld [vmem:[%s6170_s6 + $0x188] sm:$0xff]  ;;  %v947_v27 = vld [vmem:[%s6170_s6 + $0x350] sm:$0xff]  ;;  %p3499_p3 = pnand %p3498_p2, %p3492_p13 }
  0x3b   : > { %3452 = vset.pattern.permute.xlu1 %v3575_v6  ;;  %633 = vperm.xlu0 %3450, %v531_v3   ;;  %v889_v39 = vld [vmem:[%s6170_s6 + $0x180] sm:$0xff]  ;;  %v882_v40 = vld [vmem:[%s6170_s6 + $0x148] sm:$0xff] }
  0x3c   : > { %629 = vperm.xlu1 %3452, %v530_v2   ;;  %3362 = vmatpush3.msra.mxu0 %v689_v14  ;;  %v881_v41 = vld [vmem:[%s6170_s6 + $0x140] sm:$0xff]  ;;  %v874_v42 = vld [vmem:[%s6170_s6 + $0x108] sm:$0xff] }
  0x3d   : > { %3363 = vmatprep.subr.mxu0 %v688_v15  ;;  %1019 = vmatprep.subr.mxu1 %v930_v28  ;;  %v873_v43 = vld [vmem:[%s6170_s6 + $0x100] sm:$0xff]  ;;  %v866_v44 = vld [vmem:[%s6170_s6 + $0xc8] sm:$0xff] }
  0x3e   : > { %3364 = vmatpush3.msra.mxu0 %v688_v15  ;;  %1020 = vmatpush1.msra.mxu1 %v929_v29  ;;  %v539_v48 = vld [vmem:[%s6166_s2] sm:$0x3] }
  0x3f   : > { %3454 = vset.pattern.permute.xlu0 %v3574_v0  ;;  %1124 = vmatprep.subr.mxu0 %v964_v20  ;;  %v548_v51 = vrot.slane %v539_v48, %v3860_v47  ;;  %v558_v53 = vrot.slane %v539_v48, %v3866_v49  ;;  %v3879_v63 = vld [vmem:[%s6167_s3] ss:$0 sm:$0xff]  ;;  %v956_v20 = vld [vmem:[%s6170_s6 + $0x398] sm:$0xff] }
  0x40   : > { %3453 = vset.pattern.permute.xlu1 %v3574_v0  ;;  %579 = vperm.xlu0 %3454, %v533_v9  }
  0x41   : > { %574 = vperm.xlu1 %3453, %v532_v10   ;;  %1021 = vmatprep.subr.mxu1 %v922_v30 }
  0x42   : > { %1022 = vmatpush1.msra.mxu1 %v921_v31 }
  0x43   : > { %1023 = vmatprep.subr.mxu1 %v914_v32  ;;  %v940_v32 = vld [vmem:[%s6170_s6 + $0x318] sm:$0xff] }
  0x44   : > { %584 = vperm.xlu0 %3454, %v534_v13   ;;  %1024 = vmatpush1.msra.mxu1 %v913_v33  ;;  %v939_v33 = vld [vmem:[%s6170_s6 + $0x310] sm:$0xff] }
  0x45   : > { %3455 = vset.pattern.permute.xlu1 %v3575_v6  ;;  %1025 = vmatprep.subr.mxu1 %v906_v34 }
  0x46   : > { %637 = vperm.xlu1 %3455, %v532_v10   ;;  %1026 = vmatpush1.msra.mxu1 %v905_v35 }
  0x47   : > { %1027 = vmatprep.subr.mxu1 %v898_v36  ;;  %v932_v36 = vld [vmem:[%s6170_s6 + $0x2d8] sm:$0xff] }
  0x48   : > { %3457 = vset.pattern.permute.xlu0 %v3575_v6  ;;  %1028 = vmatpush1.msra.mxu1 %v897_v37 }
  0x49   : > { %645 = vperm.xlu0 %3457, %v534_v13   ;;  %1029 = vmatprep.subr.mxu1 %v890_v38 }
  0x4a   : > { %641 = vperm.xlu1 %3455, %v533_v9   ;;  %1030 = vmatpush1.msra.mxu1 %v889_v39 }
  0x4b   : > { %1031 = vmatprep.subr.mxu1 %v882_v40  ;;  %v931_v40 = vld [vmem:[%s6170_s6 + $0x2d0] sm:$0xff] }
  0x4c   : > { %1032 = vmatpush1.msra.mxu1 %v881_v41  ;;  %v924_v41 = vld [vmem:[%s6170_s6 + $0x298] sm:$0xff] }
  0x4d   : > { %3460 = vset.pattern.permute.xlu0 %v3574_v0  ;;  %1033 = vmatprep.subr.mxu1 %v874_v42 }
  0x4e   : > { %3456 = vset.pattern.permute.xlu1 %v3574_v0  ;;  %599 = vperm.xlu0 %3460, %v537_v16  }
  0x4f   : > { %589 = vperm.xlu1 %3456, %v535_v17   ;;  %1034 = vmatpush1.msra.mxu1 %v873_v43  ;;  %v923_v43 = vld [vmem:[%s6170_s6 + $0x290] sm:$0xff] }
  0x50   : > { %1035 = vmatprep.subr.mxu1 %v866_v44  ;;  %v916_v44 = vld [vmem:[%s6170_s6 + $0x258] sm:$0xff] }
  0x52   : > { %3462 = vset.pattern.permute.xlu0 %v3575_v6 }
  0x53   : > { %3458 = vset.pattern.permute.xlu1 %v3575_v6 }
  0x54   : > { %649 = vperm.xlu1 %3458, %v535_v17  }
  0x58   : > { %3459 = vset.pattern.permute.xlu1 %v3574_v0 }
  0x59   : > { %594 = vperm.xlu1 %3459, %v536_v18  }
  0x5d   : > { %3461 = vset.pattern.permute.xlu1 %v3575_v6 }
  0x5e   : > { %653 = vperm.xlu1 %3461, %v536_v18  }
  0x62   : > { %657 = vperm.xlu1 %3461, %v537_v16   ;;  %v963_v16 = vld [vmem:[%s6170_s6 + $0x3d0] sm:$0xff] }
  0xad   : > { %v543_v52 = vpop.permute.xlu0 %542 }
  0xae   : > { %v565_v50 = vpop.permute.xlu1 %564  ;;  %v549_v54 = vmul.f32 %v548_v51, %v543_v52 }
  0xb2   : > { %v570_v55 = vpop.permute.xlu1 %569  ;;  %v553_v56 = vpop.permute.xlu0 %552 }
  0xb3   : > { %v559_v57 = vmul.f32 %v558_v53, %v553_v56  ;;  %v907_v53 = vld [vmem:[%s6170_s6 + $0x210] sm:$0xff] }
  0xb4   : > { %v899_v56 = vld [vmem:[%s6170_s6 + $0x1d0] sm:$0xff] }
  0xb5   : > { %v560_v58 = vadd.f32 %v559_v57, %v549_v54  ;;  %v900_v54 = vld [vmem:[%s6170_s6 + $0x1d8] sm:$0xff] }
  0xb6   : > { %v634_v60 = vpop.permute.xlu0 %633  ;;  %v892_v57 = vld [vmem:[%s6170_s6 + $0x198] sm:$0xff] }
  0xb7   : > { %v630_v59 = vpop.permute.xlu1 %629  ;;  %v3871_v61 = vrot.slane %v560_v58, %v3860_v47  ;;  %v3874_v62 = vrot.slane %v560_v58, %v3866_v49 }
  0xb9   : > { %v607_v0 = vmul.f32 %v3871_v61, %v570_v55  ;;  %v665_v1 = vmul.f32 %v3874_v62, %v634_v60  ;;  %v606_v2 = vmul.f32 %v3871_v61, %v565_v50  ;;  %v664_v3 = vmul.f32 %v3874_v62, %v630_v59  ;;  %v908_v50 = vld [vmem:[%s6170_s6 + $0x218] sm:$0xff]  ;;  %v891_v60 = vld [vmem:[%s6170_s6 + $0x190] sm:$0xff] }
  0xbb   : > { %v621_v4 = vadd.f32 %v3879_v63, %v607_v0  ;;  %v580_v5 = vpop.permute.xlu0 %579  ;;  %v620_v7 = vadd.f32 %v3879_v63, %v606_v2  ;;  %v884_v0 = vld [vmem:[%s6170_s6 + $0x158] sm:$0xff]  ;;  %v883_v2 = vld [vmem:[%s6170_s6 + $0x150] sm:$0xff] }
  0xbc   : > { %v575_v6 = vpop.permute.xlu1 %574  ;;  %v609_v14 = vmul.f32 %v3871_v61, %v580_v5  ;;  %v875_v5 = vld [vmem:[%s6170_s6 + $0x110] sm:$0xff] }
  0xbd   : > { %v673_v8 = vadd.f32 %v665_v1, %v621_v4  ;;  %v608_v9 = vmul.f32 %v3871_v61, %v575_v6  ;;  %v672_v10 = vadd.f32 %v664_v3, %v620_v7  ;;  %v876_v4 = vld [vmem:[%s6170_s6 + $0x118] sm:$0xff] }
  0xbe   : > { %v623_v24 = vadd.f32 %v3879_v63, %v609_v14  ;;  %v868_v7 = vld [vmem:[%s6170_s6 + $0xd8] sm:$0xff] }
  0xbf   : > { %v681_v11 = vmax.f32 %v673_v8, 0.0  ;;  %v585_v12 = vpop.permute.xlu0 %584  ;;  %v680_v13 = vmax.f32 %v672_v10, 0.0  ;;  %v622_v17 = vadd.f32 %v3879_v63, %v608_v9 }
  0xc0   : > { %v610_v18 = vmul.f32 %v3871_v61, %v585_v12 }
  0xc1   : > { %v638_v15 = vpop.permute.xlu1 %637  ;;  %3365 = vmatprep.mubr.msk.f32.mxu0 %vm703_vm0, %v680_v13 }
  0xc2   : > { %v666_v19 = vmul.f32 %v3874_v62, %v638_v15  ;;  %3366 = vmatmul.mubr.msk.f32.vlgmr.msra.gmra.mxu0 %vm703_vm0, %v681_v11  ;;  %v624_v28 = vadd.f32 %v3879_v63, %v610_v18  ;;  %v867_v18 = vld [vmem:[%s6170_s6 + $0xd0] sm:$0xff] }
  0xc3   : > { %1125 = vmatpush1.msra.mxu0 %v963_v16 }
  0xc4   : > { %v674_v22 = vadd.f32 %v666_v19, %v622_v17  ;;  %v646_v25 = vpop.permute.xlu0 %645  ;;  %1126 = vmatprep.subr.mxu0 %v956_v20  ;;  %v857_v19 = vld [vmem:[%s6170_s6 + $0x80] sm:$0xff]  ;;  %v859_v20 = vld [vmem:[%s6170_s6 + $0x90] sm:$0xff] }
  0xc5   : > { %v642_v26 = vpop.permute.xlu1 %641  ;;  %v668_v30 = vmul.f32 %v3874_v62, %v646_v25  ;;  %1127 = vmatpush1.msra.mxu0 %v955_v21  ;;  %v850_v21 = vld [vmem:[%s6170_s6 + $0x48] sm:$0xff] }
  0xc6   : > { %v682_v29 = vmax.f32 %v674_v22, 0.0  ;;  %v667_v31 = vmul.f32 %v3874_v62, %v642_v26  ;;  %1128 = vmatprep.subr.mxu0 %v948_v23  ;;  %v852_v22 = vld [vmem:[%s6170_s6 + $0x58] sm:$0xff]  ;;  %v849_v23 = vld [vmem:[%s6170_s6 + $0x40] sm:$0xff]  ;;  %v842_v25 = vld [vmem:[%s6170_s6 + $0x8] sm:$0xff] }
  0xc7   : > { %v676_v34 = vadd.f32 %v668_v30, %v624_v28  ;;  %1129 = vmatpush1.msra.mxu0 %v947_v27  ;;  %v844_v26 = vld [vmem:[%s6170_s6 + $0x18] sm:$0xff]  ;;  %v841_v27 = vld [vmem:[%s6170_s6] sm:$0xff]  ;;  %v843_v28 = vld [vmem:[%s6170_s6 + $0x10] sm:$0xff] }
  0xc8   : > { %v675_v35 = vadd.f32 %v667_v31, %v623_v24  ;;  %3368 = vmatprep.mubr.msk.f32.mxu0 %vm703_vm0, %v682_v29  ;;  %1130 = vmatprep.subr.mxu0 %v940_v32  ;;  %v851_v24 = vld [vmem:[%s6170_s6 + $0x50] sm:$0xff]  ;;  %v3576_v29 = vmov 0.0   ;;  %v966_v30 = vld [vmem:[%s6170_s6 + $0x3e8] sm:$0xff]  ;;  %v968_v31 = vld [vmem:[%s6170_s6 + $0x3f8] sm:$0xff] }
  0xc9   : > { %v684_v37 = vmax.f32 %v676_v34, 0.0  ;;  %1131 = vmatpush1.msra.mxu0 %v939_v33  ;;  %v600_v3 = vpop.permute.xlu0 %599  ;;  %1075 = vmatprep.mubr.f32.mxu1 %v3576_v29  ;;  %v4038_v33 = vld [vmem:[%s6169_s5] ss:$0 sm:$0xff] }
  0xca   : > { %v683_v38 = vmax.f32 %v675_v35, 0.0  ;;  %v590_v39 = vpop.permute.xlu1 %589  ;;  %1132 = vmatprep.subr.mxu0 %v932_v36  ;;  %v613_v8 = vmul.f32 %v3871_v61, %v600_v3 }
  0xcb   : > { %v611_v42 = vmul.f32 %v3871_v61, %v590_v39  ;;  %1133 = vmatpush1.msra.mxu0 %v931_v40  ;;  %v967_v39 = vld [vmem:[%s6170_s6 + $0x3f0] sm:$0xff]  ;;  %v958_v40 = vld [vmem:[%s6170_s6 + $0x3a8] sm:$0xff] }
  0xcc   : > { %3369 = vmatmul.mubr.msk.f32.gmra.mxu0 %vm703_vm0, %v683_v38  ;;  %1134 = vmatprep.subr.mxu0 %v924_v41  ;;  %v627_v13 = vadd.f32 %v3879_v63, %v613_v8  ;;  %v965_v38 = vld [vmem:[%s6170_s6 + $0x3e0] sm:$0xff]  ;;  %v960_v41 = vld [vmem:[%s6170_s6 + $0x3b8] sm:$0xff] }
  0xcd   : > { %3371 = vmatprep.mubr.msk.f32.mxu0 %vm703_vm0, %v684_v37  ;;  %1135 = vmatpush1.msra.mxu0 %v923_v43  ;;  %v625_v51 = vadd.f32 %v3879_v63, %v611_v42  ;;  %v928_v8 = vld [vmem:[%s6170_s6 + $0x2b8] sm:$0xff] }
  0xce   : > { %1136 = vmatprep.subr.mxu0 %v916_v44  ;;  %v957_v44 = vld [vmem:[%s6170_s6 + $0x3a0] sm:$0xff] }
  0xcf   : > { %v650_v48 = vpop.permute.xlu1 %649  ;;  %1137 = vmatpush1.msra.mxu0 %v915_v45  ;;  %v959_v45 = vld [vmem:[%s6170_s6 + $0x3b0] sm:$0xff] }
  0xd0   : > { %v669_v52 = vmul.f32 %v3874_v62, %v650_v48  ;;  %1138 = vmatprep.subr.mxu0 %v908_v50  ;;  %v950_v50 = vld [vmem:[%s6170_s6 + $0x368] sm:$0xff] }
  0xd1   : > { %1139 = vmatpush1.msra.mxu0 %v907_v53  ;;  %v949_v53 = vld [vmem:[%s6170_s6 + $0x360] sm:$0xff] }
  0xd2   : > { %v677_v55 = vadd.f32 %v669_v52, %v625_v51  ;;  %1140 = vmatprep.subr.mxu0 %v900_v54  ;;  %v952_v51 = vld [vmem:[%s6170_s6 + $0x378] sm:$0xff]  ;;  %v951_v54 = vld [vmem:[%s6170_s6 + $0x370] sm:$0xff] }
  0xd3   : > { %1141 = vmatpush1.msra.mxu0 %v899_v56 }
  0xd4   : > { %v685_v58 = vmax.f32 %v677_v55, 0.0  ;;  %v595_v59 = vpop.permute.xlu1 %594  ;;  %1142 = vmatprep.subr.mxu0 %v892_v57  ;;  %v942_v57 = vld [vmem:[%s6170_s6 + $0x328] sm:$0xff] }
  0xd5   : > { %v612_v1 = vmul.f32 %v3871_v61, %v595_v59  ;;  %1143 = vmatpush1.msra.mxu0 %v891_v60  ;;  %v865_v61 = vld [vmem:[%s6170_s6 + $0xc0] sm:$0xff]  ;;  %v943_v60 = vld [vmem:[%s6170_s6 + $0x330] sm:$0xff] }
  0xd6   : > { %3372 = vmatmul.mubr.msk.f32.gmra.mxu0 %vm703_vm0, %v685_v58  ;;  %1144 = vmatprep.subr.mxu0 %v884_v0  ;;  %v944_v58 = vld [vmem:[%s6170_s6 + $0x338] sm:$0xff]  ;;  %v941_v59 = vld [vmem:[%s6170_s6 + $0x320] sm:$0xff] }
  0xd7   : > { %1145 = vmatpush1.msra.mxu0 %v883_v2  ;;  %v626_v9 = vadd.f32 %v3879_v63, %v612_v1  ;;  %1036 = vmatpush1.msra.mxu1 %v865_v61  ;;  %v860_v63 = vld [vmem:[%s6170_s6 + $0x98] sm:$0xff]  ;;  %v934_v1 = vld [vmem:[%s6170_s6 + $0x2e8] sm:$0xff] }
  0xd8   : > { %1146 = vmatprep.subr.mxu0 %v876_v4  ;;  %v936_v2 = vld [vmem:[%s6170_s6 + $0x2f8] sm:$0xff]  ;;  %v933_v4 = vld [vmem:[%s6170_s6 + $0x2e0] sm:$0xff]  ;;  %v910_v61 = vld [vmem:[%s6170_s6 + $0x228] sm:$0xff] }
  0xd9   : > { %v654_v6 = vpop.permute.xlu1 %653  ;;  %1147 = vmatpush1.msra.mxu0 %v875_v5  ;;  %v935_v5 = vld [vmem:[%s6170_s6 + $0x2f0] sm:$0xff] }
  0xda   : > { %v670_v10 = vmul.f32 %v3874_v62, %v654_v6  ;;  %1148 = vmatprep.subr.mxu0 %v868_v7  ;;  %v926_v7 = vld [vmem:[%s6170_s6 + $0x2a8] sm:$0xff] }
  0xdb   : > { %1149 = vmatpush1.msra.mxu0 %v867_v18  ;;  %v912_v18 = vld [vmem:[%s6170_s6 + $0x238] sm:$0xff] }
  0xdc   : > { %v678_v11 = vadd.f32 %v670_v10, %v626_v9  ;;  %1150 = vmatprep.subr.mxu0 %v860_v63  ;;  %v925_v10 = vld [vmem:[%s6170_s6 + $0x2a0] sm:$0xff] }
  0xdd   : > { %v658_v12 = vpop.permute.xlu1 %657  ;;  %1151 = vmatpush1.msra.mxu0 %v859_v20  ;;  %v909_v63 = vld [vmem:[%s6170_s6 + $0x220] sm:$0xff]  ;;  %v902_v20 = vld [vmem:[%s6170_s6 + $0x1e8] sm:$0xff] }
  0xde   : > { %v686_v14 = vmax.f32 %v678_v11, 0.0  ;;  %v671_v15 = vmul.f32 %v3874_v62, %v658_v12  ;;  %v858_v62 = vld [vmem:[%s6170_s6 + $0x88] sm:$0xff]  ;;  %1152 = vmatprep.subr.mxu0 %v852_v22  ;;  %v927_v11 = vld [vmem:[%s6170_s6 + $0x2b0] sm:$0xff]  ;;  %v901_v22 = vld [vmem:[%s6170_s6 + $0x1e0] sm:$0xff] }
  0xdf   : > { %1037 = vmatprep.subr.mxu1 %v858_v62  ;;  %1153 = vmatpush1.msra.mxu0 %v851_v24  ;;  %v894_v24 = vld [vmem:[%s6170_s6 + $0x1a8] sm:$0xff] }
  0xe0   : > { %v679_v16 = vadd.f32 %v671_v15, %v627_v13  ;;  %3374 = vmatprep.mubr.msk.f32.mxu0 %vm703_vm0, %v686_v14  ;;  %1038 = vmatpush1.msra.mxu1 %v857_v19  ;;  %v918_v13 = vld [vmem:[%s6170_s6 + $0x268] sm:$0xff]  ;;  %v920_v14 = vld [vmem:[%s6170_s6 + $0x278] sm:$0xff]  ;;  %v911_v19 = vld [vmem:[%s6170_s6 + $0x230] sm:$0xff] }
  0xe1   : > { %1039 = vmatprep.subr.mxu1 %v850_v21  ;;  %1154 = vmatprep.subr.mxu0 %v844_v26  ;;  %v904_v21 = vld [vmem:[%s6170_s6 + $0x1f8] sm:$0xff] }
  0xe2   : > { %v687_v17 = vmax.f32 %v679_v16, 0.0  ;;  %1040 = vmatpush1.msra.mxu1 %v849_v23  ;;  %1155 = vmatpush1.msra.mxu0 %v843_v28  ;;  %v917_v16 = vld [vmem:[%s6170_s6 + $0x260] sm:$0xff]  ;;  %v903_v23 = vld [vmem:[%s6170_s6 + $0x1f0] sm:$0xff] }
  0xe3   : > { %1041 = vmatprep.subr.mxu1 %v842_v25  ;;  %1350 = vmatprep.subr.mxu0 %v968_v31  ;;  %v896_v25 = vld [vmem:[%s6170_s6 + $0x1b8] sm:$0xff]  ;;  %v895_v28 = vld [vmem:[%s6170_s6 + $0x1b0] sm:$0xff] }
  0xe4   : > { %3375 = vmatmul.mubr.msk.f32.gmra.mxu0 %vm703_vm0, %v687_v17  ;;  %1042 = vmatpush1.msra.mxu1 %v841_v27  ;;  %v919_v17 = vld [vmem:[%s6170_s6 + $0x270] sm:$0xff]  ;;  %v893_v27 = vld [vmem:[%s6170_s6 + $0x1a0] sm:$0xff]  ;;  %v888_v31 = vld [vmem:[%s6170_s6 + $0x178] sm:$0xff] }
  0xe5   : > { %1188 = vmatprep.mubr.f32.mxu0 %v3576_v29  ;;  %1237 = vmatprep.subr.mxu1 %v966_v30  ;;  %v886_v30 = vld [vmem:[%s6170_s6 + $0x168] sm:$0xff] }
 0x182   : > { %v3367_v32 = vpop.f32.mrf.mxu0 }
 0x183   : > { %v800_v36 = vadd.f32 %v3367_v32, %v4038_v33 }
 0x184   : > { %v794_v34 = vpop.f32.mrf.mxu0 }
 0x185   : > { %v795_v35 = vadd.f32 %v4038_v33, %v794_v34  ;;  %v4060_v42 = vmax.f32 %v800_v36, 0.0  ;;  %v885_v34 = vld [vmem:[%s6170_s6 + $0x160] sm:$0xff] }
 0x187   : > { %v4042_v37 = vmax.f32 %v795_v35, 0.0  ;;  %v887_v35 = vld [vmem:[%s6170_s6 + $0x170] sm:$0xff] }
 0x189   : > { %1076 = vmatmul.mubr.f32.vlgmr.msra.gmra.mxu1 %v4042_v37  ;;  %1189 = vmatmul.mubr.f32.vlgmr.msra.gmra.mxu0 %v4042_v37 }
 0x18a   : > { %1081 = vmatprep.mubr.f32.mxu1 %v3576_v29  ;;  %1194 = vmatprep.mubr.f32.mxu0 %v3576_v29 }
 0x18b   : > { %1238 = vmatpush1.msra.mxu1 %v965_v38  ;;  %1351 = vmatpush1.msra.mxu0 %v967_v39  ;;  %v878_v38 = vld [vmem:[%s6170_s6 + $0x128] sm:$0xff]  ;;  %v880_v39 = vld [vmem:[%s6170_s6 + $0x138] sm:$0xff] }
 0x18c   : > { %v3370_v43 = vpop.f32.mrf.mxu0  ;;  %1239 = vmatprep.subr.mxu1 %v958_v40  ;;  %1352 = vmatprep.subr.mxu0 %v960_v41  ;;  %v877_v40 = vld [vmem:[%s6170_s6 + $0x120] sm:$0xff]  ;;  %v879_v41 = vld [vmem:[%s6170_s6 + $0x130] sm:$0xff] }
 0x18d   : > { %1082 = vmatmul.mubr.f32.gmra.mxu1 %v4060_v42  ;;  %1195 = vmatmul.mubr.f32.gmra.mxu0 %v4060_v42  ;;  %v810_v55 = vadd.f32 %v3370_v43, %v4038_v33 }
 0x18e   : > { %v804_v48 = vpop.f32.mrf.mxu0  ;;  %1087 = vmatprep.mubr.f32.mxu1 %v3576_v29  ;;  %1200 = vmatprep.mubr.f32.mxu0 %v3576_v29 }
 0x18f   : > { %v805_v52 = vadd.f32 %v4038_v33, %v804_v48  ;;  %1240 = vmatpush1.msra.mxu1 %v957_v44  ;;  %1353 = vmatpush1.msra.mxu0 %v959_v45  ;;  %v4104_v0 = vmax.f32 %v810_v55, 0.0  ;;  %v870_v44 = vld [vmem:[%s6170_s6 + $0xe8] sm:$0xff]  ;;  %v872_v45 = vld [vmem:[%s6170_s6 + $0xf8] sm:$0xff]  ;;  %v869_v48 = vld [vmem:[%s6170_s6 + $0xe0] sm:$0xff] }
 0x190   : > { %1241 = vmatprep.subr.mxu1 %v950_v50  ;;  %1354 = vmatprep.subr.mxu0 %v952_v51  ;;  %v871_v50 = vld [vmem:[%s6170_s6 + $0xf0] sm:$0xff]  ;;  %v862_v51 = vld [vmem:[%s6170_s6 + $0xa8] sm:$0xff] }
 0x191   : > { %v4086_v56 = vmax.f32 %v805_v52, 0.0  ;;  %1242 = vmatpush1.msra.mxu1 %v949_v53  ;;  %1355 = vmatpush1.msra.mxu0 %v951_v54  ;;  %v864_v52 = vld [vmem:[%s6170_s6 + $0xb8] sm:$0xff]  ;;  %v861_v54 = vld [vmem:[%s6170_s6 + $0xa0] sm:$0xff]  ;;  %v863_v55 = vld [vmem:[%s6170_s6 + $0xb0] sm:$0xff] }
 0x192   : > { %1243 = vmatprep.subr.mxu1 %v942_v57  ;;  %1356 = vmatprep.subr.mxu0 %v944_v58  ;;  %v856_v57 = vld [vmem:[%s6170_s6 + $0x78] sm:$0xff] }
 0x193   : > { %1088 = vmatmul.mubr.f32.gmra.mxu1 %v4086_v56  ;;  %1201 = vmatmul.mubr.f32.gmra.mxu0 %v4086_v56 }
 0x194   : > { %1093 = vmatprep.mubr.f32.mxu1 %v3576_v29  ;;  %1206 = vmatprep.mubr.f32.mxu0 %v3576_v29 }
 0x195   : > { %1244 = vmatpush1.msra.mxu1 %v941_v59  ;;  %1357 = vmatpush1.msra.mxu0 %v943_v60  ;;  %v853_v59 = vld [vmem:[%s6170_s6 + $0x60] sm:$0xff]  ;;  %v855_v60 = vld [vmem:[%s6170_s6 + $0x70] sm:$0xff] }
 0x196   : > { %v3373_v3 = vpop.f32.mrf.mxu0  ;;  %1245 = vmatprep.subr.mxu1 %v934_v1  ;;  %1358 = vmatprep.subr.mxu0 %v936_v2  ;;  %v846_v1 = vld [vmem:[%s6170_s6 + $0x28] sm:$0xff]  ;;  %v848_v2 = vld [vmem:[%s6170_s6 + $0x38] sm:$0xff] }
 0x197   : > { %1094 = vmatmul.mubr.f32.gmra.mxu1 %v4104_v0  ;;  %1207 = vmatmul.mubr.f32.gmra.mxu0 %v4104_v0  ;;  %v820_v15 = vadd.f32 %v3373_v3, %v4038_v33  ;;  %v845_v3 = vld [vmem:[%s6170_s6 + $0x20] sm:$0xff] }
 0x198   : > { %v814_v6 = vpop.f32.mrf.mxu0  ;;  %1246 = vmatpush1.msra.mxu1 %v933_v4  ;;  %1359 = vmatpush1.msra.mxu0 %v935_v5  ;;  %v847_v4 = vld [vmem:[%s6170_s6 + $0x30] sm:$0xff]  ;;  %v1817_v5 = vld [vmem:[%s6172_s8 + $0x5c8] sm:$0xff] }
 0x199   : > { %v815_v9 = vadd.f32 %v4038_v33, %v814_v6  ;;  %1099 = vmatprep.mubr.f32.mxu1 %v3576_v29  ;;  %1212 = vmatprep.mubr.f32.mxu0 %v3576_v29  ;;  %v4158_v62 = vmax.f32 %v820_v15, 0.0  ;;  %v1688_v6 = vld [vmem:[%s6172_s8 + $0x1c0] sm:$0xff] }
 0x19a   : > { %1247 = vmatprep.subr.mxu1 %v926_v7  ;;  %1360 = vmatprep.subr.mxu0 %v928_v8  ;;  %v1816_v7 = vld [vmem:[%s6172_s8 + $0x5c0] sm:$0xff]  ;;  %v1685_v8 = vld [vmem:[%s6172_s8 + $0x1a8] sm:$0xff] }
 0x19b   : > { %v4135_v12 = vmax.f32 %v815_v9, 0.0  ;;  %1248 = vmatpush1.msra.mxu1 %v925_v10  ;;  %1361 = vmatpush1.msra.mxu0 %v927_v11  ;;  %v1813_v9 = vld [vmem:[%s6172_s8 + $0x5a8] sm:$0xff]  ;;  %v1684_v10 = vld [vmem:[%s6172_s8 + $0x1a0] sm:$0xff] }
 0x19c   : > { %1249 = vmatprep.subr.mxu1 %v918_v13  ;;  %1362 = vmatprep.subr.mxu0 %v920_v14  ;;  %v1812_v11 = vld [vmem:[%s6172_s8 + $0x5a0] sm:$0xff]  ;;  %v1809_v13 = vld [vmem:[%s6172_s8 + $0x588] sm:$0xff] }
 0x19d   : > { %1100 = vmatmul.mubr.f32.gmra.mxu1 %v4135_v12  ;;  %1213 = vmatmul.mubr.f32.gmra.mxu0 %v4135_v12  ;;  %v1680_v14 = vld [vmem:[%s6172_s8 + $0x180] sm:$0xff] }
 0x19e   : > { %1250 = vmatpush1.msra.mxu1 %v917_v16  ;;  %1363 = vmatpush1.msra.mxu0 %v919_v17  ;;  %v1808_v15 = vld [vmem:[%s6172_s8 + $0x580] sm:$0xff]  ;;  %v1677_v16 = vld [vmem:[%s6172_s8 + $0x168] sm:$0xff] }
 0x19f   : > { %1105 = vmatprep.mubr.f32.mxu1 %v3576_v29  ;;  %1218 = vmatprep.mubr.f32.mxu0 %v3576_v29  ;;  %v1805_v17 = vld [vmem:[%s6172_s8 + $0x568] sm:$0xff] }
 0x1a0   : > { %1251 = vmatprep.subr.mxu1 %v910_v61  ;;  %1364 = vmatprep.subr.mxu0 %v912_v18  ;;  %v1676_v61 = vld [vmem:[%s6172_s8 + $0x160] sm:$0xff] }
 0x1a1   : > { %1106 = vmatmul.mubr.f32.gmra.mxu1 %v4158_v62  ;;  %1219 = vmatmul.mubr.f32.gmra.mxu0 %v4158_v62  ;;  %v1804_v18 = vld [vmem:[%s6172_s8 + $0x560] sm:$0xff] }
 0x1a2   : > { %1252 = vmatpush1.msra.mxu1 %v909_v63  ;;  %1365 = vmatpush1.msra.mxu0 %v911_v19  ;;  %v1801_v63 = vld [vmem:[%s6172_s8 + $0x548] sm:$0xff]  ;;  %v1672_v19 = vld [vmem:[%s6172_s8 + $0x140] sm:$0xff] }
 0x1a3   : > { %1253 = vmatprep.subr.mxu1 %v902_v20  ;;  %1366 = vmatprep.subr.mxu0 %v904_v21  ;;  %v1800_v20 = vld [vmem:[%s6172_s8 + $0x540] sm:$0xff]  ;;  %v1669_v21 = vld [vmem:[%s6172_s8 + $0x128] sm:$0xff] }
 0x1a4   : > { %v3376_v26 = vpop.f32.mrf.mxu0  ;;  %1254 = vmatpush1.msra.mxu1 %v901_v22  ;;  %1367 = vmatpush1.msra.mxu0 %v903_v23  ;;  %v1797_v22 = vld [vmem:[%s6172_s8 + $0x528] sm:$0xff]  ;;  %v1668_v23 = vld [vmem:[%s6172_s8 + $0x120] sm:$0xff] }
 0x1a5   : > { %1255 = vmatprep.subr.mxu1 %v894_v24  ;;  %1368 = vmatprep.subr.mxu0 %v896_v25  ;;  %v830_v53 = vadd.f32 %v3376_v26, %v4038_v33  ;;  %v1796_v24 = vld [vmem:[%s6172_s8 + $0x520] sm:$0xff]  ;;  %v1665_v25 = vld [vmem:[%s6172_s8 + $0x108] sm:$0xff] }
 0x1a6   : > { %v824_v32 = vpop.f32.mrf.mxu0  ;;  %1256 = vmatpush1.msra.mxu1 %v893_v27  ;;  %1369 = vmatpush1.msra.mxu0 %v895_v28  ;;  %v1793_v26 = vld [vmem:[%s6172_s8 + $0x508] sm:$0xff]  ;;  %v1664_v27 = vld [vmem:[%s6172_s8 + $0x100] sm:$0xff] }
 0x1a7   : > { %v825_v36 = vadd.f32 %v4038_v33, %v824_v32  ;;  %1257 = vmatprep.subr.mxu1 %v886_v30  ;;  %1370 = vmatprep.subr.mxu0 %v888_v31  ;;  %v854_v33 = vld [vmem:[%s6170_s6 + $0x68] sm:$0xff]  ;;  %v840_v58 = vmax.f32 %v830_v53, 0.0  ;;  %v1792_v28 = vld [vmem:[%s6172_s8 + $0x500] sm:$0xff] }
 0x1a8   : > { %1258 = vmatpush1.msra.mxu1 %v885_v34  ;;  %1371 = vmatpush1.msra.mxu0 %v887_v35  ;;  %v1661_v30 = vld [vmem:[%s6172_s8 + $0xe8] sm:$0xff]  ;;  %v1660_v32 = vld [vmem:[%s6172_s8 + $0xe0] sm:$0xff] }
 0x1a9   : > { %v4219_v43 = vmax.f32 %v825_v36, 0.0  ;;  %1259 = vmatprep.subr.mxu1 %v878_v38  ;;  %1372 = vmatprep.subr.mxu0 %v880_v39  ;;  %v1789_v31 = vld [vmem:[%s6172_s8 + $0x4e8] sm:$0xff]  ;;  %v1788_v34 = vld [vmem:[%s6172_s8 + $0x4e0] sm:$0xff] }
 0x1aa   : > { %1260 = vmatpush1.msra.mxu1 %v877_v40  ;;  %1373 = vmatpush1.msra.mxu0 %v879_v41  ;;  %v1657_v35 = vld [vmem:[%s6172_s8 + $0xc8] sm:$0xff]  ;;  %v1656_v38 = vld [vmem:[%s6172_s8 + $0xc0] sm:$0xff] }
 0x1ab   : > { %1111 = vmatprep.mubr.f32.mxu1 %v3576_v29  ;;  %1224 = vmatprep.mubr.f32.mxu0 %v3576_v29  ;;  %v1785_v36 = vld [vmem:[%s6172_s8 + $0x4c8] sm:$0xff]  ;;  %v1784_v39 = vld [vmem:[%s6172_s8 + $0x4c0] sm:$0xff] }
 0x1ac   : > { %1261 = vmatprep.subr.mxu1 %v870_v44  ;;  %1374 = vmatprep.subr.mxu0 %v872_v45  ;;  %v1653_v40 = vld [vmem:[%s6172_s8 + $0xa8] sm:$0xff]  ;;  %v1780_v44 = vld [vmem:[%s6172_s8 + $0x4a0] sm:$0xff] }
 0x1ad   : > { %1112 = vmatmul.mubr.f32.gmra.mxu1 %v4219_v43  ;;  %1225 = vmatmul.mubr.f32.gmra.mxu0 %v4219_v43  ;;  %v1781_v41 = vld [vmem:[%s6172_s8 + $0x4a8] sm:$0xff] }
 0x1ae   : > { %1262 = vmatpush1.msra.mxu1 %v869_v48  ;;  %1375 = vmatpush1.msra.mxu0 %v871_v50  ;;  %v1649_v45 = vld [vmem:[%s6172_s8 + $0x88] sm:$0xff]  ;;  %v1648_v50 = vld [vmem:[%s6172_s8 + $0x80] sm:$0xff] }
 0x1af   : > { %1263 = vmatprep.subr.mxu1 %v862_v51  ;;  %1376 = vmatprep.subr.mxu0 %v864_v52  ;;  %v1777_v48 = vld [vmem:[%s6172_s8 + $0x488] sm:$0xff]  ;;  %v1776_v51 = vld [vmem:[%s6172_s8 + $0x480] sm:$0xff] }
 0x1b0   : > { %1264 = vmatpush1.msra.mxu1 %v861_v54  ;;  %1377 = vmatpush1.msra.mxu0 %v863_v55  ;;  %v1645_v52 = vld [vmem:[%s6172_s8 + $0x68] sm:$0xff]  ;;  %v1644_v54 = vld [vmem:[%s6172_s8 + $0x60] sm:$0xff] }
 0x1b1   : > { %1117 = vmatprep.mubr.f32.mxu1 %v3576_v29  ;;  %1230 = vmatprep.mubr.f32.mxu0 %v3576_v29  ;;  %v1773_v53 = vld [vmem:[%s6172_s8 + $0x468] sm:$0xff]  ;;  %v1772_v55 = vld [vmem:[%s6172_s8 + $0x460] sm:$0xff] }
 0x1b2   : > { %1265 = vmatprep.subr.mxu1 %v854_v33  ;;  %1378 = vmatprep.subr.mxu0 %v856_v57  ;;  %v1641_v33 = vld [vmem:[%s6172_s8 + $0x48] sm:$0xff] }
 0x1b3   : > { %1118 = vmatmul.mubr.f32.gmra.mxu1 %v840_v58  ;;  %1231 = vmatmul.mubr.f32.gmra.mxu0 %v840_v58  ;;  %v1769_v57 = vld [vmem:[%s6172_s8 + $0x448] sm:$0xff] }
 0x1b4   : > { %1266 = vmatpush1.msra.mxu1 %v853_v59  ;;  %1379 = vmatpush1.msra.mxu0 %v855_v60  ;;  %v1768_v59 = vld [vmem:[%s6172_s8 + $0x440] sm:$0xff]  ;;  %v1637_v60 = vld [vmem:[%s6172_s8 + $0x28] sm:$0xff] }
 0x1b5   : > { %1267 = vmatprep.subr.mxu1 %v846_v1  ;;  %1380 = vmatprep.subr.mxu0 %v848_v2  ;;  %v1765_v1 = vld [vmem:[%s6172_s8 + $0x428] sm:$0xff]  ;;  %v1636_v2 = vld [vmem:[%s6172_s8 + $0x20] sm:$0xff] }
 0x1b6   : > { %1268 = vmatpush1.msra.mxu1 %v845_v3  ;;  %1381 = vmatpush1.msra.mxu0 %v847_v4  ;;  %v1764_v3 = vld [vmem:[%s6172_s8 + $0x420] sm:$0xff]  ;;  %v1633_v4 = vld [vmem:[%s6172_s8 + $0x8] sm:$0xff] }
 0x1b7   : > { %1301 = vmatprep.mubr.f32.mxu1 %v3576_v29  ;;  %1414 = vmatprep.mubr.f32.mxu0 %v3576_v29 }
 0x1b8   : > { %1302 = vmatmul.mubr.f32.vlgmr.msra.gmra.mxu1 %v4042_v37  ;;  %1415 = vmatmul.mubr.f32.vlgmr.msra.gmra.mxu0 %v4042_v37  ;;  %v1693_v37 = vld [vmem:[%s6172_s8 + $0x1e8] sm:$0xff] }
 0x1b9   : > { %1307 = vmatprep.mubr.f32.mxu1 %v3576_v29  ;;  %1420 = vmatprep.mubr.f32.mxu0 %v3576_v29 }
 0x1ba   : > { %2207 = vmatprep.subr.mxu1 %v1693_v37  ;;  %v1761_v37 = vld [vmem:[%s6172_s8 + $0x408] sm:$0xff] }
 0x1bc   : > { %1308 = vmatmul.mubr.f32.gmra.mxu1 %v4060_v42  ;;  %1421 = vmatmul.mubr.f32.gmra.mxu0 %v4060_v42  ;;  %v1821_v42 = vld [vmem:[%s6172_s8 + $0x5e8] sm:$0xff] }
 0x1bd   : > { %1313 = vmatprep.mubr.f32.mxu1 %v3576_v29  ;;  %1426 = vmatprep.mubr.f32.mxu0 %v3576_v29 }
 0x1be   : > { %2278 = vmatprep.subr.mxu0 %v1821_v42  ;;  %v1632_v42 = vld [vmem:[%s6172_s8] sm:$0xff] }
 0x1c0   : > { %1314 = vmatmul.mubr.f32.gmra.mxu1 %v4086_v56  ;;  %1427 = vmatmul.mubr.f32.gmra.mxu0 %v4086_v56  ;;  %v1692_v56 = vld [vmem:[%s6172_s8 + $0x1e0] sm:$0xff] }
 0x1c1   : > { %1319 = vmatprep.mubr.f32.mxu1 %v3576_v29  ;;  %1432 = vmatprep.mubr.f32.mxu0 %v3576_v29 }
 0x1c2   : > { %2208 = vmatpush1.msra.mxu1 %v1692_v56  ;;  %v1760_v56 = vld [vmem:[%s6172_s8 + $0x400] sm:$0xff] }
 0x1c4   : > { %1320 = vmatmul.mubr.f32.gmra.mxu1 %v4104_v0  ;;  %1433 = vmatmul.mubr.f32.gmra.mxu0 %v4104_v0  ;;  %v1689_v0 = vld [vmem:[%s6172_s8 + $0x1c8] sm:$0xff] }
 0x1c5   : > { %1325 = vmatprep.mubr.f32.mxu1 %v3576_v29  ;;  %1438 = vmatprep.mubr.f32.mxu0 %v3576_v29 }
 0x1c6   : > { %2209 = vmatprep.subr.mxu1 %v1689_v0  ;;  %v1885_v0 = vld [vmem:[%s6172_s8 + $0x7e8] sm:$0xff] }
 0x1c7   : > { %2210 = vmatpush1.msra.mxu1 %v1688_v6  ;;  %v1884_v6 = vld [vmem:[%s6172_s8 + $0x7e0] sm:$0xff] }
 0x1c8   : > { %1326 = vmatmul.mubr.f32.gmra.mxu1 %v4135_v12  ;;  %1439 = vmatmul.mubr.f32.gmra.mxu0 %v4135_v12  ;;  %v1681_v12 = vld [vmem:[%s6172_s8 + $0x188] sm:$0xff] }
 0x1c9   : > { %1331 = vmatprep.mubr.f32.mxu1 %v3576_v29  ;;  %1444 = vmatprep.mubr.f32.mxu0 %v3576_v29 }
 0x1ca   : > { %2211 = vmatprep.subr.mxu1 %v1685_v8  ;;  %v1881_v8 = vld [vmem:[%s6172_s8 + $0x7c8] sm:$0xff] }
 0x1cb   : > { %2212 = vmatpush1.msra.mxu1 %v1684_v10  ;;  %v1880_v10 = vld [vmem:[%s6172_s8 + $0x7c0] sm:$0xff] }
 0x1cc   : > { %1332 = vmatmul.mubr.f32.gmra.mxu1 %v4158_v62  ;;  %1445 = vmatmul.mubr.f32.gmra.mxu0 %v4158_v62  ;;  %v1673_v62 = vld [vmem:[%s6172_s8 + $0x148] sm:$0xff] }
 0x1cd   : > { %1337 = vmatprep.mubr.f32.mxu1 %v3576_v29  ;;  %1450 = vmatprep.mubr.f32.mxu0 %v3576_v29 }
 0x1ce   : > { %2213 = vmatprep.subr.mxu1 %v1681_v12  ;;  %v1877_v12 = vld [vmem:[%s6172_s8 + $0x7a8] sm:$0xff] }
 0x1cf   : > { %2214 = vmatpush1.msra.mxu1 %v1680_v14  ;;  %v1876_v14 = vld [vmem:[%s6172_s8 + $0x7a0] sm:$0xff] }
 0x1d0   : > { %1338 = vmatmul.mubr.f32.gmra.mxu1 %v4219_v43  ;;  %1451 = vmatmul.mubr.f32.gmra.mxu0 %v4219_v43  ;;  %v1652_v43 = vld [vmem:[%s6172_s8 + $0xa0] sm:$0xff] }
 0x1d1   : > { %1343 = vmatprep.mubr.f32.mxu1 %v3576_v29  ;;  %1456 = vmatprep.mubr.f32.mxu0 %v3576_v29  ;;  %v1820_v29 = vld [vmem:[%s6172_s8 + $0x5e0] sm:$0xff] }
 0x1d2   : > { %2279 = vmatpush1.msra.mxu0 %v1820_v29  ;;  %2215 = vmatprep.subr.mxu1 %v1677_v16  ;;  %v1757_v29 = vld [vmem:[%s6172_s8 + $0x3e8] sm:$0xff] }
 0x1d3   : > { %2280 = vmatprep.subr.mxu0 %v1817_v5  ;;  %2216 = vmatpush1.msra.mxu1 %v1676_v61  ;;  %v1756_v5 = vld [vmem:[%s6172_s8 + $0x3e0] sm:$0xff]  ;;  %v1873_v16 = vld [vmem:[%s6172_s8 + $0x788] sm:$0xff] }
 0x1d4   : > { %1344 = vmatmul.mubr.f32.gmra.mxu1 %v840_v58  ;;  %1457 = vmatmul.mubr.f32.gmra.mxu0 %v840_v58  ;;  %v1640_v58 = vld [vmem:[%s6172_s8 + $0x40] sm:$0xff] }
 0x1d5   : > { %2281 = vmatpush1.msra.mxu0 %v1816_v7  ;;  %2217 = vmatprep.subr.mxu1 %v1673_v62  ;;  %v1753_v7 = vld [vmem:[%s6172_s8 + $0x3c8] sm:$0xff]  ;;  %v1872_v61 = vld [vmem:[%s6172_s8 + $0x780] sm:$0xff] }
 0x1d6   : > { %2282 = vmatprep.subr.mxu0 %v1813_v9  ;;  %2218 = vmatpush1.msra.mxu1 %v1672_v19  ;;  %v1752_v9 = vld [vmem:[%s6172_s8 + $0x3c0] sm:$0xff]  ;;  %v1869_v62 = vld [vmem:[%s6172_s8 + $0x768] sm:$0xff] }
 0x1d7   : > { %2283 = vmatpush1.msra.mxu0 %v1812_v11  ;;  %2219 = vmatprep.subr.mxu1 %v1669_v21  ;;  %v1749_v11 = vld [vmem:[%s6172_s8 + $0x3a8] sm:$0xff]  ;;  %v1868_v19 = vld [vmem:[%s6172_s8 + $0x760] sm:$0xff] }
 0x1d8   : > { %2284 = vmatprep.subr.mxu0 %v1809_v13  ;;  %2220 = vmatpush1.msra.mxu1 %v1668_v23  ;;  %v1748_v13 = vld [vmem:[%s6172_s8 + $0x3a0] sm:$0xff]  ;;  %v1865_v21 = vld [vmem:[%s6172_s8 + $0x748] sm:$0xff] }
 0x1d9   : > { %2285 = vmatpush1.msra.mxu0 %v1808_v15  ;;  %2221 = vmatprep.subr.mxu1 %v1665_v25  ;;  %v1745_v15 = vld [vmem:[%s6172_s8 + $0x388] sm:$0xff]  ;;  %v1864_v23 = vld [vmem:[%s6172_s8 + $0x740] sm:$0xff] }
 0x1da   : > { %2286 = vmatprep.subr.mxu0 %v1805_v17  ;;  %2222 = vmatpush1.msra.mxu1 %v1664_v27  ;;  %v1744_v17 = vld [vmem:[%s6172_s8 + $0x380] sm:$0xff]  ;;  %v1861_v25 = vld [vmem:[%s6172_s8 + $0x728] sm:$0xff] }
 0x1db   : > { %2287 = vmatpush1.msra.mxu0 %v1804_v18  ;;  %2223 = vmatprep.subr.mxu1 %v1661_v30  ;;  %v1741_v18 = vld [vmem:[%s6172_s8 + $0x368] sm:$0xff]  ;;  %v1860_v27 = vld [vmem:[%s6172_s8 + $0x720] sm:$0xff] }
 0x1dc   : > { %2288 = vmatprep.subr.mxu0 %v1801_v63  ;;  %2224 = vmatpush1.msra.mxu1 %v1660_v32  ;;  %v1740_v63 = vld [vmem:[%s6172_s8 + $0x360] sm:$0xff]  ;;  %v1857_v30 = vld [vmem:[%s6172_s8 + $0x708] sm:$0xff] }
 0x1dd   : > { %2289 = vmatpush1.msra.mxu0 %v1800_v20  ;;  %2225 = vmatprep.subr.mxu1 %v1657_v35  ;;  %v1737_v20 = vld [vmem:[%s6172_s8 + $0x348] sm:$0xff]  ;;  %v1856_v32 = vld [vmem:[%s6172_s8 + $0x700] sm:$0xff] }
 0x1de   : > { %2290 = vmatprep.subr.mxu0 %v1797_v22  ;;  %2226 = vmatpush1.msra.mxu1 %v1656_v38  ;;  %v1736_v22 = vld [vmem:[%s6172_s8 + $0x340] sm:$0xff]  ;;  %v1853_v35 = vld [vmem:[%s6172_s8 + $0x6e8] sm:$0xff] }
 0x1df   : > { %2291 = vmatpush1.msra.mxu0 %v1796_v24  ;;  %2227 = vmatprep.subr.mxu1 %v1653_v40  ;;  %v1733_v24 = vld [vmem:[%s6172_s8 + $0x328] sm:$0xff]  ;;  %v1852_v38 = vld [vmem:[%s6172_s8 + $0x6e0] sm:$0xff] }
 0x1e0   : > { %2292 = vmatprep.subr.mxu0 %v1793_v26  ;;  %2228 = vmatpush1.msra.mxu1 %v1652_v43  ;;  %v1732_v26 = vld [vmem:[%s6172_s8 + $0x320] sm:$0xff]  ;;  %v1849_v40 = vld [vmem:[%s6172_s8 + $0x6c8] sm:$0xff] }
 0x1e1   : > { %2293 = vmatpush1.msra.mxu0 %v1792_v28  ;;  %2229 = vmatprep.subr.mxu1 %v1649_v45  ;;  %v1729_v28 = vld [vmem:[%s6172_s8 + $0x308] sm:$0xff]  ;;  %v1848_v43 = vld [vmem:[%s6172_s8 + $0x6c0] sm:$0xff] }
 0x1e2   : > { %2294 = vmatprep.subr.mxu0 %v1789_v31  ;;  %2230 = vmatpush1.msra.mxu1 %v1648_v50  ;;  %v1728_v31 = vld [vmem:[%s6172_s8 + $0x300] sm:$0xff]  ;;  %v1845_v45 = vld [vmem:[%s6172_s8 + $0x6a8] sm:$0xff] }
 0x1e3   : > { %2295 = vmatpush1.msra.mxu0 %v1788_v34  ;;  %2231 = vmatprep.subr.mxu1 %v1645_v52  ;;  %v1725_v34 = vld [vmem:[%s6172_s8 + $0x2e8] sm:$0xff]  ;;  %v1844_v50 = vld [vmem:[%s6172_s8 + $0x6a0] sm:$0xff] }
 0x1e4   : > { %2296 = vmatprep.subr.mxu0 %v1785_v36  ;;  %2232 = vmatpush1.msra.mxu1 %v1644_v54  ;;  %v1724_v36 = vld [vmem:[%s6172_s8 + $0x2e0] sm:$0xff]  ;;  %v1841_v52 = vld [vmem:[%s6172_s8 + $0x688] sm:$0xff] }
 0x1e5   : > { %2297 = vmatpush1.msra.mxu0 %v1784_v39  ;;  %2233 = vmatprep.subr.mxu1 %v1641_v33  ;;  %v1721_v39 = vld [vmem:[%s6172_s8 + $0x2c8] sm:$0xff]  ;;  %v1840_v54 = vld [vmem:[%s6172_s8 + $0x680] sm:$0xff] }
 0x1e6   : > { %2298 = vmatprep.subr.mxu0 %v1781_v41  ;;  %2234 = vmatpush1.msra.mxu1 %v1640_v58  ;;  %v1720_v41 = vld [vmem:[%s6172_s8 + $0x2c0] sm:$0xff]  ;;  %v1837_v33 = vld [vmem:[%s6172_s8 + $0x668] sm:$0xff] }
 0x1e7   : > { %2299 = vmatpush1.msra.mxu0 %v1780_v44  ;;  %2235 = vmatprep.subr.mxu1 %v1637_v60  ;;  %v1717_v44 = vld [vmem:[%s6172_s8 + $0x2a8] sm:$0xff]  ;;  %v1836_v58 = vld [vmem:[%s6172_s8 + $0x660] sm:$0xff] }
 0x1e8   : > { %2300 = vmatprep.subr.mxu0 %v1777_v48  ;;  %2236 = vmatpush1.msra.mxu1 %v1636_v2  ;;  %v1716_v48 = vld [vmem:[%s6172_s8 + $0x2a0] sm:$0xff]  ;;  %v1833_v60 = vld [vmem:[%s6172_s8 + $0x648] sm:$0xff] }
 0x1e9   : > { %2301 = vmatpush1.msra.mxu0 %v1776_v51  ;;  %2237 = vmatprep.subr.mxu1 %v1633_v4  ;;  %v1713_v51 = vld [vmem:[%s6172_s8 + $0x288] sm:$0xff]  ;;  %v1832_v2 = vld [vmem:[%s6172_s8 + $0x640] sm:$0xff] }
 0x1ea   : > { %2302 = vmatprep.subr.mxu0 %v1773_v53  ;;  %2238 = vmatpush1.msra.mxu1 %v1632_v42  ;;  %v1712_v53 = vld [vmem:[%s6172_s8 + $0x280] sm:$0xff]  ;;  %v1829_v4 = vld [vmem:[%s6172_s8 + $0x628] sm:$0xff] }
 0x1eb   : > { %2303 = vmatpush1.msra.mxu0 %v1772_v55  ;;  %2239 = vmatprep.subr.mxu1 %v1757_v29  ;;  %v1709_v55 = vld [vmem:[%s6172_s8 + $0x268] sm:$0xff]  ;;  %v1828_v42 = vld [vmem:[%s6172_s8 + $0x620] sm:$0xff] }
 0x1ec   : > { %2304 = vmatprep.subr.mxu0 %v1769_v57  ;;  %2240 = vmatpush2.msra.mxu1 %v1756_v5  ;;  %v1708_v57 = vld [vmem:[%s6172_s8 + $0x260] sm:$0xff]  ;;  %v1825_v29 = vld [vmem:[%s6172_s8 + $0x608] sm:$0xff] }
 0x1ed   : > { %2305 = vmatpush1.msra.mxu0 %v1768_v59  ;;  %2241 = vmatprep.subr.mxu1 %v1753_v7  ;;  %v1705_v59 = vld [vmem:[%s6172_s8 + $0x248] sm:$0xff]  ;;  %v1824_v5 = vld [vmem:[%s6172_s8 + $0x600] sm:$0xff] }
 0x1ee   : > { %2306 = vmatprep.subr.mxu0 %v1765_v1  ;;  %2242 = vmatpush2.msra.mxu1 %v1752_v9  ;;  %v1704_v1 = vld [vmem:[%s6172_s8 + $0x240] sm:$0xff]  ;;  %v2077_v7 = vld [vmem:[%s6172_s8 + $0xde8] sm:$0xff] }
 0x1ef   : > { %2307 = vmatpush1.msra.mxu0 %v1764_v3  ;;  %2243 = vmatprep.subr.mxu1 %v1749_v11  ;;  %v1701_v3 = vld [vmem:[%s6172_s8 + $0x228] sm:$0xff] }
 0x1f0   : > { %2308 = vmatprep.subr.mxu0 %v1761_v37  ;;  %2244 = vmatpush2.msra.mxu1 %v1748_v13  ;;  %v1700_v37 = vld [vmem:[%s6172_s8 + $0x220] sm:$0xff] }
 0x1f1   : > { %2309 = vmatpush1.msra.mxu0 %v1760_v56  ;;  %2245 = vmatprep.subr.mxu1 %v1745_v15  ;;  %v1697_v56 = vld [vmem:[%s6172_s8 + $0x208] sm:$0xff] }
 0x1f2   : > { %2310 = vmatprep.subr.mxu0 %v1885_v0  ;;  %2246 = vmatpush2.msra.mxu1 %v1744_v17  ;;  %v1696_v0 = vld [vmem:[%s6172_s8 + $0x200] sm:$0xff] }
 0x1f3   : > { %2311 = vmatpush2.msra.mxu0 %v1884_v6  ;;  %2247 = vmatprep.subr.mxu1 %v1741_v18  ;;  %v1949_v6 = vld [vmem:[%s6172_s8 + $0x9e8] sm:$0xff] }
 0x1f4   : > { %2312 = vmatprep.subr.mxu0 %v1881_v8  ;;  %2248 = vmatpush2.msra.mxu1 %v1740_v63 }
 0x1f5   : > { %2313 = vmatpush2.msra.mxu0 %v1880_v10  ;;  %2249 = vmatprep.subr.mxu1 %v1737_v20 }
 0x1f6   : > { %2314 = vmatprep.subr.mxu0 %v1877_v12  ;;  %2250 = vmatpush2.msra.mxu1 %v1736_v22 }
 0x1f7   : > { %2315 = vmatpush2.msra.mxu0 %v1876_v14  ;;  %2251 = vmatprep.subr.mxu1 %v1733_v24 }
 0x1f8   : > { %2316 = vmatprep.subr.mxu0 %v1873_v16  ;;  %2252 = vmatpush2.msra.mxu1 %v1732_v26  ;;  %v4700_v26 = vsub.s32 2, %v3857_v46 }
 0x1f9   : > { %2317 = vmatpush2.msra.mxu0 %v1872_v61  ;;  %2253 = vmatprep.subr.mxu1 %v1729_v28 }
 0x1fa   : > { %2318 = vmatprep.subr.mxu0 %v1869_v62  ;;  %2254 = vmatpush2.msra.mxu1 %v1728_v31 }
 0x1fb   : > { %2319 = vmatpush2.msra.mxu0 %v1868_v19  ;;  %2255 = vmatprep.subr.mxu1 %v1725_v34 }
 0x1fc   : > { %2320 = vmatprep.subr.mxu0 %v1865_v21  ;;  %2256 = vmatpush2.msra.mxu1 %v1724_v36 }
 0x1fd   : > { %2321 = vmatpush2.msra.mxu0 %v1864_v23  ;;  %2257 = vmatprep.subr.mxu1 %v1721_v39 }
 0x1fe   : > { %2322 = vmatprep.subr.mxu0 %v1861_v25  ;;  %2258 = vmatpush2.msra.mxu1 %v1720_v41  ;;  %v4697_v25 = vsub.s32 3, %v3857_v46 }
 0x1ff   : > { %2323 = vmatpush2.msra.mxu0 %v1860_v27  ;;  %2259 = vmatprep.subr.mxu1 %v1717_v44 }
 0x200   : > { %2324 = vmatprep.subr.mxu0 %v1857_v30  ;;  %2260 = vmatpush2.msra.mxu1 %v1716_v48  ;;  %v4705_v30 = vld [vmem:[%s6171_s7] sm:$0xff] }
 0x201   : > { %2325 = vmatpush2.msra.mxu0 %v1856_v32  ;;  %2261 = vmatprep.subr.mxu1 %v1713_v51  ;;  %v978_v31 = vrot.slane %v4705_v30, %v3866_v49  ;;  %v986_v32 = vrot.slane %v4705_v30, %v4697_v25  ;;  %v4713_v34 = vrot.slane %v4705_v30, %v3860_v47 }
 0x202   : > { %2326 = vmatprep.subr.mxu0 %v1853_v35  ;;  %2262 = vmatpush2.msra.mxu1 %v1712_v53  ;;  %v4717_v35 = vrot.slane %v4705_v30, %v4700_v26 }
 0x203   : > { %2327 = vmatpush2.msra.mxu0 %v1852_v38  ;;  %2263 = vmatprep.subr.mxu1 %v1709_v55 }
 0x204   : > { %2328 = vmatprep.subr.mxu0 %v1849_v40  ;;  %2264 = vmatpush2.msra.mxu1 %v1708_v57 }
 0x205   : > { %2329 = vmatpush2.msra.mxu0 %v1848_v43  ;;  %2265 = vmatprep.subr.mxu1 %v1705_v59 }
 0x206   : > { %2330 = vmatprep.subr.mxu0 %v1845_v45  ;;  %2266 = vmatpush2.msra.mxu1 %v1704_v1 }
 0x207   : > { %2331 = vmatpush2.msra.mxu0 %v1844_v50  ;;  %2267 = vmatprep.subr.mxu1 %v1701_v3 }
 0x208   : > { %2332 = vmatprep.subr.mxu0 %v1841_v52  ;;  %2268 = vmatpush2.msra.mxu1 %v1700_v37 }
 0x209   : > { %2333 = vmatpush2.msra.mxu0 %v1840_v54  ;;  %2269 = vmatprep.subr.mxu1 %v1697_v56 }
 0x20a   : > { %2334 = vmatprep.subr.mxu0 %v1837_v33  ;;  %2270 = vmatpush2.msra.mxu1 %v1696_v0 }
 0x20b   : > { %2335 = vmatpush2.msra.mxu0 %v1836_v58  ;;  %2349 = vmatprep.subr.mxu1 %v1949_v6 }
 0x20c   : > { %2336 = vmatprep.subr.mxu0 %v1833_v60 }
 0x20d   : > { %2337 = vmatpush2.msra.mxu0 %v1832_v2 }
 0x20e   : > { %2338 = vmatprep.subr.mxu0 %v1829_v4 }
 0x20f   : > { %2339 = vmatpush2.msra.mxu0 %v1828_v42 }
 0x210   : > { %2340 = vmatprep.subr.mxu0 %v1825_v29 }
 0x211   : > { %2341 = vmatpush2.msra.mxu0 %v1824_v5 }
 0x212   : > { %2420 = vmatprep.subr.mxu0 %v2077_v7 }
 0x249   : > { %v1077_v8 = vpop.f32.mrf.mxu1  ;;  %v1190_v9 = vpop.f32.mrf.mxu0 }
 0x24a   : > { %v1078_v53 = vadd.f32 %v1077_v8, %v4713_v34  ;;  %v1191_v54 = vadd.f32 %v1190_v9, %v4717_v35 }
 0x24b   : > { %v1079_v10 = vpop.f32.mrf.mxu1  ;;  %v1192_v11 = vpop.f32.mrf.mxu0 }
 0x24c   : > { %v1080_v41 = vadd.f32 %v1079_v10, %v978_v31  ;;  %v1193_v43 = vadd.f32 %v1192_v11, %v986_v32 }
 0x24d   : > { %v1083_v12 = vpop.f32.mrf.mxu1  ;;  %v1196_v13 = vpop.f32.mrf.mxu0 }
 0x24e   : > { %v1084_v44 = vadd.f32 %v1083_v12, %v4713_v34  ;;  %v1197_v45 = vadd.f32 %v1196_v13, %v4717_v35 }
 0x24f   : > { %v1085_v14 = vpop.f32.mrf.mxu1  ;;  %v1198_v15 = vpop.f32.mrf.mxu0 }
 0x250   : > { %v1086_v36 = vadd.f32 %v1085_v14, %v978_v31  ;;  %v1199_v38 = vadd.f32 %v1198_v15, %v986_v32  ;;  %v1464_v3 = vmax.f32 %v1078_v53, %v1084_v44  ;;  %v1490_v4 = vmax.f32 %v1191_v54, %v1197_v45 }
 0x252   : > { %v1477_v55 = vmax.f32 %v1080_v41, %v1086_v36  ;;  %v1503_v33 = vmax.f32 %v1193_v43, %v1199_v38 }
 0x253   : > { %v1089_v16 = vpop.f32.mrf.mxu1  ;;  %v1202_v17 = vpop.f32.mrf.mxu0 }
 0x254   : > { %v1090_v59 = vadd.f32 %v1089_v16, %v4713_v34  ;;  %v1203_v60 = vadd.f32 %v1202_v17, %v4717_v35 }
 0x255   : > { %v1091_v61 = vpop.f32.mrf.mxu1  ;;  %v1204_v18 = vpop.f32.mrf.mxu0 }
 0x256   : > { %v1092_v51 = vadd.f32 %v1091_v61, %v978_v31  ;;  %v1205_v52 = vadd.f32 %v1204_v18, %v986_v32  ;;  %v1465_v8 = vmax.f32 %v1464_v3, %v1090_v59  ;;  %v1491_v9 = vmax.f32 %v1490_v4, %v1203_v60 }
 0x257   : > { %v1095_v62 = vpop.f32.mrf.mxu1  ;;  %v1208_v63 = vpop.f32.mrf.mxu0 }
 0x258   : > { %v1478_v37 = vmax.f32 %v1477_v55, %v1092_v51  ;;  %v1504_v42 = vmax.f32 %v1503_v33, %v1205_v52  ;;  %v1096_v56 = vadd.f32 %v1095_v62, %v4713_v34  ;;  %v1209_v29 = vadd.f32 %v1208_v63, %v4717_v35 }
 0x259   : > { %v1097_v19 = vpop.f32.mrf.mxu1  ;;  %v1210_v20 = vpop.f32.mrf.mxu0 }
 0x25a   : > { %v1098_v1 = vadd.f32 %v1097_v19, %v978_v31  ;;  %v1211_v2 = vadd.f32 %v1210_v20, %v986_v32  ;;  %v1466_v61 = vmax.f32 %v1465_v8, %v1096_v56  ;;  %v1492_v18 = vmax.f32 %v1491_v9, %v1209_v29 }
 0x25c   : > { %v1479_v10 = vmax.f32 %v1478_v37, %v1098_v1  ;;  %v1505_v11 = vmax.f32 %v1504_v42, %v1211_v2 }
 0x25d   : > { %v1101_v21 = vpop.f32.mrf.mxu1  ;;  %v1214_v22 = vpop.f32.mrf.mxu0 }
 0x25e   : > { %v1102_v12 = vadd.f32 %v1101_v21, %v4713_v34  ;;  %v1215_v13 = vadd.f32 %v1214_v22, %v4717_v35 }
 0x25f   : > { %v1103_v23 = vpop.f32.mrf.mxu1  ;;  %v1216_v24 = vpop.f32.mrf.mxu0 }
 0x260   : > { %v1104_v0 = vadd.f32 %v1103_v23, %v978_v31  ;;  %v1217_v5 = vadd.f32 %v1216_v24, %v986_v32  ;;  %v1467_v41 = vmax.f32 %v1466_v61, %v1102_v12  ;;  %v1493_v21 = vmax.f32 %v1492_v18, %v1215_v13 }
 0x261   : > { %v1107_v27 = vpop.f32.mrf.mxu1  ;;  %v1220_v28 = vpop.f32.mrf.mxu0 }
 0x262   : > { %v1480_v62 = vmax.f32 %v1479_v10, %v1104_v0  ;;  %v1506_v63 = vmax.f32 %v1505_v11, %v1217_v5  ;;  %v1108_v19 = vadd.f32 %v1107_v27, %v4713_v34  ;;  %v1221_v20 = vadd.f32 %v1220_v28, %v4717_v35 }
 0x263   : > { %v1109_v39 = vpop.f32.mrf.mxu1  ;;  %v1222_v40 = vpop.f32.mrf.mxu0 }
 0x264   : > { %v1110_v14 = vadd.f32 %v1109_v39, %v978_v31  ;;  %v1223_v15 = vadd.f32 %v1222_v40, %v986_v32  ;;  %v1468_v53 = vmax.f32 %v1467_v41, %v1108_v19  ;;  %v1494_v27 = vmax.f32 %v1493_v21, %v1221_v20 }
 0x266   : > { %v1481_v43 = vmax.f32 %v1480_v62, %v1110_v14  ;;  %v1507_v22 = vmax.f32 %v1506_v63, %v1223_v15 }
 0x26d   : > { %v1113_v48 = vpop.f32.mrf.mxu1  ;;  %v1226_v50 = vpop.f32.mrf.mxu0 }
 0x26e   : > { %v1114_v39 = vadd.f32 %v1113_v48, %v4713_v34  ;;  %v1227_v40 = vadd.f32 %v1226_v50, %v4717_v35 }
 0x26f   : > { %v1115_v57 = vpop.f32.mrf.mxu1  ;;  %v1228_v58 = vpop.f32.mrf.mxu0 }
 0x270   : > { %v1116_v23 = vadd.f32 %v1115_v57, %v978_v31  ;;  %v1229_v24 = vadd.f32 %v1228_v58, %v986_v32  ;;  %v1469_v59 = vmax.f32 %v1468_v53, %v1114_v39  ;;  %v1495_v60 = vmax.f32 %v1494_v27, %v1227_v40 }
 0x272   : > { %v1482_v54 = vmax.f32 %v1481_v43, %v1116_v23  ;;  %v1508_v28 = vmax.f32 %v1507_v22, %v1229_v24 }
 0x273   : > { %v1119_v6 = vpop.f32.mrf.mxu1  ;;  %v1232_v7 = vpop.f32.mrf.mxu0 }
 0x274   : > { %v1120_v55 = vadd.f32 %v1119_v6, %v4713_v34  ;;  %v1233_v33 = vadd.f32 %v1232_v7, %v4717_v35  ;;  %v993_v34 = vsub.s32 5, %v3857_v46  ;;  %v1001_v35 = vsub.s32 7, %v3857_v46 }
 0x275   : > { %v1121_v16 = vpop.f32.mrf.mxu1  ;;  %v1234_v17 = vpop.f32.mrf.mxu0 }
 0x276   : > { %v1122_v44 = vadd.f32 %v1121_v16, %v978_v31  ;;  %v1235_v45 = vadd.f32 %v1234_v17, %v986_v32  ;;  %v989_v31 = vsub.s32 4, %v3857_v46  ;;  %v997_v32 = vsub.s32 6, %v3857_v46 }
 0x277   : > { %v1470_v3 = vmax.f32 %v1469_v59, %v1120_v55  ;;  %v1496_v4 = vmax.f32 %v1495_v60, %v1233_v33  ;;  %v4752_v12 = vrot.slane %v4705_v30, %v993_v34  ;;  %v4757_v13 = vrot.slane %v4705_v30, %v1001_v35 }
 0x278   : > { %v1303_v36 = vpop.f32.mrf.mxu1  ;;  %v1416_v38 = vpop.f32.mrf.mxu0  ;;  %v1483_v1 = vmax.f32 %v1482_v54, %v1122_v44  ;;  %v1509_v48 = vmax.f32 %v1508_v28, %v1235_v45  ;;  %v4742_v6 = vrot.slane %v4705_v30, %v989_v31  ;;  %v4747_v7 = vrot.slane %v4705_v30, %v997_v32 }
 0x279   : > { %v1471_v8 = vrot.slane %v1470_v3, 4  ;;  %v1497_v9 = vrot.slane %v1496_v4, 4 }
 0x27a   : > { %v1305_v51 = vpop.f32.mrf.mxu1  ;;  %v1418_v52 = vpop.f32.mrf.mxu0  ;;  %v1484_v56 = vrot.slane %v1483_v1, 4  ;;  %v1510_v29 = vrot.slane %v1509_v48, 4  ;;  %v1304_v61 = vadd.f32 %v1303_v36, %v4742_v6  ;;  %v1417_v18 = vadd.f32 %v1416_v38, %v4747_v7 }
 0x27b   : > { %v4767_v19 = vmax.f32 %v1470_v3, %v1471_v8  ;;  %v4769_v20 = vmax.f32 %v1496_v4, %v1497_v9  ;;  %v1306_v21 = vadd.f32 %v1305_v51, %v4752_v12  ;;  %v1419_v36 = vadd.f32 %v1418_v52, %v4757_v13 }
 0x27c   : > { %v1309_v57 = vpop.f32.mrf.mxu1  ;;  %v1422_v58 = vpop.f32.mrf.mxu0  ;;  %v4759_v14 = vmax.f32 %v1483_v1, %v1484_v56  ;;  %v4761_v15 = vmax.f32 %v1509_v48, %v1510_v29 }
 0x27d   : > { %v1310_v62 = vadd.f32 %v1309_v57, %v4742_v6  ;;  %v1423_v63 = vadd.f32 %v1422_v58, %v4747_v7 }
 0x27e   : > { %v1311_v2 = vpop.f32.mrf.mxu1  ;;  %v1424_v50 = vpop.f32.mrf.mxu0  ;;  %v1486_v22 = vrot.slane %v4759_v14, 2  ;;  %v1512_v39 = vrot.slane %v4761_v15, 2 }
 0x27f   : > { %v1312_v30 = vadd.f32 %v1311_v2, %v4752_v12  ;;  %v1425_v23 = vadd.f32 %v1424_v50, %v4757_v13  ;;  %v1516_v27 = vmax.f32 %v1304_v61, %v1310_v62  ;;  %v1542_v54 = vmax.f32 %v1417_v18, %v1423_v63 }
 0x280   : > { %v1315_v37 = vpop.f32.mrf.mxu1  ;;  %v1428_v42 = vpop.f32.mrf.mxu0 }
 0x281   : > { %v1316_v38 = vadd.f32 %v1315_v37, %v4742_v6  ;;  %v1429_v43 = vadd.f32 %v1428_v42, %v4747_v7  ;;  %v1529_v28 = vmax.f32 %v1306_v21, %v1312_v30  ;;  %v1555_v55 = vmax.f32 %v1419_v36, %v1425_v23 }
 0x282   : > { %v1317_v0 = vpop.f32.mrf.mxu1  ;;  %v1430_v5 = vpop.f32.mrf.mxu0  ;;  %v1473_v23 = vrot.slane %v4767_v19, 2 }
 0x283   : > { %v1318_v40 = vadd.f32 %v1317_v0, %v4752_v12  ;;  %v1431_v44 = vadd.f32 %v1430_v5, %v4757_v13  ;;  %v1517_v60 = vmax.f32 %v1516_v27, %v1316_v38  ;;  %v1543_v1 = vmax.f32 %v1542_v54, %v1429_v43 }
 0x284   : > { %v1321_v10 = vpop.f32.mrf.mxu1  ;;  %v1434_v11 = vpop.f32.mrf.mxu0  ;;  %v1513_v27 = vmax.f32 %v4761_v15, %v1512_v39 }
 0x285   : > { %v1322_v51 = vadd.f32 %v1321_v10, %v4742_v6  ;;  %v1435_v52 = vadd.f32 %v1434_v11, %v4747_v7  ;;  %v1530_v50 = vmax.f32 %v1529_v28, %v1318_v40  ;;  %v1556_v3 = vmax.f32 %v1555_v55, %v1431_v44 }
 0x286   : > { %v1323_v16 = vpop.f32.mrf.mxu1  ;;  %v1436_v17 = vpop.f32.mrf.mxu0 }
 0x287   : > { %v1324_v33 = vadd.f32 %v1323_v16, %v4752_v12  ;;  %v1437_v57 = vadd.f32 %v1436_v17, %v4757_v13  ;;  %v1518_v29 = vmax.f32 %v1517_v60, %v1322_v51  ;;  %v1544_v0 = vmax.f32 %v1543_v1, %v1435_v52 }
 0x288   : > { %v1327_v24 = vpop.f32.mrf.mxu1  ;;  %v1440_v41 = vpop.f32.mrf.mxu0 }
 0x289   : > { %v1328_v48 = vadd.f32 %v1327_v24, %v4742_v6  ;;  %v1441_v2 = vadd.f32 %v1440_v41, %v4747_v7  ;;  %v1531_v9 = vmax.f32 %v1530_v50, %v1324_v33  ;;  %v1557_v10 = vmax.f32 %v1556_v3, %v1437_v57 }
 0x28a   : > { %v1329_v45 = vpop.f32.mrf.mxu1  ;;  %v1442_v53 = vpop.f32.mrf.mxu0  ;;  %v1499_v24 = vrot.slane %v4769_v20, 2 }
 0x28b   : > { %v1330_v4 = vadd.f32 %v1329_v45, %v4752_v12  ;;  %v1443_v37 = vadd.f32 %v1442_v53, %v4757_v13  ;;  %v1519_v18 = vmax.f32 %v1518_v29, %v1328_v48  ;;  %v1545_v62 = vmax.f32 %v1544_v0, %v1441_v2 }
 0x28c   : > { %v1333_v58 = vpop.f32.mrf.mxu1  ;;  %v1446_v59 = vpop.f32.mrf.mxu0  ;;  %v1487_v53 = vmax.f32 %v4759_v14, %v1486_v22  ;;  %v1500_v60 = vmax.f32 %v4769_v20, %v1499_v24 }
 0x28d   : > { %v1334_v5 = vadd.f32 %v1333_v58, %v4742_v6  ;;  %v1447_v8 = vadd.f32 %v1446_v59, %v4747_v7  ;;  %v1532_v41 = vmax.f32 %v1531_v9, %v1330_v4  ;;  %v1558_v21 = vmax.f32 %v1557_v10, %v1443_v37 }
 0x28e   : > { %v1335_v42 = vpop.f32.mrf.mxu1  ;;  %v1448_v56 = vpop.f32.mrf.mxu0  ;;  %v1474_v59 = vmax.f32 %v4767_v19, %v1473_v23  ;;  %v1488_v3 = vrot.slane %v1487_v53, 1  ;;  %v3577_v4 = vmov 1966171168   ;;  %v1501_v20 = vrot.slane %v1500_v60, 1 }
 0x28f   : > { %v1336_v11 = vadd.f32 %v1335_v42, %v4752_v12  ;;  %v1449_v16 = vadd.f32 %v1448_v56, %v4757_v13  ;;  %v1520_v43 = vmax.f32 %v1519_v18, %v1334_v5  ;;  %v1546_v40 = vmax.f32 %v1545_v62, %v1447_v8 }
 0x290   : > { %v1339_v17 = vpop.f32.mrf.mxu1  ;;  %v1452_v61 = vpop.f32.mrf.mxu0  ;;  %v1581_v37 = vunpack.c.l.s4 %v3577_v4  ;;  %v1475_v29 = vrot.slane %v1474_v59, 1  ;;  %v1489_v10 = vmax.f32 %v1487_v53, %v1488_v3  ;;  %v1502_v62 = vmax.f32 %v1500_v60, %v1501_v20  ;;  %v1948_v3 = vld [vmem:[%s6172_s8 + $0x9e0] sm:$0xff] }
 0x291   : > { %v1340_v63 = vadd.f32 %v1339_v17, %v4742_v6  ;;  %v1453_v30 = vadd.f32 %v1452_v61, %v4747_v7  ;;  %v1533_v54 = vmax.f32 %v1532_v41, %v1336_v11  ;;  %v1559_v51 = vmax.f32 %v1558_v21, %v1449_v16  ;;  %v2076_v4 = vld [vmem:[%s6172_s8 + $0xde0] sm:$0xff] }
 0x292   : > { %v1341_v36 = vpop.f32.mrf.mxu1  ;;  %v1454_v38 = vpop.f32.mrf.mxu0  ;;  %v1582_v11 = vunpack.c.0.s8 %v1581_v37  ;;  %v1476_v18 = vmax.f32 %v1474_v59, %v1475_v29  ;;  %v1945_v37 = vld [vmem:[%s6172_s8 + $0x9c8] sm:$0xff]  ;;  %v1940_v29 = vld [vmem:[%s6172_s8 + $0x9a0] sm:$0xff] }
 0x293   : > { %v1342_v44 = vadd.f32 %v1341_v36, %v4752_v12  ;;  %v1455_v45 = vadd.f32 %v1454_v38, %v4757_v13  ;;  %v1521_v55 = vmax.f32 %v1520_v43, %v1340_v63  ;;  %v1547_v33 = vmax.f32 %v1546_v40, %v1453_v30  ;;  %v2068_v20 = vld [vmem:[%s6172_s8 + $0xda0] sm:$0xff] }
 0x294   : > { %v1345_v52 = vpop.f32.mrf.mxu1  ;;  %v1458_v28 = vpop.f32.mrf.mxu0  ;;  %v1576_v41 = vcombine.low %v1476_v18, %v1489_v10  ;;  %v1585_v21 = vsub.s32 %v1582_v11, %v3857_v46  ;;  %v1933_v10 = vld [vmem:[%s6172_s8 + $0x968] sm:$0xff]  ;;  %v2056_v18 = vld [vmem:[%s6172_s8 + $0xd40] sm:$0xff]  ;;  %v1822_v46 = vld [vmem:[%s6172_s8 + $0x5f0] sm:$0xff] }
 0x295   : > { %v1346_v57 = vadd.f32 %v1345_v52, %v4742_v6  ;;  %v1459_v58 = vadd.f32 %v1458_v28, %v4747_v7  ;;  %v1534_v1 = vmax.f32 %v1533_v54, %v1342_v44  ;;  %v1560_v48 = vmax.f32 %v1559_v51, %v1455_v45  ;;  %v2061_v11 = vld [vmem:[%s6172_s8 + $0xd68] sm:$0xff] }
 0x296   : > { %v1347_v2 = vpop.f32.mrf.mxu1  ;;  %v1460_v14 = vpop.f32.mrf.mxu0  ;;  %v1514_v6 = vrot.slane %v1513_v27, 1 }
 0x297   : > { %v1522_v22 = vmax.f32 %v1521_v55, %v1346_v57  ;;  %v1548_v15 = vmax.f32 %v1547_v33, %v1459_v58  ;;  %v1348_v39 = vadd.f32 %v1347_v2, %v4752_v12  ;;  %v1461_v50 = vadd.f32 %v1460_v14, %v4757_v13 }
 0x298   : > { %v1515_v16 = vmax.f32 %v1513_v27, %v1514_v6  ;;  %v1586_v27 = vrot.slane %v1576_v41, %v1585_v21  ;;  %v2049_v41 = vld [vmem:[%s6172_s8 + $0xd08] sm:$0xff] }
 0x299   : > { %v1523_v42 = vrot.slane %v1522_v22, 4  ;;  %v1549_v7 = vrot.slane %v1548_v15, 4  ;;  %v1535_v56 = vmax.f32 %v1534_v1, %v1348_v39  ;;  %v1561_v19 = vmax.f32 %v1560_v48, %v1461_v50 }
 0x29a   : > { %v1577_v36 = vcombine.low %v1502_v62, %v1515_v16  ;;  %v1932_v16 = vld [vmem:[%s6172_s8 + $0x960] sm:$0xff]  ;;  %v1925_v62 = vld [vmem:[%s6172_s8 + $0x928] sm:$0xff] }
 0x29b   : > { %v1524_v0 = vmax.f32 %v1522_v22, %v1523_v42  ;;  %v1550_v5 = vmax.f32 %v1548_v15, %v1549_v7  ;;  %v1536_v8 = vrot.slane %v1535_v56, 4  ;;  %v1562_v9 = vrot.slane %v1561_v19, 4  ;;  %v2073_v42 = vld [vmem:[%s6172_s8 + $0xdc8] sm:$0xff] }
 0x29c   : > { %v1593_v54 = vrot.slane %v1577_v36, %v1585_v21  ;;  %v2048_v36 = vld [vmem:[%s6172_s8 + $0xd00] sm:$0xff] }
 0x29d   : > { %v1525_v12 = vrot.slane %v1524_v0, 2  ;;  %v1551_v17 = vrot.slane %v1550_v5, 2  ;;  %v1537_v13 = vmax.f32 %v1535_v56, %v1536_v8  ;;  %v1563_v61 = vmax.f32 %v1561_v19, %v1562_v9  ;;  %v1944_v56 = vld [vmem:[%s6172_s8 + $0x9c0] sm:$0xff]  ;;  %v1941_v19 = vld [vmem:[%s6172_s8 + $0x9a8] sm:$0xff] }
 0x29e   : > { %v1608_v58 = vcombine.low %v1586_v27, %v1593_v54  ;;  %v1936_v8 = vld [vmem:[%s6172_s8 + $0x980] sm:$0xff] }
 0x29f   : > { %v1526_v63 = vmax.f32 %v1524_v0, %v1525_v12  ;;  %v1552_v30 = vmax.f32 %v1550_v5, %v1551_v17  ;;  %v1538_v23 = vrot.slane %v1537_v13, 2  ;;  %v1564_v24 = vrot.slane %v1563_v61, 2  ;;  %v1937_v0 = vld [vmem:[%s6172_s8 + $0x988] sm:$0xff]  ;;  %v2064_v9 = vld [vmem:[%s6172_s8 + $0xd80] sm:$0xff] }
 0x2a0   : > { %v1616_v48 = vrot.slane %v1608_v58, %v1585_v21  ;;  %v2065_v5 = vld [vmem:[%s6172_s8 + $0xd88] sm:$0xff]  ;;  %v2060_v12 = vld [vmem:[%s6172_s8 + $0xd60] sm:$0xff] }
 0x2a1   : > { %v1527_v38 = vrot.slane %v1526_v63, 1  ;;  %v1553_v43 = vrot.slane %v1552_v30, 1  ;;  %v1539_v40 = vmax.f32 %v1537_v13, %v1538_v23  ;;  %v1565_v44 = vmax.f32 %v1563_v61, %v1564_v24  ;;  %v1929_v17 = vld [vmem:[%s6172_s8 + $0x948] sm:$0xff]  ;;  %v1928_v61 = vld [vmem:[%s6172_s8 + $0x940] sm:$0xff] }
 0x2a2   : > { %v2057_v13 = vld [vmem:[%s6172_s8 + $0xd48] sm:$0xff]  ;;  %v2052_v23 = vld [vmem:[%s6172_s8 + $0xd20] sm:$0xff] }
 0x2a3   : > { %v1540_v45 = vrot.slane %v1539_v40, 1  ;;  %v1566_v53 = vrot.slane %v1565_v44, 1  ;;  %v1528_v51 = vmax.f32 %v1526_v63, %v1527_v38  ;;  %v1554_v52 = vmax.f32 %v1552_v30, %v1553_v43  ;;  %v2053_v63 = vld [vmem:[%s6172_s8 + $0xd28] sm:$0xff]  ;;  %v1924_v30 = vld [vmem:[%s6172_s8 + $0x920] sm:$0xff] }
 0x2a4   : > { %v1921_v24 = vld [vmem:[%s6172_s8 + $0x908] sm:$0xff]  ;;  %v1912_v27 = vld [vmem:[%s6172_s8 + $0x8c0] sm:$0xff] }
 0x2a5   : > { %v1541_v28 = vmax.f32 %v1539_v40, %v1540_v45  ;;  %v1567_v55 = vmax.f32 %v1565_v44, %v1566_v53  ;;  %v1917_v38 = vld [vmem:[%s6172_s8 + $0x8e8] sm:$0xff]  ;;  %v1916_v40 = vld [vmem:[%s6172_s8 + $0x8e0] sm:$0xff] }
 0x2a6   : > { %v2045_v43 = vld [vmem:[%s6172_s8 + $0xce8] sm:$0xff]  ;;  %v2044_v44 = vld [vmem:[%s6172_s8 + $0xce0] sm:$0xff] }
 0x2a7   : > { %v1578_v33 = vcombine.low %v1528_v51, %v1541_v28  ;;  %v1579_v57 = vcombine.low %v1554_v52, %v1567_v55  ;;  %v1913_v45 = vld [vmem:[%s6172_s8 + $0x8c8] sm:$0xff]  ;;  %v2040_v54 = vld [vmem:[%s6172_s8 + $0xcc0] sm:$0xff] }
 0x2a8   : > { %v2041_v53 = vld [vmem:[%s6172_s8 + $0xcc8] sm:$0xff]  ;;  %v1908_v28 = vld [vmem:[%s6172_s8 + $0x8a0] sm:$0xff] }
 0x2a9   : > { %v1600_v59 = vrot.slane %v1578_v33, %v1585_v21  ;;  %v1607_v60 = vrot.slane %v1579_v57, %v1585_v21  ;;  %v1909_v51 = vld [vmem:[%s6172_s8 + $0x8a8] sm:$0xff]  ;;  %v2036_v55 = vld [vmem:[%s6172_s8 + $0xca0] sm:$0xff] }
 0x2aa   : > { %v2037_v52 = vld [vmem:[%s6172_s8 + $0xca8] sm:$0xff]  ;;  %v1904_v58 = vld [vmem:[%s6172_s8 + $0x880] sm:$0xff] }
 0x2ab   : > { %v1609_v1 = vcombine.low %v1600_v59, %v1607_v60  ;;  %v1905_v33 = vld [vmem:[%s6172_s8 + $0x888] sm:$0xff]  ;;  %v2032_v59 = vld [vmem:[%s6172_s8 + $0xc80] sm:$0xff] }
 0x2ac   : > { %v2033_v57 = vld [vmem:[%s6172_s8 + $0xc88] sm:$0xff] }
 0x2ad   : > { %v1623_v2 = vrot.slane %v1609_v1, %v1585_v21  ;;  %v1920_v21 = vld [vmem:[%s6172_s8 + $0x900] sm:$0xff]  ;;  %v1901_v60 = vld [vmem:[%s6172_s8 + $0x868] sm:$0xff] }
 0x2ae   : > { %v2029_v1 = vld [vmem:[%s6172_s8 + $0xc68] sm:$0xff] }
 0x2af   : > { %v4808_v14 = vcombine.low %v1616_v48, %v1623_v2  ;;  %v1900_v48 = vld [vmem:[%s6172_s8 + $0x860] sm:$0xff] }
 0x2b0   : > { %v2028_v2 = vld [vmem:[%s6172_s8 + $0xc60] sm:$0xff] }
 0x2b1   : > { %v4812_v22 = vrot.slane %v4808_v14, %v3866_v49  ;;  %v4816_v15 = vrot.slane %v4808_v14, %v4697_v25  ;;  %v4820_v39 = vrot.slane %v4808_v14, %v3860_v47  ;;  %v4824_v50 = vrot.slane %v4808_v14, %v4700_v26 }
 0x2b2   : > { %v4842_v6 = vrot.slane %v4808_v14, %v993_v34  ;;  %v4850_v7 = vrot.slane %v4808_v14, %v1001_v35  ;;  %v2072_v34 = vld [vmem:[%s6172_s8 + $0xdc0] sm:$0xff]  ;;  %v2069_v35 = vld [vmem:[%s6172_s8 + $0xda8] sm:$0xff] }
 0x2b3   : > { %2271 = vmatprep.mubr.f32.mxu1 %v4812_v22  ;;  %2342 = vmatprep.mubr.f32.mxu0 %v4816_v15 }
 0x2b4   : > { %2272 = vmatmul.mubr.f32.vlgmr.msra.gmra.mxu1 %v4820_v39  ;;  %2343 = vmatmul.mubr.f32.vlgmr.msra.gmra.mxu0 %v4824_v50 }
 0x2b5   : > { %2350 = vmatpush1.msra.mxu1 %v1948_v3  ;;  %2421 = vmatpush1.msra.mxu0 %v2076_v4  ;;  %v1897_v3 = vld [vmem:[%s6172_s8 + $0x848] sm:$0xff] }
 0x2b6   : > { %2351 = vmatprep.subr.mxu1 %v1945_v37  ;;  %2413 = vmatprep.mubr.f32.mxu1 %v4842_v6  ;;  %v2025_v4 = vld [vmem:[%s6172_s8 + $0xc48] sm:$0xff]  ;;  %v1896_v37 = vld [vmem:[%s6172_s8 + $0x840] sm:$0xff] }
 0x2b7   : > { %2422 = vmatprep.subr.mxu0 %v2073_v42  ;;  %2484 = vmatprep.mubr.f32.mxu0 %v4850_v7  ;;  %v2024_v42 = vld [vmem:[%s6172_s8 + $0xc40] sm:$0xff] }
 0x2b8   : > { %2352 = vmatpush1.msra.mxu1 %v1944_v56  ;;  %2423 = vmatpush1.msra.mxu0 %v2072_v34  ;;  %v1893_v56 = vld [vmem:[%s6172_s8 + $0x828] sm:$0xff] }
 0x2b9   : > { %2353 = vmatprep.subr.mxu1 %v1941_v19  ;;  %2424 = vmatprep.subr.mxu0 %v2069_v35  ;;  %v2021_v34 = vld [vmem:[%s6172_s8 + $0xc28] sm:$0xff]  ;;  %v1892_v19 = vld [vmem:[%s6172_s8 + $0x820] sm:$0xff] }
 0x2ba   : > { %2354 = vmatpush1.msra.mxu1 %v1940_v29  ;;  %2425 = vmatpush1.msra.mxu0 %v2068_v20  ;;  %v2020_v35 = vld [vmem:[%s6172_s8 + $0xc20] sm:$0xff]  ;;  %v1889_v29 = vld [vmem:[%s6172_s8 + $0x808] sm:$0xff] }
 0x2bb   : > { %2355 = vmatprep.subr.mxu1 %v1937_v0  ;;  %2426 = vmatprep.subr.mxu0 %v2065_v5  ;;  %v2017_v20 = vld [vmem:[%s6172_s8 + $0xc08] sm:$0xff]  ;;  %v1888_v0 = vld [vmem:[%s6172_s8 + $0x800] sm:$0xff] }
 0x2bc   : > { %2356 = vmatpush1.msra.mxu1 %v1936_v8  ;;  %2427 = vmatpush1.msra.mxu0 %v2064_v9  ;;  %v2016_v5 = vld [vmem:[%s6172_s8 + $0xc00] sm:$0xff]  ;;  %v2013_v8 = vld [vmem:[%s6172_s8 + $0xbe8] sm:$0xff] }
 0x2bd   : > { %2357 = vmatprep.subr.mxu1 %v1933_v10  ;;  %2428 = vmatprep.subr.mxu0 %v2061_v11  ;;  %v2141_v9 = vld [vmem:[%s6172_s8 + $0xfe8] sm:$0xff]  ;;  %v2012_v10 = vld [vmem:[%s6172_s8 + $0xbe0] sm:$0xff] }
 0x2be   : > { %2358 = vmatpush1.msra.mxu1 %v1932_v16  ;;  %2429 = vmatpush1.msra.mxu0 %v2060_v12  ;;  %v2140_v11 = vld [vmem:[%s6172_s8 + $0xfe0] sm:$0xff]  ;;  %v2009_v16 = vld [vmem:[%s6172_s8 + $0xbc8] sm:$0xff] }
 0x2bf   : > { %2359 = vmatprep.subr.mxu1 %v1929_v17  ;;  %2430 = vmatprep.subr.mxu0 %v2057_v13  ;;  %v2137_v12 = vld [vmem:[%s6172_s8 + $0xfc8] sm:$0xff]  ;;  %v2008_v17 = vld [vmem:[%s6172_s8 + $0xbc0] sm:$0xff] }
 0x2c0   : > { %2360 = vmatpush1.msra.mxu1 %v1928_v61  ;;  %2431 = vmatpush1.msra.mxu0 %v2056_v18  ;;  %v2136_v13 = vld [vmem:[%s6172_s8 + $0xfc0] sm:$0xff]  ;;  %v2005_v61 = vld [vmem:[%s6172_s8 + $0xba8] sm:$0xff] }
 0x2c1   : > { %2361 = vmatprep.subr.mxu1 %v1925_v62  ;;  %2432 = vmatprep.subr.mxu0 %v2053_v63  ;;  %v2133_v18 = vld [vmem:[%s6172_s8 + $0xfa8] sm:$0xff]  ;;  %v2004_v62 = vld [vmem:[%s6172_s8 + $0xba0] sm:$0xff] }
 0x2c2   : > { %2362 = vmatpush1.msra.mxu1 %v1924_v30  ;;  %2433 = vmatpush1.msra.mxu0 %v2052_v23  ;;  %v2132_v63 = vld [vmem:[%s6172_s8 + $0xfa0] sm:$0xff]  ;;  %v2001_v30 = vld [vmem:[%s6172_s8 + $0xb88] sm:$0xff] }
 0x2c3   : > { %2363 = vmatprep.subr.mxu1 %v1921_v24  ;;  %2434 = vmatprep.subr.mxu0 %v2049_v41  ;;  %v2129_v23 = vld [vmem:[%s6172_s8 + $0xf88] sm:$0xff]  ;;  %v2000_v24 = vld [vmem:[%s6172_s8 + $0xb80] sm:$0xff] }
 0x2c4   : > { %2364 = vmatpush1.msra.mxu1 %v1920_v21  ;;  %2435 = vmatpush1.msra.mxu0 %v2048_v36  ;;  %v2128_v41 = vld [vmem:[%s6172_s8 + $0xf80] sm:$0xff]  ;;  %v1997_v21 = vld [vmem:[%s6172_s8 + $0xb68] sm:$0xff] }
 0x2c5   : > { %2365 = vmatprep.subr.mxu1 %v1917_v38  ;;  %2436 = vmatprep.subr.mxu0 %v2045_v43  ;;  %v2125_v36 = vld [vmem:[%s6172_s8 + $0xf68] sm:$0xff]  ;;  %v1996_v38 = vld [vmem:[%s6172_s8 + $0xb60] sm:$0xff] }
 0x2c6   : > { %2366 = vmatpush1.msra.mxu1 %v1916_v40  ;;  %2437 = vmatpush1.msra.mxu0 %v2044_v44  ;;  %v2124_v43 = vld [vmem:[%s6172_s8 + $0xf60] sm:$0xff]  ;;  %v1993_v40 = vld [vmem:[%s6172_s8 + $0xb48] sm:$0xff] }
 0x2c7   : > { %2367 = vmatprep.subr.mxu1 %v1913_v45  ;;  %2438 = vmatprep.subr.mxu0 %v2041_v53  ;;  %v2121_v44 = vld [vmem:[%s6172_s8 + $0xf48] sm:$0xff]  ;;  %v1992_v45 = vld [vmem:[%s6172_s8 + $0xb40] sm:$0xff] }
 0x2c8   : > { %2368 = vmatpush1.msra.mxu1 %v1912_v27  ;;  %2439 = vmatpush1.msra.mxu0 %v2040_v54  ;;  %v2120_v53 = vld [vmem:[%s6172_s8 + $0xf40] sm:$0xff]  ;;  %v1989_v27 = vld [vmem:[%s6172_s8 + $0xb28] sm:$0xff] }
 0x2c9   : > { %2369 = vmatprep.subr.mxu1 %v1909_v51  ;;  %2440 = vmatprep.subr.mxu0 %v2037_v52  ;;  %v2117_v54 = vld [vmem:[%s6172_s8 + $0xf28] sm:$0xff]  ;;  %v1988_v51 = vld [vmem:[%s6172_s8 + $0xb20] sm:$0xff] }
 0x2ca   : > { %2370 = vmatpush1.msra.mxu1 %v1908_v28  ;;  %2441 = vmatpush1.msra.mxu0 %v2036_v55  ;;  %v2116_v52 = vld [vmem:[%s6172_s8 + $0xf20] sm:$0xff]  ;;  %v1985_v28 = vld [vmem:[%s6172_s8 + $0xb08] sm:$0xff] }
 0x2cb   : > { %2371 = vmatprep.subr.mxu1 %v1905_v33  ;;  %2442 = vmatprep.subr.mxu0 %v2033_v57  ;;  %v2113_v55 = vld [vmem:[%s6172_s8 + $0xf08] sm:$0xff]  ;;  %v1984_v33 = vld [vmem:[%s6172_s8 + $0xb00] sm:$0xff] }
 0x2cc   : > { %2372 = vmatpush1.msra.mxu1 %v1904_v58  ;;  %2443 = vmatpush1.msra.mxu0 %v2032_v59  ;;  %v2112_v57 = vld [vmem:[%s6172_s8 + $0xf00] sm:$0xff]  ;;  %v1981_v58 = vld [vmem:[%s6172_s8 + $0xae8] sm:$0xff] }
 0x2cd   : > { %2373 = vmatprep.subr.mxu1 %v1901_v60  ;;  %2444 = vmatprep.subr.mxu0 %v2029_v1  ;;  %v2109_v59 = vld [vmem:[%s6172_s8 + $0xee8] sm:$0xff]  ;;  %v1980_v60 = vld [vmem:[%s6172_s8 + $0xae0] sm:$0xff] }
 0x2ce   : > { %2374 = vmatpush1.msra.mxu1 %v1900_v48  ;;  %2445 = vmatpush1.msra.mxu0 %v2028_v2  ;;  %v2108_v1 = vld [vmem:[%s6172_s8 + $0xee0] sm:$0xff]  ;;  %v1977_v48 = vld [vmem:[%s6172_s8 + $0xac8] sm:$0xff] }
 0x2cf   : > { %2375 = vmatprep.subr.mxu1 %v1897_v3  ;;  %2446 = vmatprep.subr.mxu0 %v2025_v4  ;;  %v2105_v2 = vld [vmem:[%s6172_s8 + $0xec8] sm:$0xff]  ;;  %v1976_v3 = vld [vmem:[%s6172_s8 + $0xac0] sm:$0xff] }
 0x2d0   : > { %2376 = vmatpush1.msra.mxu1 %v1896_v37  ;;  %2447 = vmatpush1.msra.mxu0 %v2024_v42  ;;  %v2104_v4 = vld [vmem:[%s6172_s8 + $0xec0] sm:$0xff]  ;;  %v1973_v37 = vld [vmem:[%s6172_s8 + $0xaa8] sm:$0xff] }
 0x2d1   : > { %2377 = vmatprep.subr.mxu1 %v1893_v56  ;;  %2448 = vmatprep.subr.mxu0 %v2021_v34  ;;  %v2101_v42 = vld [vmem:[%s6172_s8 + $0xea8] sm:$0xff]  ;;  %v1972_v56 = vld [vmem:[%s6172_s8 + $0xaa0] sm:$0xff] }
 0x2d2   : > { %2378 = vmatpush1.msra.mxu1 %v1892_v19  ;;  %2449 = vmatpush1.msra.mxu0 %v2020_v35  ;;  %v2100_v34 = vld [vmem:[%s6172_s8 + $0xea0] sm:$0xff]  ;;  %v1969_v19 = vld [vmem:[%s6172_s8 + $0xa88] sm:$0xff] }
 0x2d3   : > { %2379 = vmatprep.subr.mxu1 %v1889_v29  ;;  %2450 = vmatprep.subr.mxu0 %v2017_v20  ;;  %v2097_v35 = vld [vmem:[%s6172_s8 + $0xe88] sm:$0xff]  ;;  %v1968_v29 = vld [vmem:[%s6172_s8 + $0xa80] sm:$0xff] }
 0x2d4   : > { %2380 = vmatpush1.msra.mxu1 %v1888_v0  ;;  %2451 = vmatpush1.msra.mxu0 %v2016_v5  ;;  %v2096_v20 = vld [vmem:[%s6172_s8 + $0xe80] sm:$0xff]  ;;  %v1965_v0 = vld [vmem:[%s6172_s8 + $0xa68] sm:$0xff] }
 0x2d5   : > { %2381 = vmatprep.subr.mxu1 %v2013_v8  ;;  %2452 = vmatprep.subr.mxu0 %v2141_v9  ;;  %v2093_v5 = vld [vmem:[%s6172_s8 + $0xe68] sm:$0xff]  ;;  %v1964_v8 = vld [vmem:[%s6172_s8 + $0xa60] sm:$0xff] }
 0x2d6   : > { %2382 = vmatpush2.msra.mxu1 %v2012_v10  ;;  %2453 = vmatpush2.msra.mxu0 %v2140_v11  ;;  %v2092_v9 = vld [vmem:[%s6172_s8 + $0xe60] sm:$0xff]  ;;  %v1961_v10 = vld [vmem:[%s6172_s8 + $0xa48] sm:$0xff] }
 0x2d7   : > { %2383 = vmatprep.subr.mxu1 %v2009_v16  ;;  %2454 = vmatprep.subr.mxu0 %v2137_v12  ;;  %v2089_v11 = vld [vmem:[%s6172_s8 + $0xe48] sm:$0xff]  ;;  %v1960_v16 = vld [vmem:[%s6172_s8 + $0xa40] sm:$0xff] }
 0x2d8   : > { %2384 = vmatpush2.msra.mxu1 %v2008_v17  ;;  %2455 = vmatpush2.msra.mxu0 %v2136_v13  ;;  %v2088_v12 = vld [vmem:[%s6172_s8 + $0xe40] sm:$0xff]  ;;  %v1957_v17 = vld [vmem:[%s6172_s8 + $0xa28] sm:$0xff] }
 0x2d9   : > { %2385 = vmatprep.subr.mxu1 %v2005_v61  ;;  %2456 = vmatprep.subr.mxu0 %v2133_v18  ;;  %v2085_v13 = vld [vmem:[%s6172_s8 + $0xe28] sm:$0xff]  ;;  %v1956_v61 = vld [vmem:[%s6172_s8 + $0xa20] sm:$0xff] }
 0x2da   : > { %2386 = vmatpush2.msra.mxu1 %v2004_v62  ;;  %2457 = vmatpush2.msra.mxu0 %v2132_v63  ;;  %v2084_v18 = vld [vmem:[%s6172_s8 + $0xe20] sm:$0xff]  ;;  %v1953_v62 = vld [vmem:[%s6172_s8 + $0xa08] sm:$0xff] }
 0x2db   : > { %2387 = vmatprep.subr.mxu1 %v2001_v30  ;;  %2458 = vmatprep.subr.mxu0 %v2129_v23  ;;  %v2081_v63 = vld [vmem:[%s6172_s8 + $0xe08] sm:$0xff]  ;;  %v1952_v30 = vld [vmem:[%s6172_s8 + $0xa00] sm:$0xff] }
 0x2dc   : > { %2388 = vmatpush2.msra.mxu1 %v2000_v24  ;;  %2459 = vmatpush2.msra.mxu0 %v2128_v41  ;;  %v2080_v23 = vld [vmem:[%s6172_s8 + $0xe00] sm:$0xff]  ;;  %v5223_v24 = vrot.slane %v4808_v14, %v989_v31  ;;  %v5228_v41 = vrot.slane %v4808_v14, %v997_v32  ;;  %v1694_v31 = vld [vmem:[%s6172_s8 + $0x1f0] sm:$0xff]  ;;  %v1691_v32 = vld [vmem:[%s6172_s8 + $0x1d8] sm:$0xff] }
 0x2dd   : > { %2389 = vmatprep.subr.mxu1 %v1997_v21  ;;  %2460 = vmatprep.subr.mxu0 %v2125_v36  ;;  %v1695_v21 = vld [vmem:[%s6172_s8 + $0x1f8] sm:$0xff] }
 0x2de   : > { %2390 = vmatpush2.msra.mxu1 %v1996_v38  ;;  %2461 = vmatpush2.msra.mxu0 %v2124_v43  ;;  %v1823_v36 = vld [vmem:[%s6172_s8 + $0x5f8] sm:$0xff]  ;;  %v1690_v38 = vld [vmem:[%s6172_s8 + $0x1d0] sm:$0xff] }
 0x2df   : > { %2391 = vmatprep.subr.mxu1 %v1993_v40  ;;  %2462 = vmatprep.subr.mxu0 %v2121_v44  ;;  %v1819_v14 = vld [vmem:[%s6172_s8 + $0x5d8] sm:$0xff]  ;;  %v1818_v43 = vld [vmem:[%s6172_s8 + $0x5d0] sm:$0xff] }
 0x2e0   : > { %2392 = vmatpush2.msra.mxu1 %v1992_v45  ;;  %2463 = vmatpush2.msra.mxu0 %v2120_v53  ;;  %v1687_v40 = vld [vmem:[%s6172_s8 + $0x1b8] sm:$0xff]  ;;  %v1814_v45 = vld [vmem:[%s6172_s8 + $0x5b0] sm:$0xff] }
 0x2e1   : > { %2393 = vmatprep.subr.mxu1 %v1989_v27  ;;  %2464 = vmatprep.subr.mxu0 %v2117_v54  ;;  %v1815_v44 = vld [vmem:[%s6172_s8 + $0x5b8] sm:$0xff]  ;;  %v1682_v27 = vld [vmem:[%s6172_s8 + $0x190] sm:$0xff] }
 0x2e2   : > { %2394 = vmatpush2.msra.mxu1 %v1988_v51  ;;  %2465 = vmatpush2.msra.mxu0 %v2116_v52  ;;  %v1811_v53 = vld [vmem:[%s6172_s8 + $0x598] sm:$0xff]  ;;  %v1810_v54 = vld [vmem:[%s6172_s8 + $0x590] sm:$0xff] }
 0x2e3   : > { %2395 = vmatprep.subr.mxu1 %v1985_v28  ;;  %2466 = vmatprep.subr.mxu0 %v2113_v55  ;;  %v1679_v51 = vld [vmem:[%s6172_s8 + $0x178] sm:$0xff]  ;;  %v1678_v28 = vld [vmem:[%s6172_s8 + $0x170] sm:$0xff] }
 0x2e4   : > { %2396 = vmatpush2.msra.mxu1 %v1984_v33  ;;  %2467 = vmatpush2.msra.mxu0 %v2112_v57  ;;  %v1807_v52 = vld [vmem:[%s6172_s8 + $0x578] sm:$0xff]  ;;  %v1806_v55 = vld [vmem:[%s6172_s8 + $0x570] sm:$0xff] }
 0x2e5   : > { %2397 = vmatprep.subr.mxu1 %v1981_v58  ;;  %2468 = vmatprep.subr.mxu0 %v2109_v59  ;;  %v1675_v33 = vld [vmem:[%s6172_s8 + $0x158] sm:$0xff]  ;;  %v1674_v58 = vld [vmem:[%s6172_s8 + $0x150] sm:$0xff] }
 0x2e6   : > { %2398 = vmatpush2.msra.mxu1 %v1980_v60  ;;  %2469 = vmatpush2.msra.mxu0 %v2108_v1  ;;  %v1803_v57 = vld [vmem:[%s6172_s8 + $0x558] sm:$0xff]  ;;  %v1802_v59 = vld [vmem:[%s6172_s8 + $0x550] sm:$0xff] }
 0x2e7   : > { %2399 = vmatprep.subr.mxu1 %v1977_v48  ;;  %2470 = vmatprep.subr.mxu0 %v2105_v2  ;;  %v1671_v60 = vld [vmem:[%s6172_s8 + $0x138] sm:$0xff]  ;;  %v1670_v48 = vld [vmem:[%s6172_s8 + $0x130] sm:$0xff] }
 0x2e8   : > { %2400 = vmatpush2.msra.mxu1 %v1976_v3  ;;  %2471 = vmatpush2.msra.mxu0 %v2104_v4  ;;  %v1799_v1 = vld [vmem:[%s6172_s8 + $0x538] sm:$0xff]  ;;  %v1798_v2 = vld [vmem:[%s6172_s8 + $0x530] sm:$0xff] }
 0x2e9   : > { %2401 = vmatprep.subr.mxu1 %v1973_v37  ;;  %2472 = vmatprep.subr.mxu0 %v2101_v42  ;;  %v1667_v3 = vld [vmem:[%s6172_s8 + $0x118] sm:$0xff]  ;;  %v1666_v37 = vld [vmem:[%s6172_s8 + $0x110] sm:$0xff] }
 0x2ea   : > { %2402 = vmatpush2.msra.mxu1 %v1972_v56  ;;  %2473 = vmatpush2.msra.mxu0 %v2100_v34  ;;  %v1795_v4 = vld [vmem:[%s6172_s8 + $0x518] sm:$0xff]  ;;  %v1794_v42 = vld [vmem:[%s6172_s8 + $0x510] sm:$0xff] }
 0x2eb   : > { %2403 = vmatprep.subr.mxu1 %v1969_v19  ;;  %2474 = vmatprep.subr.mxu0 %v2097_v35  ;;  %v1663_v56 = vld [vmem:[%s6172_s8 + $0xf8] sm:$0xff]  ;;  %v1662_v19 = vld [vmem:[%s6172_s8 + $0xf0] sm:$0xff] }
 0x2ec   : > { %2404 = vmatpush2.msra.mxu1 %v1968_v29  ;;  %2475 = vmatpush2.msra.mxu0 %v2096_v20  ;;  %v1791_v34 = vld [vmem:[%s6172_s8 + $0x4f8] sm:$0xff]  ;;  %v1790_v35 = vld [vmem:[%s6172_s8 + $0x4f0] sm:$0xff] }
 0x2ed   : > { %2405 = vmatprep.subr.mxu1 %v1965_v0  ;;  %2476 = vmatprep.subr.mxu0 %v2093_v5  ;;  %v1659_v29 = vld [vmem:[%s6172_s8 + $0xd8] sm:$0xff]  ;;  %v1658_v0 = vld [vmem:[%s6172_s8 + $0xd0] sm:$0xff] }
 0x2ee   : > { %2406 = vmatpush2.msra.mxu1 %v1964_v8  ;;  %2477 = vmatpush2.msra.mxu0 %v2092_v9  ;;  %v1787_v20 = vld [vmem:[%s6172_s8 + $0x4d8] sm:$0xff]  ;;  %v1786_v5 = vld [vmem:[%s6172_s8 + $0x4d0] sm:$0xff] }
 0x2ef   : > { %2407 = vmatprep.subr.mxu1 %v1961_v10  ;;  %2478 = vmatprep.subr.mxu0 %v2089_v11  ;;  %v1655_v8 = vld [vmem:[%s6172_s8 + $0xb8] sm:$0xff]  ;;  %v1654_v10 = vld [vmem:[%s6172_s8 + $0xb0] sm:$0xff] }
 0x2f0   : > { %2408 = vmatpush2.msra.mxu1 %v1960_v16  ;;  %2479 = vmatpush2.msra.mxu0 %v2088_v12  ;;  %v1783_v9 = vld [vmem:[%s6172_s8 + $0x4b8] sm:$0xff]  ;;  %v1782_v11 = vld [vmem:[%s6172_s8 + $0x4b0] sm:$0xff] }
 0x2f1   : > { %2409 = vmatprep.subr.mxu1 %v1957_v17  ;;  %2480 = vmatprep.subr.mxu0 %v2085_v13  ;;  %v1651_v16 = vld [vmem:[%s6172_s8 + $0x98] sm:$0xff]  ;;  %v1650_v17 = vld [vmem:[%s6172_s8 + $0x90] sm:$0xff] }
 0x2f2   : > { %2410 = vmatpush2.msra.mxu1 %v1956_v61  ;;  %2481 = vmatpush2.msra.mxu0 %v2084_v18  ;;  %v1779_v12 = vld [vmem:[%s6172_s8 + $0x498] sm:$0xff]  ;;  %v1778_v13 = vld [vmem:[%s6172_s8 + $0x490] sm:$0xff] }
 0x2f3   : > { %2411 = vmatprep.subr.mxu1 %v1953_v62  ;;  %2482 = vmatprep.subr.mxu0 %v2081_v63  ;;  %v1647_v61 = vld [vmem:[%s6172_s8 + $0x78] sm:$0xff]  ;;  %v1646_v62 = vld [vmem:[%s6172_s8 + $0x70] sm:$0xff] }
 0x2f4   : > { %2412 = vmatpush2.msra.mxu1 %v1952_v30  ;;  %2483 = vmatpush2.msra.mxu0 %v2080_v23  ;;  %v1775_v18 = vld [vmem:[%s6172_s8 + $0x478] sm:$0xff]  ;;  %v1774_v63 = vld [vmem:[%s6172_s8 + $0x470] sm:$0xff] }
 0x2f5   : > { %2414 = vmatmul.mubr.f32.vlgmr.msra.gmra.mxu1 %v5223_v24  ;;  %2485 = vmatmul.mubr.f32.vlgmr.msra.gmra.mxu0 %v5228_v41  ;;  %v1643_v30 = vld [vmem:[%s6172_s8 + $0x58] sm:$0xff] }
 0x2f6   : > { %2491 = vmatprep.subr.mxu1 %v1695_v21  ;;  %2562 = vmatprep.subr.mxu0 %v1823_v36  ;;  %v1771_v23 = vld [vmem:[%s6172_s8 + $0x458] sm:$0xff]  ;;  %v1642_v21 = vld [vmem:[%s6172_s8 + $0x50] sm:$0xff] }
 0x2f7   : > { %2492 = vmatpush1.msra.mxu1 %v1694_v31  ;;  %2555 = vmatprep.mubr.f32.mxu1 %v4812_v22  ;;  %v1686_v22 = vld [vmem:[%s6172_s8 + $0x1b0] sm:$0xff]  ;;  %v1639_v31 = vld [vmem:[%s6172_s8 + $0x38] sm:$0xff] }
 0x2f8   : > { %2563 = vmatpush1.msra.mxu0 %v1822_v46  ;;  %2626 = vmatprep.mubr.f32.mxu0 %v4816_v15  ;;  %v1683_v15 = vld [vmem:[%s6172_s8 + $0x198] sm:$0xff]  ;;  %v1770_v36 = vld [vmem:[%s6172_s8 + $0x450] sm:$0xff] }
 0x2f9   : > { %2493 = vmatprep.subr.mxu1 %v1691_v32  ;;  %2564 = vmatprep.subr.mxu0 %v1819_v14  ;;  %v1767_v46 = vld [vmem:[%s6172_s8 + $0x438] sm:$0xff]  ;;  %v1638_v32 = vld [vmem:[%s6172_s8 + $0x30] sm:$0xff] }
 0x2fa   : > { %2494 = vmatpush1.msra.mxu1 %v1690_v38  ;;  %2565 = vmatpush1.msra.mxu0 %v1818_v43  ;;  %v1766_v14 = vld [vmem:[%s6172_s8 + $0x430] sm:$0xff]  ;;  %v1635_v38 = vld [vmem:[%s6172_s8 + $0x18] sm:$0xff] }
 0x2fb   : > { %2495 = vmatprep.subr.mxu1 %v1687_v40  ;;  %2566 = vmatprep.subr.mxu0 %v1815_v44  ;;  %v1763_v43 = vld [vmem:[%s6172_s8 + $0x418] sm:$0xff]  ;;  %v1634_v40 = vld [vmem:[%s6172_s8 + $0x10] sm:$0xff] }
 0x2fc   : > { %2496 = vmatpush1.msra.mxu1 %v1686_v22  ;;  %2567 = vmatpush1.msra.mxu0 %v1814_v45  ;;  %v1762_v44 = vld [vmem:[%s6172_s8 + $0x410] sm:$0xff]  ;;  %v1759_v22 = vld [vmem:[%s6172_s8 + $0x3f8] sm:$0xff] }
 0x2fd   : > { %2497 = vmatprep.subr.mxu1 %v1683_v15  ;;  %2568 = vmatprep.subr.mxu0 %v1811_v53  ;;  %v1887_v45 = vld [vmem:[%s6172_s8 + $0x7f8] sm:$0xff]  ;;  %v1758_v15 = vld [vmem:[%s6172_s8 + $0x3f0] sm:$0xff] }
 0x2fe   : > { %2498 = vmatpush1.msra.mxu1 %v1682_v27  ;;  %2569 = vmatpush1.msra.mxu0 %v1810_v54  ;;  %v1886_v53 = vld [vmem:[%s6172_s8 + $0x7f0] sm:$0xff]  ;;  %v1755_v27 = vld [vmem:[%s6172_s8 + $0x3d8] sm:$0xff] }
 0x2ff   : > { %2499 = vmatprep.subr.mxu1 %v1679_v51  ;;  %2570 = vmatprep.subr.mxu0 %v1807_v52  ;;  %v1883_v54 = vld [vmem:[%s6172_s8 + $0x7d8] sm:$0xff]  ;;  %v1754_v51 = vld [vmem:[%s6172_s8 + $0x3d0] sm:$0xff] }
 0x300   : > { %2500 = vmatpush1.msra.mxu1 %v1678_v28  ;;  %2571 = vmatpush1.msra.mxu0 %v1806_v55  ;;  %v1882_v52 = vld [vmem:[%s6172_s8 + $0x7d0] sm:$0xff]  ;;  %v1751_v28 = vld [vmem:[%s6172_s8 + $0x3b8] sm:$0xff] }
 0x301   : > { %2501 = vmatprep.subr.mxu1 %v1675_v33  ;;  %2572 = vmatprep.subr.mxu0 %v1803_v57  ;;  %v1879_v55 = vld [vmem:[%s6172_s8 + $0x7b8] sm:$0xff]  ;;  %v1750_v33 = vld [vmem:[%s6172_s8 + $0x3b0] sm:$0xff] }
 0x302   : > { %2502 = vmatpush1.msra.mxu1 %v1674_v58  ;;  %2573 = vmatpush1.msra.mxu0 %v1802_v59  ;;  %v1878_v57 = vld [vmem:[%s6172_s8 + $0x7b0] sm:$0xff]  ;;  %v1747_v58 = vld [vmem:[%s6172_s8 + $0x398] sm:$0xff] }
 0x303   : > { %2503 = vmatprep.subr.mxu1 %v1671_v60  ;;  %2574 = vmatprep.subr.mxu0 %v1799_v1  ;;  %v1875_v59 = vld [vmem:[%s6172_s8 + $0x798] sm:$0xff]  ;;  %v1746_v60 = vld [vmem:[%s6172_s8 + $0x390] sm:$0xff] }
 0x304   : > { %2504 = vmatpush1.msra.mxu1 %v1670_v48  ;;  %2575 = vmatpush1.msra.mxu0 %v1798_v2  ;;  %v1874_v1 = vld [vmem:[%s6172_s8 + $0x790] sm:$0xff]  ;;  %v1743_v48 = vld [vmem:[%s6172_s8 + $0x378] sm:$0xff] }
 0x305   : > { %2505 = vmatprep.subr.mxu1 %v1667_v3  ;;  %2576 = vmatprep.subr.mxu0 %v1795_v4  ;;  %v1871_v2 = vld [vmem:[%s6172_s8 + $0x778] sm:$0xff]  ;;  %v1742_v3 = vld [vmem:[%s6172_s8 + $0x370] sm:$0xff] }
 0x306   : > { %2506 = vmatpush1.msra.mxu1 %v1666_v37  ;;  %2577 = vmatpush1.msra.mxu0 %v1794_v42  ;;  %v1870_v4 = vld [vmem:[%s6172_s8 + $0x770] sm:$0xff]  ;;  %v1739_v37 = vld [vmem:[%s6172_s8 + $0x358] sm:$0xff] }
 0x307   : > { %2507 = vmatprep.subr.mxu1 %v1663_v56  ;;  %2578 = vmatprep.subr.mxu0 %v1791_v34  ;;  %v1867_v42 = vld [vmem:[%s6172_s8 + $0x758] sm:$0xff]  ;;  %v1738_v56 = vld [vmem:[%s6172_s8 + $0x350] sm:$0xff] }
 0x308   : > { %2508 = vmatpush1.msra.mxu1 %v1662_v19  ;;  %2579 = vmatpush1.msra.mxu0 %v1790_v35  ;;  %v1866_v34 = vld [vmem:[%s6172_s8 + $0x750] sm:$0xff]  ;;  %v1735_v19 = vld [vmem:[%s6172_s8 + $0x338] sm:$0xff] }
 0x309   : > { %2509 = vmatprep.subr.mxu1 %v1659_v29  ;;  %2580 = vmatprep.subr.mxu0 %v1787_v20  ;;  %v1863_v35 = vld [vmem:[%s6172_s8 + $0x738] sm:$0xff]  ;;  %v1734_v29 = vld [vmem:[%s6172_s8 + $0x330] sm:$0xff] }
 0x30a   : > { %2510 = vmatpush1.msra.mxu1 %v1658_v0  ;;  %2581 = vmatpush1.msra.mxu0 %v1786_v5  ;;  %v1862_v20 = vld [vmem:[%s6172_s8 + $0x730] sm:$0xff]  ;;  %v1731_v0 = vld [vmem:[%s6172_s8 + $0x318] sm:$0xff] }
 0x30b   : > { %2511 = vmatprep.subr.mxu1 %v1655_v8  ;;  %2582 = vmatprep.subr.mxu0 %v1783_v9  ;;  %v1859_v5 = vld [vmem:[%s6172_s8 + $0x718] sm:$0xff]  ;;  %v1730_v8 = vld [vmem:[%s6172_s8 + $0x310] sm:$0xff] }
 0x30c   : > { %2512 = vmatpush1.msra.mxu1 %v1654_v10  ;;  %2583 = vmatpush1.msra.mxu0 %v1782_v11  ;;  %v1858_v9 = vld [vmem:[%s6172_s8 + $0x710] sm:$0xff]  ;;  %v1727_v10 = vld [vmem:[%s6172_s8 + $0x2f8] sm:$0xff] }
 0x30d   : > { %2513 = vmatprep.subr.mxu1 %v1651_v16  ;;  %2584 = vmatprep.subr.mxu0 %v1779_v12  ;;  %v1855_v11 = vld [vmem:[%s6172_s8 + $0x6f8] sm:$0xff]  ;;  %v1726_v16 = vld [vmem:[%s6172_s8 + $0x2f0] sm:$0xff] }
 0x30e   : > { %2514 = vmatpush1.msra.mxu1 %v1650_v17  ;;  %2585 = vmatpush1.msra.mxu0 %v1778_v13  ;;  %v1854_v12 = vld [vmem:[%s6172_s8 + $0x6f0] sm:$0xff]  ;;  %v1723_v17 = vld [vmem:[%s6172_s8 + $0x2d8] sm:$0xff] }
 0x30f   : > { %2515 = vmatprep.subr.mxu1 %v1647_v61  ;;  %2586 = vmatprep.subr.mxu0 %v1775_v18  ;;  %v1851_v13 = vld [vmem:[%s6172_s8 + $0x6d8] sm:$0xff]  ;;  %v1722_v61 = vld [vmem:[%s6172_s8 + $0x2d0] sm:$0xff] }
 0x310   : > { %2516 = vmatpush1.msra.mxu1 %v1646_v62  ;;  %2587 = vmatpush1.msra.mxu0 %v1774_v63  ;;  %v1850_v18 = vld [vmem:[%s6172_s8 + $0x6d0] sm:$0xff]  ;;  %v1719_v62 = vld [vmem:[%s6172_s8 + $0x2b8] sm:$0xff] }
 0x311   : > { %2517 = vmatprep.subr.mxu1 %v1643_v30  ;;  %2588 = vmatprep.subr.mxu0 %v1771_v23  ;;  %v1847_v63 = vld [vmem:[%s6172_s8 + $0x6b8] sm:$0xff]  ;;  %v1718_v30 = vld [vmem:[%s6172_s8 + $0x2b0] sm:$0xff] }
 0x312   : > { %2518 = vmatpush1.msra.mxu1 %v1642_v21  ;;  %2589 = vmatpush1.msra.mxu0 %v1770_v36  ;;  %v1846_v23 = vld [vmem:[%s6172_s8 + $0x6b0] sm:$0xff]  ;;  %v1715_v21 = vld [vmem:[%s6172_s8 + $0x298] sm:$0xff] }
 0x313   : > { %2519 = vmatprep.subr.mxu1 %v1639_v31  ;;  %2590 = vmatprep.subr.mxu0 %v1767_v46  ;;  %v1843_v36 = vld [vmem:[%s6172_s8 + $0x698] sm:$0xff]  ;;  %v1714_v31 = vld [vmem:[%s6172_s8 + $0x290] sm:$0xff] }
 0x314   : > { %2520 = vmatpush1.msra.mxu1 %v1638_v32  ;;  %2591 = vmatpush1.msra.mxu0 %v1766_v14  ;;  %v1842_v46 = vld [vmem:[%s6172_s8 + $0x690] sm:$0xff]  ;;  %v1711_v32 = vld [vmem:[%s6172_s8 + $0x278] sm:$0xff] }
 0x315   : > { %2521 = vmatprep.subr.mxu1 %v1635_v38  ;;  %2592 = vmatprep.subr.mxu0 %v1763_v43  ;;  %v1839_v14 = vld [vmem:[%s6172_s8 + $0x678] sm:$0xff]  ;;  %v1710_v38 = vld [vmem:[%s6172_s8 + $0x270] sm:$0xff] }
 0x316   : > { %2522 = vmatpush1.msra.mxu1 %v1634_v40  ;;  %2593 = vmatpush1.msra.mxu0 %v1762_v44  ;;  %v1838_v43 = vld [vmem:[%s6172_s8 + $0x670] sm:$0xff]  ;;  %v1707_v40 = vld [vmem:[%s6172_s8 + $0x258] sm:$0xff] }
 0x317   : > { %2523 = vmatprep.subr.mxu1 %v1759_v22  ;;  %2594 = vmatprep.subr.mxu0 %v1887_v45  ;;  %v1835_v44 = vld [vmem:[%s6172_s8 + $0x658] sm:$0xff]  ;;  %v1706_v22 = vld [vmem:[%s6172_s8 + $0x250] sm:$0xff] }
 0x318   : > { %2524 = vmatpush2.msra.mxu1 %v1758_v15  ;;  %2595 = vmatpush2.msra.mxu0 %v1886_v53  ;;  %v1834_v45 = vld [vmem:[%s6172_s8 + $0x650] sm:$0xff]  ;;  %v1703_v15 = vld [vmem:[%s6172_s8 + $0x238] sm:$0xff] }
 0x319   : > { %2525 = vmatprep.subr.mxu1 %v1755_v27  ;;  %2596 = vmatprep.subr.mxu0 %v1883_v54  ;;  %v1831_v53 = vld [vmem:[%s6172_s8 + $0x638] sm:$0xff]  ;;  %v1702_v27 = vld [vmem:[%s6172_s8 + $0x230] sm:$0xff] }
 0x31a   : > { %2526 = vmatpush2.msra.mxu1 %v1754_v51  ;;  %2597 = vmatpush2.msra.mxu0 %v1882_v52  ;;  %v1830_v54 = vld [vmem:[%s6172_s8 + $0x630] sm:$0xff]  ;;  %v1699_v51 = vld [vmem:[%s6172_s8 + $0x218] sm:$0xff] }
 0x31b   : > { %2527 = vmatprep.subr.mxu1 %v1751_v28  ;;  %2598 = vmatprep.subr.mxu0 %v1879_v55  ;;  %v1827_v52 = vld [vmem:[%s6172_s8 + $0x618] sm:$0xff]  ;;  %v1698_v28 = vld [vmem:[%s6172_s8 + $0x210] sm:$0xff] }
 0x31c   : > { %2528 = vmatpush2.msra.mxu1 %v1750_v33  ;;  %2599 = vmatpush2.msra.mxu0 %v1878_v57  ;;  %v1826_v55 = vld [vmem:[%s6172_s8 + $0x610] sm:$0xff]  ;;  %v1951_v33 = vld [vmem:[%s6172_s8 + $0x9f8] sm:$0xff] }
 0x31d   : > { %2529 = vmatprep.subr.mxu1 %v1747_v58  ;;  %2600 = vmatprep.subr.mxu0 %v1875_v59  ;;  %v2079_v57 = vld [vmem:[%s6172_s8 + $0xdf8] sm:$0xff]  ;;  %v1950_v58 = vld [vmem:[%s6172_s8 + $0x9f0] sm:$0xff] }
 0x31e   : > { %2530 = vmatpush2.msra.mxu1 %v1746_v60  ;;  %2601 = vmatpush2.msra.mxu0 %v1874_v1  ;;  %v2078_v59 = vld [vmem:[%s6172_s8 + $0xdf0] sm:$0xff]  ;;  %v1947_v60 = vld [vmem:[%s6172_s8 + $0x9d8] sm:$0xff] }
 0x31f   : > { %2531 = vmatprep.subr.mxu1 %v1743_v48  ;;  %2602 = vmatprep.subr.mxu0 %v1871_v2  ;;  %v2075_v1 = vld [vmem:[%s6172_s8 + $0xdd8] sm:$0xff] }
 0x320   : > { %2532 = vmatpush2.msra.mxu1 %v1742_v3  ;;  %2603 = vmatpush2.msra.mxu0 %v1870_v4  ;;  %v1943_v48 = vld [vmem:[%s6172_s8 + $0x9b8] sm:$0xff]  ;;  %v2070_v3 = vld [vmem:[%s6172_s8 + $0xdb0] sm:$0xff] }
 0x321   : > { %2533 = vmatprep.subr.mxu1 %v1739_v37  ;;  %2604 = vmatprep.subr.mxu0 %v1867_v42  ;;  %v2071_v2 = vld [vmem:[%s6172_s8 + $0xdb8] sm:$0xff]  ;;  %v1938_v37 = vld [vmem:[%s6172_s8 + $0x990] sm:$0xff] }
 0x322   : > { %2534 = vmatpush2.msra.mxu1 %v1738_v56  ;;  %2605 = vmatpush2.msra.mxu0 %v1866_v34  ;;  %v2067_v4 = vld [vmem:[%s6172_s8 + $0xd98] sm:$0xff]  ;;  %v2066_v42 = vld [vmem:[%s6172_s8 + $0xd90] sm:$0xff] }
 0x323   : > { %2535 = vmatprep.subr.mxu1 %v1735_v19  ;;  %2606 = vmatprep.subr.mxu0 %v1863_v35  ;;  %v1935_v56 = vld [vmem:[%s6172_s8 + $0x978] sm:$0xff]  ;;  %v1934_v19 = vld [vmem:[%s6172_s8 + $0x970] sm:$0xff] }
 0x324   : > { %2536 = vmatpush2.msra.mxu1 %v1734_v29  ;;  %2607 = vmatpush2.msra.mxu0 %v1862_v20  ;;  %v2063_v34 = vld [vmem:[%s6172_s8 + $0xd78] sm:$0xff]  ;;  %v2062_v35 = vld [vmem:[%s6172_s8 + $0xd70] sm:$0xff] }
 0x325   : > { %2537 = vmatprep.subr.mxu1 %v1731_v0  ;;  %2608 = vmatprep.subr.mxu0 %v1859_v5  ;;  %v1931_v29 = vld [vmem:[%s6172_s8 + $0x958] sm:$0xff]  ;;  %v1930_v0 = vld [vmem:[%s6172_s8 + $0x950] sm:$0xff] }
 0x326   : > { %2538 = vmatpush2.msra.mxu1 %v1730_v8  ;;  %2609 = vmatpush2.msra.mxu0 %v1858_v9  ;;  %v2059_v20 = vld [vmem:[%s6172_s8 + $0xd58] sm:$0xff]  ;;  %v2058_v5 = vld [vmem:[%s6172_s8 + $0xd50] sm:$0xff] }
 0x327   : > { %2539 = vmatprep.subr.mxu1 %v1727_v10  ;;  %2610 = vmatprep.subr.mxu0 %v1855_v11  ;;  %v1927_v8 = vld [vmem:[%s6172_s8 + $0x938] sm:$0xff]  ;;  %v1926_v10 = vld [vmem:[%s6172_s8 + $0x930] sm:$0xff] }
 0x328   : > { %2540 = vmatpush2.msra.mxu1 %v1726_v16  ;;  %2611 = vmatpush2.msra.mxu0 %v1854_v12  ;;  %v2055_v9 = vld [vmem:[%s6172_s8 + $0xd38] sm:$0xff]  ;;  %v2054_v11 = vld [vmem:[%s6172_s8 + $0xd30] sm:$0xff] }
 0x329   : > { %2541 = vmatprep.subr.mxu1 %v1723_v17  ;;  %2612 = vmatprep.subr.mxu0 %v1851_v13  ;;  %v1923_v16 = vld [vmem:[%s6172_s8 + $0x918] sm:$0xff]  ;;  %v1922_v17 = vld [vmem:[%s6172_s8 + $0x910] sm:$0xff] }
 0x32a   : > { %2542 = vmatpush2.msra.mxu1 %v1722_v61  ;;  %2613 = vmatpush2.msra.mxu0 %v1850_v18  ;;  %v2051_v12 = vld [vmem:[%s6172_s8 + $0xd18] sm:$0xff]  ;;  %v2050_v13 = vld [vmem:[%s6172_s8 + $0xd10] sm:$0xff] }
 0x32b   : > { %2543 = vmatprep.subr.mxu1 %v1719_v62  ;;  %2614 = vmatprep.subr.mxu0 %v1847_v63  ;;  %v1919_v61 = vld [vmem:[%s6172_s8 + $0x8f8] sm:$0xff]  ;;  %v1918_v62 = vld [vmem:[%s6172_s8 + $0x8f0] sm:$0xff] }
 0x32c   : > { %2544 = vmatpush2.msra.mxu1 %v1718_v30  ;;  %2615 = vmatpush2.msra.mxu0 %v1846_v23  ;;  %v2047_v18 = vld [vmem:[%s6172_s8 + $0xcf8] sm:$0xff]  ;;  %v2046_v63 = vld [vmem:[%s6172_s8 + $0xcf0] sm:$0xff] }
 0x32d   : > { %2545 = vmatprep.subr.mxu1 %v1715_v21  ;;  %2616 = vmatprep.subr.mxu0 %v1843_v36  ;;  %v1915_v30 = vld [vmem:[%s6172_s8 + $0x8d8] sm:$0xff]  ;;  %v1914_v21 = vld [vmem:[%s6172_s8 + $0x8d0] sm:$0xff] }
 0x32e   : > { %2546 = vmatpush2.msra.mxu1 %v1714_v31  ;;  %2617 = vmatpush2.msra.mxu0 %v1842_v46  ;;  %v2043_v23 = vld [vmem:[%s6172_s8 + $0xcd8] sm:$0xff]  ;;  %v2042_v36 = vld [vmem:[%s6172_s8 + $0xcd0] sm:$0xff] }
 0x32f   : > { %2547 = vmatprep.subr.mxu1 %v1711_v32  ;;  %2618 = vmatprep.subr.mxu0 %v1839_v14  ;;  %v1911_v31 = vld [vmem:[%s6172_s8 + $0x8b8] sm:$0xff]  ;;  %v1910_v32 = vld [vmem:[%s6172_s8 + $0x8b0] sm:$0xff] }
 0x330   : > { %2548 = vmatpush2.msra.mxu1 %v1710_v38  ;;  %2619 = vmatpush2.msra.mxu0 %v1838_v43  ;;  %v2039_v46 = vld [vmem:[%s6172_s8 + $0xcb8] sm:$0xff]  ;;  %v2038_v14 = vld [vmem:[%s6172_s8 + $0xcb0] sm:$0xff] }
 0x331   : > { %2549 = vmatprep.subr.mxu1 %v1707_v40  ;;  %2620 = vmatprep.subr.mxu0 %v1835_v44  ;;  %v1907_v38 = vld [vmem:[%s6172_s8 + $0x898] sm:$0xff]  ;;  %v1906_v40 = vld [vmem:[%s6172_s8 + $0x890] sm:$0xff] }
 0x332   : > { %2550 = vmatpush2.msra.mxu1 %v1706_v22  ;;  %2621 = vmatpush2.msra.mxu0 %v1834_v45  ;;  %v2035_v43 = vld [vmem:[%s6172_s8 + $0xc98] sm:$0xff]  ;;  %v2034_v44 = vld [vmem:[%s6172_s8 + $0xc90] sm:$0xff] }
 0x333   : > { %2551 = vmatprep.subr.mxu1 %v1703_v15  ;;  %2622 = vmatprep.subr.mxu0 %v1831_v53  ;;  %v1903_v22 = vld [vmem:[%s6172_s8 + $0x878] sm:$0xff]  ;;  %v1902_v15 = vld [vmem:[%s6172_s8 + $0x870] sm:$0xff] }
 0x334   : > { %2552 = vmatpush2.msra.mxu1 %v1702_v27  ;;  %2623 = vmatpush2.msra.mxu0 %v1830_v54  ;;  %v2031_v45 = vld [vmem:[%s6172_s8 + $0xc78] sm:$0xff]  ;;  %v2030_v53 = vld [vmem:[%s6172_s8 + $0xc70] sm:$0xff] }
 0x335   : > { %2553 = vmatprep.subr.mxu1 %v1699_v51  ;;  %2624 = vmatprep.subr.mxu0 %v1827_v52  ;;  %v1899_v27 = vld [vmem:[%s6172_s8 + $0x858] sm:$0xff]  ;;  %v1898_v51 = vld [vmem:[%s6172_s8 + $0x850] sm:$0xff] }
 0x336   : > { %2554 = vmatpush2.msra.mxu1 %v1698_v28  ;;  %2625 = vmatpush2.msra.mxu0 %v1826_v55  ;;  %v2027_v54 = vld [vmem:[%s6172_s8 + $0xc58] sm:$0xff]  ;;  %v2026_v52 = vld [vmem:[%s6172_s8 + $0xc50] sm:$0xff] }
 0x337   : > { %2556 = vmatmul.mubr.f32.vlgmr.msra.gmra.mxu1 %v4820_v39  ;;  %2627 = vmatmul.mubr.f32.vlgmr.msra.gmra.mxu0 %v4824_v50  ;;  %v1946_v39 = vld [vmem:[%s6172_s8 + $0x9d0] sm:$0xff]  ;;  %v1895_v28 = vld [vmem:[%s6172_s8 + $0x838] sm:$0xff] }
 0x338   : > { %2633 = vmatprep.subr.mxu1 %v1951_v33  ;;  %2704 = vmatprep.subr.mxu0 %v2079_v57  ;;  %v2074_v50 = vld [vmem:[%s6172_s8 + $0xdd0] sm:$0xff]  ;;  %v2023_v55 = vld [vmem:[%s6172_s8 + $0xc38] sm:$0xff] }
 0x339   : > { %2634 = vmatpush1.msra.mxu1 %v1950_v58  ;;  %2697 = vmatprep.mubr.f32.mxu1 %v4842_v6  ;;  %v1942_v6 = vld [vmem:[%s6172_s8 + $0x9b0] sm:$0xff]  ;;  %v1891_v58 = vld [vmem:[%s6172_s8 + $0x818] sm:$0xff] }
 0x33a   : > { %2705 = vmatpush1.msra.mxu0 %v2078_v59  ;;  %2768 = vmatprep.mubr.f32.mxu0 %v4850_v7  ;;  %v1939_v7 = vld [vmem:[%s6172_s8 + $0x998] sm:$0xff]  ;;  %v1894_v33 = vld [vmem:[%s6172_s8 + $0x830] sm:$0xff] }
 0x33b   : > { %2635 = vmatprep.subr.mxu1 %v1947_v60  ;;  %2706 = vmatprep.subr.mxu0 %v2075_v1  ;;  %v2022_v57 = vld [vmem:[%s6172_s8 + $0xc30] sm:$0xff]  ;;  %v2019_v59 = vld [vmem:[%s6172_s8 + $0xc18] sm:$0xff] }
 0x33c   : > { %2636 = vmatpush1.msra.mxu1 %v1946_v39  ;;  %2707 = vmatpush1.msra.mxu0 %v2074_v50  ;;  %v1890_v60 = vld [vmem:[%s6172_s8 + $0x810] sm:$0xff]  ;;  %v2015_v39 = vld [vmem:[%s6172_s8 + $0xbf8] sm:$0xff] }
 0x33d   : > { %2637 = vmatprep.subr.mxu1 %v1943_v48  ;;  %2708 = vmatprep.subr.mxu0 %v2071_v2  ;;  %v2018_v1 = vld [vmem:[%s6172_s8 + $0xc10] sm:$0xff]  ;;  %v2143_v50 = vld [vmem:[%s6172_s8 + $0xff8] sm:$0xff] }
 0x33e   : > { %2638 = vmatpush1.msra.mxu1 %v1942_v6  ;;  %2709 = vmatpush1.msra.mxu0 %v2070_v3  ;;  %v2014_v48 = vld [vmem:[%s6172_s8 + $0xbf0] sm:$0xff]  ;;  %v2011_v6 = vld [vmem:[%s6172_s8 + $0xbd8] sm:$0xff] }
 0x33f   : > { %2639 = vmatprep.subr.mxu1 %v1939_v7  ;;  %2710 = vmatprep.subr.mxu0 %v2067_v4  ;;  %v2142_v2 = vld [vmem:[%s6172_s8 + $0xff0] sm:$0xff]  ;;  %v2139_v3 = vld [vmem:[%s6172_s8 + $0xfd8] sm:$0xff] }
 0x340   : > { %2640 = vmatpush1.msra.mxu1 %v1938_v37  ;;  %2711 = vmatpush1.msra.mxu0 %v2066_v42  ;;  %v2010_v7 = vld [vmem:[%s6172_s8 + $0xbd0] sm:$0xff]  ;;  %v2007_v37 = vld [vmem:[%s6172_s8 + $0xbb8] sm:$0xff] }
 0x341   : > { %2641 = vmatprep.subr.mxu1 %v1935_v56  ;;  %2712 = vmatprep.subr.mxu0 %v2063_v34  ;;  %v2138_v4 = vld [vmem:[%s6172_s8 + $0xfd0] sm:$0xff]  ;;  %v2135_v42 = vld [vmem:[%s6172_s8 + $0xfb8] sm:$0xff] }
 0x342   : > { %2642 = vmatpush1.msra.mxu1 %v1934_v19  ;;  %2713 = vmatpush1.msra.mxu0 %v2062_v35  ;;  %v2006_v56 = vld [vmem:[%s6172_s8 + $0xbb0] sm:$0xff]  ;;  %v2003_v19 = vld [vmem:[%s6172_s8 + $0xb98] sm:$0xff] }
 0x343   : > { %2643 = vmatprep.subr.mxu1 %v1931_v29  ;;  %2714 = vmatprep.subr.mxu0 %v2059_v20  ;;  %v2134_v34 = vld [vmem:[%s6172_s8 + $0xfb0] sm:$0xff]  ;;  %v2131_v35 = vld [vmem:[%s6172_s8 + $0xf98] sm:$0xff] }
 0x344   : > { %2644 = vmatpush1.msra.mxu1 %v1930_v0  ;;  %2715 = vmatpush1.msra.mxu0 %v2058_v5  ;;  %v2002_v29 = vld [vmem:[%s6172_s8 + $0xb90] sm:$0xff]  ;;  %v1999_v0 = vld [vmem:[%s6172_s8 + $0xb78] sm:$0xff] }
 0x345   : > { %2645 = vmatprep.subr.mxu1 %v1927_v8  ;;  %2716 = vmatprep.subr.mxu0 %v2055_v9  ;;  %v2130_v20 = vld [vmem:[%s6172_s8 + $0xf90] sm:$0xff]  ;;  %v2127_v5 = vld [vmem:[%s6172_s8 + $0xf78] sm:$0xff] }
 0x346   : > { %2646 = vmatpush1.msra.mxu1 %v1926_v10  ;;  %2717 = vmatpush1.msra.mxu0 %v2054_v11  ;;  %v1998_v8 = vld [vmem:[%s6172_s8 + $0xb70] sm:$0xff]  ;;  %v1995_v10 = vld [vmem:[%s6172_s8 + $0xb58] sm:$0xff] }
 0x347   : > { %2647 = vmatprep.subr.mxu1 %v1923_v16  ;;  %2718 = vmatprep.subr.mxu0 %v2051_v12  ;;  %v2126_v9 = vld [vmem:[%s6172_s8 + $0xf70] sm:$0xff]  ;;  %v2123_v11 = vld [vmem:[%s6172_s8 + $0xf58] sm:$0xff] }
 0x348   : > { %2648 = vmatpush1.msra.mxu1 %v1922_v17  ;;  %2719 = vmatpush1.msra.mxu0 %v2050_v13  ;;  %v1994_v16 = vld [vmem:[%s6172_s8 + $0xb50] sm:$0xff]  ;;  %v1991_v17 = vld [vmem:[%s6172_s8 + $0xb38] sm:$0xff] }
 0x349   : > { %2649 = vmatprep.subr.mxu1 %v1919_v61  ;;  %2720 = vmatprep.subr.mxu0 %v2047_v18  ;;  %v2122_v12 = vld [vmem:[%s6172_s8 + $0xf50] sm:$0xff]  ;;  %v2119_v13 = vld [vmem:[%s6172_s8 + $0xf38] sm:$0xff] }
 0x34a   : > { %2650 = vmatpush1.msra.mxu1 %v1918_v62  ;;  %2721 = vmatpush1.msra.mxu0 %v2046_v63  ;;  %v1990_v61 = vld [vmem:[%s6172_s8 + $0xb30] sm:$0xff]  ;;  %v1987_v62 = vld [vmem:[%s6172_s8 + $0xb18] sm:$0xff] }
 0x34b   : > { %2651 = vmatprep.subr.mxu1 %v1915_v30  ;;  %2722 = vmatprep.subr.mxu0 %v2043_v23  ;;  %v2118_v18 = vld [vmem:[%s6172_s8 + $0xf30] sm:$0xff]  ;;  %v2115_v63 = vld [vmem:[%s6172_s8 + $0xf18] sm:$0xff] }
 0x34c   : > { %2652 = vmatpush1.msra.mxu1 %v1914_v21  ;;  %2723 = vmatpush1.msra.mxu0 %v2042_v36  ;;  %v1986_v30 = vld [vmem:[%s6172_s8 + $0xb10] sm:$0xff]  ;;  %v1983_v21 = vld [vmem:[%s6172_s8 + $0xaf8] sm:$0xff] }
 0x34d   : > { %2653 = vmatprep.subr.mxu1 %v1911_v31  ;;  %2724 = vmatprep.subr.mxu0 %v2039_v46  ;;  %v2114_v23 = vld [vmem:[%s6172_s8 + $0xf10] sm:$0xff]  ;;  %v2111_v36 = vld [vmem:[%s6172_s8 + $0xef8] sm:$0xff] }
 0x34e   : > { %2654 = vmatpush1.msra.mxu1 %v1910_v32  ;;  %2725 = vmatpush1.msra.mxu0 %v2038_v14  ;;  %v1982_v31 = vld [vmem:[%s6172_s8 + $0xaf0] sm:$0xff]  ;;  %v1979_v32 = vld [vmem:[%s6172_s8 + $0xad8] sm:$0xff] }
 0x34f   : > { %2655 = vmatprep.subr.mxu1 %v1907_v38  ;;  %2726 = vmatprep.subr.mxu0 %v2035_v43  ;;  %v2110_v46 = vld [vmem:[%s6172_s8 + $0xef0] sm:$0xff]  ;;  %v2107_v14 = vld [vmem:[%s6172_s8 + $0xed8] sm:$0xff] }
 0x350   : > { %2656 = vmatpush1.msra.mxu1 %v1906_v40  ;;  %2727 = vmatpush1.msra.mxu0 %v2034_v44  ;;  %v1978_v38 = vld [vmem:[%s6172_s8 + $0xad0] sm:$0xff]  ;;  %v1975_v40 = vld [vmem:[%s6172_s8 + $0xab8] sm:$0xff] }
 0x351   : > { %2657 = vmatprep.subr.mxu1 %v1903_v22  ;;  %2728 = vmatprep.subr.mxu0 %v2031_v45  ;;  %v2106_v43 = vld [vmem:[%s6172_s8 + $0xed0] sm:$0xff]  ;;  %v2103_v44 = vld [vmem:[%s6172_s8 + $0xeb8] sm:$0xff] }
 0x352   : > { %2658 = vmatpush1.msra.mxu1 %v1902_v15  ;;  %2729 = vmatpush1.msra.mxu0 %v2030_v53  ;;  %v1974_v22 = vld [vmem:[%s6172_s8 + $0xab0] sm:$0xff]  ;;  %v1971_v15 = vld [vmem:[%s6172_s8 + $0xa98] sm:$0xff] }
 0x353   : > { %2659 = vmatprep.subr.mxu1 %v1899_v27  ;;  %2730 = vmatprep.subr.mxu0 %v2027_v54  ;;  %v2102_v45 = vld [vmem:[%s6172_s8 + $0xeb0] sm:$0xff]  ;;  %v2099_v53 = vld [vmem:[%s6172_s8 + $0xe98] sm:$0xff] }
 0x354   : > { %2660 = vmatpush1.msra.mxu1 %v1898_v51  ;;  %2731 = vmatpush1.msra.mxu0 %v2026_v52  ;;  %v1970_v27 = vld [vmem:[%s6172_s8 + $0xa90] sm:$0xff]  ;;  %v1967_v51 = vld [vmem:[%s6172_s8 + $0xa78] sm:$0xff] }
 0x355   : > { %2661 = vmatprep.subr.mxu1 %v1895_v28  ;;  %2732 = vmatprep.subr.mxu0 %v2023_v55  ;;  %v2098_v54 = vld [vmem:[%s6172_s8 + $0xe90] sm:$0xff]  ;;  %v2095_v52 = vld [vmem:[%s6172_s8 + $0xe78] sm:$0xff] }
 0x356   : > { %2662 = vmatpush1.msra.mxu1 %v1894_v33  ;;  %2733 = vmatpush1.msra.mxu0 %v2022_v57  ;;  %v1966_v28 = vld [vmem:[%s6172_s8 + $0xa70] sm:$0xff]  ;;  %v1963_v33 = vld [vmem:[%s6172_s8 + $0xa58] sm:$0xff] }
 0x357   : > { %2663 = vmatprep.subr.mxu1 %v1891_v58  ;;  %2734 = vmatprep.subr.mxu0 %v2019_v59  ;;  %v2094_v55 = vld [vmem:[%s6172_s8 + $0xe70] sm:$0xff]  ;;  %v2091_v57 = vld [vmem:[%s6172_s8 + $0xe58] sm:$0xff] }
 0x358   : > { %2664 = vmatpush1.msra.mxu1 %v1890_v60  ;;  %2735 = vmatpush1.msra.mxu0 %v2018_v1  ;;  %v1962_v58 = vld [vmem:[%s6172_s8 + $0xa50] sm:$0xff]  ;;  %v1959_v60 = vld [vmem:[%s6172_s8 + $0xa38] sm:$0xff] }
 0x359   : > { %2665 = vmatprep.subr.mxu1 %v2015_v39  ;;  %2736 = vmatprep.subr.mxu0 %v2143_v50  ;;  %v2090_v59 = vld [vmem:[%s6172_s8 + $0xe50] sm:$0xff]  ;;  %v2087_v1 = vld [vmem:[%s6172_s8 + $0xe38] sm:$0xff] }
 0x35a   : > { %2666 = vmatpush2.msra.mxu1 %v2014_v48  ;;  %2737 = vmatpush2.msra.mxu0 %v2142_v2  ;;  %v1958_v39 = vld [vmem:[%s6172_s8 + $0xa30] sm:$0xff]  ;;  %v1955_v48 = vld [vmem:[%s6172_s8 + $0xa18] sm:$0xff] }
 0x35b   : > { %2667 = vmatprep.subr.mxu1 %v2011_v6  ;;  %2738 = vmatprep.subr.mxu0 %v2139_v3  ;;  %v2086_v50 = vld [vmem:[%s6172_s8 + $0xe30] sm:$0xff]  ;;  %v2083_v2 = vld [vmem:[%s6172_s8 + $0xe18] sm:$0xff] }
 0x35c   : > { %2668 = vmatpush2.msra.mxu1 %v2010_v7  ;;  %2739 = vmatpush2.msra.mxu0 %v2138_v4  ;;  %v1954_v6 = vld [vmem:[%s6172_s8 + $0xa10] sm:$0xff]  ;;  %v2810_v7 = vld [vmem:[#allocation3 + $0xf8] sm:$0xff] }
 0x35d   : > { %2669 = vmatprep.subr.mxu1 %v2007_v37  ;;  %2740 = vmatprep.subr.mxu0 %v2135_v42  ;;  %v2082_v3 = vld [vmem:[%s6172_s8 + $0xe10] sm:$0xff]  ;;  %v2808_v37 = vld [vmem:[#allocation3 + $0xe8] sm:$0xff]  ;;  %v2807_v42 = vld [vmem:[#allocation3 + $0xe0] sm:$0xff] }
 0x35e   : > { %2670 = vmatpush2.msra.mxu1 %v2006_v56  ;;  %2741 = vmatpush2.msra.mxu0 %v2134_v34  ;;  %v2809_v4 = vld [vmem:[#allocation3 + $0xf0] sm:$0xff]  ;;  %v2806_v56 = vld [vmem:[#allocation3 + $0xd8] sm:$0xff] }
 0x35f   : > { %2671 = vmatprep.subr.mxu1 %v2003_v19  ;;  %2742 = vmatprep.subr.mxu0 %v2131_v35  ;;  %v2805_v34 = vld [vmem:[#allocation3 + $0xd0] sm:$0xff]  ;;  %v2874_v19 = vld [vmem:[#allocation3 + $0x2f8] sm:$0xff] }
 0x360   : > { %2672 = vmatpush2.msra.mxu1 %v2002_v29  ;;  %2743 = vmatpush2.msra.mxu0 %v2130_v20  ;;  %v2873_v35 = vld [vmem:[#allocation3 + $0x2f0] sm:$0xff]  ;;  %v2872_v29 = vld [vmem:[#allocation3 + $0x2e8] sm:$0xff] }
 0x361   : > { %2673 = vmatprep.subr.mxu1 %v1999_v0  ;;  %2744 = vmatprep.subr.mxu0 %v2127_v5  ;;  %v2804_v20 = vld [vmem:[#allocation3 + $0xc8] sm:$0xff]  ;;  %v2871_v0 = vld [vmem:[#allocation3 + $0x2e0] sm:$0xff] }
 0x362   : > { %2674 = vmatpush2.msra.mxu1 %v1998_v8  ;;  %2745 = vmatpush2.msra.mxu0 %v2126_v9  ;;  %v2803_v5 = vld [vmem:[#allocation3 + $0xc0] sm:$0xff]  ;;  %v2869_v8 = vld [vmem:[#allocation3 + $0x2d0] sm:$0xff] }
 0x363   : > { %2675 = vmatprep.subr.mxu1 %v1995_v10  ;;  %2746 = vmatprep.subr.mxu0 %v2123_v11  ;;  %v2801_v9 = vld [vmem:[#allocation3 + $0xb0] sm:$0xff]  ;;  %v2868_v10 = vld [vmem:[#allocation3 + $0x2c8] sm:$0xff] }
 0x364   : > { %2676 = vmatpush2.msra.mxu1 %v1994_v16  ;;  %2747 = vmatpush2.msra.mxu0 %v2122_v12  ;;  %v2800_v11 = vld [vmem:[#allocation3 + $0xa8] sm:$0xff]  ;;  %v2867_v16 = vld [vmem:[#allocation3 + $0x2c0] sm:$0xff] }
 0x365   : > { %2677 = vmatprep.subr.mxu1 %v1991_v17  ;;  %2748 = vmatprep.subr.mxu0 %v2119_v13  ;;  %v2799_v12 = vld [vmem:[#allocation3 + $0xa0] sm:$0xff]  ;;  %v2866_v17 = vld [vmem:[#allocation3 + $0x2b8] sm:$0xff] }
 0x366   : > { %2678 = vmatpush2.msra.mxu1 %v1990_v61  ;;  %2749 = vmatpush2.msra.mxu0 %v2118_v18  ;;  %v2798_v13 = vld [vmem:[#allocation3 + $0x98] sm:$0xff]  ;;  %v2865_v61 = vld [vmem:[#allocation3 + $0x2b0] sm:$0xff] }
 0x367   : > { %2679 = vmatprep.subr.mxu1 %v1987_v62  ;;  %2750 = vmatprep.subr.mxu0 %v2115_v63  ;;  %v2797_v18 = vld [vmem:[#allocation3 + $0x90] sm:$0xff]  ;;  %v2864_v62 = vld [vmem:[#allocation3 + $0x2a8] sm:$0xff] }
 0x368   : > { %2680 = vmatpush2.msra.mxu1 %v1986_v30  ;;  %2751 = vmatpush2.msra.mxu0 %v2114_v23  ;;  %v2796_v63 = vld [vmem:[#allocation3 + $0x88] sm:$0xff]  ;;  %v2863_v30 = vld [vmem:[#allocation3 + $0x2a0] sm:$0xff] }
 0x369   : > { %2681 = vmatprep.subr.mxu1 %v1983_v21  ;;  %2752 = vmatprep.subr.mxu0 %v2111_v36  ;;  %v2795_v23 = vld [vmem:[#allocation3 + $0x80] sm:$0xff]  ;;  %v2862_v21 = vld [vmem:[#allocation3 + $0x298] sm:$0xff] }
 0x36a   : > { %2682 = vmatpush2.msra.mxu1 %v1982_v31  ;;  %2753 = vmatpush2.msra.mxu0 %v2110_v46  ;;  %v2794_v36 = vld [vmem:[#allocation3 + $0x78] sm:$0xff]  ;;  %v2861_v31 = vld [vmem:[#allocation3 + $0x290] sm:$0xff] }
 0x36b   : > { %2683 = vmatprep.subr.mxu1 %v1979_v32  ;;  %2754 = vmatprep.subr.mxu0 %v2107_v14  ;;  %v2793_v46 = vld [vmem:[#allocation3 + $0x70] sm:$0xff]  ;;  %v2860_v32 = vld [vmem:[#allocation3 + $0x288] sm:$0xff] }
 0x36c   : > { %2684 = vmatpush2.msra.mxu1 %v1978_v38  ;;  %2755 = vmatpush2.msra.mxu0 %v2106_v43  ;;  %v2792_v14 = vld [vmem:[#allocation3 + $0x68] sm:$0xff]  ;;  %v2859_v38 = vld [vmem:[#allocation3 + $0x280] sm:$0xff] }
 0x36d   : > { %2685 = vmatprep.subr.mxu1 %v1975_v40  ;;  %2756 = vmatprep.subr.mxu0 %v2103_v44  ;;  %v2791_v43 = vld [vmem:[#allocation3 + $0x60] sm:$0xff]  ;;  %v2858_v40 = vld [vmem:[#allocation3 + $0x278] sm:$0xff] }
 0x36e   : > { %2686 = vmatpush2.msra.mxu1 %v1974_v22  ;;  %2757 = vmatpush2.msra.mxu0 %v2102_v45  ;;  %v2790_v44 = vld [vmem:[#allocation3 + $0x58] sm:$0xff]  ;;  %v2857_v22 = vld [vmem:[#allocation3 + $0x270] sm:$0xff] }
 0x36f   : > { %2687 = vmatprep.subr.mxu1 %v1971_v15  ;;  %2758 = vmatprep.subr.mxu0 %v2099_v53  ;;  %v2789_v45 = vld [vmem:[#allocation3 + $0x50] sm:$0xff]  ;;  %v2856_v15 = vld [vmem:[#allocation3 + $0x268] sm:$0xff] }
 0x370   : > { %2688 = vmatpush2.msra.mxu1 %v1970_v27  ;;  %2759 = vmatpush2.msra.mxu0 %v2098_v54  ;;  %v2788_v53 = vld [vmem:[#allocation3 + $0x48] sm:$0xff]  ;;  %v2855_v27 = vld [vmem:[#allocation3 + $0x260] sm:$0xff] }
 0x371   : > { %2689 = vmatprep.subr.mxu1 %v1967_v51  ;;  %2760 = vmatprep.subr.mxu0 %v2095_v52  ;;  %v2787_v54 = vld [vmem:[#allocation3 + $0x40] sm:$0xff]  ;;  %v2854_v51 = vld [vmem:[#allocation3 + $0x258] sm:$0xff] }
 0x372   : > { %2690 = vmatpush2.msra.mxu1 %v1966_v28  ;;  %2761 = vmatpush2.msra.mxu0 %v2094_v55  ;;  %v2786_v52 = vld [vmem:[#allocation3 + $0x38] sm:$0xff]  ;;  %v2853_v28 = vld [vmem:[#allocation3 + $0x250] sm:$0xff] }
 0x373   : > { %2691 = vmatprep.subr.mxu1 %v1963_v33  ;;  %2762 = vmatprep.subr.mxu0 %v2091_v57  ;;  %v2785_v55 = vld [vmem:[#allocation3 + $0x30] sm:$0xff]  ;;  %v2852_v33 = vld [vmem:[#allocation3 + $0x248] sm:$0xff] }
 0x374   : > { %2692 = vmatpush2.msra.mxu1 %v1962_v58  ;;  %2763 = vmatpush2.msra.mxu0 %v2090_v59  ;;  %v2784_v57 = vld [vmem:[#allocation3 + $0x28] sm:$0xff]  ;;  %v2851_v58 = vld [vmem:[#allocation3 + $0x240] sm:$0xff] }
 0x375   : > { %2693 = vmatprep.subr.mxu1 %v1959_v60  ;;  %2764 = vmatprep.subr.mxu0 %v2087_v1  ;;  %v2783_v59 = vld [vmem:[#allocation3 + $0x20] sm:$0xff]  ;;  %v2850_v60 = vld [vmem:[#allocation3 + $0x238] sm:$0xff] }
 0x376   : > { %2694 = vmatpush2.msra.mxu1 %v1958_v39  ;;  %2765 = vmatpush2.msra.mxu0 %v2086_v50  ;;  %v2782_v1 = vld [vmem:[#allocation3 + $0x18] sm:$0xff]  ;;  %v2849_v39 = vld [vmem:[#allocation3 + $0x230] sm:$0xff] }
 0x377   : > { %2695 = vmatprep.subr.mxu1 %v1955_v48  ;;  %2766 = vmatprep.subr.mxu0 %v2083_v2  ;;  %v2781_v50 = vld [vmem:[#allocation3 + $0x10] sm:$0xff]  ;;  %v2848_v48 = vld [vmem:[#allocation3 + $0x228] sm:$0xff] }
 0x378   : > { %2696 = vmatpush2.msra.mxu1 %v1954_v6  ;;  %2767 = vmatpush2.msra.mxu0 %v2082_v3  ;;  %v2780_v2 = vld [vmem:[#allocation3 + $0x8] sm:$0xff]  ;;  %v2847_v6 = vld [vmem:[#allocation3 + $0x220] sm:$0xff] }
 0x379   : > { %2698 = vmatmul.mubr.f32.vlgmr.msra.gmra.mxu1 %v5223_v24  ;;  %2769 = vmatmul.mubr.f32.vlgmr.msra.gmra.mxu0 %v5228_v41  ;;  %v2870_v24 = vld [vmem:[#allocation3 + $0x2d8] sm:$0xff]  ;;  %v2779_v3 = vld [vmem:[#allocation3] sm:$0xff] }
 0x37a   : > { %2919 = vmatprep.subr.mxu1 %v2810_v7  ;;  %2990 = vmatprep.subr.mxu0 %v2874_v19  ;;  %v2802_v41 = vld [vmem:[#allocation3 + $0xb8] sm:$0xff]  ;;  %v2843_v19 = vld [vmem:[#allocation3 + $0x200] sm:$0xff] }
 0x37b   : > { %2920 = vmatpush1.msra.mxu1 %v2809_v4  ;;  %2991 = vmatpush1.msra.mxu0 %v2873_v35  ;;  %v2846_v7 = vld [vmem:[#allocation3 + $0x218] sm:$0xff]  ;;  %v2839_v35 = vld [vmem:[#allocation3 + $0x1e0] sm:$0xff] }
 0x37c   : > { %2921 = vmatprep.subr.mxu1 %v2808_v37  ;;  %2992 = vmatprep.subr.mxu0 %v2872_v29  ;;  %v2842_v4 = vld [vmem:[#allocation3 + $0x1f8] sm:$0xff]  ;;  %v2845_v37 = vld [vmem:[#allocation3 + $0x210] sm:$0xff] }
 0x37d   : > { %2922 = vmatpush1.msra.mxu1 %v2807_v42  ;;  %2993 = vmatpush1.msra.mxu0 %v2871_v0  ;;  %v2841_v42 = vld [vmem:[#allocation3 + $0x1f0] sm:$0xff]  ;;  %v2906_v29 = vld [vmem:[#allocation3 + $0x3f8] sm:$0xff] }
 0x37e   : > { %2923 = vmatprep.subr.mxu1 %v2806_v56  ;;  %2994 = vmatprep.subr.mxu0 %v2870_v24  ;;  %v2844_v56 = vld [vmem:[#allocation3 + $0x208] sm:$0xff]  ;;  %v2905_v0 = vld [vmem:[#allocation3 + $0x3f0] sm:$0xff] }
 0x37f   : > { %2924 = vmatpush1.msra.mxu1 %v2805_v34  ;;  %2995 = vmatpush1.msra.mxu0 %v2869_v8  ;;  %v2840_v34 = vld [vmem:[#allocation3 + $0x1e8] sm:$0xff]  ;;  %v2903_v8 = vld [vmem:[#allocation3 + $0x3e0] sm:$0xff] }
 0x380   : > { %2925 = vmatprep.subr.mxu1 %v2804_v20  ;;  %2996 = vmatprep.subr.mxu0 %v2868_v10  ;;  %v2838_v20 = vld [vmem:[#allocation3 + $0x1d8] sm:$0xff]  ;;  %v2904_v24 = vld [vmem:[#allocation3 + $0x3e8] sm:$0xff] }
 0x381   : > { %2926 = vmatpush1.msra.mxu1 %v2803_v5  ;;  %2997 = vmatpush1.msra.mxu0 %v2867_v16  ;;  %v2837_v5 = vld [vmem:[#allocation3 + $0x1d0] sm:$0xff]  ;;  %v2902_v10 = vld [vmem:[#allocation3 + $0x3d8] sm:$0xff] }
 0x382   : > { %2927 = vmatprep.subr.mxu1 %v2802_v41  ;;  %2998 = vmatprep.subr.mxu0 %v2866_v17  ;;  %v2836_v41 = vld [vmem:[#allocation3 + $0x1c8] sm:$0xff]  ;;  %v2901_v16 = vld [vmem:[#allocation3 + $0x3d0] sm:$0xff] }
 0x383   : > { %2928 = vmatpush1.msra.mxu1 %v2801_v9  ;;  %2999 = vmatpush1.msra.mxu0 %v2865_v61  ;;  %v2835_v9 = vld [vmem:[#allocation3 + $0x1c0] sm:$0xff]  ;;  %v2900_v17 = vld [vmem:[#allocation3 + $0x3c8] sm:$0xff] }
 0x384   : > { %2929 = vmatprep.subr.mxu1 %v2800_v11  ;;  %3000 = vmatprep.subr.mxu0 %v2864_v62  ;;  %v2834_v11 = vld [vmem:[#allocation3 + $0x1b8] sm:$0xff]  ;;  %v2899_v61 = vld [vmem:[#allocation3 + $0x3c0] sm:$0xff] }
 0x385   : > { %2930 = vmatpush1.msra.mxu1 %v2799_v12  ;;  %3001 = vmatpush1.msra.mxu0 %v2863_v30  ;;  %v2833_v12 = vld [vmem:[#allocation3 + $0x1b0] sm:$0xff]  ;;  %v2898_v62 = vld [vmem:[#allocation3 + $0x3b8] sm:$0xff] }
 0x386   : > { %2931 = vmatprep.subr.mxu1 %v2798_v13  ;;  %3002 = vmatprep.subr.mxu0 %v2862_v21  ;;  %v2832_v13 = vld [vmem:[#allocation3 + $0x1a8] sm:$0xff]  ;;  %v2897_v30 = vld [vmem:[#allocation3 + $0x3b0] sm:$0xff] }
 0x387   : > { %2932 = vmatpush1.msra.mxu1 %v2797_v18  ;;  %3003 = vmatpush1.msra.mxu0 %v2861_v31  ;;  %v2831_v18 = vld [vmem:[#allocation3 + $0x1a0] sm:$0xff]  ;;  %v2896_v21 = vld [vmem:[#allocation3 + $0x3a8] sm:$0xff] }
 0x388   : > { %2933 = vmatprep.subr.mxu1 %v2796_v63  ;;  %3004 = vmatprep.subr.mxu0 %v2860_v32  ;;  %v2830_v63 = vld [vmem:[#allocation3 + $0x198] sm:$0xff]  ;;  %v2895_v31 = vld [vmem:[#allocation3 + $0x3a0] sm:$0xff] }
 0x389   : > { %2934 = vmatpush1.msra.mxu1 %v2795_v23  ;;  %3005 = vmatpush1.msra.mxu0 %v2859_v38  ;;  %v2829_v23 = vld [vmem:[#allocation3 + $0x190] sm:$0xff]  ;;  %v2894_v32 = vld [vmem:[#allocation3 + $0x398] sm:$0xff] }
 0x38a   : > { %2935 = vmatprep.subr.mxu1 %v2794_v36  ;;  %3006 = vmatprep.subr.mxu0 %v2858_v40  ;;  %v2828_v36 = vld [vmem:[#allocation3 + $0x188] sm:$0xff]  ;;  %v2893_v38 = vld [vmem:[#allocation3 + $0x390] sm:$0xff] }
 0x38b   : > { %2936 = vmatpush1.msra.mxu1 %v2793_v46  ;;  %3007 = vmatpush1.msra.mxu0 %v2857_v22  ;;  %v2827_v46 = vld [vmem:[#allocation3 + $0x180] sm:$0xff]  ;;  %v2892_v40 = vld [vmem:[#allocation3 + $0x388] sm:$0xff] }
 0x38c   : > { %2937 = vmatprep.subr.mxu1 %v2792_v14  ;;  %3008 = vmatprep.subr.mxu0 %v2856_v15  ;;  %v2826_v14 = vld [vmem:[#allocation3 + $0x178] sm:$0xff]  ;;  %v2824_v22 = vld [vmem:[#allocation3 + $0x168] sm:$0xff]  ;;  %v2823_v15 = vld [vmem:[#allocation3 + $0x160] sm:$0xff] }
 0x38d   : > { %2938 = vmatpush1.msra.mxu1 %v2791_v43  ;;  %3009 = vmatpush1.msra.mxu0 %v2855_v27  ;;  %v2825_v43 = vld [vmem:[#allocation3 + $0x170] sm:$0xff]  ;;  %v2273_v27 = vpop.f32.mrf.mxu1 }
 0x38e   : > { %2939 = vmatprep.subr.mxu1 %v2790_v44  ;;  %3010 = vmatprep.subr.mxu0 %v2854_v51  ;;  %v6011_v44 = vld [vmem:[%s6173_s9] sm:$0xf]  ;;  %v2889_v51 = vld [vmem:[#allocation3 + $0x370] sm:$0xff] }
 0x38f   : > { %2940 = vmatpush1.msra.mxu1 %v2789_v45  ;;  %3011 = vmatpush1.msra.mxu0 %v2853_v28  ;;  %v2891_v45 = vld [vmem:[#allocation3 + $0x380] sm:$0xff]  ;;  %v2821_v28 = vld [vmem:[#allocation3 + $0x150] sm:$0xff] }
 0x390   : > { %2941 = vmatprep.subr.mxu1 %v2788_v53  ;;  %3012 = vmatprep.subr.mxu0 %v2852_v33  ;;  %v2890_v53 = vld [vmem:[#allocation3 + $0x378] sm:$0xff]  ;;  %v2820_v33 = vld [vmem:[#allocation3 + $0x148] sm:$0xff] }
 0x391   : > { %2942 = vmatpush1.msra.mxu1 %v2787_v54  ;;  %3013 = vmatpush1.msra.mxu0 %v2851_v58  ;;  %v2822_v54 = vld [vmem:[#allocation3 + $0x158] sm:$0xff]  ;;  %v2194_v58 = vrot.slane %v6011_v44, %v3866_v49 }
 0x392   : > { %2943 = vmatprep.subr.mxu1 %v2786_v52  ;;  %3014 = vmatprep.subr.mxu0 %v2850_v60  ;;  %v2190_v52 = vrot.slane %v6011_v44, %v3860_v47  ;;  %v2886_v60 = vld [vmem:[#allocation3 + $0x358] sm:$0xff] }
 0x393   : > { %2944 = vmatpush1.msra.mxu1 %v2785_v55  ;;  %3015 = vmatpush1.msra.mxu0 %v2849_v39  ;;  %v2888_v55 = vld [vmem:[#allocation3 + $0x368] sm:$0xff]  ;;  %v2275_v39 = vpop.f32.mrf.mxu1 }
 0x394   : > { %2945 = vmatprep.subr.mxu1 %v2784_v57  ;;  %3016 = vmatprep.subr.mxu0 %v2848_v48  ;;  %v2887_v57 = vld [vmem:[#allocation3 + $0x360] sm:$0xff]  ;;  %v2885_v48 = vld [vmem:[#allocation3 + $0x350] sm:$0xff] }
 0x395   : > { %2946 = vmatpush1.msra.mxu1 %v2783_v59  ;;  %3017 = vmatpush1.msra.mxu0 %v2847_v6  ;;  %v2819_v59 = vld [vmem:[#allocation3 + $0x140] sm:$0xff]  ;;  %v2817_v6 = vld [vmem:[#allocation3 + $0x130] sm:$0xff] }
 0x396   : > { %2947 = vmatprep.subr.mxu1 %v2782_v1  ;;  %3018 = vmatprep.subr.mxu0 %v2846_v7  ;;  %v2344_v1 = vpop.f32.mrf.mxu0  ;;  %v2276_v7 = vadd.f32 %v2275_v39, %v2194_v58  ;;  %v3084_v58 = vld [vmem:[%s6176_s12 + $0xa8] sm:$0xff] }
 0x397   : > { %2948 = vmatpush1.msra.mxu1 %v2781_v50  ;;  %3019 = vmatpush1.msra.mxu0 %v2845_v37  ;;  %v2818_v50 = vld [vmem:[#allocation3 + $0x138] sm:$0xff] }
 0x398   : > { %2949 = vmatprep.subr.mxu1 %v2780_v2  ;;  %3020 = vmatprep.subr.mxu0 %v2844_v56  ;;  %v2274_v2 = vadd.f32 %v2273_v27, %v2190_v52  ;;  %v2346_v37 = vpop.f32.mrf.mxu0  ;;  %v3088_v27 = vld [vmem:[%s6176_s12 + $0xc8] sm:$0xff]  ;;  %v3071_v52 = vld [vmem:[%s6176_s12 + $0x40] sm:$0xff] }
 0x399   : > { %2950 = vmatpush1.msra.mxu1 %v2779_v3  ;;  %3021 = vmatpush1.msra.mxu0 %v2843_v19  ;;  %v2816_v3 = vld [vmem:[#allocation3 + $0x128] sm:$0xff] }
 0x39a   : > { %2951 = vmatprep.subr.mxu1 %v2842_v4  ;;  %3022 = vmatprep.subr.mxu0 %v2906_v29  ;;  %v2815_v4 = vld [vmem:[#allocation3 + $0x120] sm:$0xff]  ;;  %v2345_v56 = vadd.f32 %v2344_v1, %v2274_v2  ;;  %v2812_v29 = vld [vmem:[#allocation3 + $0x108] sm:$0xff] }
 0x39b   : > { %2952 = vmatpush2.msra.mxu1 %v2841_v42  ;;  %3023 = vmatpush2.msra.mxu0 %v2905_v0  ;;  %v2814_v42 = vld [vmem:[#allocation3 + $0x118] sm:$0xff]  ;;  %v3067_v1 = vld [vmem:[%s6176_s12 + $0x20] sm:$0xff] }
 0x39c   : > { %2953 = vmatprep.subr.mxu1 %v2840_v34  ;;  %3024 = vmatprep.subr.mxu0 %v2904_v24  ;;  %v2813_v34 = vld [vmem:[#allocation3 + $0x110] sm:$0xff] }
 0x39d   : > { %2954 = vmatpush2.msra.mxu1 %v2839_v35  ;;  %3025 = vmatpush2.msra.mxu0 %v2903_v8  ;;  %v2884_v8 = vld [vmem:[#allocation3 + $0x348] sm:$0xff] }
 0x39e   : > { %2955 = vmatprep.subr.mxu1 %v2838_v20  ;;  %3026 = vmatprep.subr.mxu0 %v2902_v10  ;;  %v2347_v20 = vadd.f32 %v2346_v37, %v2276_v7 }
 0x39f   : > { %2956 = vmatpush2.msra.mxu1 %v2837_v5  ;;  %3027 = vmatpush2.msra.mxu0 %v2901_v16  ;;  %v2811_v5 = vld [vmem:[#allocation3 + $0x100] sm:$0xff] }
 0x3a0   : > { %2957 = vmatprep.subr.mxu1 %v2836_v41  ;;  %3028 = vmatprep.subr.mxu0 %v2900_v17  ;;  %v2881_v17 = vld [vmem:[#allocation3 + $0x330] sm:$0xff] }
 0x3a1   : > { %2958 = vmatpush2.msra.mxu1 %v2835_v9  ;;  %3029 = vmatpush2.msra.mxu0 %v2899_v61  ;;  %v2880_v61 = vld [vmem:[#allocation3 + $0x328] sm:$0xff] }
 0x3a2   : > { %2959 = vmatprep.subr.mxu1 %v2834_v11  ;;  %3030 = vmatprep.subr.mxu0 %v2898_v62  ;;  %v2883_v11 = vld [vmem:[#allocation3 + $0x340] sm:$0xff] }
 0x3a3   : > { %2960 = vmatpush2.msra.mxu1 %v2833_v12  ;;  %3031 = vmatpush2.msra.mxu0 %v2897_v30  ;;  %v2882_v12 = vld [vmem:[#allocation3 + $0x338] sm:$0xff]  ;;  %v2879_v62 = vld [vmem:[#allocation3 + $0x320] sm:$0xff]  ;;  %v2877_v30 = vld [vmem:[#allocation3 + $0x310] sm:$0xff] }
 0x3a4   : > { %2961 = vmatprep.subr.mxu1 %v2832_v13  ;;  %3032 = vmatprep.subr.mxu0 %v2896_v21  ;;  %v2875_v21 = vld [vmem:[#allocation3 + $0x300] sm:$0xff] }
 0x3a5   : > { %2962 = vmatpush2.msra.mxu1 %v2831_v18  ;;  %3033 = vmatpush2.msra.mxu0 %v2895_v31  ;;  %v3078_v31 = vld [vmem:[%s6176_s12 + $0x78] sm:$0xff] }
 0x3a6   : > { %2963 = vmatprep.subr.mxu1 %v2830_v63  ;;  %3034 = vmatprep.subr.mxu0 %v2894_v32  ;;  %v2878_v63 = vld [vmem:[#allocation3 + $0x318] sm:$0xff]  ;;  %v3077_v32 = vld [vmem:[%s6176_s12 + $0x70] sm:$0xff] }
 0x3a7   : > { %2964 = vmatpush2.msra.mxu1 %v2829_v23  ;;  %3035 = vmatpush2.msra.mxu0 %v2893_v38  ;;  %v2876_v23 = vld [vmem:[#allocation3 + $0x308] sm:$0xff] }
 0x3a8   : > { %2965 = vmatprep.subr.mxu1 %v2828_v36  ;;  %3036 = vmatprep.subr.mxu0 %v2892_v40  ;;  %v3094_v36 = vld [vmem:[%s6176_s12 + $0xf8] sm:$0xff]  ;;  %v3076_v38 = vld [vmem:[%s6176_s12 + $0x68] sm:$0xff]  ;;  %v3075_v40 = vld [vmem:[%s6176_s12 + $0x60] sm:$0xff] }
 0x3a9   : > { %2966 = vmatpush2.msra.mxu1 %v2827_v46  ;;  %3037 = vmatpush2.msra.mxu0 %v2891_v45  ;;  %v3093_v46 = vld [vmem:[%s6176_s12 + $0xf0] sm:$0xff]  ;;  %v3074_v45 = vld [vmem:[%s6176_s12 + $0x58] sm:$0xff] }
 0x3aa   : > { %2967 = vmatprep.subr.mxu1 %v2826_v14  ;;  %3038 = vmatprep.subr.mxu0 %v2890_v53  ;;  %v3092_v14 = vld [vmem:[%s6176_s12 + $0xe8] sm:$0xff]  ;;  %v3073_v53 = vld [vmem:[%s6176_s12 + $0x50] sm:$0xff] }
 0x3ab   : > { %2968 = vmatpush2.msra.mxu1 %v2825_v43  ;;  %3039 = vmatpush2.msra.mxu0 %v2889_v51  ;;  %v3091_v43 = vld [vmem:[%s6176_s12 + $0xe0] sm:$0xff] }
 0x3ac   : > { %2969 = vmatprep.subr.mxu1 %v2824_v22  ;;  %3040 = vmatprep.subr.mxu0 %v2888_v55  ;;  %v3090_v22 = vld [vmem:[%s6176_s12 + $0xd8] sm:$0xff]  ;;  %v3087_v51 = vld [vmem:[%s6176_s12 + $0xc0] sm:$0xff] }
 0x3ad   : > { %2970 = vmatpush2.msra.mxu1 %v2823_v15  ;;  %3041 = vmatpush2.msra.mxu0 %v2887_v57  ;;  %v3089_v15 = vld [vmem:[%s6176_s12 + $0xd0] sm:$0xff]  ;;  %v3070_v55 = vld [vmem:[%s6176_s12 + $0x38] sm:$0xff] }
 0x3ae   : > { %2971 = vmatprep.subr.mxu1 %v2822_v54  ;;  %3042 = vmatprep.subr.mxu0 %v2886_v60  ;;  %v3072_v54 = vld [vmem:[%s6176_s12 + $0x48] sm:$0xff]  ;;  %v3069_v57 = vld [vmem:[%s6176_s12 + $0x30] sm:$0xff]  ;;  %v3083_v60 = vld [vmem:[%s6176_s12 + $0xa0] sm:$0xff] }
 0x3af   : > { %2972 = vmatpush2.msra.mxu1 %v2821_v28  ;;  %3043 = vmatpush2.msra.mxu0 %v2885_v48  ;;  %v3086_v28 = vld [vmem:[%s6176_s12 + $0xb8] sm:$0xff]  ;;  %v2202_v48 = vrot.slane %v6011_v44, %v4697_v25 }
 0x3b0   : > { %2973 = vmatprep.subr.mxu1 %v2820_v33  ;;  %3044 = vmatprep.subr.mxu0 %v2884_v8  ;;  %v3085_v33 = vld [vmem:[%s6176_s12 + $0xb0] sm:$0xff]  ;;  %v3082_v25 = vld [vmem:[%s6176_s12 + $0x98] sm:$0xff] }
 0x3b1   : > { %2974 = vmatpush2.msra.mxu1 %v2819_v59  ;;  %3045 = vmatpush2.msra.mxu0 %v2883_v11  ;;  %v3068_v59 = vld [vmem:[%s6176_s12 + $0x28] sm:$0xff]  ;;  %v3065_v8 = vld [vmem:[%s6176_s12 + $0x10] sm:$0xff]  ;;  %v3079_v11 = vld [vmem:[%s6176_s12 + $0x80] sm:$0xff] }
 0x3b2   : > { %2975 = vmatprep.subr.mxu1 %v2818_v50  ;;  %3046 = vmatprep.subr.mxu0 %v2882_v12  ;;  %v2198_v50 = vrot.slane %v6011_v44, %v4700_v26  ;;  %v3066_v44 = vld [vmem:[%s6176_s12 + $0x18] sm:$0xff]  ;;  %v2907_v12 = vld [vmem:[%s6175_s11] sm:$0x3] }
 0x3b3   : > { %2976 = vmatpush2.msra.mxu1 %v2817_v6  ;;  %3047 = vmatpush2.msra.mxu0 %v2881_v17 }
 0x3b4   : > { %2977 = vmatprep.subr.mxu1 %v2816_v3  ;;  %3048 = vmatprep.subr.mxu0 %v2880_v61  ;;  %v2916_v61 = vrot.slane %v2907_v12, %v3866_v49 }
 0x3b5   : > { %v2415_v19 = vpop.f32.mrf.mxu1  ;;  %v2486_v35 = vpop.f32.mrf.mxu0  ;;  %2978 = vmatpush2.msra.mxu1 %v2815_v4  ;;  %3049 = vmatpush2.msra.mxu0 %v2879_v62 }
 0x3b6   : > { %v2416_v0 = vadd.f32 %v2415_v19, %v2345_v56  ;;  %2979 = vmatprep.subr.mxu1 %v2814_v42  ;;  %3050 = vmatprep.subr.mxu0 %v2878_v63 }
 0x3b7   : > { %v2417_v24 = vpop.f32.mrf.mxu1  ;;  %2980 = vmatpush2.msra.mxu1 %v2813_v34  ;;  %v2488_v10 = vpop.f32.mrf.mxu0  ;;  %3051 = vmatpush2.msra.mxu0 %v2877_v30 }
 0x3b8   : > { %v2418_v41 = vadd.f32 %v2417_v24, %v2347_v20  ;;  %2981 = vmatprep.subr.mxu1 %v2812_v29  ;;  %v2487_v9 = vadd.f32 %v2486_v35, %v2416_v0  ;;  %3052 = vmatprep.subr.mxu0 %v2876_v23 }
 0x3b9   : > { %2982 = vmatpush2.msra.mxu1 %v2811_v5  ;;  %3053 = vmatpush2.msra.mxu0 %v2875_v21 }
 0x3ba   : > { %v2489_v16 = vadd.f32 %v2488_v10, %v2418_v41  ;;  %v2775_v18 = vmax.f32 %v2487_v9, 0.0  ;;  %3314 = vmatprep.subr.mxu1 %v3094_v36  ;;  %v3081_v41 = vld [vmem:[%s6176_s12 + $0x90] sm:$0xff]  ;;  %v3080_v9 = vld [vmem:[%s6176_s12 + $0x88] sm:$0xff] }
 0x3bb   : > { %v3064_v10 = vld [vmem:[%s6176_s12 + $0x8] sm:$0xff] }
 0x3bc   : > { %v2776_v13 = vmax.f32 %v2489_v16, 0.0  ;;  %v3063_v16 = vld [vmem:[%s6176_s12] sm:$0xff] }
 0x3be   : > { %2983 = vmatprep.mubr.f32.mxu1 %v2776_v13  ;;  %v2912_v13 = vrot.slane %v2907_v12, %v3860_v47  ;;  %v3095_v47 = vld [vmem:[%s6177_s13] sm:$0x1] }
 0x3bf   : > { %2984 = vmatmul.mubr.f32.vlgmr.msra.gmra.mxu1 %v2775_v18 }
 0x3c0   : > { %3315 = vmatpush3.msra.mxu1 %v3078_v31 }
 0x3c1   : > { %3316 = vmatprep.subr.mxu1 %v3093_v46 }
 0x3c2   : > { %3317 = vmatpush3.msra.mxu1 %v3077_v32 }
 0x3c3   : > { %3318 = vmatprep.subr.mxu1 %v3092_v14 }
 0x3c4   : > { %3319 = vmatpush3.msra.mxu1 %v3076_v38 }
 0x3c5   : > { %3320 = vmatprep.subr.mxu1 %v3091_v43 }
 0x3c6   : > { %3321 = vmatpush3.msra.mxu1 %v3075_v40 }
 0x3c7   : > { %3322 = vmatprep.subr.mxu1 %v3090_v22 }
 0x3c8   : > { %3323 = vmatpush3.msra.mxu1 %v3074_v45 }
 0x3c9   : > { %3324 = vmatprep.subr.mxu1 %v3089_v15 }
 0x3ca   : > { %3325 = vmatpush3.msra.mxu1 %v3073_v53 }
 0x3cb   : > { %3326 = vmatprep.subr.mxu1 %v3088_v27 }
 0x3cc   : > { %3327 = vmatpush3.msra.mxu1 %v3072_v54 }
 0x3cd   : > { %3328 = vmatprep.subr.mxu1 %v3087_v51 }
 0x3ce   : > { %3329 = vmatpush3.msra.mxu1 %v3071_v52 }
 0x3cf   : > { %3330 = vmatprep.subr.mxu1 %v3086_v28 }
 0x3d0   : > { %3331 = vmatpush3.msra.mxu1 %v3070_v55 }
 0x3d1   : > { %3332 = vmatprep.subr.mxu1 %v3085_v33 }
 0x3d2   : > { %3333 = vmatpush3.msra.mxu1 %v3069_v57 }
 0x3d3   : > { %3334 = vmatprep.subr.mxu1 %v3084_v58 }
 0x3d4   : > { %3335 = vmatpush3.msra.mxu1 %v3068_v59 }
 0x3d5   : > { %3336 = vmatprep.subr.mxu1 %v3083_v60 }
 0x3d6   : > { %3337 = vmatpush3.msra.mxu1 %v3067_v1 }
 0x3d7   : > { %3338 = vmatprep.subr.mxu1 %v3082_v25 }
 0x3d8   : > { %3339 = vmatpush3.msra.mxu1 %v3066_v44 }
 0x3d9   : > { %3340 = vmatprep.subr.mxu1 %v3081_v41 }
 0x3da   : > { %3341 = vmatpush3.msra.mxu1 %v3065_v8 }
 0x3db   : > { %3342 = vmatprep.subr.mxu1 %v3080_v9 }
 0x3dc   : > { %3343 = vmatpush3.msra.mxu1 %v3064_v10 }
 0x3dd   : > { %3344 = vmatprep.subr.mxu1 %v3079_v11 }
 0x3de   : > { %3345 = vmatpush3.msra.mxu1 %v3063_v16 }
 0x3f7   : > { %v2557_v39 = vpop.f32.mrf.mxu1  ;;  %v2628_v2 = vpop.f32.mrf.mxu0 }
 0x3f8   : > { %v2558_v3 = vadd.f32 %v2557_v39, %v2198_v50 }
 0x3f9   : > { %v2559_v6 = vpop.f32.mrf.mxu1  ;;  %v2630_v4 = vpop.f32.mrf.mxu0 }
 0x3fa   : > { %v2560_v7 = vadd.f32 %v2559_v6, %v2202_v48  ;;  %v2629_v37 = vadd.f32 %v2628_v2, %v2558_v3 }
 0x3fc   : > { %v2631_v34 = vadd.f32 %v2630_v4, %v2560_v7 }
 0x439   : > { %v2699_v42 = vpop.f32.mrf.mxu1  ;;  %v2770_v56 = vpop.f32.mrf.mxu0 }
 0x43a   : > { %v2700_v19 = vadd.f32 %v2699_v42, %v2629_v37 }
 0x43b   : > { %v2701_v35 = vpop.f32.mrf.mxu1  ;;  %v2772_v0 = vpop.f32.mrf.mxu0 }
 0x43c   : > { %v2702_v29 = vadd.f32 %v2701_v35, %v2631_v34  ;;  %v2771_v20 = vadd.f32 %v2770_v56, %v2700_v19 }
 0x43e   : > { %v2773_v5 = vadd.f32 %v2772_v0, %v2702_v29  ;;  %v2777_v26 = vmax.f32 %v2771_v20, 0.0 }
 0x440   : > { %v2778_v24 = vmax.f32 %v2773_v5, 0.0 }
 0x442   : > { %3054 = vmatprep.mubr.f32.mxu0 %v2778_v24 }
 0x443   : > { %3055 = vmatmul.mubr.f32.vlgmr.msra.gmra.mxu0 %v2777_v26 }
 0x47f   : > { %v2985_v17 = vpop.f32.mrf.mxu1 }
 0x480   : > { %v2986_v62 = vadd.f32 %v2985_v17, %v2912_v13 }
 0x481   : > { %v2987_v18 = vpop.f32.mrf.mxu1 }
 0x482   : > { %v2988_v30 = vadd.f32 %v2987_v18, %v2916_v61 }
 0x503   : > { %v3056_v63 = vpop.f32.mrf.mxu0 }
 0x504   : > { %v3057_v23 = vadd.f32 %v3056_v63, %v2986_v62 }
 0x505   : > { %v3058_v21 = vpop.f32.mrf.mxu0 }
 0x506   : > { %v3059_v36 = vadd.f32 %v3058_v21, %v2988_v30  ;;  %v3061_v46 = vmax.f32 %v3057_v23, 0.0 }
 0x508   : > { %v3062_v31 = vmax.f32 %v3059_v36, 0.0 }
 0x50a   : > { %3160 = vmatprep.mubr.f32.mxu1 %v3062_v31 }
 0x50b   : > { %3161 = vmatmul.mubr.f32.vlgmr.msra.gmra.mxu1 %v3061_v46 }
 0x5cb   : > { %v3346_v32 = vpop.f32.mrf.mxu1 }
 0x5cd   : > { %v3347_v49 = vpop.f32.mrf.mxu1 }
 0x5ce   : > { %v3348_v14 = vadd.f32 %v3347_v49, %v3346_v32 }
 0x5d0   : > { %v3163_v38 = vadd.f32 %v3348_v14, %v3095_v47 }
 0x5d2   : > { %3167 = vst.msk [vmem:[%s510_s20] sm:$0x1] %vm3166_vm1, %v3163_v38 }
 0x5d3   : > { %3502 = shalt.err (!%p3499_p3)
}
 0x5d4   : > { %s3503_s0 = scalar_lea.hbm %s3179_s10, 16  ;;  %s3507_s20 = scalar_lea.hbm %s6178_s14, 32 }
 0x5d5   : > { %p3504_p5 = scmp.ne.s32.totalorder %s3179_s10, %s3503_s0  ;;  %p3508_p9 = scmp.lt.s32.totalorder %s3179_s10, %s6178_s14 }
 0x5d6   : > { %p3509_p12 = scmp.lt.s32.totalorder %s3507_s20, %s3503_s0 }
 0x5d7   : > { %p3505_p6 = pnand %p3504_p5, %p3694_p4 }
 0x5d8   : > { %p3510_p10 = por %p3509_p12, %p3508_p9 }
 0x5d9   : > { %p3506_p7 = pneg %p3505_p6 }
 0x5db   : > { %p3511_p11 = pnand %p3510_p10, %p3506_p7 }
 0x5dd   : > { %3514 = shalt.err (!%p3511_p11)
}
 0x5de   : > { %3381 = dma.vmem_to_hbm [thread:$0]  (%p3694_p4), %s3182_s26, 16, %s3179_s10, %s3169_s15  }
 0x5df PF: > { %p3393_p13 = scmp.ge.s32.totalorder %s3569_s18, 2  ;;  %s3193_s27 = sand.u32 1, %s3549_s29  }
 0x5e0   : > { %s3194_s19 = scalar_lea.sflag [#allocation5], %s3193_s27 }
 0x5e1   : > { %p3388_p0 = pnand %p3393_p13, %p3701_p8 }
 0x5e3   : > { %p3389_p1 = pneg %p3388_p0 }
 0x5e5   : > { %3544 = dma.done.wait (%p3389_p1), %s3194_s19, 16  }
 0x5e6   : > { %3546 = vsyncadd (%p3389_p1), %s3194_s19, 4294967280  ;;  %s28_s18 = sadd.s32 1, %s3569_s18   ;;  %s6194_s0 = sld [smem:[#allocation9_spill]] }
 0x5e7   : > { %p25_p2 = scmp.ge.s32.totalorder %s28_s18, 4   ;;  %s6195_s15 = sld [smem:[#allocation12_spill]] }
 0x5e8   : > { %s6196_s16 = sld [smem:[#allocation10_spill]]  ;;  %s6198_s29 = smov %s3553_s30 }
 0x5e9   : > { %s6197_s17 = sld [smem:[#allocation11_spill]]  ;;  %27 = sbr.rel (!%p25_p2) target bundleno = 8 (0x8), region = 127 }
 0x5ec   : > { %s6199_s30 = smov %s6194_s0 }
 0x5ee   :  { %3198 = vsyncpa [#allocation4], 1 }
 0x5ef   :  { %3200 = vsyncpa [#allocation4 + $0x1], 1 }
 0x5f0   :  { %3201 = vsyncpa [#allocation5], 1 }
 0x5f1   :  { %3203 = vsyncpa [#allocation5 + $0x1], 1 }

</bundles_post_ra>
